<compile_context>
chip_gen: v7x
topology: tpu7x:2x2x1
jax: 0.10.0
libtpu: 0.0.40
codegen_flags: <defaults>
</compile_context>

<pallas_src>
import functools
import math

import jax
import jax.numpy as jnp
from jax.experimental import pallas as pl
from jax.experimental.pallas import tpu as pltpu


# ---------------------------------------------------------------------------
# Fused kernel: 5 x (matmul [+ BN] [+ activation]) in one body, VMEM-resident,
# with manual async DMA of the large weights overlapped with early layers.
# ---------------------------------------------------------------------------
def _generator_kernel(z_ref, w0_ref, b0_ref, w1_ref,
                      w2_hbm, w3_hbm, w4_hbm, b4_ref,
                      o_ref,
                      w2_vmem, w3_vmem, w4_vmem, sem,
                      *, eps, slope):
    # Kick off the big-weight DMAs immediately; they stream from HBM while
    # layers 0-1 compute on the small, auto-copied weights.
    cp2 = pltpu.make_async_copy(w2_hbm, w2_vmem, sem.at[0])
    cp3 = pltpu.make_async_copy(w3_hbm, w3_vmem, sem.at[1])
    cp4 = pltpu.make_async_copy(w4_hbm, w4_vmem, sem.at[2])
    cp2.start()
    cp3.start()
    cp4.start()

    def leaky(y):
        return jnp.where(y > 0, y, slope * y)

    def bn_leaky(y):
        # Training-mode batch statistics (biased variance), eps=0.8.
        # One traversal for both moments; gamma=1 / beta=0 (fresh BN init).
        mean = jnp.mean(y, axis=0, keepdims=True)
        mean_sq = jnp.mean(y * y, axis=0, keepdims=True)
        var = mean_sq - mean * mean
        scale = jax.lax.rsqrt(var + eps)
        shift = -mean * scale
        t = y * scale + shift
        return jnp.where(t > 0, t, slope * t)

    # Layer 0: Linear + bias + LeakyReLU (no BN). z / w0 are zero-padded to
    # a lane-dense K of 128, which is exact (0 * 0 contributions).
    h = jnp.dot(z_ref[...].astype(jnp.bfloat16), w0_ref[...],
                preferred_element_type=jnp.float32) + b0_ref[...]
    h = leaky(h)

    # Layers 1-3: Linear (bias dropped: exactly cancelled by the batch-mean
    # subtraction) + BN + LeakyReLU.
    h = jnp.dot(h.astype(jnp.bfloat16), w1_ref[...],
                preferred_element_type=jnp.float32)
    h = bn_leaky(h)

    cp2.wait()
    h = jnp.dot(h.astype(jnp.bfloat16), w2_vmem[...],
                preferred_element_type=jnp.float32)
    h = bn_leaky(h)

    cp3.wait()
    h = jnp.dot(h.astype(jnp.bfloat16), w3_vmem[...],
                preferred_element_type=jnp.float32)
    h = bn_leaky(h)

    # Layer 4: Linear (lane-padded to 128 output columns) + bias + Tanh.
    cp4.wait()
    y = jnp.dot(h.astype(jnp.bfloat16), w4_vmem[...],
                preferred_element_type=jnp.float32) + b4_ref[...]
    o_ref[...] = jnp.tanh(y).astype(o_ref.dtype)


def _fused_generator(z_pad, w0p, b0, w1, w2, w3, w4p, b4p):
    B = z_pad.shape[0]
    out_pad = w4p.shape[1]
    kernel = functools.partial(_generator_kernel, eps=0.8, slope=0.2)
    vmem = pl.BlockSpec(memory_space=pltpu.MemorySpace.VMEM)
    hbm = pl.BlockSpec(memory_space=pl.ANY)
    return pl.pallas_call(
        kernel,
        out_shape=jax.ShapeDtypeStruct((B, out_pad), jnp.float32),
        in_specs=[vmem, vmem, vmem, vmem, hbm, hbm, hbm, vmem],
        out_specs=vmem,
        scratch_shapes=[
            pltpu.VMEM(w2.shape, jnp.bfloat16),
            pltpu.VMEM(w3.shape, jnp.bfloat16),
            pltpu.VMEM(w4p.shape, jnp.bfloat16),
            pltpu.SemaphoreType.DMA((3,)),
        ],
        compiler_params=pltpu.CompilerParams(
            vmem_limit_bytes=32 * 1024 * 1024),
    )(z_pad, w0p, b0, w1, w2, w3, w4p, b4p)


# ---------------------------------------------------------------------------
# Parameters + wrappers
# ---------------------------------------------------------------------------
def init_generator_params(key, latent_dim, img_shape):
    """torch-style U(-1/sqrt(fan_in), 1/sqrt(fan_in)) init; f32 master params."""
    dims = [latent_dim, 128, 256, 512, 1024, math.prod(img_shape)]
    params = []
    for din, dout in zip(dims[:-1], dims[1:]):
        key, kw, kb = jax.random.split(key, 3)
        bound = 1.0 / (din ** 0.5)
        w = jax.random.uniform(kw, (din, dout), jnp.float32, -bound, bound)
        b = jax.random.uniform(kb, (1, dout), jnp.float32, -bound, bound)
        params.append((w, b))
    return params


def prepare_kernel_params(params, latent_dim, img_shape):
    """One-time padding + bf16 conversion of the weights for the kernel."""
    (w0, b0), (w1, _b1), (w2, _b2), (w3, _b3), (w4, b4) = params
    out_dim = math.prod(img_shape)
    out_pad = max(128, ((out_dim + 127) // 128) * 128)
    k_pad = max(128, ((latent_dim + 127) // 128) * 128)
    w0p = jnp.pad(w0, ((0, k_pad - latent_dim), (0, 0))).astype(jnp.bfloat16)
    w4p = jnp.pad(w4, ((0, 0), (0, out_pad - out_dim))).astype(jnp.bfloat16)
    b4p = jnp.pad(b4, ((0, 0), (0, out_pad - out_dim)))
    return (w0p, b0,
            w1.astype(jnp.bfloat16),
            w2.astype(jnp.bfloat16),
            w3.astype(jnp.bfloat16),
            w4p, b4p)


@functools.partial(jax.jit, static_argnames=("img_shape",))
def generator_forward(z, kparams, img_shape):
    """Fused Pallas forward pass; returns (B, *img_shape) like the torch module."""
    w0p, b0, w1, w2, w3, w4p, b4p = kparams
    B, latent = z.shape
    k_pad = w0p.shape[0]
    z_pad = jnp.pad(z, ((0, 0), (0, k_pad - latent)))
    y = _fused_generator(z_pad, w0p, b0, w1, w2, w3, w4p, b4p)
    out_dim = math.prod(img_shape)
    return y[:, :out_dim].reshape((B,) + tuple(img_shape))


def generator_reference(z, params, img_shape):
    """Pure-JAX reference with the same bf16 matmul inputs / f32 accumulation.

    Keeps the Linear biases on the BN layers (they cancel under the batch-mean
    subtraction) and uses the two-pass variance, proving the kernel's folded
    formulation is equivalent.
    """
    cfgs = [(False, "leaky"), (True, "leaky"), (True, "leaky"),
            (True, "leaky"), (False, "tanh")]
    h = z
    for (w, b), (use_bn, act) in zip(params, cfgs):
        y = jnp.dot(h.astype(jnp.bfloat16), w.astype(jnp.bfloat16),
                    preferred_element_type=jnp.float32) + b
        if use_bn:
            mean = jnp.mean(y, axis=0, keepdims=True)
            var = jnp.mean(jnp.square(y - mean), axis=0, keepdims=True)
            y = (y - mean) * jax.lax.rsqrt(var + 0.8)   # gamma=1, beta=0
        y = jnp.where(y > 0, y, 0.2 * y) if act == "leaky" else jnp.tanh(y)
        h = y
    return h.reshape((z.shape[0],) + tuple(img_shape))


if __name__ == "__main__":
    latent_dim = 32
    img_shape = (1, 8, 8)   # (C, H, W); final linear is 1024 -> 64
    B = 128                 # full batch in one invocation (BN over whole batch)

    key = jax.random.PRNGKey(0)
    kz, kp = jax.random.split(key)
    z = jax.random.normal(kz, (B, latent_dim), jnp.float32)
    params = init_generator_params(kp, latent_dim, img_shape)
    kparams = prepare_kernel_params(params, latent_dim, img_shape)

    img = generator_forward(z, kparams, img_shape)
    img = jax.block_until_ready(img)

    ref = generator_reference(z, params, img_shape)
    assert img.shape == (B,) + img_shape
    # bf16 matmul inputs => relaxed (but still tight vs a precision-matched
    # reference) tolerance on the tanh outputs.
    assert jnp.max(jnp.abs(img - ref)) < 1e-2

    print("KERNEL_OK")
</pallas_src>

<mosaic_0001>
module attributes {stable_mosaic.version = 11 : i64} {
  func.func @_generator_kernel(%arg0: memref<128x128xf32, #tpu.memory_space<vmem>>, %arg1: memref<128x128xbf16, #tpu.memory_space<vmem>>, %arg2: memref<1x128xf32, #tpu.memory_space<vmem>>, %arg3: memref<128x256xbf16, #tpu.memory_space<vmem>>, %arg4: memref<256x512xbf16, #tpu.memory_space<any>>, %arg5: memref<512x1024xbf16, #tpu.memory_space<any>>, %arg6: memref<1024x128xbf16, #tpu.memory_space<any>>, %arg7: memref<1x128xf32, #tpu.memory_space<vmem>>, %arg8: memref<128x128xf32, #tpu.memory_space<vmem>>, %arg9: memref<256x512xbf16, #tpu.memory_space<vmem>>, %arg10: memref<512x1024xbf16, #tpu.memory_space<vmem>>, %arg11: memref<1024x128xbf16, #tpu.memory_space<vmem>>, %arg12: memref<3x!tpu.dma_semaphore, #tpu.memory_space<semaphore_mem>>) attributes {dimension_semantics = [], scalar_prefetch = 0 : i64, scratch_operands = 4 : i64, tpu.core_type = #tpu.core_type<tc>} {
    %c0_i32 = arith.constant 0 : i32
    %0 = tpu.memref_slice %arg12[%c0_i32] : memref<3x!tpu.dma_semaphore, #tpu.memory_space<semaphore_mem>> -> memref<1x!tpu.dma_semaphore, #tpu.memory_space<semaphore_mem>>
    %1 = tpu.memref_squeeze %0 : memref<1x!tpu.dma_semaphore, #tpu.memory_space<semaphore_mem>> -> memref<!tpu.dma_semaphore, #tpu.memory_space<semaphore_mem>>
    tpu.enqueue_dma source(%arg4 : memref<256x512xbf16, #tpu.memory_space<any>>) target(%arg9 : memref<256x512xbf16, #tpu.memory_space<vmem>>) target_semaphore(%1 : memref<!tpu.dma_semaphore, #tpu.memory_space<semaphore_mem>>)
    %c1_i32 = arith.constant 1 : i32
    %2 = tpu.memref_slice %arg12[%c1_i32] : memref<3x!tpu.dma_semaphore, #tpu.memory_space<semaphore_mem>> -> memref<1x!tpu.dma_semaphore, #tpu.memory_space<semaphore_mem>>
    %3 = tpu.memref_squeeze %2 : memref<1x!tpu.dma_semaphore, #tpu.memory_space<semaphore_mem>> -> memref<!tpu.dma_semaphore, #tpu.memory_space<semaphore_mem>>
    tpu.enqueue_dma source(%arg5 : memref<512x1024xbf16, #tpu.memory_space<any>>) target(%arg10 : memref<512x1024xbf16, #tpu.memory_space<vmem>>) target_semaphore(%3 : memref<!tpu.dma_semaphore, #tpu.memory_space<semaphore_mem>>)
    %c2_i32 = arith.constant 2 : i32
    %4 = tpu.memref_slice %arg12[%c2_i32] : memref<3x!tpu.dma_semaphore, #tpu.memory_space<semaphore_mem>> -> memref<1x!tpu.dma_semaphore, #tpu.memory_space<semaphore_mem>>
    %5 = tpu.memref_squeeze %4 : memref<1x!tpu.dma_semaphore, #tpu.memory_space<semaphore_mem>> -> memref<!tpu.dma_semaphore, #tpu.memory_space<semaphore_mem>>
    tpu.enqueue_dma source(%arg6 : memref<1024x128xbf16, #tpu.memory_space<any>>) target(%arg11 : memref<1024x128xbf16, #tpu.memory_space<vmem>>) target_semaphore(%5 : memref<!tpu.dma_semaphore, #tpu.memory_space<semaphore_mem>>)
    %c0 = arith.constant 0 : index
    %c0_0 = arith.constant 0 : index
    %6 = vector.load %arg0[%c0, %c0_0] : memref<128x128xf32, #tpu.memory_space<vmem>>, vector<128x128xf32>
    %7 = arith.truncf %6 : vector<128x128xf32> to vector<128x128xbf16>
    %c0_1 = arith.constant 0 : index
    %c0_2 = arith.constant 0 : index
    %8 = vector.load %arg1[%c0_1, %c0_2] : memref<128x128xbf16, #tpu.memory_space<vmem>>, vector<128x128xbf16>
    %cst = arith.constant dense<0.000000e+00> : vector<128x128xf32>
    %9 = tpu.matmul %7, %8, %cst {dimension_numbers = #tpu.dot_dimension_numbers<[1], [0], [0], [1], [0, 0, 1, 1], [], []>} : vector<128x128xbf16>, vector<128x128xbf16>, vector<128x128xf32> -> vector<128x128xf32>
    %c0_3 = arith.constant 0 : index
    %c0_4 = arith.constant 0 : index
    %10 = vector.load %arg2[%c0_3, %c0_4] : memref<1x128xf32, #tpu.memory_space<vmem>>, vector<1x128xf32>
    %11 = vector.broadcast %10 : vector<1x128xf32> to vector<128x128xf32>
    %12 = arith.addf %9, %11 : vector<128x128xf32>
    %cst_5 = arith.constant 0.000000e+00 : f32
    %13 = vector.broadcast %cst_5 : f32 to vector<128x128xf32>
    %14 = arith.cmpf ogt, %12, %13 : vector<128x128xf32>
    %cst_6 = arith.constant 2.000000e-01 : f32
    %15 = vector.broadcast %cst_6 : f32 to vector<128x128xf32>
    %16 = arith.mulf %15, %12 : vector<128x128xf32>
    %17 = arith.select %14, %12, %16 : vector<128x128xi1>, vector<128x128xf32>
    %18 = arith.truncf %17 : vector<128x128xf32> to vector<128x128xbf16>
    %c0_7 = arith.constant 0 : index
    %c0_8 = arith.constant 0 : index
    %19 = vector.load %arg3[%c0_7, %c0_8] : memref<128x256xbf16, #tpu.memory_space<vmem>>, vector<128x256xbf16>
    %cst_9 = arith.constant dense<0.000000e+00> : vector<128x256xf32>
    %20 = tpu.matmul %18, %19, %cst_9 {dimension_numbers = #tpu.dot_dimension_numbers<[1], [0], [0], [1], [0, 0, 1, 1], [], []>} : vector<128x128xbf16>, vector<128x256xbf16>, vector<128x256xf32> -> vector<128x256xf32>
    %cst_10 = arith.constant dense<0.000000e+00> : vector<256xf32>
    %21 = vector.multi_reduction <add>, %20, %cst_10 [0] : vector<128x256xf32> to vector<256xf32>
    %22 = vector.shape_cast %21 : vector<256xf32> to vector<1x256xf32>
    %cst_11 = arith.constant 1.280000e+02 : f32
    %23 = vector.broadcast %cst_11 : f32 to vector<1x256xf32>
    %24 = arith.divf %22, %23 : vector<1x256xf32>
    %25 = arith.mulf %20, %20 : vector<128x256xf32>
    %cst_12 = arith.constant dense<0.000000e+00> : vector<256xf32>
    %26 = vector.multi_reduction <add>, %25, %cst_12 [0] : vector<128x256xf32> to vector<256xf32>
    %27 = vector.shape_cast %26 : vector<256xf32> to vector<1x256xf32>
    %cst_13 = arith.constant 1.280000e+02 : f32
    %28 = vector.broadcast %cst_13 : f32 to vector<1x256xf32>
    %29 = arith.divf %27, %28 : vector<1x256xf32>
    %30 = arith.mulf %24, %24 : vector<1x256xf32>
    %31 = arith.subf %29, %30 : vector<1x256xf32>
    %cst_14 = arith.constant 8.000000e-01 : f32
    %32 = vector.broadcast %cst_14 : f32 to vector<1x256xf32>
    %33 = arith.addf %31, %32 : vector<1x256xf32>
    %34 = math.rsqrt %33 : vector<1x256xf32>
    %cst_15 = arith.constant 0.000000e+00 : f32
    %35 = vector.broadcast %cst_15 : f32 to vector<1x256xf32>
    %36 = arith.subf %35, %24 : vector<1x256xf32>
    %37 = arith.mulf %36, %34 : vector<1x256xf32>
    %38 = vector.broadcast %34 : vector<1x256xf32> to vector<128x256xf32>
    %39 = arith.mulf %20, %38 : vector<128x256xf32>
    %40 = vector.broadcast %37 : vector<1x256xf32> to vector<128x256xf32>
    %41 = arith.addf %39, %40 : vector<128x256xf32>
    %cst_16 = arith.constant 0.000000e+00 : f32
    %42 = vector.broadcast %cst_16 : f32 to vector<128x256xf32>
    %43 = arith.cmpf ogt, %41, %42 : vector<128x256xf32>
    %cst_17 = arith.constant 2.000000e-01 : f32
    %44 = vector.broadcast %cst_17 : f32 to vector<128x256xf32>
    %45 = arith.mulf %44, %41 : vector<128x256xf32>
    %46 = arith.select %43, %41, %45 : vector<128x256xi1>, vector<128x256xf32>
    %c0_i32_18 = arith.constant 0 : i32
    %47 = tpu.memref_slice %arg12[%c0_i32_18] : memref<3x!tpu.dma_semaphore, #tpu.memory_space<semaphore_mem>> -> memref<1x!tpu.dma_semaphore, #tpu.memory_space<semaphore_mem>>
    %48 = tpu.memref_squeeze %47 : memref<1x!tpu.dma_semaphore, #tpu.memory_space<semaphore_mem>> -> memref<!tpu.dma_semaphore, #tpu.memory_space<semaphore_mem>>
    tpu.wait_dma2 semaphore(%48 : memref<!tpu.dma_semaphore, #tpu.memory_space<semaphore_mem>>) src(%arg4 : memref<256x512xbf16, #tpu.memory_space<any>>) dst(%arg9 : memref<256x512xbf16, #tpu.memory_space<vmem>>)
    %49 = arith.truncf %46 : vector<128x256xf32> to vector<128x256xbf16>
    %c0_19 = arith.constant 0 : index
    %c0_20 = arith.constant 0 : index
    %50 = vector.load %arg9[%c0_19, %c0_20] : memref<256x512xbf16, #tpu.memory_space<vmem>>, vector<256x512xbf16>
    %cst_21 = arith.constant dense<0.000000e+00> : vector<128x512xf32>
    %51 = tpu.matmul %49, %50, %cst_21 {dimension_numbers = #tpu.dot_dimension_numbers<[1], [0], [0], [1], [0, 0, 1, 1], [], []>} : vector<128x256xbf16>, vector<256x512xbf16>, vector<128x512xf32> -> vector<128x512xf32>
    %cst_22 = arith.constant dense<0.000000e+00> : vector<512xf32>
    %52 = vector.multi_reduction <add>, %51, %cst_22 [0] : vector<128x512xf32> to vector<512xf32>
    %53 = vector.shape_cast %52 : vector<512xf32> to vector<1x512xf32>
    %cst_23 = arith.constant 1.280000e+02 : f32
    %54 = vector.broadcast %cst_23 : f32 to vector<1x512xf32>
    %55 = arith.divf %53, %54 : vector<1x512xf32>
    %56 = arith.mulf %51, %51 : vector<128x512xf32>
    %cst_24 = arith.constant dense<0.000000e+00> : vector<512xf32>
    %57 = vector.multi_reduction <add>, %56, %cst_24 [0] : vector<128x512xf32> to vector<512xf32>
    %58 = vector.shape_cast %57 : vector<512xf32> to vector<1x512xf32>
    %cst_25 = arith.constant 1.280000e+02 : f32
    %59 = vector.broadcast %cst_25 : f32 to vector<1x512xf32>
    %60 = arith.divf %58, %59 : vector<1x512xf32>
    %61 = arith.mulf %55, %55 : vector<1x512xf32>
    %62 = arith.subf %60, %61 : vector<1x512xf32>
    %cst_26 = arith.constant 8.000000e-01 : f32
    %63 = vector.broadcast %cst_26 : f32 to vector<1x512xf32>
    %64 = arith.addf %62, %63 : vector<1x512xf32>
    %65 = math.rsqrt %64 : vector<1x512xf32>
    %cst_27 = arith.constant 0.000000e+00 : f32
    %66 = vector.broadcast %cst_27 : f32 to vector<1x512xf32>
    %67 = arith.subf %66, %55 : vector<1x512xf32>
    %68 = arith.mulf %67, %65 : vector<1x512xf32>
    %69 = vector.broadcast %65 : vector<1x512xf32> to vector<128x512xf32>
    %70 = arith.mulf %51, %69 : vector<128x512xf32>
    %71 = vector.broadcast %68 : vector<1x512xf32> to vector<128x512xf32>
    %72 = arith.addf %70, %71 : vector<128x512xf32>
    %cst_28 = arith.constant 0.000000e+00 : f32
    %73 = vector.broadcast %cst_28 : f32 to vector<128x512xf32>
    %74 = arith.cmpf ogt, %72, %73 : vector<128x512xf32>
    %cst_29 = arith.constant 2.000000e-01 : f32
    %75 = vector.broadcast %cst_29 : f32 to vector<128x512xf32>
    %76 = arith.mulf %75, %72 : vector<128x512xf32>
    %77 = arith.select %74, %72, %76 : vector<128x512xi1>, vector<128x512xf32>
    %c1_i32_30 = arith.constant 1 : i32
    %78 = tpu.memref_slice %arg12[%c1_i32_30] : memref<3x!tpu.dma_semaphore, #tpu.memory_space<semaphore_mem>> -> memref<1x!tpu.dma_semaphore, #tpu.memory_space<semaphore_mem>>
    %79 = tpu.memref_squeeze %78 : memref<1x!tpu.dma_semaphore, #tpu.memory_space<semaphore_mem>> -> memref<!tpu.dma_semaphore, #tpu.memory_space<semaphore_mem>>
    tpu.wait_dma2 semaphore(%79 : memref<!tpu.dma_semaphore, #tpu.memory_space<semaphore_mem>>) src(%arg5 : memref<512x1024xbf16, #tpu.memory_space<any>>) dst(%arg10 : memref<512x1024xbf16, #tpu.memory_space<vmem>>)
    %80 = arith.truncf %77 : vector<128x512xf32> to vector<128x512xbf16>
    %c0_31 = arith.constant 0 : index
    %c0_32 = arith.constant 0 : index
    %81 = vector.load %arg10[%c0_31, %c0_32] : memref<512x1024xbf16, #tpu.memory_space<vmem>>, vector<512x1024xbf16>
    %cst_33 = arith.constant dense<0.000000e+00> : vector<128x1024xf32>
    %82 = tpu.matmul %80, %81, %cst_33 {dimension_numbers = #tpu.dot_dimension_numbers<[1], [0], [0], [1], [0, 0, 1, 1], [], []>} : vector<128x512xbf16>, vector<512x1024xbf16>, vector<128x1024xf32> -> vector<128x1024xf32>
    %cst_34 = arith.constant dense<0.000000e+00> : vector<1024xf32>
    %83 = vector.multi_reduction <add>, %82, %cst_34 [0] : vector<128x1024xf32> to vector<1024xf32>
    %84 = vector.shape_cast %83 : vector<1024xf32> to vector<1x1024xf32>
    %cst_35 = arith.constant 1.280000e+02 : f32
    %85 = vector.broadcast %cst_35 : f32 to vector<1x1024xf32>
    %86 = arith.divf %84, %85 : vector<1x1024xf32>
    %87 = arith.mulf %82, %82 : vector<128x1024xf32>
    %cst_36 = arith.constant dense<0.000000e+00> : vector<1024xf32>
    %88 = vector.multi_reduction <add>, %87, %cst_36 [0] : vector<128x1024xf32> to vector<1024xf32>
    %89 = vector.shape_cast %88 : vector<1024xf32> to vector<1x1024xf32>
    %cst_37 = arith.constant 1.280000e+02 : f32
    %90 = vector.broadcast %cst_37 : f32 to vector<1x1024xf32>
    %91 = arith.divf %89, %90 : vector<1x1024xf32>
    %92 = arith.mulf %86, %86 : vector<1x1024xf32>
    %93 = arith.subf %91, %92 : vector<1x1024xf32>
    %cst_38 = arith.constant 8.000000e-01 : f32
    %94 = vector.broadcast %cst_38 : f32 to vector<1x1024xf32>
    %95 = arith.addf %93, %94 : vector<1x1024xf32>
    %96 = math.rsqrt %95 : vector<1x1024xf32>
    %cst_39 = arith.constant 0.000000e+00 : f32
    %97 = vector.broadcast %cst_39 : f32 to vector<1x1024xf32>
    %98 = arith.subf %97, %86 : vector<1x1024xf32>
    %99 = arith.mulf %98, %96 : vector<1x1024xf32>
    %100 = vector.broadcast %96 : vector<1x1024xf32> to vector<128x1024xf32>
    %101 = arith.mulf %82, %100 : vector<128x1024xf32>
    %102 = vector.broadcast %99 : vector<1x1024xf32> to vector<128x1024xf32>
    %103 = arith.addf %101, %102 : vector<128x1024xf32>
    %cst_40 = arith.constant 0.000000e+00 : f32
    %104 = vector.broadcast %cst_40 : f32 to vector<128x1024xf32>
    %105 = arith.cmpf ogt, %103, %104 : vector<128x1024xf32>
    %cst_41 = arith.constant 2.000000e-01 : f32
    %106 = vector.broadcast %cst_41 : f32 to vector<128x1024xf32>
    %107 = arith.mulf %106, %103 : vector<128x1024xf32>
    %108 = arith.select %105, %103, %107 : vector<128x1024xi1>, vector<128x1024xf32>
    %c2_i32_42 = arith.constant 2 : i32
    %109 = tpu.memref_slice %arg12[%c2_i32_42] : memref<3x!tpu.dma_semaphore, #tpu.memory_space<semaphore_mem>> -> memref<1x!tpu.dma_semaphore, #tpu.memory_space<semaphore_mem>>
    %110 = tpu.memref_squeeze %109 : memref<1x!tpu.dma_semaphore, #tpu.memory_space<semaphore_mem>> -> memref<!tpu.dma_semaphore, #tpu.memory_space<semaphore_mem>>
    tpu.wait_dma2 semaphore(%110 : memref<!tpu.dma_semaphore, #tpu.memory_space<semaphore_mem>>) src(%arg6 : memref<1024x128xbf16, #tpu.memory_space<any>>) dst(%arg11 : memref<1024x128xbf16, #tpu.memory_space<vmem>>)
    %111 = arith.truncf %108 : vector<128x1024xf32> to vector<128x1024xbf16>
    %c0_43 = arith.constant 0 : index
    %c0_44 = arith.constant 0 : index
    %112 = vector.load %arg11[%c0_43, %c0_44] : memref<1024x128xbf16, #tpu.memory_space<vmem>>, vector<1024x128xbf16>
    %cst_45 = arith.constant dense<0.000000e+00> : vector<128x128xf32>
    %113 = tpu.matmul %111, %112, %cst_45 {dimension_numbers = #tpu.dot_dimension_numbers<[1], [0], [0], [1], [0, 0, 1, 1], [], []>} : vector<128x1024xbf16>, vector<1024x128xbf16>, vector<128x128xf32> -> vector<128x128xf32>
    %c0_46 = arith.constant 0 : index
    %c0_47 = arith.constant 0 : index
    %114 = vector.load %arg7[%c0_46, %c0_47] : memref<1x128xf32, #tpu.memory_space<vmem>>, vector<1x128xf32>
    %115 = vector.broadcast %114 : vector<1x128xf32> to vector<128x128xf32>
    %116 = arith.addf %113, %115 : vector<128x128xf32>
    %117 = math.tanh %116 : vector<128x128xf32>
    %c0_48 = arith.constant 0 : index
    %c0_49 = arith.constant 0 : index
    %118 = vector.load %arg8[%c0_48, %c0_49] : memref<128x128xf32, #tpu.memory_space<vmem>>, vector<128x128xf32>
    tpu.vector_store %arg8[%c0_48, %c0_49], %117 {strides = array<i32>} : memref<128x128xf32, #tpu.memory_space<vmem>>, vector<128x128xf32>,
    return
  }
}

</mosaic_0001>

<bundles_post_ra>
// kernel: generator_forward.1
= control target key start
LH: loop header
LB: loop body
LE: loop exit
PB: predicated region body
PF: predicated region fallthrough
CT: control target
= control target key end

     0   :  { %s28_s27 = sld [smem:[#allocation0]]   ;;  %s5298_s28 = smov [#allocation2]   ;;  %v5312_v48 = vmov 0   ;;  %s8384_s0 = inlined_call_operand.vmem [shape: f32[128,128], index: 0, kind: input, shape index: {}]   ;;  %s8385_s1 = inlined_call_operand.vmem [shape: bf16[128,128], index: 1, kind: input, shape index: {}]   ;;  %s8386_s2 = inlined_call_operand.vmem [shape: f32[1,128], index: 2, kind: input, shape index: {}]   ;;  %s8387_s3 = inlined_call_operand.vmem [shape: bf16[128,256], index: 3, kind: input, shape index: {}]   ;;  %s8388_s4 = inlined_call_operand.hbm [shape: bf16[256,512], index: 4, kind: input, shape index: {}]   ;;  %s8389_s5 = inlined_call_operand.hbm [shape: bf16[512,1024], index: 5, kind: input, shape index: {}]   ;;  %s8390_s6 = inlined_call_operand.hbm [shape: bf16[1024,128], index: 6, kind: input, shape index: {}]   ;;  %s8391_s7 = inlined_call_operand.vmem [shape: f32[1,128], index: 7, kind: input, shape index: {}]   ;;  %s8392_s8 = inlined_call_operand.vmem [shape: f32[128,128], index: 8, kind: output, shape index: {}]  }
   0x1   :  { %s36_s29 = sshll.u32 %s5298_s28, 4  ;;  %s5299_s30 = smov 512   ;;  %482 = vmatprep.mubr.bf16.mxu1 %v5312_v48  ;;  %s37_s29 = int_to_ptr.vmem [resolvable:$true] %s36_s29 }
   0x2   :  { %40 = sst [smem:[#allocation7]] %s5299_s30  ;;  %s5300_s9 = smov 4  }
   0x3   :  { %42 = sst [smem:[#allocation7 + $0x1]] %s5299_s30  ;;  %s5301_s10 = smov 64  }
   0x4   :  { %44 = sst [smem:[#allocation7 + $0x2]] %s5300_s9  ;;  %s5302_s12 = smov 128  }
   0x5   :  { %46 = sst [smem:[#allocation7 + $0x3]] %s5301_s10  ;;  %s5303_s14 = smov 2  }
   0x6   :  { %s4697_s11 = sshll.u32 %s28_s27, 26  ;;  %48 = sst [smem:[#allocation7 + $0x4]] %s5302_s12 }
   0x7   :  { %s5362_s13 = sadd.s32 134217728, %s4697_s11  ;;  %50 = sst [smem:[#allocation7 + $0x5]] %s5303_s14 }
   0x8   :  { %s5304_s15 = smov 256   ;;  %54 = sst [smem:[#allocation7 + $0x7]] %s5301_s10 }
   0x9   :  { %52 = sst [smem:[#allocation7 + $0x6]] %s5304_s15  ;;  %s5305_s16 = smov [#allocation5]  }
   0xa   :  { %56 = sst [smem:[#allocation7 + $0x8]] %s5300_s9  ;;  %s5306_s17 = smov [#allocation6]  }
   0xb   :  { %58 = dma.general %s8388_s4, 8192, %s37_s29, %s5305_s16, %s5306_s17, [#allocation7], %s5362_s13, 0  }
   0xc   :  { %s5307_s20 = smov 1024   ;;  %s5308_s21 = smov 8  }
   0xd   :  { %75 = sst [smem:[#allocation9]] %s5307_s20  ;;  %s5309_s22 = smov [#allocation3]  }
   0xe   :  { %77 = sst [smem:[#allocation9 + $0x1]] %s5307_s20  ;;  %s71_s23 = sshll.u32 %s5309_s22, 4  ;;  %s72_s23 = int_to_ptr.vmem [resolvable:$true] %s71_s23 }
   0xf   :  { %79 = sst [smem:[#allocation9 + $0x2]] %s5308_s21  ;;  %s5310_s24 = smov [#allocation5 + $0x1]  }
  0x10   :  { %81 = sst [smem:[#allocation9 + $0x3]] %s5301_s10  ;;  %s5311_s25 = smov [#allocation8]  }
  0x11   :  { %83 = sst [smem:[#allocation9 + $0x4]] %s5302_s12 }
  0x12   :  { %85 = sst [smem:[#allocation9 + $0x5]] %s5303_s14 }
  0x13   :  { %87 = sst [smem:[#allocation9 + $0x6]] %s5299_s30 }
  0x14   :  { %89 = sst [smem:[#allocation9 + $0x7]] %s5301_s10 }
  0x15   :  { %91 = sst [smem:[#allocation9 + $0x8]] %s5300_s9 }
  0x16   :  { %93 = dma.general %s8389_s5, 32768, %s72_s23, %s5310_s24, %s5311_s25, [#allocation9], %s5362_s13, 0  }
  0x17   :  { %v5178_v0 = vld [vmem:[%s8385_s1] sm:$0xff]   ;;  %v5179_v1 = vld [vmem:[%s8385_s1 + $0x8] sm:$0xff]   ;;  %v5180_v2 = vld [vmem:[%s8385_s1 + $0x10] sm:$0xff]   ;;  %s5270_s13 = scalar_lea.hbm %s8390_s6, 8192 }
  0x18   :  { %5002 = vmatprep.subr.bf16.mxu0 %v5178_v0  ;;  %v5181_v3 = vld [vmem:[%s8385_s1 + $0x18] sm:$0xff]   ;;  %v106_v4 = vld [vmem:[%s8384_s0] sm:$0xff]  ;;  %v107_v5 = vld [vmem:[%s8384_s0 + $0x8] sm:$0xff]  ;;  %p5271_p0 = scmp.ne.s32.totalorder %s8390_s6, %s5270_s13  ;;  %p5274_p1 = scmp.lt.u32.totalorder %s5270_s13, %s8390_s6 }
  0x19   :  { %5003 = vmatpush3.bf16.msra.mxu0 %v5178_v0  ;;  %v122_v6 = vpack.c.bf16 %v107_v5, %v106_v4  ;;  %v5182_v7 = vld [vmem:[%s8385_s1 + $0x20] sm:$0xff]   ;;  %v5189_v10 = vld [vmem:[%s8387_s3 + $0x14] ss:$8 sps:$4 sm:$0xff]   ;;  %v5183_v11 = vld [vmem:[%s8385_s1 + $0x28] sm:$0xff]  }
  0x1a   :  { %5004 = vmatprep.subr.bf16.mxu0 %v5179_v1  ;;  %v5186_v8 = vld [vmem:[%s8387_s3 + $0x4] ss:$8 sps:$4 sm:$0xff]   ;;  %v5188_v9 = vld [vmem:[%s8387_s3] ss:$8 sps:$4 sm:$0xff]   ;;  %v5191_v12 = vld [vmem:[%s8387_s3 + $0x10] ss:$8 sps:$4 sm:$0xff]   ;;  %p5276_p2 = pnand %p5274_p1, %p5271_p0 }
  0x1b   :  { %5018 = vmatprep.mubr.bf16.mxu0 %v122_v6  ;;  %450 = vmatprep.subr.bf16.mxu1 %v5186_v8  ;;  %v5192_v13 = vld [vmem:[%s8387_s3 + $0x24] ss:$8 sps:$4 sm:$0xff]   ;;  %v5184_v14 = vld [vmem:[%s8385_s1 + $0x30] sm:$0xff]   ;;  %v5194_v15 = vld [vmem:[%s8387_s3 + $0x20] ss:$8 sps:$4 sm:$0xff]  }
  0x1c   :  { %451 = vmatpush1.bf16.msra.mxu1 %v5188_v9  ;;  %v5195_v16 = vld [vmem:[%s8387_s3 + $0x34] ss:$8 sps:$4 sm:$0xff]   ;;  %v5197_v18 = vld [vmem:[%s8387_s3 + $0x30] ss:$8 sps:$4 sm:$0xff]   ;;  %v5198_v19 = vld [vmem:[%s8387_s3 + $0x44] ss:$8 sps:$4 sm:$0xff]  }
  0x1d   :  { %5005 = vmatpush3.bf16.msra.mxu0 %v5179_v1  ;;  %452 = vmatprep.subr.bf16.mxu1 %v5189_v10  ;;  %v5185_v17 = vld [vmem:[%s8385_s1 + $0x38] sm:$0xff]   ;;  %v108_v20 = vld [vmem:[%s8384_s0 + $0x10] sm:$0xff]  ;;  %v110_v22 = vld [vmem:[%s8384_s0 + $0x20] sm:$0xff] }
  0x1e   :  { %5006 = vmatprep.subr.bf16.mxu0 %v5180_v2  ;;  %v109_v21 = vld [vmem:[%s8384_s0 + $0x18] sm:$0xff]  ;;  %v111_v23 = vld [vmem:[%s8384_s0 + $0x28] sm:$0xff]  ;;  %v112_v28 = vld [vmem:[%s8384_s0 + $0x30] sm:$0xff] }
  0x1f   :  { %v5200_v24 = vld [vmem:[%s8387_s3 + $0x40] ss:$8 sps:$4 sm:$0xff]   ;;  %v123_v25 = vpack.c.bf16 %v109_v21, %v108_v20  ;;  %v5201_v26 = vld [vmem:[%s8387_s3 + $0x54] ss:$8 sps:$4 sm:$0xff]   ;;  %v124_v27 = vpack.c.bf16 %v111_v23, %v110_v22  ;;  %v5203_v43 = vld [vmem:[%s8387_s3 + $0x50] ss:$8 sps:$4 sm:$0xff]  }
  0x20   :  { %453 = vmatpush1.bf16.msra.mxu1 %v5191_v12  ;;  %v113_v29 = vld [vmem:[%s8384_s0 + $0x38] sm:$0xff]  ;;  %v114_v30 = vld [vmem:[%s8384_s0 + $0x40] sm:$0xff]  ;;  %v115_v31 = vld [vmem:[%s8384_s0 + $0x48] sm:$0xff] }
  0x21   :  { %5007 = vmatpush3.bf16.msra.mxu0 %v5180_v2  ;;  %454 = vmatprep.subr.bf16.mxu1 %v5192_v13  ;;  %v125_v32 = vpack.c.bf16 %v113_v29, %v112_v28  ;;  %v126_v33 = vpack.c.bf16 %v115_v31, %v114_v30  ;;  %v116_v34 = vld [vmem:[%s8384_s0 + $0x50] sm:$0xff]  ;;  %v117_v35 = vld [vmem:[%s8384_s0 + $0x58] sm:$0xff]  ;;  %v118_v36 = vld [vmem:[%s8384_s0 + $0x60] sm:$0xff] }
  0x22   :  { %5008 = vmatprep.subr.bf16.mxu0 %v5181_v3  ;;  %v119_v37 = vld [vmem:[%s8384_s0 + $0x68] sm:$0xff]  ;;  %v127_v38 = vpack.c.bf16 %v117_v35, %v116_v34  ;;  %v120_v40 = vld [vmem:[%s8384_s0 + $0x70] sm:$0xff]  ;;  %v121_v41 = vld [vmem:[%s8384_s0 + $0x78] sm:$0xff] }
  0x23   :  { %v128_v39 = vpack.c.bf16 %v119_v37, %v118_v36  ;;  %v129_v42 = vpack.c.bf16 %v121_v41, %v120_v40  ;;  %v5204_v44 = vld [vmem:[%s8387_s3 + $0x64] ss:$8 sps:$4 sm:$0xff]   ;;  %v5206_v45 = vld [vmem:[%s8387_s3 + $0x60] ss:$8 sps:$4 sm:$0xff]   ;;  %v5207_v46 = vld [vmem:[%s8387_s3 + $0x74] ss:$8 sps:$4 sm:$0xff]  }
  0x24   :  { %455 = vmatpush1.bf16.msra.mxu1 %v5194_v15  ;;  %v5209_v47 = vld [vmem:[%s8387_s3 + $0x70] ss:$8 sps:$4 sm:$0xff]   ;;  %v5499_v49 = vld [vmem:[%s8386_s2] ss:$0 sm:$0xff]  ;;  %s5313_s2 = smov [#allocation4]  }
  0x25   :  { %5009 = vmatpush3.bf16.msra.mxu0 %v5181_v3  ;;  %456 = vmatprep.subr.bf16.mxu1 %v5195_v16  ;;  %s102_s3 = sshll.u32 %s5313_s2, 4  ;;  %s103_s3 = int_to_ptr.vmem [resolvable:$true] %s102_s3 }
  0x26   :  { %5010 = vmatprep.subr.bf16.mxu0 %v5182_v7 }
  0x28   :  { %457 = vmatpush1.bf16.msra.mxu1 %v5197_v18 }
  0x29   :  { %5011 = vmatpush3.bf16.msra.mxu0 %v5182_v7  ;;  %458 = vmatprep.subr.bf16.mxu1 %v5198_v19 }
  0x2a   :  { %5012 = vmatprep.subr.bf16.mxu0 %v5183_v11 }
  0x2c   :  { %459 = vmatpush1.bf16.msra.mxu1 %v5200_v24 }
  0x2d   :  { %5013 = vmatpush3.bf16.msra.mxu0 %v5183_v11  ;;  %460 = vmatprep.subr.bf16.mxu1 %v5201_v26 }
  0x2e   :  { %5014 = vmatprep.subr.bf16.mxu0 %v5184_v14 }
  0x30   :  { %461 = vmatpush1.bf16.msra.mxu1 %v5203_v43 }
  0x31   :  { %5015 = vmatpush3.bf16.msra.mxu0 %v5184_v14  ;;  %462 = vmatprep.subr.bf16.mxu1 %v5204_v44 }
  0x32   :  { %5016 = vmatprep.subr.bf16.mxu0 %v5185_v17 }
  0x34   :  { %463 = vmatpush1.bf16.msra.mxu1 %v5206_v45 }
  0x35   :  { %5017 = vmatpush3.bf16.msra.mxu0 %v5185_v17  ;;  %464 = vmatprep.subr.bf16.mxu1 %v5207_v46 }
  0x38   :  { %5019 = vmatmul.mubr.bf16.vlgmr.msra.gmra.mrb[0].mxu0 %v123_v25  ;;  %465 = vmatpush1.bf16.msra.mxu1 %v5209_v47 }
  0x39   :  { %5022 = vmatprep.mubr.bf16.mxu0 %v124_v27 }
  0x40   :  { %5023 = vmatmul.mubr.bf16.gmra.mrb[4].mxu0 %v125_v32 }
  0x41   :  { %5026 = vmatprep.mubr.bf16.mxu0 %v126_v33 }
  0x48   :  { %5027 = vmatmul.mubr.bf16.gmra.mrb[8].mxu0 %v127_v38 }
  0x49   :  { %5030 = vmatprep.mubr.bf16.mxu0 %v128_v39 }
  0x50   :  { %5031 = vmatmul.mubr.bf16.gmra.mrb[12].mxu0 %v129_v42 }
 0x10b   :  { %v5020_v50 = vpop.f32.mrb[0].mxu0 }
 0x10c   :  { %v244_v51 = vadd.f32 %v5020_v50, %v5499_v49  ;;  %v235_v52 = vpop.f32.mrb[1].mxu0 }
 0x10d   :  { %v236_v53 = vadd.f32 %v5499_v49, %v235_v52  ;;  %v5021_v54 = vpop.f32.mrb[2].mxu0 }
 0x10e   :  { %v316_v55 = vmul.f32 0.2, %v244_v51  ;;  %v247_v56 = vadd.f32 %v5021_v54, %v5499_v49  ;;  %v238_v57 = vpop.f32.mrb[3].mxu0  ;;  %vm300_vm0 = vcmp.gt.f32.partialorder %v244_v51, 0.0 }
 0x10f   :  { %v314_v58 = vmul.f32 0.2, %v236_v53  ;;  %v239_v59 = vadd.f32 %v5499_v49, %v238_v57  ;;  %vm298_vm1 = vcmp.gt.f32.partialorder %v236_v53, 0.0 }
 0x110   :  { %vm301_vm2 = vcmp.gt.f32.partialorder %v247_v56, 0.0  ;;  %v317_v60 = vmul.f32 0.2, %v247_v56  ;;  %v332_v62 = vsel %vm300_vm0, %v244_v51, %v316_v55 }
 0x111   :  { %vm299_vm3 = vcmp.gt.f32.partialorder %v239_v59, 0.0  ;;  %v315_v61 = vmul.f32 0.2, %v239_v59  ;;  %v330_v1 = vsel %vm298_vm1, %v236_v53, %v314_v58 }
 0x112   :  { %v333_v63 = vsel %vm301_vm2, %v247_v56, %v317_v60 }
 0x113   :  { %v5024_v0 = vpop.f32.mrb[4].mxu0  ;;  %v331_v2 = vsel %vm299_vm3, %v239_v59, %v315_v61  ;;  %v347_v3 = vpack.c.bf16 %v333_v63, %v332_v62 }
 0x114   :  { %v260_v4 = vadd.f32 %v5024_v0, %v5499_v49  ;;  %v346_v5 = vpack.c.bf16 %v331_v2, %v330_v1  ;;  %v251_v6 = vpop.f32.mrb[5].mxu0 }
 0x115   :  { %v252_v7 = vadd.f32 %v5499_v49, %v251_v6  ;;  %v5025_v8 = vpop.f32.mrb[6].mxu0 }
 0x116   :  { %vm304_vm4 = vcmp.gt.f32.partialorder %v260_v4, 0.0  ;;  %v320_v9 = vmul.f32 0.2, %v260_v4  ;;  %483 = vmatmul.mubr.bf16.vlgmr.msra.gmra.mrb[0].mxu1 %v346_v5  ;;  %v263_v10 = vadd.f32 %v5025_v8, %v5499_v49  ;;  %v254_v11 = vpop.f32.mrb[7].mxu0 }
 0x117   :  { %vm302_vm5 = vcmp.gt.f32.partialorder %v252_v7, 0.0  ;;  %v318_v12 = vmul.f32 0.2, %v252_v7  ;;  %v255_v13 = vadd.f32 %v5499_v49, %v254_v11  ;;  %492 = vmatprep.mubr.bf16.mxu1 %v5312_v48 }
 0x118   :  { %vm305_vm6 = vcmp.gt.f32.partialorder %v263_v10, 0.0  ;;  %v321_v14 = vmul.f32 0.2, %v263_v10  ;;  %v336_v15 = vsel %vm304_vm4, %v260_v4, %v320_v9 }
 0x119   :  { %vm303_vm7 = vcmp.gt.f32.partialorder %v255_v13, 0.0  ;;  %v319_v16 = vmul.f32 0.2, %v255_v13  ;;  %v334_v17 = vsel %vm302_vm5, %v252_v7, %v318_v12 }
 0x11a   :  { %v337_v18 = vsel %vm305_vm6, %v263_v10, %v321_v14 }
 0x11b   :  { %v5028_v19 = vpop.f32.mrb[8].mxu0  ;;  %v335_v20 = vsel %vm303_vm7, %v255_v13, %v319_v16  ;;  %v349_v21 = vpack.c.bf16 %v337_v18, %v336_v15 }
 0x11c   :  { %v276_v22 = vadd.f32 %v5028_v19, %v5499_v49  ;;  %v348_v23 = vpack.c.bf16 %v335_v20, %v334_v17  ;;  %v267_v24 = vpop.f32.mrb[9].mxu0 }
 0x11d   :  { %v268_v25 = vadd.f32 %v5499_v49, %v267_v24  ;;  %v5029_v26 = vpop.f32.mrb[10].mxu0 }
 0x11e   :  { %493 = vmatmul.mubr.bf16.gmra.mrb[4].mxu1 %v347_v3  ;;  %vm308_vm8 = vcmp.gt.f32.partialorder %v276_v22, 0.0  ;;  %v324_v27 = vmul.f32 0.2, %v276_v22  ;;  %v279_v28 = vadd.f32 %v5029_v26, %v5499_v49  ;;  %v270_v29 = vpop.f32.mrb[11].mxu0 }
 0x11f   :  { %502 = vmatprep.mubr.bf16.mxu1 %v5312_v48  ;;  %vm306_vm9 = vcmp.gt.f32.partialorder %v268_v25, 0.0  ;;  %v322_v30 = vmul.f32 0.2, %v268_v25  ;;  %v271_v31 = vadd.f32 %v5499_v49, %v270_v29 }
 0x120   :  { %vm309_vm10 = vcmp.gt.f32.partialorder %v279_v28, 0.0  ;;  %v325_v32 = vmul.f32 0.2, %v279_v28  ;;  %v340_v33 = vsel %vm308_vm8, %v276_v22, %v324_v27 }
 0x121   :  { %vm307_vm11 = vcmp.gt.f32.partialorder %v271_v31, 0.0  ;;  %v323_v34 = vmul.f32 0.2, %v271_v31  ;;  %v338_v35 = vsel %vm306_vm9, %v268_v25, %v322_v30 }
 0x122   :  { %v341_v36 = vsel %vm309_vm10, %v279_v28, %v325_v32 }
 0x123   :  { %v5032_v37 = vpop.f32.mrb[12].mxu0  ;;  %v339_v38 = vsel %vm307_vm11, %v271_v31, %v323_v34  ;;  %v351_v39 = vpack.c.bf16 %v341_v36, %v340_v33 }
 0x124   :  { %v292_v40 = vadd.f32 %v5032_v37, %v5499_v49  ;;  %v350_v41 = vpack.c.bf16 %v339_v38, %v338_v35  ;;  %v283_v42 = vpop.f32.mrb[13].mxu0 }
 0x125   :  { %v284_v43 = vadd.f32 %v5499_v49, %v283_v42  ;;  %v5033_v44 = vpop.f32.mrb[14].mxu0 }
 0x126   :  { %503 = vmatmul.mubr.bf16.gmra.mrb[8].mxu1 %v348_v23  ;;  %vm312_vm12 = vcmp.gt.f32.partialorder %v292_v40, 0.0  ;;  %v328_v45 = vmul.f32 0.2, %v292_v40  ;;  %v295_v46 = vadd.f32 %v5033_v44, %v5499_v49  ;;  %v286_v47 = vpop.f32.mrb[15].mxu0 }
 0x127   :  { %512 = vmatprep.mubr.bf16.mxu1 %v5312_v48  ;;  %vm310_vm13 = vcmp.gt.f32.partialorder %v284_v43, 0.0  ;;  %v326_v50 = vmul.f32 0.2, %v284_v43  ;;  %v287_v51 = vadd.f32 %v5499_v49, %v286_v47 }
 0x128   :  { %vm313_vm14 = vcmp.gt.f32.partialorder %v295_v46, 0.0  ;;  %v329_v52 = vmul.f32 0.2, %v295_v46  ;;  %v344_v53 = vsel %vm312_vm12, %v292_v40, %v328_v45 }
 0x129   :  { %vm311_vm15 = vcmp.gt.f32.partialorder %v287_v51, 0.0  ;;  %v327_v54 = vmul.f32 0.2, %v287_v51  ;;  %v342_v55 = vsel %vm310_vm13, %v284_v43, %v326_v50 }
 0x12a   :  { %v345_v56 = vsel %vm313_vm14, %v295_v46, %v329_v52 }
 0x12b   :  { %v343_v57 = vsel %vm311_vm15, %v287_v51, %v327_v54  ;;  %v353_v58 = vpack.c.bf16 %v345_v56, %v344_v53 }
 0x12c   :  { %v352_v59 = vpack.c.bf16 %v343_v57, %v342_v55 }
 0x12e   :  { %513 = vmatmul.mubr.bf16.gmra.mrb[12].mxu1 %v349_v21 }
 0x12f   :  { %522 = vmatprep.mubr.bf16.mxu1 %v5312_v48 }
 0x136   :  { %523 = vmatmul.mubr.bf16.gmra.mrb[16].mxu1 %v350_v41 }
 0x137   :  { %532 = vmatprep.mubr.bf16.mxu1 %v5312_v48 }
 0x13e   :  { %533 = vmatmul.mubr.bf16.gmra.mrb[20].mxu1 %v351_v39 }
 0x13f   :  { %542 = vmatprep.mubr.bf16.mxu1 %v5312_v48 }
 0x146   :  { %543 = vmatmul.mubr.bf16.gmra.mrb[24].mxu1 %v352_v59 }
 0x147   :  { %552 = vmatprep.mubr.bf16.mxu1 %v5312_v48 }
 0x14e   :  { %553 = vmatmul.mubr.bf16.gmra.mrb[28].mxu1 %v353_v58 }
 0x1e9   :  { %v5524_v49 = vpop.f32.mrb[0].mxu1 }
 0x1ea   :  { %v5526_v60 = vpop.f32.mrb[1].mxu1  ;;  %v608_v62 = vmul.f32 %v5524_v49, %v5524_v49 }
 0x1eb   :  { %v5528_v61 = vpop.f32.mrb[2].mxu1  ;;  %v609_v48 = vmul.f32 %v5526_v60, %v5526_v60 }
 0x1ec   :  { %v563_v63 = vadd.f32 %v5528_v61, %v5524_v49  ;;  %v610_v0 = vmul.f32 %v5528_v61, %v5528_v61  ;;  %v5536_v1 = vpop.f32.mrb[3].mxu1 }
 0x1ed   :  { %v584_v2 = vadd.f32 %v5536_v1, %v5526_v60  ;;  %v611_v3 = vmul.f32 %v5536_v1, %v5536_v1 }
 0x1ee   :  { %5279 = shalt.err (!%p5276_p2)  }
 0x1ef   :  { %s5280_s18 = scalar_lea.vmem %s103_s3, 8192  ;;  %p5285_p4 = scmp.lt.s32.totalorder %s103_s3, %s103_s3 }
 0x1f0   :  { %p5281_p3 = scmp.ne.s32.totalorder %s103_s3, %s5280_s18  ;;  %p5286_p5 = scmp.lt.s32.totalorder %s5280_s18, %s5280_s18 }
 0x1f2   :  { %p5287_p6 = por %p5286_p5, %p5285_p4 }
 0x1f4   :  { %p5288_p7 = pnand %p5287_p6, %p5281_p3 }
 0x1f6   :  { %5291 = shalt.err (!%p5288_p7)  }
 0x1f7   :  { %105 = dma.hbm_to_vmem [thread:$0]  %s8390_s6, 8192, %s103_s3, [#allocation5 + $0x2]  ;;  %v640_v4 = vadd.f32 %v610_v0, %v608_v62  ;;  %v661_v5 = vadd.f32 %v611_v3, %v609_v48  ;;  %v5556_v6 = vpop.f32.mrb[4].mxu1 }
 0x1f8   :  { %v564_v7 = vadd.f32 %v563_v63, %v5556_v6  ;;  %v612_v8 = vmul.f32 %v5556_v6, %v5556_v6  ;;  %v5561_v9 = vpop.f32.mrb[5].mxu1 }
 0x1f9   :  { %v585_v10 = vadd.f32 %v584_v2, %v5561_v9  ;;  %v613_v11 = vmul.f32 %v5561_v9, %v5561_v9  ;;  %v5566_v12 = vpop.f32.mrb[6].mxu1 }
 0x1fa   :  { %v641_v13 = vadd.f32 %v640_v4, %v612_v8  ;;  %v565_v14 = vadd.f32 %v564_v7, %v5566_v12  ;;  %v614_v15 = vmul.f32 %v5566_v12, %v5566_v12  ;;  %v5571_v16 = vpop.f32.mrb[7].mxu1 }
 0x1fb   :  { %v662_v17 = vadd.f32 %v661_v5, %v613_v11  ;;  %v586_v18 = vadd.f32 %v585_v10, %v5571_v16  ;;  %v615_v19 = vmul.f32 %v5571_v16, %v5571_v16  ;;  %v5576_v22 = vpop.f32.mrb[8].mxu1 }
 0x1fc   :  { %v642_v20 = vadd.f32 %v641_v13, %v614_v15  ;;  %v566_v23 = vadd.f32 %v565_v14, %v5576_v22  ;;  %v616_v24 = vmul.f32 %v5576_v22, %v5576_v22  ;;  %v5581_v25 = vpop.f32.mrb[9].mxu1 }
 0x1fd   :  { %v663_v21 = vadd.f32 %v662_v17, %v615_v19  ;;  %v587_v26 = vadd.f32 %v586_v18, %v5581_v25  ;;  %v617_v27 = vmul.f32 %v5581_v25, %v5581_v25  ;;  %v5586_v28 = vpop.f32.mrb[10].mxu1 }
 0x1fe   :  { %v643_v29 = vadd.f32 %v642_v20, %v616_v24  ;;  %v567_v30 = vadd.f32 %v566_v23, %v5586_v28  ;;  %v618_v31 = vmul.f32 %v5586_v28, %v5586_v28  ;;  %v5591_v32 = vpop.f32.mrb[11].mxu1 }
 0x1ff   :  { %v664_v33 = vadd.f32 %v663_v21, %v617_v27  ;;  %v588_v34 = vadd.f32 %v587_v26, %v5591_v32  ;;  %v619_v35 = vmul.f32 %v5591_v32, %v5591_v32 }
 0x200   :  { %v644_v36 = vadd.f32 %v643_v29, %v618_v31 }
 0x201   :  { %v665_v37 = vadd.f32 %v664_v33, %v619_v35  ;;  %v5596_v38 = vpop.f32.mrb[12].mxu1 }
 0x202   :  { %v568_v39 = vadd.f32 %v567_v30, %v5596_v38  ;;  %v620_v40 = vmul.f32 %v5596_v38, %v5596_v38  ;;  %v5601_v41 = vpop.f32.mrb[13].mxu1 }
 0x203   :  { %v589_v42 = vadd.f32 %v588_v34, %v5601_v41  ;;  %v621_v43 = vmul.f32 %v5601_v41, %v5601_v41  ;;  %v5606_v44 = vpop.f32.mrb[14].mxu1 }
 0x204   :  { %v645_v45 = vadd.f32 %v644_v36, %v620_v40  ;;  %v569_v46 = vadd.f32 %v568_v39, %v5606_v44  ;;  %v622_v47 = vmul.f32 %v5606_v44, %v5606_v44  ;;  %v5611_v50 = vpop.f32.mrb[15].mxu1 }
 0x205   :  { %v666_v51 = vadd.f32 %v665_v37, %v621_v43  ;;  %v590_v52 = vadd.f32 %v589_v42, %v5611_v50  ;;  %v623_v53 = vmul.f32 %v5611_v50, %v5611_v50 }
 0x206   :  { %v646_v54 = vadd.f32 %v645_v45, %v622_v47 }
 0x207   :  { %v667_v55 = vadd.f32 %v666_v51, %v623_v53 }
 0x209   :  { %v5616_v56 = vpop.f32.mrb[16].mxu1 }
 0x20a   :  { %v570_v57 = vadd.f32 %v569_v46, %v5616_v56  ;;  %v624_v58 = vmul.f32 %v5616_v56, %v5616_v56  ;;  %v5621_v59 = vpop.f32.mrb[17].mxu1 }
 0x20b   :  { %v591_v62 = vadd.f32 %v590_v52, %v5621_v59  ;;  %v625_v63 = vmul.f32 %v5621_v59, %v5621_v59  ;;  %v5626_v0 = vpop.f32.mrb[18].mxu1 }
 0x20c   :  { %v647_v48 = vadd.f32 %v646_v54, %v624_v58  ;;  %v571_v2 = vadd.f32 %v570_v57, %v5626_v0  ;;  %v626_v3 = vmul.f32 %v5626_v0, %v5626_v0  ;;  %v5631_v4 = vpop.f32.mrb[19].mxu1 }
 0x20d   :  { %v668_v5 = vadd.f32 %v667_v55, %v625_v63  ;;  %v592_v7 = vadd.f32 %v591_v62, %v5631_v4  ;;  %v627_v8 = vmul.f32 %v5631_v4, %v5631_v4 }
 0x20e   :  { %v648_v10 = vadd.f32 %v647_v48, %v626_v3 }
 0x20f   :  { %v669_v11 = vadd.f32 %v668_v5, %v627_v8 }
 0x211   :  { %v5636_v13 = vpop.f32.mrb[20].mxu1 }
 0x212   :  { %v572_v14 = vadd.f32 %v571_v2, %v5636_v13  ;;  %v628_v15 = vmul.f32 %v5636_v13, %v5636_v13  ;;  %v5641_v17 = vpop.f32.mrb[21].mxu1 }
 0x213   :  { %v593_v18 = vadd.f32 %v592_v7, %v5641_v17  ;;  %v629_v19 = vmul.f32 %v5641_v17, %v5641_v17  ;;  %v5646_v20 = vpop.f32.mrb[22].mxu1 }
 0x214   :  { %v649_v21 = vadd.f32 %v648_v10, %v628_v15  ;;  %v573_v23 = vadd.f32 %v572_v14, %v5646_v20  ;;  %v630_v24 = vmul.f32 %v5646_v20, %v5646_v20  ;;  %v5651_v26 = vpop.f32.mrb[23].mxu1 }
 0x215   :  { %v670_v27 = vadd.f32 %v669_v11, %v629_v19  ;;  %v594_v29 = vadd.f32 %v593_v18, %v5651_v26  ;;  %v631_v30 = vmul.f32 %v5651_v26, %v5651_v26 }
 0x216   :  { %v650_v31 = vadd.f32 %v649_v21, %v630_v24 }
 0x217   :  { %v671_v33 = vadd.f32 %v670_v27, %v631_v30 }
 0x219   :  { %v5656_v34 = vpop.f32.mrb[24].mxu1 }
 0x21a   :  { %v574_v35 = vadd.f32 %v573_v23, %v5656_v34  ;;  %v632_v36 = vmul.f32 %v5656_v34, %v5656_v34  ;;  %v5661_v37 = vpop.f32.mrb[25].mxu1 }
 0x21b   :  { %v595_v39 = vadd.f32 %v594_v29, %v5661_v37  ;;  %v633_v40 = vmul.f32 %v5661_v37, %v5661_v37  ;;  %v5666_v42 = vpop.f32.mrb[26].mxu1 }
 0x21c   :  { %v651_v43 = vadd.f32 %v650_v31, %v632_v36  ;;  %v575_v45 = vadd.f32 %v574_v35, %v5666_v42  ;;  %v634_v46 = vmul.f32 %v5666_v42, %v5666_v42  ;;  %v5671_v47 = vpop.f32.mrb[27].mxu1 }
 0x21d   :  { %v672_v51 = vadd.f32 %v671_v33, %v633_v40  ;;  %v596_v52 = vadd.f32 %v595_v39, %v5671_v47  ;;  %v635_v53 = vmul.f32 %v5671_v47, %v5671_v47 }
 0x21e   :  { %v652_v54 = vadd.f32 %v651_v43, %v634_v46 }
 0x21f   :  { %v673_v55 = vadd.f32 %v672_v51, %v635_v53 }
 0x221   :  { %v5676_v57 = vpop.f32.mrb[28].mxu1 }
 0x222   :  { %v576_v58 = vadd.f32 %v575_v45, %v5676_v57  ;;  %v636_v62 = vmul.f32 %v5676_v57, %v5676_v57  ;;  %v5681_v63 = vpop.f32.mrb[29].mxu1 }
 0x223   :  { %v597_v48 = vadd.f32 %v596_v52, %v5681_v63  ;;  %v637_v2 = vmul.f32 %v5681_v63, %v5681_v63  ;;  %v5686_v3 = vpop.f32.mrb[30].mxu1 }
 0x224   :  { %v653_v5 = vadd.f32 %v652_v54, %v636_v62  ;;  %v577_v7 = vadd.f32 %v576_v58, %v5686_v3  ;;  %v638_v8 = vmul.f32 %v5686_v3, %v5686_v3  ;;  %v5691_v10 = vpop.f32.mrb[31].mxu1 }
 0x225   :  { %v674_v11 = vadd.f32 %v673_v55, %v637_v2  ;;  %v598_v14 = vadd.f32 %v597_v48, %v5691_v10  ;;  %v639_v15 = vmul.f32 %v5691_v10, %v5691_v10 }
 0x226   :  { %v578_v18 = vrot.slane %v577_v7, 4  ;;  %v654_v19 = vadd.f32 %v653_v5, %v638_v8 }
 0x227   :  { %v599_v21 = vrot.slane %v598_v14, 4  ;;  %v675_v23 = vadd.f32 %v674_v11, %v639_v15 }
 0x228   :  { %v579_v24 = vadd.f32 %v578_v18, %v577_v7  ;;  %v655_v27 = vrot.slane %v654_v19, 4 }
 0x229   :  { %v600_v29 = vadd.f32 %v599_v21, %v598_v14  ;;  %v676_v30 = vrot.slane %v675_v23, 4 }
 0x22a   :  { %v580_v31 = vrot.slane %v579_v24, 2  ;;  %v656_v33 = vadd.f32 %v655_v27, %v654_v19 }
 0x22b   :  { %v601_v35 = vrot.slane %v600_v29, 2  ;;  %v677_v36 = vadd.f32 %v676_v30, %v675_v23 }
 0x22c   :  { %v581_v39 = vadd.f32 %v580_v31, %v579_v24  ;;  %v657_v40 = vrot.slane %v656_v33, 2 }
 0x22d   :  { %v602_v43 = vadd.f32 %v601_v35, %v600_v29  ;;  %v678_v45 = vrot.slane %v677_v36, 2 }
 0x22e   :  { %v582_v46 = vrot.slane %v581_v39, 1  ;;  %v658_v51 = vadd.f32 %v657_v40, %v656_v33 }
 0x22f   :  { %v603_v52 = vrot.slane %v602_v43, 1  ;;  %v679_v53 = vadd.f32 %v678_v45, %v677_v36 }
 0x230   :  { %v583_v54 = vadd.f32 %v582_v46, %v581_v39  ;;  %v659_v55 = vrot.slane %v658_v51, 1 }
 0x231   :  { %v604_v58 = vadd.f32 %v603_v52, %v602_v43  ;;  %v680_v62 = vrot.slane %v679_v53, 1 }
 0x232   :  { %v606_v48 = vmul.f32 0.0078125, %v583_v54  ;;  %v660_v2 = vadd.f32 %v659_v55, %v658_v51 }
 0x233   :  { %v5696_v5 = vmul.f32 0.0078125, %v604_v58  ;;  %v681_v7 = vadd.f32 %v680_v62, %v679_v53 }
 0x234   :  { %v682_v8 = vmul.f32 0.0078125, %v660_v2  ;;  %v684_v11 = vmul.f32 %v606_v48, %v606_v48  ;;  %v692_v24 = vsub.f32 0.0, %v606_v48 }
 0x235   :  { %v683_v14 = vmul.f32 0.0078125, %v681_v7  ;;  %v685_v15 = vmul.f32 %v5696_v5, %v5696_v5  ;;  %v693_v29 = vsub.f32 0.0, %v5696_v5 }
 0x236   :  { %v686_v18 = vsub.f32 %v682_v8, %v684_v11 }
 0x237   :  { %v687_v19 = vsub.f32 %v683_v14, %v685_v15 }
 0x238   :  { %v688_v21 = vadd.f32 0.8, %v686_v18 }
 0x239   :  { %v689_v23 = vadd.f32 0.8, %v687_v19 }
 0x23a   :  { %5210 = vrsqrt.f32 %v688_v21 }
 0x23b   :  { %5212 = vrsqrt.f32 %v689_v23 }
 0x244   :  { %v5211_v27 = vpop.eup %5210 }
 0x245   :  { %v694_v30 = vmul.f32 %v5211_v27, %v692_v24  ;;  %v696_v31 = vmul.f32 %v5211_v27, %v5524_v49  ;;  %v698_v33 = vmul.f32 %v5211_v27, %v5528_v61  ;;  %v700_v35 = vmul.f32 %v5211_v27, %v5556_v6 }
 0x246   :  { %v702_v36 = vmul.f32 %v5211_v27, %v5566_v12  ;;  %v704_v39 = vmul.f32 %v5211_v27, %v5576_v22  ;;  %v706_v40 = vmul.f32 %v5211_v27, %v5586_v28  ;;  %v708_v43 = vmul.f32 %v5211_v27, %v5596_v38 }
 0x247   :  { %v710_v45 = vmul.f32 %v5211_v27, %v5606_v44  ;;  %v712_v46 = vmul.f32 %v5211_v27, %v5616_v56  ;;  %v714_v51 = vmul.f32 %v5211_v27, %v5626_v0  ;;  %v716_v49 = vmul.f32 %v5211_v27, %v5636_v13 }
 0x248   :  { %v718_v61 = vmul.f32 %v5211_v27, %v5646_v20  ;;  %v720_v6 = vmul.f32 %v5211_v27, %v5656_v34  ;;  %v722_v12 = vmul.f32 %v5211_v27, %v5666_v42  ;;  %v724_v22 = vmul.f32 %v5211_v27, %v5676_v57  ;;  %v5213_v57 = vpop.eup %5212 }
 0x249   :  { %v726_v28 = vmul.f32 %v5211_v27, %v5686_v3  ;;  %v728_v52 = vadd.f32 %v696_v31, %v694_v30  ;;  %v730_v38 = vadd.f32 %v698_v33, %v694_v30  ;;  %v732_v53 = vadd.f32 %v700_v35, %v694_v30 }
 0x24a   :  { %v734_v44 = vadd.f32 %v702_v36, %v694_v30  ;;  %v736_v54 = vadd.f32 %v704_v39, %v694_v30  ;;  %v738_v56 = vadd.f32 %v706_v40, %v694_v30  ;;  %v740_v55 = vadd.f32 %v708_v43, %v694_v30 }
 0x24b   :  { %v742_v0 = vadd.f32 %v710_v45, %v694_v30  ;;  %v744_v58 = vadd.f32 %v712_v46, %v694_v30  ;;  %v746_v13 = vadd.f32 %v714_v51, %v694_v30  ;;  %v748_v62 = vadd.f32 %v716_v49, %v694_v30 }
 0x24c   :  { %v750_v20 = vadd.f32 %v718_v61, %v694_v30  ;;  %v752_v48 = vadd.f32 %v720_v6, %v694_v30  ;;  %v754_v34 = vadd.f32 %v722_v12, %v694_v30  ;;  %v756_v2 = vadd.f32 %v724_v22, %v694_v30 }
 0x24d   :  { %v758_v42 = vadd.f32 %v726_v28, %v694_v30  ;;  %vm760_vm0 = vcmp.gt.f32.partialorder %v728_v52, 0.0  ;;  %vm762_vm1 = vcmp.gt.f32.partialorder %v730_v38, 0.0  ;;  %vm764_vm2 = vcmp.gt.f32.partialorder %v732_v53, 0.0 }
 0x24e   :  { %vm766_vm3 = vcmp.gt.f32.partialorder %v734_v44, 0.0  ;;  %vm768_vm4 = vcmp.gt.f32.partialorder %v736_v54, 0.0  ;;  %vm770_vm5 = vcmp.gt.f32.partialorder %v738_v56, 0.0  ;;  %vm772_vm6 = vcmp.gt.f32.partialorder %v740_v55, 0.0 }
 0x24f   :  { %vm774_vm7 = vcmp.gt.f32.partialorder %v742_v0, 0.0  ;;  %vm776_vm8 = vcmp.gt.f32.partialorder %v744_v58, 0.0  ;;  %vm778_vm9 = vcmp.gt.f32.partialorder %v746_v13, 0.0  ;;  %vm780_vm10 = vcmp.gt.f32.partialorder %v748_v62, 0.0 }
 0x250   :  { %vm782_vm11 = vcmp.gt.f32.partialorder %v750_v20, 0.0  ;;  %vm784_vm12 = vcmp.gt.f32.partialorder %v752_v48, 0.0  ;;  %vm786_vm13 = vcmp.gt.f32.partialorder %v754_v34, 0.0  ;;  %vm788_vm14 = vcmp.gt.f32.partialorder %v756_v2, 0.0 }
 0x251   :  { %vm790_vm15 = vcmp.gt.f32.partialorder %v758_v42, 0.0  ;;  %v792_v3 = vmul.f32 0.2, %v728_v52  ;;  %v794_v5 = vmul.f32 0.2, %v730_v38  ;;  %v695_v7 = vmul.f32 %v5213_v57, %v693_v29 }
 0x252   :  { %v796_v8 = vmul.f32 0.2, %v732_v53  ;;  %v798_v11 = vmul.f32 0.2, %v734_v44  ;;  %v800_v14 = vmul.f32 0.2, %v736_v54  ;;  %v697_v15 = vmul.f32 %v5213_v57, %v5526_v60 }
 0x253   :  { %v802_v18 = vmul.f32 0.2, %v738_v56  ;;  %v804_v19 = vmul.f32 0.2, %v740_v55  ;;  %v806_v21 = vmul.f32 0.2, %v742_v0  ;;  %v5719_v23 = vsel %vm760_vm0, %v728_v52, %v792_v3 }
 0x254   :  { %v808_v24 = vmul.f32 0.2, %v744_v58  ;;  %v810_v27 = vmul.f32 0.2, %v746_v13  ;;  %v812_v30 = vmul.f32 0.2, %v748_v62  ;;  %v5722_v31 = vsel %vm762_vm1, %v730_v38, %v794_v5 }
 0x255   :  { %v814_v33 = vmul.f32 0.2, %v750_v20  ;;  %v816_v35 = vmul.f32 0.2, %v752_v48  ;;  %v818_v29 = vmul.f32 0.2, %v754_v34  ;;  %v5725_v36 = vsel %vm764_vm2, %v732_v53, %v796_v8 }
 0x256   :  { %v820_v39 = vmul.f32 0.2, %v756_v2  ;;  %v822_v60 = vmul.f32 0.2, %v758_v42  ;;  %v5728_v40 = vsel %vm766_vm3, %v734_v44, %v798_v11  ;;  %v5731_v43 = vsel %vm768_vm4, %v736_v54, %v800_v14 }
 0x257   :  { %v5734_v45 = vsel %vm770_vm5, %v738_v56, %v802_v18  ;;  %v5737_v46 = vsel %vm772_vm6, %v740_v55, %v804_v19  ;;  %v5740_v51 = vsel %vm774_vm7, %v742_v0, %v806_v21  ;;  %v5743_v49 = vsel %vm776_vm8, %v744_v58, %v808_v24 }
 0x258   :  { %v5746_v61 = vsel %vm778_vm9, %v746_v13, %v810_v27  ;;  %v5749_v6 = vsel %vm780_vm10, %v748_v62, %v812_v30  ;;  %v5752_v12 = vsel %vm782_vm11, %v750_v20, %v814_v33  ;;  %v5755_v22 = vsel %vm784_vm12, %v752_v48, %v816_v35 }
 0x259   :  { %v5758_v28 = vsel %vm786_vm13, %v754_v34, %v818_v29  ;;  %v5761_v52 = vsel %vm788_vm14, %v756_v2, %v820_v39  ;;  %v5764_v38 = vsel %vm790_vm15, %v758_v42, %v822_v60  ;;  %v699_v53 = vmul.f32 %v5213_v57, %v5536_v1 }
 0x25a   :  { %v701_v44 = vmul.f32 %v5213_v57, %v5561_v9  ;;  %v703_v54 = vmul.f32 %v5213_v57, %v5571_v16  ;;  %v705_v56 = vmul.f32 %v5213_v57, %v5581_v25  ;;  %v707_v55 = vmul.f32 %v5213_v57, %v5591_v32 }
 0x25b   :  { %v709_v0 = vmul.f32 %v5213_v57, %v5601_v41  ;;  %v711_v58 = vmul.f32 %v5213_v57, %v5611_v50  ;;  %v713_v13 = vmul.f32 %v5213_v57, %v5621_v59  ;;  %v715_v62 = vmul.f32 %v5213_v57, %v5631_v4 }
 0x25c   :  { %v717_v20 = vmul.f32 %v5213_v57, %v5641_v17  ;;  %v719_v1 = vmul.f32 %v5213_v57, %v5651_v26  ;;  %v721_v9 = vmul.f32 %v5213_v57, %v5661_v37  ;;  %v723_v16 = vmul.f32 %v5213_v57, %v5671_v47 }
 0x25d   :  { %v725_v25 = vmul.f32 %v5213_v57, %v5681_v63  ;;  %v727_v32 = vmul.f32 %v5213_v57, %v5691_v10  ;;  %v729_v48 = vadd.f32 %v697_v15, %v695_v7  ;;  %v731_v41 = vadd.f32 %v699_v53, %v695_v7 }
 0x25e   :  { %v733_v34 = vadd.f32 %v701_v44, %v695_v7  ;;  %v735_v50 = vadd.f32 %v703_v54, %v695_v7  ;;  %v737_v2 = vadd.f32 %v705_v56, %v695_v7  ;;  %v739_v59 = vadd.f32 %v707_v55, %v695_v7 }
 0x25f   :  { %v741_v42 = vadd.f32 %v709_v0, %v695_v7  ;;  %v743_v4 = vadd.f32 %v711_v58, %v695_v7  ;;  %v745_v3 = vadd.f32 %v713_v13, %v695_v7  ;;  %v747_v17 = vadd.f32 %v715_v62, %v695_v7 }
 0x260   :  { %v749_v5 = vadd.f32 %v717_v20, %v695_v7  ;;  %v751_v26 = vadd.f32 %v719_v1, %v695_v7  ;;  %v753_v8 = vadd.f32 %v721_v9, %v695_v7  ;;  %v755_v37 = vadd.f32 %v723_v16, %v695_v7 }
 0x261   :  { %v757_v11 = vadd.f32 %v725_v25, %v695_v7  ;;  %v759_v47 = vadd.f32 %v727_v32, %v695_v7  ;;  %vm761_vm0 = vcmp.gt.f32.partialorder %v729_v48, 0.0  ;;  %vm763_vm1 = vcmp.gt.f32.partialorder %v731_v41, 0.0 }
 0x262   :  { %vm765_vm2 = vcmp.gt.f32.partialorder %v733_v34, 0.0  ;;  %vm767_vm3 = vcmp.gt.f32.partialorder %v735_v50, 0.0  ;;  %vm769_vm4 = vcmp.gt.f32.partialorder %v737_v2, 0.0  ;;  %vm771_vm5 = vcmp.gt.f32.partialorder %v739_v59, 0.0 }
 0x263   :  { %vm773_vm6 = vcmp.gt.f32.partialorder %v741_v42, 0.0  ;;  %vm775_vm7 = vcmp.gt.f32.partialorder %v743_v4, 0.0  ;;  %vm777_vm8 = vcmp.gt.f32.partialorder %v745_v3, 0.0  ;;  %vm779_vm9 = vcmp.gt.f32.partialorder %v747_v17, 0.0 }
 0x264   :  { %vm781_vm10 = vcmp.gt.f32.partialorder %v749_v5, 0.0  ;;  %vm783_vm11 = vcmp.gt.f32.partialorder %v751_v26, 0.0  ;;  %vm785_vm12 = vcmp.gt.f32.partialorder %v753_v8, 0.0  ;;  %vm787_vm13 = vcmp.gt.f32.partialorder %v755_v37, 0.0 }
 0x265   :  { %vm789_vm14 = vcmp.gt.f32.partialorder %v757_v11, 0.0  ;;  %vm791_vm15 = vcmp.gt.f32.partialorder %v759_v47, 0.0  ;;  %v793_v63 = vmul.f32 0.2, %v729_v48  ;;  %v795_v10 = vmul.f32 0.2, %v731_v41 }
 0x266   :  { %v797_v57 = vmul.f32 0.2, %v733_v34  ;;  %v799_v7 = vmul.f32 0.2, %v735_v50  ;;  %v801_v14 = vmul.f32 0.2, %v737_v2 }
 0x267   :  { %v803_v15 = vmul.f32 0.2, %v739_v59  ;;  %v805_v18 = vmul.f32 0.2, %v741_v42  ;;  %v807_v19 = vmul.f32 0.2, %v743_v4  ;;  %v825_v21 = vsel %vm761_vm0, %v729_v48, %v793_v63 }
 0x268   :  { %v809_v24 = vmul.f32 0.2, %v745_v3  ;;  %v811_v27 = vmul.f32 0.2, %v747_v17  ;;  %v813_v30 = vmul.f32 0.2, %v749_v5  ;;  %v827_v33 = vsel %vm763_vm1, %v731_v41, %v795_v10 }
 0x269   :  { %v815_v35 = vmul.f32 0.2, %v751_v26  ;;  %v817_v29 = vmul.f32 0.2, %v753_v8  ;;  %v819_v39 = vmul.f32 0.2, %v755_v37  ;;  %v5784_v60 = vsel %vm765_vm2, %v733_v34, %v797_v57 }
 0x26a   :  { %v821_v53 = vmul.f32 0.2, %v757_v11  ;;  %v823_v44 = vmul.f32 0.2, %v759_v47  ;;  %v5787_v54 = vsel %vm767_vm3, %v735_v50, %v799_v7  ;;  %v5790_v56 = vsel %vm769_vm4, %v737_v2, %v801_v14 }
 0x26b   :  { %v5793_v55 = vsel %vm771_vm5, %v739_v59, %v803_v15  ;;  %v5796_v0 = vsel %vm773_vm6, %v741_v42, %v805_v18  ;;  %v5799_v58 = vsel %vm775_vm7, %v743_v4, %v807_v19  ;;  %v5802_v13 = vsel %vm777_vm8, %v745_v3, %v809_v24 }
 0x26c   :  { %v5805_v62 = vsel %vm779_vm9, %v747_v17, %v811_v27  ;;  %v5808_v20 = vsel %vm781_vm10, %v749_v5, %v813_v30  ;;  %v5811_v1 = vsel %vm783_vm11, %v751_v26, %v815_v35  ;;  %v5814_v9 = vsel %vm785_vm12, %v753_v8, %v817_v29 }
 0x26d   :  { %v5817_v16 = vsel %vm787_vm13, %v755_v37, %v819_v39  ;;  %v5820_v25 = vsel %vm789_vm14, %v757_v11, %v821_v53  ;;  %v5823_v32 = vsel %vm791_vm15, %v759_v47, %v823_v44 }
 0x26e   :  { %5292 = dma.done.wait [#allocation5], 8192 }
 0x26f   :  { %5293 = vsyncadd [#allocation5], 4294959104  ;;  %v861_v48 = vpack.c.bf16 %v827_v33, %v825_v21  ;;  %v877_v41 = vld [vmem:[#allocation2 + $0x8] sm:$0xff]  ;;  %v879_v34 = vld [vmem:[#allocation2 + $0x18] sm:$0xff] }
 0x270   :  { %v876_v50 = vld [vmem:[#allocation2] sm:$0xff]  ;;  %940 = vmatprep.subr.bf16.mxu0 %v877_v41  ;;  %1053 = vmatprep.subr.bf16.mxu1 %v879_v34  ;;  %v878_v2 = vld [vmem:[#allocation2 + $0x10] sm:$0xff]  ;;  %v881_v59 = vld [vmem:[#allocation2 + $0x28] sm:$0xff] }
 0x271   :  { %972 = vmatprep.mubr.bf16.mxu0 %v861_v48  ;;  %1085 = vmatprep.mubr.bf16.mxu1 %v861_v48  ;;  %v883_v42 = vld [vmem:[#allocation2 + $0x38] sm:$0xff]  ;;  %v880_v4 = vld [vmem:[#allocation2 + $0x20] sm:$0xff]  ;;  %v882_v3 = vld [vmem:[#allocation2 + $0x30] sm:$0xff] }
 0x272   :  { %941 = vmatpush1.bf16.msra.mxu0 %v876_v50  ;;  %1054 = vmatpush1.bf16.msra.mxu1 %v878_v2  ;;  %v885_v17 = vld [vmem:[#allocation2 + $0x48] sm:$0xff]  ;;  %v887_v5 = vld [vmem:[#allocation2 + $0x58] sm:$0xff]  ;;  %v884_v26 = vld [vmem:[#allocation2 + $0x40] sm:$0xff] }
 0x273   :  { %942 = vmatprep.subr.bf16.mxu0 %v881_v59  ;;  %1055 = vmatprep.subr.bf16.mxu1 %v883_v42  ;;  %v886_v8 = vld [vmem:[#allocation2 + $0x50] sm:$0xff]  ;;  %v889_v37 = vld [vmem:[#allocation2 + $0x68] sm:$0xff]  ;;  %v891_v11 = vld [vmem:[#allocation2 + $0x78] sm:$0xff] }
 0x274   :  { %v888_v47 = vld [vmem:[#allocation2 + $0x60] sm:$0xff]  ;;  %v890_v63 = vld [vmem:[#allocation2 + $0x70] sm:$0xff]  ;;  %v893_v10 = vld [vmem:[#allocation2 + $0x88] sm:$0xff] }
 0x275   :  { %v895_v57 = vld [vmem:[#allocation2 + $0x98] sm:$0xff]  ;;  %v892_v7 = vld [vmem:[#allocation2 + $0x80] sm:$0xff]  ;;  %v894_v14 = vld [vmem:[#allocation2 + $0x90] sm:$0xff] }
 0x276   :  { %943 = vmatpush1.bf16.msra.mxu0 %v880_v4  ;;  %1056 = vmatpush1.bf16.msra.mxu1 %v882_v3  ;;  %v897_v15 = vld [vmem:[#allocation2 + $0xa8] sm:$0xff]  ;;  %v899_v18 = vld [vmem:[#allocation2 + $0xb8] sm:$0xff]  ;;  %v896_v19 = vld [vmem:[#allocation2 + $0xa0] sm:$0xff] }
 0x277   :  { %944 = vmatprep.subr.bf16.mxu0 %v885_v17  ;;  %1057 = vmatprep.subr.bf16.mxu1 %v887_v5  ;;  %v898_v21 = vld [vmem:[#allocation2 + $0xb0] sm:$0xff]  ;;  %v901_v24 = vld [vmem:[#allocation2 + $0xc8] sm:$0xff]  ;;  %v903_v27 = vld [vmem:[#allocation2 + $0xd8] sm:$0xff] }
 0x278   :  { %v900_v30 = vld [vmem:[#allocation2 + $0xc0] sm:$0xff]  ;;  %v902_v33 = vld [vmem:[#allocation2 + $0xd0] sm:$0xff]  ;;  %v905_v35 = vld [vmem:[#allocation2 + $0xe8] sm:$0xff] }
 0x279   :  { %v907_v29 = vld [vmem:[#allocation2 + $0xf8] sm:$0xff]  ;;  %v904_v39 = vld [vmem:[#allocation2 + $0xe0] sm:$0xff]  ;;  %v906_v53 = vld [vmem:[#allocation2 + $0xf0] sm:$0xff] }
 0x27a   :  { %945 = vmatpush1.bf16.msra.mxu0 %v884_v26  ;;  %1058 = vmatpush1.bf16.msra.mxu1 %v886_v8  ;;  %v909_v44 = vld [vmem:[#allocation2 + $0x108] sm:$0xff]  ;;  %v911_v48 = vld [vmem:[#allocation2 + $0x118] sm:$0xff]  ;;  %v908_v41 = vld [vmem:[#allocation2 + $0x100] sm:$0xff] }
 0x27b   :  { %946 = vmatprep.subr.bf16.mxu0 %v889_v37  ;;  %1059 = vmatprep.subr.bf16.mxu1 %v891_v11  ;;  %v910_v34 = vld [vmem:[#allocation2 + $0x110] sm:$0xff]  ;;  %v913_v50 = vld [vmem:[#allocation2 + $0x128] sm:$0xff]  ;;  %v915_v2 = vld [vmem:[#allocation2 + $0x138] sm:$0xff] }
 0x27c   :  { %v912_v59 = vld [vmem:[#allocation2 + $0x120] sm:$0xff]  ;;  %v914_v42 = vld [vmem:[#allocation2 + $0x130] sm:$0xff]  ;;  %v917_v4 = vld [vmem:[#allocation2 + $0x148] sm:$0xff] }
 0x27d   :  { %v919_v3 = vld [vmem:[#allocation2 + $0x158] sm:$0xff]  ;;  %v916_v17 = vld [vmem:[#allocation2 + $0x140] sm:$0xff]  ;;  %v918_v5 = vld [vmem:[#allocation2 + $0x150] sm:$0xff] }
 0x27e   :  { %947 = vmatpush1.bf16.msra.mxu0 %v888_v47  ;;  %1060 = vmatpush1.bf16.msra.mxu1 %v890_v63  ;;  %v921_v26 = vld [vmem:[#allocation2 + $0x168] sm:$0xff]  ;;  %v923_v8 = vld [vmem:[#allocation2 + $0x178] sm:$0xff]  ;;  %v920_v37 = vld [vmem:[#allocation2 + $0x160] sm:$0xff] }
 0x27f   :  { %948 = vmatprep.subr.bf16.mxu0 %v893_v10  ;;  %1061 = vmatprep.subr.bf16.mxu1 %v895_v57  ;;  %v922_v11 = vld [vmem:[#allocation2 + $0x170] sm:$0xff]  ;;  %v925_v47 = vld [vmem:[#allocation2 + $0x188] sm:$0xff]  ;;  %v927_v63 = vld [vmem:[#allocation2 + $0x198] sm:$0xff] }
 0x280   :  { %v924_v10 = vld [vmem:[#allocation2 + $0x180] sm:$0xff]  ;;  %v926_v57 = vld [vmem:[#allocation2 + $0x190] sm:$0xff] }
 0x282   :  { %949 = vmatpush1.bf16.msra.mxu0 %v892_v7  ;;  %1062 = vmatpush1.bf16.msra.mxu1 %v894_v14  ;;  %v929_v7 = vld [vmem:[#allocation2 + $0x1a8] sm:$0xff]  ;;  %v931_v14 = vld [vmem:[#allocation2 + $0x1b8] sm:$0xff] }
 0x283   :  { %950 = vmatprep.subr.bf16.mxu0 %v897_v15  ;;  %1063 = vmatprep.subr.bf16.mxu1 %v899_v18  ;;  %v928_v15 = vld [vmem:[#allocation2 + $0x1a0] sm:$0xff]  ;;  %v930_v18 = vld [vmem:[#allocation2 + $0x1b0] sm:$0xff] }
 0x286   :  { %951 = vmatpush1.bf16.msra.mxu0 %v896_v19  ;;  %1064 = vmatpush1.bf16.msra.mxu1 %v898_v21  ;;  %v933_v19 = vld [vmem:[#allocation2 + $0x1c8] sm:$0xff]  ;;  %v935_v21 = vld [vmem:[#allocation2 + $0x1d8] sm:$0xff] }
 0x287   :  { %952 = vmatprep.subr.bf16.mxu0 %v901_v24  ;;  %1065 = vmatprep.subr.bf16.mxu1 %v903_v27  ;;  %v932_v24 = vld [vmem:[#allocation2 + $0x1c0] sm:$0xff]  ;;  %v934_v27 = vld [vmem:[#allocation2 + $0x1d0] sm:$0xff] }
 0x28a   :  { %953 = vmatpush1.bf16.msra.mxu0 %v900_v30  ;;  %1066 = vmatpush1.bf16.msra.mxu1 %v902_v33  ;;  %v937_v30 = vld [vmem:[#allocation2 + $0x1e8] sm:$0xff]  ;;  %v939_v33 = vld [vmem:[#allocation2 + $0x1f8] sm:$0xff] }
 0x28b   :  { %954 = vmatprep.subr.bf16.mxu0 %v905_v35  ;;  %1067 = vmatprep.subr.bf16.mxu1 %v907_v29  ;;  %v936_v35 = vld [vmem:[#allocation2 + $0x1e0] sm:$0xff]  ;;  %v938_v29 = vld [vmem:[#allocation2 + $0x1f0] sm:$0xff] }
 0x28e   :  { %955 = vmatpush1.bf16.msra.mxu0 %v904_v39  ;;  %1068 = vmatpush1.bf16.msra.mxu1 %v906_v53  ;;  %v860_v39 = vpack.c.bf16 %v5722_v31, %v5719_v23  ;;  %v863_v53 = vpack.c.bf16 %v5787_v54, %v5784_v60  ;;  %v864_v23 = vpack.c.bf16 %v5734_v45, %v5731_v43 }
 0x28f   :  { %956 = vmatprep.subr.bf16.mxu0 %v909_v44  ;;  %1069 = vmatprep.subr.bf16.mxu1 %v911_v48  ;;  %v862_v44 = vpack.c.bf16 %v5728_v40, %v5725_v36  ;;  %v865_v48 = vpack.c.bf16 %v5793_v55, %v5790_v56  ;;  %v867_v31 = vpack.c.bf16 %v5799_v58, %v5796_v0 }
 0x290   :  { %v866_v36 = vpack.c.bf16 %v5740_v51, %v5737_v46  ;;  %v869_v40 = vpack.c.bf16 %v5805_v62, %v5802_v13  ;;  %v868_v43 = vpack.c.bf16 %v5746_v61, %v5743_v49  ;;  %v871_v45 = vpack.c.bf16 %v5811_v1, %v5808_v20 }
 0x291   :  { %v870_v46 = vpack.c.bf16 %v5752_v12, %v5749_v6  ;;  %v873_v51 = vpack.c.bf16 %v5817_v16, %v5814_v9  ;;  %v872_v49 = vpack.c.bf16 %v5758_v28, %v5755_v22  ;;  %v875_v61 = vpack.c.bf16 %v5823_v32, %v5820_v25 }
 0x292   :  { %957 = vmatpush1.bf16.msra.mxu0 %v908_v41  ;;  %1070 = vmatpush1.bf16.msra.mxu1 %v910_v34  ;;  %v874_v6 = vpack.c.bf16 %v5764_v38, %v5761_v52 }
 0x293   :  { %958 = vmatprep.subr.bf16.mxu0 %v913_v50  ;;  %1071 = vmatprep.subr.bf16.mxu1 %v915_v2 }
 0x296   :  { %959 = vmatpush1.bf16.msra.mxu0 %v912_v59  ;;  %1072 = vmatpush1.bf16.msra.mxu1 %v914_v42 }
 0x297   :  { %960 = vmatprep.subr.bf16.mxu0 %v917_v4  ;;  %1073 = vmatprep.subr.bf16.mxu1 %v919_v3 }
 0x29a   :  { %961 = vmatpush1.bf16.msra.mxu0 %v916_v17  ;;  %1074 = vmatpush1.bf16.msra.mxu1 %v918_v5 }
 0x29b   :  { %962 = vmatprep.subr.bf16.mxu0 %v921_v26  ;;  %1075 = vmatprep.subr.bf16.mxu1 %v923_v8 }
 0x29e   :  { %963 = vmatpush1.bf16.msra.mxu0 %v920_v37  ;;  %1076 = vmatpush1.bf16.msra.mxu1 %v922_v11 }
 0x29f   :  { %964 = vmatprep.subr.bf16.mxu0 %v925_v47  ;;  %1077 = vmatprep.subr.bf16.mxu1 %v927_v63 }
 0x2a2   :  { %965 = vmatpush1.bf16.msra.mxu0 %v924_v10  ;;  %1078 = vmatpush1.bf16.msra.mxu1 %v926_v57 }
 0x2a3   :  { %966 = vmatprep.subr.bf16.mxu0 %v929_v7  ;;  %1079 = vmatprep.subr.bf16.mxu1 %v931_v14 }
 0x2a6   :  { %967 = vmatpush1.bf16.msra.mxu0 %v928_v15  ;;  %1080 = vmatpush1.bf16.msra.mxu1 %v930_v18 }
 0x2a7   :  { %968 = vmatprep.subr.bf16.mxu0 %v933_v19  ;;  %1081 = vmatprep.subr.bf16.mxu1 %v935_v21 }
 0x2aa   :  { %969 = vmatpush1.bf16.msra.mxu0 %v932_v24  ;;  %1082 = vmatpush1.bf16.msra.mxu1 %v934_v27 }
 0x2ab   :  { %970 = vmatprep.subr.bf16.mxu0 %v937_v30  ;;  %1083 = vmatprep.subr.bf16.mxu1 %v939_v33 }
 0x2ae   :  { %971 = vmatpush1.bf16.msra.mxu0 %v936_v35  ;;  %1084 = vmatpush1.bf16.msra.mxu1 %v938_v29 }
 0x2b1   :  { %973 = vmatmul.mubr.bf16.vlgmr.msra.gmra.mrb[16].mxu0 %v860_v39  ;;  %1086 = vmatmul.mubr.bf16.vlgmr.msra.gmra.mrb[32].mxu1 %v860_v39 }
 0x2b2   :  { %982 = vmatprep.mubr.bf16.mxu0 %v863_v53  ;;  %1095 = vmatprep.mubr.bf16.mxu1 %v863_v53 }
 0x2b9   :  { %983 = vmatmul.mubr.bf16.gmra.mrb[20].mxu0 %v862_v44  ;;  %1096 = vmatmul.mubr.bf16.gmra.mrb[36].mxu1 %v862_v44 }
 0x2ba   :  { %992 = vmatprep.mubr.bf16.mxu0 %v865_v48  ;;  %1105 = vmatprep.mubr.bf16.mxu1 %v865_v48 }
 0x2c1   :  { %993 = vmatmul.mubr.bf16.gmra.mrb[24].mxu0 %v864_v23  ;;  %1106 = vmatmul.mubr.bf16.gmra.mrb[40].mxu1 %v864_v23 }
 0x2c2   :  { %1002 = vmatprep.mubr.bf16.mxu0 %v867_v31  ;;  %1115 = vmatprep.mubr.bf16.mxu1 %v867_v31 }
 0x2c9   :  { %1003 = vmatmul.mubr.bf16.gmra.mrb[28].mxu0 %v866_v36  ;;  %1116 = vmatmul.mubr.bf16.gmra.mrb[44].mxu1 %v866_v36 }
 0x2ca   :  { %1012 = vmatprep.mubr.bf16.mxu0 %v869_v40  ;;  %1125 = vmatprep.mubr.bf16.mxu1 %v869_v40 }
 0x2d1   :  { %1013 = vmatmul.mubr.bf16.gmra.mrb[32].mxu0 %v868_v43  ;;  %1126 = vmatmul.mubr.bf16.gmra.mrb[48].mxu1 %v868_v43 }
 0x2d2   :  { %1022 = vmatprep.mubr.bf16.mxu0 %v871_v45  ;;  %1135 = vmatprep.mubr.bf16.mxu1 %v871_v45 }
 0x2d9   :  { %1023 = vmatmul.mubr.bf16.gmra.mrb[36].mxu0 %v870_v46  ;;  %1136 = vmatmul.mubr.bf16.gmra.mrb[52].mxu1 %v870_v46 }
 0x2da   :  { %1032 = vmatprep.mubr.bf16.mxu0 %v873_v51  ;;  %1145 = vmatprep.mubr.bf16.mxu1 %v873_v51 }
 0x2e1   :  { %1033 = vmatmul.mubr.bf16.gmra.mrb[40].mxu0 %v872_v49  ;;  %1146 = vmatmul.mubr.bf16.gmra.mrb[56].mxu1 %v872_v49 }
 0x2e2   :  { %1042 = vmatprep.mubr.bf16.mxu0 %v875_v61  ;;  %1155 = vmatprep.mubr.bf16.mxu1 %v875_v61 }
 0x2e9   :  { %1043 = vmatmul.mubr.bf16.gmra.mrb[44].mxu0 %v874_v6  ;;  %1156 = vmatmul.mubr.bf16.gmra.mrb[60].mxu1 %v874_v6 }
 0x384   :  { %v5855_v12 = vpop.f32.mrb[16].mxu0  ;;  %v5857_v60 = vpop.f32.mrb[32].mxu1 }
 0x385   :  { %v5859_v54 = vpop.f32.mrb[17].mxu0  ;;  %v5861_v56 = vpop.f32.mrb[33].mxu1  ;;  %v1254_v22 = vmul.f32 %v5855_v12, %v5855_v12  ;;  %v1256_v28 = vmul.f32 %v5857_v60, %v5857_v60 }
 0x386   :  { %8505 = vst [vmem:[#allocation17_spill] sm:$0xff] %v5859_v54  ;;  %8506 = vst [vmem:[#allocation18_spill] sm:$0xff] %v5861_v56  ;;  %v1255_v55 = vmul.f32 %v5859_v54, %v5859_v54  ;;  %v1257_v52 = vmul.f32 %v5861_v56, %v5861_v56  ;;  %v5871_v38 = vpop.f32.mrb[18].mxu0  ;;  %v5873_v0 = vpop.f32.mrb[34].mxu1 }
 0x387   :  { %v1166_v58 = vadd.f32 %v5871_v38, %v5855_v12  ;;  %v1258_v13 = vmul.f32 %v5871_v38, %v5871_v38  ;;  %v1208_v62 = vadd.f32 %v5873_v0, %v5857_v60  ;;  %v1260_v20 = vmul.f32 %v5873_v0, %v5873_v0  ;;  %v5883_v1 = vpop.f32.mrb[19].mxu0  ;;  %v5885_v9 = vpop.f32.mrb[35].mxu1 }
 0x388   :  { %8507 = vst [vmem:[#allocation19_spill] sm:$0xff] %v5883_v1  ;;  %8508 = vst [vmem:[#allocation20_spill] sm:$0xff] %v5885_v9  ;;  %v1187_v16 = vadd.f32 %v5883_v1, %v5859_v54  ;;  %v1259_v25 = vmul.f32 %v5883_v1, %v5883_v1  ;;  %v1229_v32 = vadd.f32 %v5885_v9, %v5861_v56 }
 0x389   :  { %v1261_v41 = vmul.f32 %v5885_v9, %v5885_v9  ;;  %v1318_v34 = vadd.f32 %v1258_v13, %v1254_v22  ;;  %v1360_v50 = vadd.f32 %v1260_v20, %v1256_v28 }
 0x38a   :  { %v1339_v2 = vadd.f32 %v1259_v25, %v1255_v55 }
 0x38b   :  { %v1381_v59 = vadd.f32 %v1261_v41, %v1257_v52 }
 0x38c   :  { %v5895_v42 = vpop.f32.mrb[20].mxu0  ;;  %v5897_v4 = vpop.f32.mrb[36].mxu1 }
 0x38d   :  { %v1167_v3 = vadd.f32 %v1166_v58, %v5895_v42  ;;  %v1262_v17 = vmul.f32 %v5895_v42, %v5895_v42  ;;  %v1209_v5 = vadd.f32 %v1208_v62, %v5897_v4  ;;  %v1264_v26 = vmul.f32 %v5897_v4, %v5897_v4  ;;  %v5905_v8 = vpop.f32.mrb[21].mxu0  ;;  %v5907_v37 = vpop.f32.mrb[37].mxu1 }
 0x38e   :  { %8509 = vst [vmem:[#allocation21_spill] sm:$0xff] %v5905_v8  ;;  %8510 = vst [vmem:[#allocation22_spill] sm:$0xff] %v5907_v37  ;;  %v1188_v11 = vadd.f32 %v1187_v16, %v5905_v8  ;;  %v1263_v47 = vmul.f32 %v5905_v8, %v5905_v8  ;;  %v1230_v63 = vadd.f32 %v1229_v32, %v5907_v37  ;;  %v5915_v57 = vpop.f32.mrb[22].mxu0  ;;  %v5917_v7 = vpop.f32.mrb[38].mxu1 }
 0x38f   :  { %v1265_v10 = vmul.f32 %v5907_v37, %v5907_v37  ;;  %v1319_v14 = vadd.f32 %v1318_v34, %v1262_v17  ;;  %v1361_v15 = vadd.f32 %v1360_v50, %v1264_v26  ;;  %v1168_v18 = vadd.f32 %v1167_v3, %v5915_v57  ;;  %v5922_v21 = vpop.f32.mrb[23].mxu0  ;;  %v5924_v24 = vpop.f32.mrb[39].mxu1 }
 0x390   :  { %v1266_v19 = vmul.f32 %v5915_v57, %v5915_v57  ;;  %8511 = vst [vmem:[#allocation23_spill] sm:$0xff] %v5922_v21  ;;  %8512 = vst [vmem:[#allocation24_spill] sm:$0xff] %v5924_v24  ;;  %v1340_v27 = vadd.f32 %v1339_v2, %v1263_v47  ;;  %v1210_v33 = vadd.f32 %v1209_v5, %v5917_v7 }
 0x391   :  { %v1382_v30 = vadd.f32 %v1381_v59, %v1265_v10  ;;  %v1268_v35 = vmul.f32 %v5917_v7, %v5917_v7  ;;  %v1189_v39 = vadd.f32 %v1188_v11, %v5922_v21  ;;  %v1267_v53 = vmul.f32 %v5922_v21, %v5922_v21 }
 0x392   :  { %v1320_v29 = vadd.f32 %v1319_v14, %v1266_v19  ;;  %v1231_v44 = vadd.f32 %v1230_v63, %v5924_v24  ;;  %v1269_v23 = vmul.f32 %v5924_v24, %v5924_v24 }
 0x393   :  { %v1362_v48 = vadd.f32 %v1361_v15, %v1268_v35  ;;  %v1341_v31 = vadd.f32 %v1340_v27, %v1267_v53 }
 0x394   :  { %v1383_v36 = vadd.f32 %v1382_v30, %v1269_v23  ;;  %v5935_v40 = vpop.f32.mrb[24].mxu0  ;;  %v5937_v43 = vpop.f32.mrb[40].mxu1 }
 0x395   :  { %v1169_v45 = vadd.f32 %v1168_v18, %v5935_v40  ;;  %v1270_v46 = vmul.f32 %v5935_v40, %v5935_v40  ;;  %v1211_v51 = vadd.f32 %v1210_v33, %v5937_v43  ;;  %v1272_v49 = vmul.f32 %v5937_v43, %v5937_v43  ;;  %v5945_v61 = vpop.f32.mrb[25].mxu0  ;;  %v5947_v6 = vpop.f32.mrb[41].mxu1 }
 0x396   :  { %8513 = vst [vmem:[#allocation25_spill] sm:$0xff] %v5945_v61  ;;  %8514 = vst [vmem:[#allocation26_spill] sm:$0xff] %v5947_v6  ;;  %v1190_v22 = vadd.f32 %v1189_v39, %v5945_v61  ;;  %v1271_v28 = vmul.f32 %v5945_v61, %v5945_v61  ;;  %v1232_v55 = vadd.f32 %v1231_v44, %v5947_v6  ;;  %v5955_v58 = vpop.f32.mrb[26].mxu0  ;;  %v5957_v13 = vpop.f32.mrb[42].mxu1 }
 0x397   :  { %v1273_v52 = vmul.f32 %v5947_v6, %v5947_v6  ;;  %v1321_v62 = vadd.f32 %v1320_v29, %v1270_v46  ;;  %v1363_v20 = vadd.f32 %v1362_v48, %v1272_v49  ;;  %v1170_v16 = vadd.f32 %v1169_v45, %v5955_v58  ;;  %v5962_v32 = vpop.f32.mrb[27].mxu0  ;;  %v5964_v41 = vpop.f32.mrb[43].mxu1 }
 0x398   :  { %v1274_v25 = vmul.f32 %v5955_v58, %v5955_v58  ;;  %8515 = vst [vmem:[#allocation27_spill] sm:$0xff] %v5962_v32  ;;  %8516 = vst [vmem:[#allocation28_spill] sm:$0xff] %v5964_v41  ;;  %v1342_v34 = vadd.f32 %v1341_v31, %v1271_v28  ;;  %v1212_v2 = vadd.f32 %v1211_v51, %v5957_v13 }
 0x399   :  { %v1384_v50 = vadd.f32 %v1383_v36, %v1273_v52  ;;  %v1276_v59 = vmul.f32 %v5957_v13, %v5957_v13  ;;  %v1191_v17 = vadd.f32 %v1190_v22, %v5962_v32  ;;  %v1275_v5 = vmul.f32 %v5962_v32, %v5962_v32 }
 0x39a   :  { %v1322_v3 = vadd.f32 %v1321_v62, %v1274_v25  ;;  %v1233_v26 = vadd.f32 %v1232_v55, %v5964_v41  ;;  %v1277_v47 = vmul.f32 %v5964_v41, %v5964_v41 }
 0x39b   :  { %v1364_v11 = vadd.f32 %v1363_v20, %v1276_v59  ;;  %v1343_v63 = vadd.f32 %v1342_v34, %v1275_v5 }
 0x39c   :  { %v1385_v10 = vadd.f32 %v1384_v50, %v1277_v47  ;;  %v5975_v14 = vpop.f32.mrb[28].mxu0  ;;  %v5977_v15 = vpop.f32.mrb[44].mxu1 }
 0x39d   :  { %v1171_v18 = vadd.f32 %v1170_v16, %v5975_v14  ;;  %v1278_v19 = vmul.f32 %v5975_v14, %v5975_v14  ;;  %v1213_v27 = vadd.f32 %v1212_v2, %v5977_v15  ;;  %v1280_v30 = vmul.f32 %v5977_v15, %v5977_v15  ;;  %v5985_v33 = vpop.f32.mrb[29].mxu0  ;;  %v5987_v35 = vpop.f32.mrb[45].mxu1 }
 0x39e   :  { %8517 = vst [vmem:[#allocation29_spill] sm:$0xff] %v5985_v33  ;;  %8518 = vst [vmem:[#allocation30_spill] sm:$0xff] %v5987_v35  ;;  %v1192_v29 = vadd.f32 %v1191_v17, %v5985_v33  ;;  %v1279_v39 = vmul.f32 %v5985_v33, %v5985_v33  ;;  %v1234_v53 = vadd.f32 %v1233_v26, %v5987_v35  ;;  %v5995_v48 = vpop.f32.mrb[30].mxu0  ;;  %v5997_v23 = vpop.f32.mrb[46].mxu1 }
 0x39f   :  { %v1281_v44 = vmul.f32 %v5987_v35, %v5987_v35  ;;  %v1323_v31 = vadd.f32 %v1322_v3, %v1278_v19  ;;  %v1365_v36 = vadd.f32 %v1364_v11, %v1280_v30  ;;  %v1172_v45 = vadd.f32 %v1171_v18, %v5995_v48  ;;  %v6002_v51 = vpop.f32.mrb[31].mxu0  ;;  %v6004_v49 = vpop.f32.mrb[47].mxu1 }
 0x3a0   :  { %v1282_v46 = vmul.f32 %v5995_v48, %v5995_v48  ;;  %8519 = vst [vmem:[#allocation31_spill] sm:$0xff] %v6002_v51  ;;  %8520 = vst [vmem:[#allocation32_spill] sm:$0xff] %v6004_v49  ;;  %v1344_v22 = vadd.f32 %v1343_v63, %v1279_v39  ;;  %v1214_v55 = vadd.f32 %v1213_v27, %v5997_v23 }
 0x3a1   :  { %v1386_v28 = vadd.f32 %v1385_v10, %v1281_v44  ;;  %v1284_v52 = vmul.f32 %v5997_v23, %v5997_v23  ;;  %v1193_v20 = vadd.f32 %v1192_v29, %v6002_v51  ;;  %v1283_v16 = vmul.f32 %v6002_v51, %v6002_v51 }
 0x3a2   :  { %v1324_v62 = vadd.f32 %v1323_v31, %v1282_v46  ;;  %v1235_v25 = vadd.f32 %v1234_v53, %v6004_v49  ;;  %v1285_v50 = vmul.f32 %v6004_v49, %v6004_v49 }
 0x3a3   :  { %v1366_v34 = vadd.f32 %v1365_v36, %v1284_v52  ;;  %v1345_v2 = vadd.f32 %v1344_v22, %v1283_v16 }
 0x3a4   :  { %v1387_v59 = vadd.f32 %v1386_v28, %v1285_v50  ;;  %v6015_v3 = vpop.f32.mrb[32].mxu0  ;;  %v6017_v17 = vpop.f32.mrb[48].mxu1 }
 0x3a5   :  { %v1173_v5 = vadd.f32 %v1172_v45, %v6015_v3  ;;  %v1286_v26 = vmul.f32 %v6015_v3, %v6015_v3  ;;  %v1215_v11 = vadd.f32 %v1214_v55, %v6017_v17  ;;  %v1288_v47 = vmul.f32 %v6017_v17, %v6017_v17  ;;  %v6025_v63 = vpop.f32.mrb[33].mxu0  ;;  %v6027_v10 = vpop.f32.mrb[49].mxu1 }
 0x3a6   :  { %8521 = vst [vmem:[#allocation33_spill] sm:$0xff] %v6025_v63  ;;  %8522 = vst [vmem:[#allocation34_spill] sm:$0xff] %v6027_v10  ;;  %v1194_v18 = vadd.f32 %v1193_v20, %v6025_v63  ;;  %v1287_v19 = vmul.f32 %v6025_v63, %v6025_v63  ;;  %v1236_v27 = vadd.f32 %v1235_v25, %v6027_v10  ;;  %v6035_v29 = vpop.f32.mrb[34].mxu0  ;;  %v6037_v39 = vpop.f32.mrb[50].mxu1 }
 0x3a7   :  { %v1289_v30 = vmul.f32 %v6027_v10, %v6027_v10  ;;  %v1325_v53 = vadd.f32 %v1324_v62, %v1286_v26  ;;  %v1367_v44 = vadd.f32 %v1366_v34, %v1288_v47  ;;  %v1174_v31 = vadd.f32 %v1173_v5, %v6035_v29  ;;  %v6042_v45 = vpop.f32.mrb[35].mxu0  ;;  %v6044_v46 = vpop.f32.mrb[51].mxu1 }
 0x3a8   :  { %v1290_v36 = vmul.f32 %v6035_v29, %v6035_v29  ;;  %8523 = vst [vmem:[#allocation35_spill] sm:$0xff] %v6042_v45  ;;  %8524 = vst [vmem:[#allocation36_spill] sm:$0xff] %v6044_v46  ;;  %v1346_v22 = vadd.f32 %v1345_v2, %v1287_v19  ;;  %v1216_v55 = vadd.f32 %v1215_v11, %v6037_v39 }
 0x3a9   :  { %v1388_v28 = vadd.f32 %v1387_v59, %v1289_v30  ;;  %v1292_v52 = vmul.f32 %v6037_v39, %v6037_v39  ;;  %v1195_v62 = vadd.f32 %v1194_v18, %v6042_v45  ;;  %v1291_v16 = vmul.f32 %v6042_v45, %v6042_v45 }
 0x3aa   :  { %v1326_v20 = vadd.f32 %v1325_v53, %v1290_v36  ;;  %v1237_v25 = vadd.f32 %v1236_v27, %v6044_v46  ;;  %v1293_v50 = vmul.f32 %v6044_v46, %v6044_v46 }
 0x3ab   :  { %v1368_v34 = vadd.f32 %v1367_v44, %v1292_v52  ;;  %v1347_v5 = vadd.f32 %v1346_v22, %v1291_v16 }
 0x3ac   :  { %v1389_v2 = vadd.f32 %v1388_v28, %v1293_v50  ;;  %v6055_v59 = vpop.f32.mrb[36].mxu0  ;;  %v6057_v26 = vpop.f32.mrb[52].mxu1 }
 0x3ad   :  { %v1175_v11 = vadd.f32 %v1174_v31, %v6055_v59  ;;  %v1294_v47 = vmul.f32 %v6055_v59, %v6055_v59  ;;  %v1217_v18 = vadd.f32 %v1216_v55, %v6057_v26  ;;  %v1296_v19 = vmul.f32 %v6057_v26, %v6057_v26  ;;  %v6065_v27 = vpop.f32.mrb[37].mxu0  ;;  %v6067_v30 = vpop.f32.mrb[53].mxu1 }
 0x3ae   :  { %8525 = vst [vmem:[#allocation37_spill] sm:$0xff] %v6065_v27  ;;  %8526 = vst [vmem:[#allocation38_spill] sm:$0xff] %v6067_v30  ;;  %v1196_v53 = vadd.f32 %v1195_v62, %v6065_v27  ;;  %v1295_v44 = vmul.f32 %v6065_v27, %v6065_v27  ;;  %v1238_v36 = vadd.f32 %v1237_v25, %v6067_v30  ;;  %v6075_v22 = vpop.f32.mrb[38].mxu0  ;;  %v6077_v28 = vpop.f32.mrb[54].mxu1 }
 0x3af   :  { %v1297_v31 = vmul.f32 %v6067_v30, %v6067_v30  ;;  %v1327_v55 = vadd.f32 %v1326_v20, %v1294_v47  ;;  %v1369_v52 = vadd.f32 %v1368_v34, %v1296_v19  ;;  %v1176_v16 = vadd.f32 %v1175_v11, %v6075_v22  ;;  %v6082_v62 = vpop.f32.mrb[39].mxu0  ;;  %v6084_v46 = vpop.f32.mrb[55].mxu1 }
 0x3b0   :  { %v1298_v50 = vmul.f32 %v6075_v22, %v6075_v22  ;;  %8527 = vst [vmem:[#allocation39_spill] sm:$0xff] %v6082_v62  ;;  %8528 = vst [vmem:[#allocation40_spill] sm:$0xff] %v6084_v46  ;;  %v1348_v10 = vadd.f32 %v1347_v5, %v1295_v44  ;;  %v1218_v49 = vadd.f32 %v1217_v18, %v6077_v28 }
 0x3b1   :  { %v1390_v25 = vadd.f32 %v1389_v2, %v1297_v31  ;;  %v1300_v30 = vmul.f32 %v6077_v28, %v6077_v28  ;;  %v1197_v20 = vadd.f32 %v1196_v53, %v6082_v62  ;;  %v1299_v34 = vmul.f32 %v6082_v62, %v6082_v62 }
 0x3b2   :  { %v1328_v35 = vadd.f32 %v1327_v55, %v1298_v50  ;;  %v1239_v11 = vadd.f32 %v1238_v36, %v6084_v46  ;;  %v1301_v19 = vmul.f32 %v6084_v46, %v6084_v46 }
 0x3b3   :  { %v1370_v47 = vadd.f32 %v1369_v52, %v1300_v30  ;;  %v1349_v41 = vadd.f32 %v1348_v10, %v1299_v34 }
 0x3b4   :  { %v1391_v5 = vadd.f32 %v1390_v25, %v1301_v19  ;;  %v6095_v2 = vpop.f32.mrb[40].mxu0  ;;  %v6097_v18 = vpop.f32.mrb[56].mxu1 }
 0x3b5   :  { %v1177_v44 = vadd.f32 %v1176_v16, %v6095_v2  ;;  %v1302_v53 = vmul.f32 %v6095_v2, %v6095_v2  ;;  %v1219_v31 = vadd.f32 %v1218_v49, %v6097_v18  ;;  %v1304_v36 = vmul.f32 %v6097_v18, %v6097_v18  ;;  %v6105_v30 = vpop.f32.mrb[41].mxu0  ;;  %v6107_v55 = vpop.f32.mrb[57].mxu1 }
 0x3b6   :  { %8529 = vst [vmem:[#allocation41_spill] sm:$0xff] %v6105_v30  ;;  %8530 = vst [vmem:[#allocation42_spill] sm:$0xff] %v6107_v55  ;;  %v1198_v10 = vadd.f32 %v1197_v20, %v6105_v30  ;;  %v1303_v52 = vmul.f32 %v6105_v30, %v6105_v30  ;;  %v1240_v50 = vadd.f32 %v1239_v11, %v6107_v55  ;;  %v6115_v25 = vpop.f32.mrb[42].mxu0  ;;  %v6117_v49 = vpop.f32.mrb[58].mxu1 }
 0x3b7   :  { %v1305_v16 = vmul.f32 %v6107_v55, %v6107_v55  ;;  %v1329_v34 = vadd.f32 %v1328_v35, %v1302_v53  ;;  %v1371_v19 = vadd.f32 %v1370_v47, %v1304_v36  ;;  %v1178_v46 = vadd.f32 %v1177_v44, %v6115_v25  ;;  %v6122_v20 = vpop.f32.mrb[43].mxu0  ;;  %v6124_v24 = vpop.f32.mrb[59].mxu1 }
 0x3b8   :  { %v1306_v6 = vmul.f32 %v6115_v25, %v6115_v25  ;;  %8531 = vst [vmem:[#allocation43_spill] sm:$0xff] %v6122_v20  ;;  %8532 = vst [vmem:[#allocation44_spill] sm:$0xff] %v6124_v24  ;;  %v1350_v37 = vadd.f32 %v1349_v41, %v1303_v52  ;;  %v1220_v9 = vadd.f32 %v1219_v31, %v6117_v49 }
 0x3b9   :  { %v1392_v11 = vadd.f32 %v1391_v5, %v1305_v16  ;;  %v1308_v55 = vmul.f32 %v6117_v49, %v6117_v49  ;;  %v1199_v35 = vadd.f32 %v1198_v10, %v6122_v20  ;;  %v1307_v47 = vmul.f32 %v6122_v20, %v6122_v20 }
 0x3ba   :  { %v1330_v56 = vadd.f32 %v1329_v34, %v1306_v6  ;;  %v1241_v44 = vadd.f32 %v1240_v50, %v6124_v24  ;;  %v1309_v36 = vmul.f32 %v6124_v24, %v6124_v24 }
 0x3bb   :  { %v1372_v53 = vadd.f32 %v1371_v19, %v1308_v55  ;;  %v1351_v30 = vadd.f32 %v1350_v37, %v1307_v47 }
 0x3bc   :  { %v1393_v41 = vadd.f32 %v1392_v11, %v1309_v36  ;;  %v6135_v5 = vpop.f32.mrb[44].mxu0  ;;  %v6137_v31 = vpop.f32.mrb[60].mxu1 }
 0x3bd   :  { %v1179_v52 = vadd.f32 %v1178_v46, %v6135_v5  ;;  %v1310_v6 = vmul.f32 %v6135_v5, %v6135_v5  ;;  %v1221_v10 = vadd.f32 %v1220_v9, %v6137_v31  ;;  %v1312_v50 = vmul.f32 %v6137_v31, %v6137_v31  ;;  %v6145_v55 = vpop.f32.mrb[45].mxu0  ;;  %v6147_v16 = vpop.f32.mrb[61].mxu1 }
 0x3be   :  { %8533 = vst [vmem:[#allocation45_spill] sm:$0xff] %v6145_v55  ;;  %8534 = vst [vmem:[#allocation46_spill] sm:$0xff] %v6147_v16  ;;  %v1200_v37 = vadd.f32 %v1199_v35, %v6145_v55  ;;  %v1311_v34 = vmul.f32 %v6145_v55, %v6145_v55  ;;  %v1242_v19 = vadd.f32 %v1241_v44, %v6147_v16  ;;  %v6155_v11 = vpop.f32.mrb[46].mxu0  ;;  %v6157_v9 = vpop.f32.mrb[62].mxu1 }
 0x3bf   :  { %v1313_v46 = vmul.f32 %v6147_v16, %v6147_v16  ;;  %8535 = vst [vmem:[#allocation47_spill] sm:$0xff] %v6157_v9  ;;  %v1331_v47 = vadd.f32 %v1330_v56, %v1310_v6  ;;  %v1373_v36 = vadd.f32 %v1372_v53, %v1312_v50  ;;  %v1180_v24 = vadd.f32 %v1179_v52, %v6155_v11  ;;  %v6162_v35 = vpop.f32.mrb[47].mxu0  ;;  %v6164_v62 = vpop.f32.mrb[63].mxu1 }
 0x3c0   :  { %v1314_v20 = vmul.f32 %v6155_v11, %v6155_v11  ;;  %8536 = vst [vmem:[#allocation48_spill] sm:$0xff] %v6162_v35  ;;  %8537 = vst [vmem:[#allocation49_spill] sm:$0xff] %v6164_v62  ;;  %v1352_v55 = vadd.f32 %v1351_v30, %v1311_v34  ;;  %v1222_v27 = vadd.f32 %v1221_v10, %v6157_v9 }
 0x3c1   :  { %v1394_v44 = vadd.f32 %v1393_v41, %v1313_v46  ;;  %v1316_v16 = vmul.f32 %v6157_v9, %v6157_v9  ;;  %v1181_v45 = vrot.slane %v1180_v24, 4  ;;  %v1201_v56 = vadd.f32 %v1200_v37, %v6162_v35 }
 0x3c2   :  { %v1332_v63 = vadd.f32 %v1331_v47, %v1314_v20  ;;  %v1315_v53 = vmul.f32 %v6162_v35, %v6162_v35  ;;  %v1223_v52 = vrot.slane %v1222_v27, 4  ;;  %v1243_v50 = vadd.f32 %v1242_v19, %v6164_v62 }
 0x3c3   :  { %v1374_v6 = vadd.f32 %v1373_v36, %v1316_v16  ;;  %v1317_v30 = vmul.f32 %v6164_v62, %v6164_v62  ;;  %v1182_v41 = vadd.f32 %v1181_v45, %v1180_v24  ;;  %v1202_v10 = vrot.slane %v1201_v56, 4 }
 0x3c4   :  { %v1333_v34 = vrot.slane %v1332_v63, 4  ;;  %v1353_v46 = vadd.f32 %v1352_v55, %v1315_v53  ;;  %v1224_v51 = vadd.f32 %v1223_v52, %v1222_v27  ;;  %v1244_v32 = vrot.slane %v1243_v50, 4 }
 0x3c5   :  { %v1375_v33 = vrot.slane %v1374_v6, 4  ;;  %v1395_v20 = vadd.f32 %v1394_v44, %v1317_v30  ;;  %v1183_v47 = vrot.slane %v1182_v41, 2  ;;  %v1203_v61 = vadd.f32 %v1202_v10, %v1201_v56 }
 0x3c6   :  { %v1334_v37 = vadd.f32 %v1333_v34, %v1332_v63  ;;  %v1354_v21 = vrot.slane %v1353_v46, 4  ;;  %v1225_v35 = vrot.slane %v1224_v51, 2  ;;  %v1245_v16 = vadd.f32 %v1244_v32, %v1243_v50 }
 0x3c7   :  { %v1376_v8 = vadd.f32 %v1375_v33, %v1374_v6  ;;  %v1396_v36 = vrot.slane %v1395_v20, 4  ;;  %v1184_v19 = vadd.f32 %v1183_v47, %v1182_v41  ;;  %v1204_v54 = vrot.slane %v1203_v61, 2 }
 0x3c8   :  { %v1335_v1 = vrot.slane %v1334_v37, 2  ;;  %v1355_v62 = vadd.f32 %v1354_v21, %v1353_v46  ;;  %v1226_v24 = vadd.f32 %v1225_v35, %v1224_v51  ;;  %v1246_v9 = vrot.slane %v1245_v16, 2 }
 0x3c9   :  { %v1377_v45 = vrot.slane %v1376_v8, 2  ;;  %v1397_v55 = vadd.f32 %v1396_v36, %v1395_v20  ;;  %v1185_v27 = vrot.slane %v1184_v19, 1  ;;  %v1205_v52 = vadd.f32 %v1204_v54, %v1203_v61 }
 0x3ca   :  { %v1336_v53 = vadd.f32 %v1335_v1, %v1334_v37  ;;  %v1356_v44 = vrot.slane %v1355_v62, 2  ;;  %v1227_v30 = vrot.slane %v1226_v24, 1  ;;  %v1247_v56 = vadd.f32 %v1246_v9, %v1245_v16 }
 0x3cb   :  { %v1378_v63 = vadd.f32 %v1377_v45, %v1376_v8  ;;  %v1398_v34 = vrot.slane %v1397_v55, 2  ;;  %v1186_v10 = vadd.f32 %v1185_v27, %v1184_v19  ;;  %v1206_v32 = vrot.slane %v1205_v52, 1 }
 0x3cc   :  { %v1337_v33 = vrot.slane %v1336_v53, 1  ;;  %v1357_v6 = vadd.f32 %v1356_v44, %v1355_v62  ;;  %v1228_v50 = vadd.f32 %v1227_v30, %v1226_v24  ;;  %v1248_v47 = vrot.slane %v1247_v56, 1 }
 0x3cd   :  { %v1379_v41 = vrot.slane %v1378_v63, 1  ;;  %v1399_v21 = vadd.f32 %v1398_v34, %v1397_v55  ;;  %v1250_v51 = vmul.f32 0.0078125, %v1186_v10  ;;  %v1207_v46 = vadd.f32 %v1206_v32, %v1205_v52 }
 0x3ce   :  { %v1338_v35 = vadd.f32 %v1337_v33, %v1336_v53  ;;  %v1358_v20 = vrot.slane %v1357_v6, 1  ;;  %v6175_v36 = vmul.f32 0.0078125, %v1228_v50  ;;  %v1249_v1 = vadd.f32 %v1248_v47, %v1247_v56 }
 0x3cf   :  { %v1380_v54 = vadd.f32 %v1379_v41, %v1378_v63  ;;  %v1400_v61 = vrot.slane %v1399_v21, 1  ;;  %v1406_v9 = vmul.f32 %v1250_v51, %v1250_v51  ;;  %v6177_v37 = vmul.f32 0.0078125, %v1207_v46 }
 0x3d0   :  { %v1402_v8 = vmul.f32 0.0078125, %v1338_v35  ;;  %v1408_v62 = vmul.f32 %v6175_v36, %v6175_v36  ;;  %v1359_v19 = vadd.f32 %v1358_v20, %v1357_v6  ;;  %v6183_v55 = vmul.f32 0.0078125, %v1249_v1 }
 0x3d1   :  { %v1404_v16 = vmul.f32 0.0078125, %v1380_v54  ;;  %v1407_v45 = vmul.f32 %v6177_v37, %v6177_v37  ;;  %v1401_v52 = vadd.f32 %v1400_v61, %v1399_v21  ;;  %v1422_v6 = vsub.f32 0.0, %v1250_v51 }
 0x3d2   :  { %v1410_v24 = vsub.f32 %v1402_v8, %v1406_v9  ;;  %v1403_v53 = vmul.f32 0.0078125, %v1359_v19  ;;  %v1409_v30 = vmul.f32 %v6183_v55, %v6183_v55  ;;  %v1424_v41 = vsub.f32 0.0, %v6175_v36 }
 0x3d3   :  { %v1412_v27 = vsub.f32 %v1404_v16, %v1408_v62  ;;  %v1405_v56 = vmul.f32 0.0078125, %v1401_v52  ;;  %v1423_v47 = vsub.f32 0.0, %v6177_v37 }
 0x3d4   :  { %v1414_v44 = vadd.f32 0.8, %v1410_v24  ;;  %v1411_v63 = vsub.f32 %v1403_v53, %v1407_v45 }
 0x3d5   :  { %v1413_v34 = vsub.f32 %v1405_v56, %v1409_v30  ;;  %v1416_v10 = vadd.f32 0.8, %v1412_v27 }
 0x3d6   :  { %5214 = vrsqrt.f32 %v1414_v44  ;;  %v1415_v33 = vadd.f32 0.8, %v1411_v63 }
 0x3d7   :  { %v1417_v32 = vadd.f32 0.8, %v1413_v34  ;;  %5216 = vrsqrt.f32 %v1416_v10 }
 0x3d8   :  { %5218 = vrsqrt.f32 %v1415_v33 }
 0x3d9   :  { %5220 = vrsqrt.f32 %v1417_v32 }
 0x3e0   :  { %v5215_v50 = vpop.eup %5214 }
 0x3e1   :  { %v1426_v35 = vmul.f32 %v5215_v50, %v1422_v6  ;;  %v1430_v46 = vmul.f32 %v5215_v50, %v5855_v12  ;;  %v1434_v20 = vmul.f32 %v5215_v50, %v5871_v38  ;;  %v1438_v54 = vmul.f32 %v5215_v50, %v5895_v42 }
 0x3e2   :  { %v1442_v1 = vmul.f32 %v5215_v50, %v5915_v57  ;;  %v1446_v51 = vmul.f32 %v5215_v50, %v5935_v40  ;;  %v1450_v61 = vmul.f32 %v5215_v50, %v5955_v58  ;;  %v1454_v36 = vmul.f32 %v5215_v50, %v5975_v14 }
 0x3e3   :  { %v1458_v8 = vmul.f32 %v5215_v50, %v5995_v48  ;;  %v1462_v9 = vmul.f32 %v5215_v50, %v6015_v3  ;;  %v1466_v16 = vmul.f32 %v5215_v50, %v6035_v29  ;;  %v1470_v12 = vmul.f32 %v5215_v50, %v6055_v59 }
 0x3e4   :  { %v1474_v38 = vmul.f32 %v5215_v50, %v6075_v22  ;;  %v1478_v42 = vmul.f32 %v5215_v50, %v6095_v2  ;;  %v1482_v57 = vmul.f32 %v5215_v50, %v6115_v25  ;;  %v1486_v40 = vmul.f32 %v5215_v50, %v6135_v5  ;;  %v6206_v22 = vpop.eup %5216 }
 0x3e5   :  { %v1490_v58 = vmul.f32 %v5215_v50, %v6155_v11  ;;  %v1494_v62 = vadd.f32 %v1430_v46, %v1426_v35  ;;  %v1498_v14 = vadd.f32 %v1434_v20, %v1426_v35  ;;  %v1502_v19 = vadd.f32 %v1438_v54, %v1426_v35  ;;  %v6208_v5 = vpop.eup %5218 }
 0x3e6   :  { %v1506_v48 = vadd.f32 %v1442_v1, %v1426_v35  ;;  %v1510_v24 = vadd.f32 %v1446_v51, %v1426_v35  ;;  %v1514_v3 = vadd.f32 %v1450_v61, %v1426_v35  ;;  %v1518_v45 = vadd.f32 %v1454_v36, %v1426_v35  ;;  %v6210_v30 = vpop.eup %5220 }
 0x3e7   :  { %v1522_v29 = vadd.f32 %v1458_v8, %v1426_v35  ;;  %v1526_v27 = vadd.f32 %v1462_v9, %v1426_v35  ;;  %v1530_v59 = vadd.f32 %v1466_v16, %v1426_v35  ;;  %v1534_v53 = vadd.f32 %v1470_v12, %v1426_v35 }
 0x3e8   :  { %v1538_v2 = vadd.f32 %v1474_v38, %v1426_v35  ;;  %v1542_v52 = vadd.f32 %v1478_v42, %v1426_v35  ;;  %v1546_v25 = vadd.f32 %v1482_v57, %v1426_v35  ;;  %v1550_v44 = vadd.f32 %v1486_v40, %v1426_v35 }
 0x3e9   :  { %v1554_v11 = vadd.f32 %v1490_v58, %v1426_v35  ;;  %vm1558_vm0 = vcmp.gt.f32.partialorder %v1494_v62, 0.0  ;;  %vm1562_vm1 = vcmp.gt.f32.partialorder %v1498_v14, 0.0  ;;  %vm1566_vm2 = vcmp.gt.f32.partialorder %v1502_v19, 0.0 }
 0x3ea   :  { %vm1570_vm3 = vcmp.gt.f32.partialorder %v1506_v48, 0.0  ;;  %vm1574_vm4 = vcmp.gt.f32.partialorder %v1510_v24, 0.0  ;;  %vm1578_vm5 = vcmp.gt.f32.partialorder %v1514_v3, 0.0  ;;  %vm1582_vm6 = vcmp.gt.f32.partialorder %v1518_v45, 0.0 }
 0x3eb   :  { %vm1586_vm7 = vcmp.gt.f32.partialorder %v1522_v29, 0.0  ;;  %vm1590_vm8 = vcmp.gt.f32.partialorder %v1526_v27, 0.0  ;;  %vm1594_vm9 = vcmp.gt.f32.partialorder %v1530_v59, 0.0  ;;  %vm1598_vm10 = vcmp.gt.f32.partialorder %v1534_v53, 0.0 }
 0x3ec   :  { %vm1602_vm11 = vcmp.gt.f32.partialorder %v1538_v2, 0.0  ;;  %vm1606_vm12 = vcmp.gt.f32.partialorder %v1542_v52, 0.0  ;;  %vm1610_vm13 = vcmp.gt.f32.partialorder %v1546_v25, 0.0  ;;  %vm1614_vm14 = vcmp.gt.f32.partialorder %v1550_v44, 0.0 }
 0x3ed   :  { %vm1618_vm15 = vcmp.gt.f32.partialorder %v1554_v11, 0.0  ;;  %v1622_v63 = vmul.f32 0.2, %v1494_v62  ;;  %v1626_v56 = vmul.f32 0.2, %v1498_v14  ;;  %v1428_v34 = vmul.f32 %v6206_v22, %v1424_v41 }
 0x3ee   :  { %v1630_v10 = vmul.f32 0.2, %v1502_v19  ;;  %v1634_v33 = vmul.f32 0.2, %v1506_v48  ;;  %v1638_v32 = vmul.f32 0.2, %v1510_v24  ;;  %v1432_v6 = vmul.f32 %v6206_v22, %v5857_v60 }
 0x3ef   :  { %v1642_v50 = vmul.f32 0.2, %v1514_v3  ;;  %v1646_v35 = vmul.f32 0.2, %v1518_v45  ;;  %v1650_v46 = vmul.f32 0.2, %v1522_v29  ;;  %v6216_v20 = vsel %vm1558_vm0, %v1494_v62, %v1622_v63 }
 0x3f0   :  { %v1654_v54 = vmul.f32 0.2, %v1526_v27  ;;  %v1658_v1 = vmul.f32 0.2, %v1530_v59  ;;  %v1662_v51 = vmul.f32 0.2, %v1534_v53  ;;  %v6219_v61 = vsel %vm1562_vm1, %v1498_v14, %v1626_v56 }
 0x3f1   :  { %v1666_v36 = vmul.f32 0.2, %v1538_v2  ;;  %v1670_v41 = vmul.f32 0.2, %v1542_v52  ;;  %v1674_v8 = vmul.f32 0.2, %v1546_v25  ;;  %v6222_v9 = vsel %vm1566_vm2, %v1502_v19, %v1630_v10 }
 0x3f2   :  { %v1678_v16 = vmul.f32 0.2, %v1550_v44  ;;  %v1682_v60 = vmul.f32 0.2, %v1554_v11  ;;  %v6225_v12 = vsel %vm1570_vm3, %v1506_v48, %v1634_v33  ;;  %v6228_v38 = vsel %vm1574_vm4, %v1510_v24, %v1638_v32 }
 0x3f3   :  { %v6231_v42 = vsel %vm1578_vm5, %v1514_v3, %v1642_v50  ;;  %v6234_v57 = vsel %vm1582_vm6, %v1518_v45, %v1646_v35  ;;  %v6237_v40 = vsel %vm1586_vm7, %v1522_v29, %v1650_v46  ;;  %v6240_v58 = vsel %vm1590_vm8, %v1526_v27, %v1654_v54 }
 0x3f4   :  { %v6243_v62 = vsel %vm1594_vm9, %v1530_v59, %v1658_v1  ;;  %v6246_v14 = vsel %vm1598_vm10, %v1534_v53, %v1662_v51  ;;  %v6249_v19 = vsel %vm1602_vm11, %v1538_v2, %v1666_v36  ;;  %v6252_v48 = vsel %vm1606_vm12, %v1542_v52, %v1670_v41 }
 0x3f5   :  { %v6255_v24 = vsel %vm1610_vm13, %v1546_v25, %v1674_v8  ;;  %v6258_v3 = vsel %vm1614_vm14, %v1550_v44, %v1678_v16  ;;  %v6261_v45 = vsel %vm1618_vm15, %v1554_v11, %v1682_v60  ;;  %v1436_v29 = vmul.f32 %v6206_v22, %v5873_v0  ;;  %v8541_v44 = vld [vmem:[#allocation47_spill] sm:$0xff] }
 0x3f6   :  { %8538 = vst [vmem:[#allocation50_spill] sm:$0xff] %v6255_v24  ;;  %8539 = vst [vmem:[#allocation51_spill] sm:$0xff] %v6258_v3  ;;  %v1440_v27 = vmul.f32 %v6206_v22, %v5897_v4  ;;  %v1444_v59 = vmul.f32 %v6206_v22, %v5917_v7  ;;  %v1448_v53 = vmul.f32 %v6206_v22, %v5937_v43 }
 0x3f7   :  { %8540 = vst [vmem:[#allocation52_spill] sm:$0xff] %v6261_v45  ;;  %v1452_v2 = vmul.f32 %v6206_v22, %v5957_v13  ;;  %v1456_v52 = vmul.f32 %v6206_v22, %v5977_v15  ;;  %v1460_v25 = vmul.f32 %v6206_v22, %v5997_v23  ;;  %v1464_v0 = vmul.f32 %v6206_v22, %v6017_v17 }
 0x3f8   :  { %v1468_v4 = vmul.f32 %v6206_v22, %v6037_v39  ;;  %v1472_v7 = vmul.f32 %v6206_v22, %v6057_v26  ;;  %v1476_v43 = vmul.f32 %v6206_v22, %v6077_v28  ;;  %v1480_v13 = vmul.f32 %v6206_v22, %v6097_v18 }
 0x3f9   :  { %v1484_v15 = vmul.f32 %v6206_v22, %v6117_v49  ;;  %v1488_v23 = vmul.f32 %v6206_v22, %v6137_v31  ;;  %v1492_v17 = vmul.f32 %v6206_v22, %v8541_v44  ;;  %v1496_v11 = vadd.f32 %v1432_v6, %v1428_v34 }
 0x3fa   :  { %v1500_v39 = vadd.f32 %v1436_v29, %v1428_v34  ;;  %v1504_v63 = vadd.f32 %v1440_v27, %v1428_v34  ;;  %v1508_v56 = vadd.f32 %v1444_v59, %v1428_v34  ;;  %v1512_v26 = vadd.f32 %v1448_v53, %v1428_v34 }
 0x3fb   :  { %v1516_v10 = vadd.f32 %v1452_v2, %v1428_v34  ;;  %v1520_v33 = vadd.f32 %v1456_v52, %v1428_v34  ;;  %v1524_v28 = vadd.f32 %v1460_v25, %v1428_v34  ;;  %v1528_v32 = vadd.f32 %v1464_v0, %v1428_v34 }
 0x3fc   :  { %v1532_v50 = vadd.f32 %v1468_v4, %v1428_v34  ;;  %v1536_v18 = vadd.f32 %v1472_v7, %v1428_v34  ;;  %v1540_v35 = vadd.f32 %v1476_v43, %v1428_v34  ;;  %v1544_v46 = vadd.f32 %v1480_v13, %v1428_v34 }
 0x3fd   :  { %v1548_v49 = vadd.f32 %v1484_v15, %v1428_v34  ;;  %v1552_v54 = vadd.f32 %v1488_v23, %v1428_v34  ;;  %v1556_v1 = vadd.f32 %v1492_v17, %v1428_v34  ;;  %vm1560_vm0 = vcmp.gt.f32.partialorder %v1496_v11, 0.0 }
 0x3fe   :  { %vm1564_vm1 = vcmp.gt.f32.partialorder %v1500_v39, 0.0  ;;  %vm1568_vm2 = vcmp.gt.f32.partialorder %v1504_v63, 0.0  ;;  %vm1572_vm3 = vcmp.gt.f32.partialorder %v1508_v56, 0.0  ;;  %vm1576_vm4 = vcmp.gt.f32.partialorder %v1512_v26, 0.0 }
 0x3ff   :  { %vm1580_vm5 = vcmp.gt.f32.partialorder %v1516_v10, 0.0  ;;  %vm1584_vm6 = vcmp.gt.f32.partialorder %v1520_v33, 0.0  ;;  %vm1588_vm7 = vcmp.gt.f32.partialorder %v1524_v28, 0.0  ;;  %vm1592_vm8 = vcmp.gt.f32.partialorder %v1528_v32, 0.0 }
 0x400   :  { %vm1596_vm9 = vcmp.gt.f32.partialorder %v1532_v50, 0.0  ;;  %vm1600_vm10 = vcmp.gt.f32.partialorder %v1536_v18, 0.0  ;;  %vm1604_vm11 = vcmp.gt.f32.partialorder %v1540_v35, 0.0  ;;  %vm1608_vm12 = vcmp.gt.f32.partialorder %v1544_v46, 0.0 }
 0x401   :  { %vm1612_vm13 = vcmp.gt.f32.partialorder %v1548_v49, 0.0  ;;  %vm1616_vm14 = vcmp.gt.f32.partialorder %v1552_v54, 0.0  ;;  %vm1620_vm15 = vcmp.gt.f32.partialorder %v1556_v1, 0.0  ;;  %v1624_v31 = vmul.f32 0.2, %v1496_v11 }
 0x402   :  { %v1628_v22 = vmul.f32 0.2, %v1500_v39  ;;  %v1632_v6 = vmul.f32 0.2, %v1504_v63  ;;  %v1636_v34 = vmul.f32 0.2, %v1508_v56  ;;  %v1427_v36 = vmul.f32 %v6208_v5, %v1423_v47 }
 0x403   :  { %v1640_v51 = vmul.f32 0.2, %v1512_v26  ;;  %v1644_v41 = vmul.f32 0.2, %v1516_v10  ;;  %v1648_v8 = vmul.f32 0.2, %v1520_v33  ;;  %v6297_v60 = vsel %vm1560_vm0, %v1496_v11, %v1624_v31 }
 0x404   :  { %v1652_v16 = vmul.f32 0.2, %v1524_v28  ;;  %8542 = vst [vmem:[#allocation47_spill] sm:$0xff] %v6297_v60  ;;  %v1656_v29 = vmul.f32 0.2, %v1528_v32  ;;  %v6300_v53 = vsel %vm1564_vm1, %v1500_v39, %v1628_v22  ;;  %v6303_v0 = vsel %vm1568_vm2, %v1504_v63, %v1632_v6 }
 0x405   :  { %v1660_v27 = vmul.f32 0.2, %v1532_v50  ;;  %v1664_v59 = vmul.f32 0.2, %v1536_v18  ;;  %8543 = vst [vmem:[#allocation53_spill] sm:$0xff] %v6300_v53  ;;  %8544 = vst [vmem:[#allocation54_spill] sm:$0xff] %v6303_v0  ;;  %v6306_v4 = vsel %vm1572_vm3, %v1508_v56, %v1636_v34  ;;  %v6309_v7 = vsel %vm1576_vm4, %v1512_v26, %v1640_v51 }
 0x406   :  { %v1668_v2 = vmul.f32 0.2, %v1540_v35  ;;  %v1672_v52 = vmul.f32 0.2, %v1544_v46  ;;  %v1676_v25 = vmul.f32 0.2, %v1548_v49  ;;  %v6312_v43 = vsel %vm1580_vm5, %v1516_v10, %v1644_v41 }
 0x407   :  { %v1680_v37 = vmul.f32 0.2, %v1552_v54  ;;  %v1684_v47 = vmul.f32 0.2, %v1556_v1  ;;  %8545 = vst [vmem:[#allocation55_spill] sm:$0xff] %v6306_v4  ;;  %8546 = vst [vmem:[#allocation56_spill] sm:$0xff] %v6309_v7  ;;  %v6315_v13 = vsel %vm1584_vm6, %v1520_v33, %v1648_v8  ;;  %v6318_v15 = vsel %vm1588_vm7, %v1524_v28, %v1652_v16 }
 0x408   :  { %8547 = vst [vmem:[#allocation57_spill] sm:$0xff] %v6312_v43  ;;  %8548 = vst [vmem:[#allocation58_spill] sm:$0xff] %v6315_v13  ;;  %v6321_v23 = vsel %vm1592_vm8, %v1528_v32, %v1656_v29  ;;  %v6324_v44 = vsel %vm1596_vm9, %v1532_v50, %v1660_v27  ;;  %v6327_v17 = vsel %vm1600_vm10, %v1536_v18, %v1664_v59  ;;  %v8558_v10 = vld [vmem:[#allocation17_spill] sm:$0xff]  ;;  %v8559_v28 = vld [vmem:[#allocation19_spill] sm:$0xff] }
 0x409   :  { %8549 = vst [vmem:[#allocation59_spill] sm:$0xff] %v6318_v15  ;;  %8550 = vst [vmem:[#allocation60_spill] sm:$0xff] %v6321_v23  ;;  %v6330_v11 = vsel %vm1604_vm11, %v1540_v35, %v1668_v2  ;;  %v6333_v39 = vsel %vm1608_vm12, %v1544_v46, %v1672_v52  ;;  %v6336_v63 = vsel %vm1612_vm13, %v1548_v49, %v1676_v25  ;;  %v8560_v50 = vld [vmem:[#allocation21_spill] sm:$0xff]  ;;  %v8561_v35 = vld [vmem:[#allocation23_spill] sm:$0xff] }
 0x40a   :  { %8551 = vst [vmem:[#allocation61_spill] sm:$0xff] %v6324_v44  ;;  %8552 = vst [vmem:[#allocation62_spill] sm:$0xff] %v6327_v17  ;;  %v6339_v56 = vsel %vm1616_vm14, %v1552_v54, %v1680_v37  ;;  %v6342_v26 = vsel %vm1620_vm15, %v1556_v1, %v1684_v47  ;;  %v1431_v33 = vmul.f32 %v6208_v5, %v8558_v10  ;;  %v8562_v49 = vld [vmem:[#allocation25_spill] sm:$0xff]  ;;  %v8563_v54 = vld [vmem:[#allocation27_spill] sm:$0xff] }
 0x40b   :  { %8553 = vst [vmem:[#allocation63_spill] sm:$0xff] %v6330_v11  ;;  %8554 = vst [vmem:[#allocation64_spill] sm:$0xff] %v6333_v39  ;;  %v1435_v32 = vmul.f32 %v6208_v5, %v8559_v28  ;;  %v1439_v18 = vmul.f32 %v6208_v5, %v8560_v50  ;;  %v1443_v46 = vmul.f32 %v6208_v5, %v8561_v35  ;;  %v8564_v1 = vld [vmem:[#allocation29_spill] sm:$0xff]  ;;  %v8565_v34 = vld [vmem:[#allocation31_spill] sm:$0xff] }
 0x40c   :  { %8555 = vst [vmem:[#allocation65_spill] sm:$0xff] %v6336_v63  ;;  %8556 = vst [vmem:[#allocation66_spill] sm:$0xff] %v6339_v56  ;;  %v1447_v31 = vmul.f32 %v6208_v5, %v8562_v49  ;;  %v1451_v22 = vmul.f32 %v6208_v5, %v8563_v54  ;;  %v1455_v6 = vmul.f32 %v6208_v5, %v8564_v1  ;;  %v8566_v41 = vld [vmem:[#allocation33_spill] sm:$0xff]  ;;  %v8567_v16 = vld [vmem:[#allocation35_spill] sm:$0xff] }
 0x40d   :  { %8557 = vst [vmem:[#allocation67_spill] sm:$0xff] %v6342_v26  ;;  %v1459_v51 = vmul.f32 %v6208_v5, %v8565_v34  ;;  %v1463_v8 = vmul.f32 %v6208_v5, %v8566_v41  ;;  %v1467_v29 = vmul.f32 %v6208_v5, %v8567_v16  ;;  %v8568_v27 = vld [vmem:[#allocation37_spill] sm:$0xff]  ;;  %v8569_v2 = vld [vmem:[#allocation39_spill] sm:$0xff]  ;;  %v8573_v35 = vld [vmem:[#allocation48_spill] sm:$0xff]  ;;  %v1495_v54 = vadd.f32 %v1431_v33, %v1427_v36 }
 0x40e   :  { %v1471_v59 = vmul.f32 %v6208_v5, %v8568_v27  ;;  %v1475_v52 = vmul.f32 %v6208_v5, %v8569_v2  ;;  %v8570_v25 = vld [vmem:[#allocation41_spill] sm:$0xff]  ;;  %v8571_v47 = vld [vmem:[#allocation43_spill] sm:$0xff]  ;;  %v1491_v49 = vmul.f32 %v6208_v5, %v8573_v35  ;;  %v1499_v1 = vadd.f32 %v1435_v32, %v1427_v36  ;;  %v8590_v44 = vld [vmem:[#allocation44_spill] sm:$0xff] }
 0x40f   :  { %v1479_v37 = vmul.f32 %v6208_v5, %v8570_v25  ;;  %v1483_v10 = vmul.f32 %v6208_v5, %v8571_v47  ;;  %v8572_v28 = vld [vmem:[#allocation45_spill] sm:$0xff]  ;;  %v1503_v34 = vadd.f32 %v1439_v18, %v1427_v36  ;;  %v1507_v41 = vadd.f32 %v1443_v46, %v1427_v36  ;;  %v8591_v23 = vld [vmem:[#allocation46_spill] sm:$0xff] }
 0x410   :  { %v1487_v50 = vmul.f32 %v6208_v5, %v8572_v28  ;;  %v1511_v16 = vadd.f32 %v1447_v31, %v1427_v36  ;;  %v1515_v27 = vadd.f32 %v1451_v22, %v1427_v36  ;;  %v1519_v21 = vadd.f32 %v1455_v6, %v1427_v36  ;;  %v8592_v15 = vld [vmem:[#allocation49_spill] sm:$0xff] }
 0x411   :  { %v1523_v2 = vadd.f32 %v1459_v51, %v1427_v36  ;;  %v1527_v26 = vadd.f32 %v1463_v8, %v1427_v36  ;;  %v1531_v56 = vadd.f32 %v1467_v29, %v1427_v36  ;;  %v1535_v25 = vadd.f32 %v1471_v59, %v1427_v36 }
 0x412   :  { %v1539_v63 = vadd.f32 %v1475_v52, %v1427_v36  ;;  %v1543_v39 = vadd.f32 %v1479_v37, %v1427_v36  ;;  %v1547_v47 = vadd.f32 %v1483_v10, %v1427_v36  ;;  %v1551_v11 = vadd.f32 %v1487_v50, %v1427_v36 }
 0x413   :  { %v1555_v17 = vadd.f32 %v1491_v49, %v1427_v36  ;;  %vm1559_vm0 = vcmp.gt.f32.partialorder %v1495_v54, 0.0  ;;  %vm1563_vm1 = vcmp.gt.f32.partialorder %v1499_v1, 0.0  ;;  %vm1567_vm2 = vcmp.gt.f32.partialorder %v1503_v34, 0.0 }
 0x414   :  { %vm1571_vm3 = vcmp.gt.f32.partialorder %v1507_v41, 0.0  ;;  %vm1575_vm4 = vcmp.gt.f32.partialorder %v1511_v16, 0.0  ;;  %vm1579_vm5 = vcmp.gt.f32.partialorder %v1515_v27, 0.0  ;;  %vm1583_vm6 = vcmp.gt.f32.partialorder %v1519_v21, 0.0 }
 0x415   :  { %vm1587_vm7 = vcmp.gt.f32.partialorder %v1523_v2, 0.0  ;;  %vm1591_vm8 = vcmp.gt.f32.partialorder %v1527_v26, 0.0  ;;  %vm1595_vm9 = vcmp.gt.f32.partialorder %v1531_v56, 0.0  ;;  %vm1599_vm10 = vcmp.gt.f32.partialorder %v1535_v25, 0.0 }
 0x416   :  { %vm1603_vm11 = vcmp.gt.f32.partialorder %v1539_v63, 0.0  ;;  %vm1607_vm12 = vcmp.gt.f32.partialorder %v1543_v39, 0.0  ;;  %vm1611_vm13 = vcmp.gt.f32.partialorder %v1547_v47, 0.0  ;;  %vm1615_vm14 = vcmp.gt.f32.partialorder %v1551_v11, 0.0 }
 0x417   :  { %vm1619_vm15 = vcmp.gt.f32.partialorder %v1555_v17, 0.0  ;;  %v1623_v5 = vmul.f32 0.2, %v1495_v54  ;;  %v1627_v33 = vmul.f32 0.2, %v1499_v1  ;;  %v8574_v18 = vsub.f32 0.0, %v6183_v55 }
 0x418   :  { %v1631_v32 = vmul.f32 0.2, %v1503_v34  ;;  %v1635_v36 = vmul.f32 0.2, %v1507_v41  ;;  %v1639_v31 = vmul.f32 0.2, %v1511_v16 }
 0x419   :  { %v1429_v46 = vmul.f32 %v6210_v30, %v8574_v18  ;;  %v1643_v22 = vmul.f32 0.2, %v1515_v27  ;;  %v1647_v6 = vmul.f32 0.2, %v1519_v21  ;;  %v6380_v51 = vsel %vm1559_vm0, %v1495_v54, %v1623_v5 }
 0x41a   :  { %v1651_v8 = vmul.f32 0.2, %v1523_v2  ;;  %v1655_v29 = vmul.f32 0.2, %v1527_v26  ;;  %v1659_v59 = vmul.f32 0.2, %v1531_v56  ;;  %v6383_v52 = vsel %vm1563_vm1, %v1499_v1, %v1627_v33 }
 0x41b   :  { %v1663_v37 = vmul.f32 0.2, %v1535_v25  ;;  %v1667_v10 = vmul.f32 0.2, %v1539_v63  ;;  %v1671_v28 = vmul.f32 0.2, %v1543_v39  ;;  %v6386_v50 = vsel %vm1567_vm2, %v1503_v34, %v1631_v32 }
 0x41c   :  { %v1675_v55 = vmul.f32 0.2, %v1547_v47  ;;  %v1679_v35 = vmul.f32 0.2, %v1551_v11  ;;  %v1683_v49 = vmul.f32 0.2, %v1555_v17  ;;  %v6389_v18 = vsel %vm1571_vm3, %v1507_v41, %v1635_v36 }
 0x41d   :  { %v6392_v54 = vsel %vm1575_vm4, %v1511_v16, %v1639_v31  ;;  %v6395_v5 = vsel %vm1579_vm5, %v1515_v27, %v1643_v22  ;;  %v6398_v1 = vsel %vm1583_vm6, %v1519_v21, %v1647_v6  ;;  %v6401_v33 = vsel %vm1587_vm7, %v1523_v2, %v1651_v8 }
 0x41e   :  { %v6404_v34 = vsel %vm1591_vm8, %v1527_v26, %v1655_v29  ;;  %v6407_v32 = vsel %vm1595_vm9, %v1531_v56, %v1659_v59  ;;  %v6410_v41 = vsel %vm1599_vm10, %v1535_v25, %v1663_v37  ;;  %v6413_v16 = vsel %vm1603_vm11, %v1539_v63, %v1667_v10  ;;  %v8577_v56 = vld [vmem:[#allocation18_spill] sm:$0xff]  ;;  %v8578_v25 = vld [vmem:[#allocation20_spill] sm:$0xff] }
 0x41f   :  { %v6416_v27 = vsel %vm1607_vm12, %v1543_v39, %v1671_v28  ;;  %v6419_v21 = vsel %vm1611_vm13, %v1547_v47, %v1675_v55  ;;  %v6422_v2 = vsel %vm1615_vm14, %v1551_v11, %v1679_v35  ;;  %v6425_v26 = vsel %vm1619_vm15, %v1555_v17, %v1683_v49  ;;  %v8579_v63 = vld [vmem:[#allocation22_spill] sm:$0xff]  ;;  %v8580_v39 = vld [vmem:[#allocation24_spill] sm:$0xff] }
 0x420   :  { %8575 = vst [vmem:[#allocation17_spill] sm:$0xff] %v6422_v2  ;;  %8576 = vst [vmem:[#allocation19_spill] sm:$0xff] %v6425_v26  ;;  %v1433_v36 = vmul.f32 %v6210_v30, %v8577_v56  ;;  %v1437_v31 = vmul.f32 %v6210_v30, %v8578_v25  ;;  %v1441_v22 = vmul.f32 %v6210_v30, %v8579_v63  ;;  %v8581_v47 = vld [vmem:[#allocation26_spill] sm:$0xff]  ;;  %v8582_v11 = vld [vmem:[#allocation28_spill] sm:$0xff] }
 0x421   :  { %v1445_v6 = vmul.f32 %v6210_v30, %v8580_v39  ;;  %v1449_v8 = vmul.f32 %v6210_v30, %v8581_v47  ;;  %v1453_v29 = vmul.f32 %v6210_v30, %v8582_v11  ;;  %v8583_v17 = vld [vmem:[#allocation30_spill] sm:$0xff]  ;;  %v8584_v37 = vld [vmem:[#allocation32_spill] sm:$0xff] }
 0x422   :  { %v1457_v59 = vmul.f32 %v6210_v30, %v8583_v17  ;;  %v1461_v10 = vmul.f32 %v6210_v30, %v8584_v37  ;;  %v8585_v28 = vld [vmem:[#allocation34_spill] sm:$0xff]  ;;  %v8586_v35 = vld [vmem:[#allocation36_spill] sm:$0xff]  ;;  %v1485_v17 = vmul.f32 %v6210_v30, %v8590_v44  ;;  %v1489_v37 = vmul.f32 %v6210_v30, %v8591_v23 }
 0x423   :  { %v1465_v55 = vmul.f32 %v6210_v30, %v8585_v28  ;;  %v1469_v49 = vmul.f32 %v6210_v30, %v8586_v35  ;;  %v8587_v56 = vld [vmem:[#allocation38_spill] sm:$0xff]  ;;  %v8588_v63 = vld [vmem:[#allocation40_spill] sm:$0xff]  ;;  %v1493_v28 = vmul.f32 %v6210_v30, %v8592_v15  ;;  %v1497_v13 = vadd.f32 %v1433_v36, %v1429_v46 }
 0x424   :  { %v1473_v25 = vmul.f32 %v6210_v30, %v8587_v56  ;;  %v1477_v39 = vmul.f32 %v6210_v30, %v8588_v63  ;;  %v8589_v47 = vld [vmem:[#allocation42_spill] sm:$0xff]  ;;  %v1501_v35 = vadd.f32 %v1437_v31, %v1429_v46  ;;  %v1505_v43 = vadd.f32 %v1441_v22, %v1429_v46 }
 0x425   :  { %v1481_v11 = vmul.f32 %v6210_v30, %v8589_v47  ;;  %v1509_v7 = vadd.f32 %v1445_v6, %v1429_v46  ;;  %v1513_v56 = vadd.f32 %v1449_v8, %v1429_v46  ;;  %v1517_v4 = vadd.f32 %v1453_v29, %v1429_v46 }
 0x426   :  { %v1521_v0 = vadd.f32 %v1457_v59, %v1429_v46  ;;  %v1525_v63 = vadd.f32 %v1461_v10, %v1429_v46  ;;  %v1529_v53 = vadd.f32 %v1465_v55, %v1429_v46  ;;  %v1533_v60 = vadd.f32 %v1469_v49, %v1429_v46 }
 0x427   :  { %v1537_v47 = vadd.f32 %v1473_v25, %v1429_v46  ;;  %v1541_v45 = vadd.f32 %v1477_v39, %v1429_v46  ;;  %v1545_v3 = vadd.f32 %v1481_v11, %v1429_v46  ;;  %v1549_v44 = vadd.f32 %v1485_v17, %v1429_v46 }
 0x428   :  { %v1553_v26 = vadd.f32 %v1489_v37, %v1429_v46  ;;  %v1557_v2 = vadd.f32 %v1493_v28, %v1429_v46  ;;  %vm1561_vm0 = vcmp.gt.f32.partialorder %v1497_v13, 0.0  ;;  %vm1565_vm1 = vcmp.gt.f32.partialorder %v1501_v35, 0.0 }
 0x429   :  { %vm1569_vm2 = vcmp.gt.f32.partialorder %v1505_v43, 0.0  ;;  %vm1573_vm3 = vcmp.gt.f32.partialorder %v1509_v7, 0.0  ;;  %vm1577_vm4 = vcmp.gt.f32.partialorder %v1513_v56, 0.0  ;;  %vm1581_vm5 = vcmp.gt.f32.partialorder %v1517_v4, 0.0 }
 0x42a   :  { %vm1585_vm6 = vcmp.gt.f32.partialorder %v1521_v0, 0.0  ;;  %vm1589_vm7 = vcmp.gt.f32.partialorder %v1525_v63, 0.0  ;;  %vm1593_vm8 = vcmp.gt.f32.partialorder %v1529_v53, 0.0  ;;  %vm1597_vm9 = vcmp.gt.f32.partialorder %v1533_v60, 0.0 }
 0x42b   :  { %vm1601_vm10 = vcmp.gt.f32.partialorder %v1537_v47, 0.0  ;;  %vm1605_vm11 = vcmp.gt.f32.partialorder %v1541_v45, 0.0  ;;  %vm1609_vm12 = vcmp.gt.f32.partialorder %v1545_v3, 0.0  ;;  %vm1613_vm13 = vcmp.gt.f32.partialorder %v1549_v44, 0.0 }
 0x42c   :  { %vm1617_vm14 = vcmp.gt.f32.partialorder %v1553_v26, 0.0  ;;  %vm1621_vm15 = vcmp.gt.f32.partialorder %v1557_v2, 0.0  ;;  %v1625_v30 = vmul.f32 0.2, %v1497_v13  ;;  %v1629_v15 = vmul.f32 0.2, %v1501_v35 }
 0x42d   :  { %v1633_v23 = vmul.f32 0.2, %v1505_v43  ;;  %v1637_v46 = vmul.f32 0.2, %v1509_v7  ;;  %v1641_v36 = vmul.f32 0.2, %v1513_v56 }
 0x42e   :  { %v1645_v31 = vmul.f32 0.2, %v1517_v4  ;;  %v1649_v22 = vmul.f32 0.2, %v1521_v0  ;;  %v1653_v6 = vmul.f32 0.2, %v1525_v63  ;;  %v6460_v29 = vsel %vm1561_vm0, %v1497_v13, %v1625_v30 }
 0x42f   :  { %v1657_v8 = vmul.f32 0.2, %v1529_v53  ;;  %v1661_v59 = vmul.f32 0.2, %v1533_v60  ;;  %v1665_v10 = vmul.f32 0.2, %v1537_v47  ;;  %v6463_v49 = vsel %vm1565_vm1, %v1501_v35, %v1629_v15 }
 0x430   :  { %v1669_v55 = vmul.f32 0.2, %v1541_v45  ;;  %v1673_v25 = vmul.f32 0.2, %v1545_v3  ;;  %v1677_v39 = vmul.f32 0.2, %v1549_v44  ;;  %v6466_v17 = vsel %vm1569_vm2, %v1505_v43, %v1633_v23 }
 0x431   :  { %v1681_v11 = vmul.f32 0.2, %v1553_v26  ;;  %v1685_v37 = vmul.f32 0.2, %v1557_v2  ;;  %v6469_v28 = vsel %vm1573_vm3, %v1509_v7, %v1637_v46  ;;  %v6472_v24 = vsel %vm1577_vm4, %v1513_v56, %v1641_v36 }
 0x432   :  { %v6475_v13 = vsel %vm1581_vm5, %v1517_v4, %v1645_v31  ;;  %v6478_v30 = vsel %vm1585_vm6, %v1521_v0, %v1649_v22  ;;  %v6481_v35 = vsel %vm1589_vm7, %v1525_v63, %v1653_v6  ;;  %v6484_v15 = vsel %vm1593_vm8, %v1529_v53, %v1657_v8 }
 0x433   :  { %v6487_v43 = vsel %vm1597_vm9, %v1533_v60, %v1661_v59  ;;  %v6490_v7 = vsel %vm1601_vm10, %v1537_v47, %v1665_v10  ;;  %v6493_v56 = vsel %vm1605_vm11, %v1541_v45, %v1669_v55  ;;  %v6496_v4 = vsel %vm1609_vm12, %v1545_v3, %v1673_v25 }
 0x434   :  { %v6499_v0 = vsel %vm1613_vm13, %v1549_v44, %v1677_v39  ;;  %v6502_v63 = vsel %vm1617_vm14, %v1553_v26, %v1681_v11  ;;  %v6505_v53 = vsel %vm1621_vm15, %v1557_v2, %v1685_v37 }
 0x435   :  { %5294 = dma.done.wait [#allocation5 + $0x1], 32768 }
 0x436   :  { %5295 = vsyncadd [#allocation5 + $0x1], 4294934528  ;;  %v6509_v60 = vpack.c.bf16 %v6383_v52, %v6380_v51  ;;  %v1787_v3 = vld [vmem:[#allocation3 + $0x8] sm:$0xff]  ;;  %v1789_v45 = vld [vmem:[#allocation3 + $0x18] sm:$0xff] }
 0x437   :  { %v1786_v47 = vld [vmem:[#allocation3] sm:$0xff]  ;;  %2042 = vmatprep.subr.bf16.mxu0 %v1787_v3  ;;  %2268 = vmatprep.subr.bf16.mxu1 %v1789_v45  ;;  %v1788_v26 = vld [vmem:[#allocation3 + $0x10] sm:$0xff]  ;;  %v1795_v44 = vld [vmem:[#allocation3 + $0x48] sm:$0xff] }
 0x438   :  { %2074 = vmatprep.mubr.bf16.mxu0 %v6509_v60  ;;  %2300 = vmatprep.mubr.bf16.mxu1 %v6509_v60  ;;  %v1797_v23 = vld [vmem:[#allocation3 + $0x58] sm:$0xff]  ;;  %v1794_v2 = vld [vmem:[#allocation3 + $0x40] sm:$0xff]  ;;  %v1796_v46 = vld [vmem:[#allocation3 + $0x50] sm:$0xff] }
 0x439   :  { %2043 = vmatpush1.bf16.msra.mxu0 %v1786_v47  ;;  %2269 = vmatpush1.bf16.msra.mxu1 %v1788_v26  ;;  %v1803_v51 = vld [vmem:[#allocation3 + $0x88] sm:$0xff]  ;;  %v1805_v52 = vld [vmem:[#allocation3 + $0x98] sm:$0xff]  ;;  %v1802_v36 = vld [vmem:[#allocation3 + $0x80] sm:$0xff] }
 0x43a   :  { %2044 = vmatprep.subr.bf16.mxu0 %v1795_v44  ;;  %2270 = vmatprep.subr.bf16.mxu1 %v1797_v23  ;;  %v1804_v31 = vld [vmem:[#allocation3 + $0x90] sm:$0xff]  ;;  %v1811_v22 = vld [vmem:[#allocation3 + $0xc8] sm:$0xff]  ;;  %v1813_v6 = vld [vmem:[#allocation3 + $0xd8] sm:$0xff] }
 0x43b   :  { %v1810_v8 = vld [vmem:[#allocation3 + $0xc0] sm:$0xff]  ;;  %v1812_v59 = vld [vmem:[#allocation3 + $0xd0] sm:$0xff]  ;;  %v1819_v10 = vld [vmem:[#allocation3 + $0x108] sm:$0xff] }
 0x43c   :  { %v1821_v55 = vld [vmem:[#allocation3 + $0x118] sm:$0xff]  ;;  %v1818_v25 = vld [vmem:[#allocation3 + $0x100] sm:$0xff]  ;;  %v1820_v39 = vld [vmem:[#allocation3 + $0x110] sm:$0xff] }
 0x43d   :  { %2045 = vmatpush1.bf16.msra.mxu0 %v1794_v2  ;;  %2271 = vmatpush1.bf16.msra.mxu1 %v1796_v46  ;;  %v1827_v11 = vld [vmem:[#allocation3 + $0x148] sm:$0xff]  ;;  %v1829_v37 = vld [vmem:[#allocation3 + $0x158] sm:$0xff]  ;;  %v1826_v3 = vld [vmem:[#allocation3 + $0x140] sm:$0xff] }
 0x43e   :  { %2046 = vmatprep.subr.bf16.mxu0 %v1803_v51  ;;  %2272 = vmatprep.subr.bf16.mxu1 %v1805_v52  ;;  %v1828_v45 = vld [vmem:[#allocation3 + $0x150] sm:$0xff]  ;;  %v1835_v47 = vld [vmem:[#allocation3 + $0x188] sm:$0xff]  ;;  %v1837_v26 = vld [vmem:[#allocation3 + $0x198] sm:$0xff] }
 0x43f   :  { %v1834_v44 = vld [vmem:[#allocation3 + $0x180] sm:$0xff]  ;;  %v1836_v23 = vld [vmem:[#allocation3 + $0x190] sm:$0xff]  ;;  %v1843_v2 = vld [vmem:[#allocation3 + $0x1c8] sm:$0xff] }
 0x440   :  { %v1845_v46 = vld [vmem:[#allocation3 + $0x1d8] sm:$0xff]  ;;  %v1842_v51 = vld [vmem:[#allocation3 + $0x1c0] sm:$0xff]  ;;  %v1844_v52 = vld [vmem:[#allocation3 + $0x1d0] sm:$0xff] }
 0x441   :  { %2047 = vmatpush1.bf16.msra.mxu0 %v1802_v36  ;;  %2273 = vmatpush1.bf16.msra.mxu1 %v1804_v31  ;;  %v1851_v36 = vld [vmem:[#allocation3 + $0x208] sm:$0xff]  ;;  %v1853_v31 = vld [vmem:[#allocation3 + $0x218] sm:$0xff] }
 0x442   :  { %2048 = vmatprep.subr.bf16.mxu0 %v1811_v22  ;;  %2274 = vmatprep.subr.bf16.mxu1 %v1813_v6  ;;  %v1850_v22 = vld [vmem:[#allocation3 + $0x200] sm:$0xff]  ;;  %v1852_v6 = vld [vmem:[#allocation3 + $0x210] sm:$0xff] }
 0x445   :  { %2049 = vmatpush1.bf16.msra.mxu0 %v1810_v8  ;;  %2275 = vmatpush1.bf16.msra.mxu1 %v1812_v59  ;;  %v1859_v8 = vld [vmem:[#allocation3 + $0x248] sm:$0xff]  ;;  %v1861_v59 = vld [vmem:[#allocation3 + $0x258] sm:$0xff] }
 0x446   :  { %2050 = vmatprep.subr.bf16.mxu0 %v1819_v10  ;;  %2276 = vmatprep.subr.bf16.mxu1 %v1821_v55  ;;  %v1858_v10 = vld [vmem:[#allocation3 + $0x240] sm:$0xff]  ;;  %v1860_v55 = vld [vmem:[#allocation3 + $0x250] sm:$0xff] }
 0x449   :  { %2051 = vmatpush1.bf16.msra.mxu0 %v1818_v25  ;;  %2277 = vmatpush1.bf16.msra.mxu1 %v1820_v39  ;;  %v1867_v25 = vld [vmem:[#allocation3 + $0x288] sm:$0xff]  ;;  %v1869_v39 = vld [vmem:[#allocation3 + $0x298] sm:$0xff] }
 0x44a   :  { %2052 = vmatprep.subr.bf16.mxu0 %v1827_v11  ;;  %2278 = vmatprep.subr.bf16.mxu1 %v1829_v37  ;;  %v1866_v11 = vld [vmem:[#allocation3 + $0x280] sm:$0xff]  ;;  %v1868_v37 = vld [vmem:[#allocation3 + $0x290] sm:$0xff] }
 0x44d   :  { %2053 = vmatpush1.bf16.msra.mxu0 %v1826_v3  ;;  %2279 = vmatpush1.bf16.msra.mxu1 %v1828_v45  ;;  %v1875_v3 = vld [vmem:[#allocation3 + $0x2c8] sm:$0xff]  ;;  %v1877_v45 = vld [vmem:[#allocation3 + $0x2d8] sm:$0xff] }
 0x44e   :  { %2054 = vmatprep.subr.bf16.mxu0 %v1835_v47  ;;  %2280 = vmatprep.subr.bf16.mxu1 %v1837_v26  ;;  %v1874_v47 = vld [vmem:[#allocation3 + $0x2c0] sm:$0xff]  ;;  %v1876_v26 = vld [vmem:[#allocation3 + $0x2d0] sm:$0xff] }
 0x451   :  { %2055 = vmatpush1.bf16.msra.mxu0 %v1834_v44  ;;  %2281 = vmatpush1.bf16.msra.mxu1 %v1836_v23  ;;  %v1883_v44 = vld [vmem:[#allocation3 + $0x308] sm:$0xff]  ;;  %v1885_v23 = vld [vmem:[#allocation3 + $0x318] sm:$0xff] }
 0x452   :  { %2056 = vmatprep.subr.bf16.mxu0 %v1843_v2  ;;  %2282 = vmatprep.subr.bf16.mxu1 %v1845_v46  ;;  %v1882_v2 = vld [vmem:[#allocation3 + $0x300] sm:$0xff]  ;;  %v1884_v46 = vld [vmem:[#allocation3 + $0x310] sm:$0xff] }
 0x455   :  { %2057 = vmatpush1.bf16.msra.mxu0 %v1842_v51  ;;  %2283 = vmatpush1.bf16.msra.mxu1 %v1844_v52  ;;  %v1891_v51 = vld [vmem:[#allocation3 + $0x348] sm:$0xff]  ;;  %v1893_v52 = vld [vmem:[#allocation3 + $0x358] sm:$0xff] }
 0x456   :  { %2058 = vmatprep.subr.bf16.mxu0 %v1851_v36  ;;  %2284 = vmatprep.subr.bf16.mxu1 %v1853_v31  ;;  %v1890_v36 = vld [vmem:[#allocation3 + $0x340] sm:$0xff]  ;;  %v1892_v31 = vld [vmem:[#allocation3 + $0x350] sm:$0xff] }
 0x459   :  { %2059 = vmatpush1.bf16.msra.mxu0 %v1850_v22  ;;  %2285 = vmatpush1.bf16.msra.mxu1 %v1852_v6  ;;  %v1899_v22 = vld [vmem:[#allocation3 + $0x388] sm:$0xff]  ;;  %v1901_v6 = vld [vmem:[#allocation3 + $0x398] sm:$0xff] }
 0x45a   :  { %2060 = vmatprep.subr.bf16.mxu0 %v1859_v8  ;;  %2286 = vmatprep.subr.bf16.mxu1 %v1861_v59  ;;  %v1898_v8 = vld [vmem:[#allocation3 + $0x380] sm:$0xff]  ;;  %v1900_v59 = vld [vmem:[#allocation3 + $0x390] sm:$0xff] }
 0x45d   :  { %2061 = vmatpush1.bf16.msra.mxu0 %v1858_v10  ;;  %2287 = vmatpush1.bf16.msra.mxu1 %v1860_v55  ;;  %v1907_v10 = vld [vmem:[#allocation3 + $0x3c8] sm:$0xff]  ;;  %v1909_v55 = vld [vmem:[#allocation3 + $0x3d8] sm:$0xff] }
 0x45e   :  { %2062 = vmatprep.subr.bf16.mxu0 %v1867_v25  ;;  %2288 = vmatprep.subr.bf16.mxu1 %v1869_v39  ;;  %v1906_v25 = vld [vmem:[#allocation3 + $0x3c0] sm:$0xff]  ;;  %v1908_v39 = vld [vmem:[#allocation3 + $0x3d0] sm:$0xff] }
 0x461   :  { %2063 = vmatpush1.bf16.msra.mxu0 %v1866_v11  ;;  %2289 = vmatpush1.bf16.msra.mxu1 %v1868_v37  ;;  %v1915_v11 = vld [vmem:[#allocation3 + $0x408] sm:$0xff]  ;;  %v1917_v37 = vld [vmem:[#allocation3 + $0x418] sm:$0xff] }
 0x462   :  { %2064 = vmatprep.subr.bf16.mxu0 %v1875_v3  ;;  %2290 = vmatprep.subr.bf16.mxu1 %v1877_v45  ;;  %v6515_v3 = vpack.c.bf16 %v6219_v61, %v6216_v20  ;;  %v1914_v45 = vld [vmem:[#allocation3 + $0x400] sm:$0xff]  ;;  %v1924_v61 = vld [vmem:[#allocation3 + $0x450] sm:$0xff] }
 0x463   :  { %v1922_v20 = vld [vmem:[#allocation3 + $0x440] sm:$0xff] }
 0x465   :  { %2065 = vmatpush1.bf16.msra.mxu0 %v1874_v47  ;;  %2291 = vmatpush1.bf16.msra.mxu1 %v1876_v26  ;;  %v1916_v47 = vld [vmem:[#allocation3 + $0x410] sm:$0xff]  ;;  %v1923_v26 = vld [vmem:[#allocation3 + $0x448] sm:$0xff] }
 0x466   :  { %2066 = vmatprep.subr.bf16.mxu0 %v1883_v44  ;;  %2292 = vmatprep.subr.bf16.mxu1 %v1885_v23  ;;  %v1925_v44 = vld [vmem:[#allocation3 + $0x458] sm:$0xff]  ;;  %v6519_v23 = vpack.c.bf16 %v6389_v18, %v6386_v50  ;;  %v6527_v50 = vpack.c.bf16 %v6225_v12, %v6222_v9  ;;  %v1930_v18 = vld [vmem:[#allocation3 + $0x480] sm:$0xff]  ;;  %v1940_v12 = vld [vmem:[#allocation3 + $0x4d0] sm:$0xff] }
 0x467   :  { %v1938_v9 = vld [vmem:[#allocation3 + $0x4c0] sm:$0xff] }
 0x469   :  { %2067 = vmatpush1.bf16.msra.mxu0 %v1882_v2  ;;  %2293 = vmatpush1.bf16.msra.mxu1 %v1884_v46  ;;  %v1931_v2 = vld [vmem:[#allocation3 + $0x488] sm:$0xff]  ;;  %v1933_v46 = vld [vmem:[#allocation3 + $0x498] sm:$0xff] }
 0x46a   :  { %2068 = vmatprep.subr.bf16.mxu0 %v1891_v51  ;;  %2294 = vmatprep.subr.bf16.mxu1 %v1893_v52  ;;  %v1932_v51 = vld [vmem:[#allocation3 + $0x490] sm:$0xff]  ;;  %v1939_v52 = vld [vmem:[#allocation3 + $0x4c8] sm:$0xff] }
 0x46d   :  { %2069 = vmatpush1.bf16.msra.mxu0 %v1890_v36  ;;  %2295 = vmatpush1.bf16.msra.mxu1 %v1892_v31  ;;  %v1941_v36 = vld [vmem:[#allocation3 + $0x4d8] sm:$0xff]  ;;  %v6531_v31 = vpack.c.bf16 %v6395_v5, %v6392_v54  ;;  %v6539_v54 = vpack.c.bf16 %v6231_v42, %v6228_v38  ;;  %v1946_v5 = vld [vmem:[#allocation3 + $0x500] sm:$0xff]  ;;  %v1956_v42 = vld [vmem:[#allocation3 + $0x550] sm:$0xff] }
 0x46e   :  { %2070 = vmatprep.subr.bf16.mxu0 %v1899_v22  ;;  %2296 = vmatprep.subr.bf16.mxu1 %v1901_v6  ;;  %v1947_v22 = vld [vmem:[#allocation3 + $0x508] sm:$0xff]  ;;  %v1949_v6 = vld [vmem:[#allocation3 + $0x518] sm:$0xff]  ;;  %v1954_v38 = vld [vmem:[#allocation3 + $0x540] sm:$0xff] }
 0x471   :  { %2071 = vmatpush1.bf16.msra.mxu0 %v1898_v8  ;;  %2297 = vmatpush1.bf16.msra.mxu1 %v1900_v59  ;;  %v1948_v8 = vld [vmem:[#allocation3 + $0x510] sm:$0xff]  ;;  %v1955_v59 = vld [vmem:[#allocation3 + $0x548] sm:$0xff] }
 0x472   :  { %2072 = vmatprep.subr.bf16.mxu0 %v1907_v10  ;;  %2298 = vmatprep.subr.bf16.mxu1 %v1909_v55  ;;  %v1957_v10 = vld [vmem:[#allocation3 + $0x558] sm:$0xff]  ;;  %v6543_v55 = vpack.c.bf16 %v6401_v33, %v6398_v1  ;;  %v6551_v1 = vpack.c.bf16 %v6237_v40, %v6234_v57  ;;  %v1962_v33 = vld [vmem:[#allocation3 + $0x580] sm:$0xff]  ;;  %v1972_v40 = vld [vmem:[#allocation3 + $0x5d0] sm:$0xff] }
 0x473   :  { %v1970_v57 = vld [vmem:[#allocation3 + $0x5c0] sm:$0xff] }
 0x475   :  { %2073 = vmatpush1.bf16.msra.mxu0 %v1906_v25  ;;  %2299 = vmatpush1.bf16.msra.mxu1 %v1908_v39  ;;  %v1963_v25 = vld [vmem:[#allocation3 + $0x588] sm:$0xff]  ;;  %v1965_v39 = vld [vmem:[#allocation3 + $0x598] sm:$0xff] }
 0x476   :  { %2155 = vmatprep.subr.bf16.mxu0 %v1915_v11  ;;  %2381 = vmatprep.subr.bf16.mxu1 %v1917_v37  ;;  %v1964_v11 = vld [vmem:[#allocation3 + $0x590] sm:$0xff]  ;;  %v1971_v37 = vld [vmem:[#allocation3 + $0x5c8] sm:$0xff] }
 0x478   :  { %2075 = vmatmul.mubr.bf16.vlgmr.msra.gmra.mrb[48].mxu0 %v6515_v3  ;;  %2301 = vmatmul.mubr.bf16.vlgmr.msra.gmra.mrb[64].mxu1 %v6515_v3 }
 0x479   :  { %2156 = vmatpush1.bf16.msra.mxu0 %v1914_v45  ;;  %2382 = vmatpush1.bf16.msra.mxu1 %v1916_v47  ;;  %v1973_v45 = vld [vmem:[#allocation3 + $0x5d8] sm:$0xff]  ;;  %v6555_v47 = vpack.c.bf16 %v6407_v32, %v6404_v34  ;;  %v6563_v34 = vpack.c.bf16 %v6243_v62, %v6240_v58  ;;  %v1978_v32 = vld [vmem:[#allocation3 + $0x600] sm:$0xff]  ;;  %v1988_v62 = vld [vmem:[#allocation3 + $0x650] sm:$0xff] }
 0x47a   :  { %2157 = vmatprep.subr.bf16.mxu0 %v1923_v26  ;;  %2383 = vmatprep.subr.bf16.mxu1 %v1925_v44  ;;  %v1979_v26 = vld [vmem:[#allocation3 + $0x608] sm:$0xff]  ;;  %v1981_v44 = vld [vmem:[#allocation3 + $0x618] sm:$0xff]  ;;  %v1986_v58 = vld [vmem:[#allocation3 + $0x640] sm:$0xff] }
 0x47b   :  { %2084 = vmatprep.mubr.bf16.mxu0 %v6519_v23  ;;  %2310 = vmatprep.mubr.bf16.mxu1 %v6519_v23 }
 0x47d   :  { %2158 = vmatpush1.bf16.msra.mxu0 %v1922_v20  ;;  %2384 = vmatpush1.bf16.msra.mxu1 %v1924_v61  ;;  %v1980_v20 = vld [vmem:[#allocation3 + $0x610] sm:$0xff]  ;;  %v1987_v61 = vld [vmem:[#allocation3 + $0x648] sm:$0xff] }
 0x47e   :  { %2159 = vmatprep.subr.bf16.mxu0 %v1931_v2  ;;  %2385 = vmatprep.subr.bf16.mxu1 %v1933_v46  ;;  %v1989_v2 = vld [vmem:[#allocation3 + $0x658] sm:$0xff]  ;;  %v6567_v46 = vpack.c.bf16 %v6413_v16, %v6410_v41  ;;  %v6575_v41 = vpack.c.bf16 %v6249_v19, %v6246_v14  ;;  %v1994_v16 = vld [vmem:[#allocation3 + $0x680] sm:$0xff]  ;;  %v2004_v19 = vld [vmem:[#allocation3 + $0x6d0] sm:$0xff] }
 0x47f   :  { %v2002_v14 = vld [vmem:[#allocation3 + $0x6c0] sm:$0xff] }
 0x480   :  { %2085 = vmatmul.mubr.bf16.gmra.mrb[52].mxu0 %v6527_v50  ;;  %2311 = vmatmul.mubr.bf16.gmra.mrb[68].mxu1 %v6527_v50 }
 0x481   :  { %2160 = vmatpush1.bf16.msra.mxu0 %v1930_v18  ;;  %2386 = vmatpush1.bf16.msra.mxu1 %v1932_v51  ;;  %v1995_v18 = vld [vmem:[#allocation3 + $0x688] sm:$0xff]  ;;  %v1997_v51 = vld [vmem:[#allocation3 + $0x698] sm:$0xff] }
 0x482   :  { %2161 = vmatprep.subr.bf16.mxu0 %v1939_v52  ;;  %2387 = vmatprep.subr.bf16.mxu1 %v1941_v36  ;;  %v1996_v52 = vld [vmem:[#allocation3 + $0x690] sm:$0xff]  ;;  %v2003_v36 = vld [vmem:[#allocation3 + $0x6c8] sm:$0xff] }
 0x483   :  { %2094 = vmatprep.mubr.bf16.mxu0 %v6531_v31  ;;  %2320 = vmatprep.mubr.bf16.mxu1 %v6531_v31 }
 0x485   :  { %2162 = vmatpush1.bf16.msra.mxu0 %v1938_v9  ;;  %2388 = vmatpush1.bf16.msra.mxu1 %v1940_v12  ;;  %v2005_v9 = vld [vmem:[#allocation3 + $0x6d8] sm:$0xff]  ;;  %v6579_v12 = vpack.c.bf16 %v6419_v21, %v6416_v27  ;;  %v2010_v21 = vld [vmem:[#allocation3 + $0x700] sm:$0xff] }
 0x486   :  { %2163 = vmatprep.subr.bf16.mxu0 %v1947_v22  ;;  %2389 = vmatprep.subr.bf16.mxu1 %v1949_v6  ;;  %v2011_v22 = vld [vmem:[#allocation3 + $0x708] sm:$0xff]  ;;  %v2013_v6 = vld [vmem:[#allocation3 + $0x718] sm:$0xff] }
 0x488   :  { %2095 = vmatmul.mubr.bf16.gmra.mrb[56].mxu0 %v6539_v54  ;;  %2321 = vmatmul.mubr.bf16.gmra.mrb[72].mxu1 %v6539_v54 }
 0x489   :  { %2164 = vmatpush1.bf16.msra.mxu0 %v1946_v5  ;;  %2390 = vmatpush1.bf16.msra.mxu1 %v1948_v8  ;;  %v8593_v5 = vld [vmem:[#allocation50_spill] sm:$0xff]  ;;  %v2012_v8 = vld [vmem:[#allocation3 + $0x710] sm:$0xff] }
 0x48a   :  { %2165 = vmatprep.subr.bf16.mxu0 %v1955_v59  ;;  %2391 = vmatprep.subr.bf16.mxu1 %v1957_v10  ;;  %v6587_v27 = vpack.c.bf16 %v8593_v5, %v6252_v48  ;;  %v2019_v59 = vld [vmem:[#allocation3 + $0x748] sm:$0xff]  ;;  %v2021_v10 = vld [vmem:[#allocation3 + $0x758] sm:$0xff]  ;;  %v2018_v48 = vld [vmem:[#allocation3 + $0x740] sm:$0xff] }
 0x48b   :  { %2104 = vmatprep.mubr.bf16.mxu0 %v6543_v55  ;;  %2330 = vmatprep.mubr.bf16.mxu1 %v6543_v55  ;;  %v8600_v5 = vld [vmem:[#allocation54_spill] sm:$0xff] }
 0x48d   :  { %2166 = vmatpush1.bf16.msra.mxu0 %v1954_v38  ;;  %2392 = vmatpush1.bf16.msra.mxu1 %v1956_v42  ;;  %v8594_v38 = vld [vmem:[#allocation17_spill] sm:$0xff]  ;;  %v8595_v42 = vld [vmem:[#allocation19_spill] sm:$0xff] }
 0x48e   :  { %2167 = vmatprep.subr.bf16.mxu0 %v1963_v25  ;;  %2393 = vmatprep.subr.bf16.mxu1 %v1965_v39  ;;  %v6591_v25 = vpack.c.bf16 %v8595_v42, %v8594_v38  ;;  %v2020_v39 = vld [vmem:[#allocation3 + $0x750] sm:$0xff]  ;;  %v6627_v38 = vpack.c.bf16 %v6475_v13, %v6472_v24  ;;  %v1814_v42 = vld [vmem:[#allocation3 + $0xe0] sm:$0xff] }
 0x48f   :  { %v1822_v13 = vld [vmem:[#allocation3 + $0x120] sm:$0xff] }
 0x490   :  { %2105 = vmatmul.mubr.bf16.gmra.mrb[60].mxu0 %v6551_v1  ;;  %2331 = vmatmul.mubr.bf16.gmra.mrb[76].mxu1 %v6551_v1 }
 0x491   :  { %2168 = vmatpush1.bf16.msra.mxu0 %v1962_v33  ;;  %2394 = vmatpush1.bf16.msra.mxu1 %v1964_v11  ;;  %v2027_v33 = vld [vmem:[#allocation3 + $0x788] sm:$0xff]  ;;  %v2029_v11 = vld [vmem:[#allocation3 + $0x798] sm:$0xff] }
 0x492   :  { %2169 = vmatprep.subr.bf16.mxu0 %v1971_v37  ;;  %2395 = vmatprep.subr.bf16.mxu1 %v1973_v45  ;;  %v8596_v37 = vld [vmem:[#allocation51_spill] sm:$0xff]  ;;  %v8597_v45 = vld [vmem:[#allocation52_spill] sm:$0xff] }
 0x493   :  { %2114 = vmatprep.mubr.bf16.mxu0 %v6555_v47  ;;  %2340 = vmatprep.mubr.bf16.mxu1 %v6555_v47 }
 0x495   :  { %2170 = vmatpush1.bf16.msra.mxu0 %v1970_v57  ;;  %2396 = vmatpush1.bf16.msra.mxu1 %v1972_v40  ;;  %v6599_v57 = vpack.c.bf16 %v8597_v45, %v8596_v37  ;;  %v2026_v40 = vld [vmem:[#allocation3 + $0x780] sm:$0xff]  ;;  %v1824_v45 = vld [vmem:[#allocation3 + $0x130] sm:$0xff] }
 0x496   :  { %2171 = vmatprep.subr.bf16.mxu0 %v1979_v26  ;;  %2397 = vmatprep.subr.bf16.mxu1 %v1981_v44  ;;  %v2028_v26 = vld [vmem:[#allocation3 + $0x790] sm:$0xff]  ;;  %v2035_v44 = vld [vmem:[#allocation3 + $0x7c8] sm:$0xff]  ;;  %v8603_v37 = vld [vmem:[#allocation57_spill] sm:$0xff] }
 0x498   :  { %2115 = vmatmul.mubr.bf16.gmra.mrb[64].mxu0 %v6563_v34  ;;  %2341 = vmatmul.mubr.bf16.gmra.mrb[80].mxu1 %v6563_v34 }
 0x499   :  { %2172 = vmatpush1.bf16.msra.mxu0 %v1978_v32  ;;  %2398 = vmatpush1.bf16.msra.mxu1 %v1980_v20  ;;  %v2037_v32 = vld [vmem:[#allocation3 + $0x7d8] sm:$0xff]  ;;  %v6603_v20 = vpack.c.bf16 %v6463_v49, %v6460_v29  ;;  %v1790_v49 = vld [vmem:[#allocation3 + $0x20] sm:$0xff] }
 0x49a   :  { %2173 = vmatprep.subr.bf16.mxu0 %v1987_v61  ;;  %2399 = vmatprep.subr.bf16.mxu1 %v1989_v2  ;;  %v2034_v61 = vld [vmem:[#allocation3 + $0x7c0] sm:$0xff]  ;;  %v2036_v2 = vld [vmem:[#allocation3 + $0x7d0] sm:$0xff] }
 0x49b   :  { %2124 = vmatprep.mubr.bf16.mxu0 %v6567_v46  ;;  %2350 = vmatprep.mubr.bf16.mxu1 %v6567_v46 }
 0x49d   :  { %2174 = vmatpush1.bf16.msra.mxu0 %v1986_v58  ;;  %2400 = vmatpush1.bf16.msra.mxu1 %v1988_v62  ;;  %v1791_v58 = vld [vmem:[#allocation3 + $0x28] sm:$0xff]  ;;  %v1793_v62 = vld [vmem:[#allocation3 + $0x38] sm:$0xff] }
 0x49e   :  { %2175 = vmatprep.subr.bf16.mxu0 %v1995_v18  ;;  %2401 = vmatprep.subr.bf16.mxu1 %v1997_v51  ;;  %v8598_v18 = vld [vmem:[#allocation47_spill] sm:$0xff]  ;;  %v8599_v51 = vld [vmem:[#allocation53_spill] sm:$0xff] }
 0x49f   :  { %v6611_v29 = vpack.c.bf16 %v8599_v51, %v8598_v18  ;;  %v8605_v18 = vld [vmem:[#allocation59_spill] sm:$0xff] }
 0x4a0   :  { %2125 = vmatmul.mubr.bf16.gmra.mrb[68].mxu0 %v6575_v41  ;;  %2351 = vmatmul.mubr.bf16.gmra.mrb[84].mxu1 %v6575_v41  ;;  %v1840_v51 = vld [vmem:[#allocation3 + $0x1b0] sm:$0xff] }
 0x4a1   :  { %2176 = vmatpush1.bf16.msra.mxu0 %v1994_v16  ;;  %2402 = vmatpush1.bf16.msra.mxu1 %v1996_v52  ;;  %v1792_v16 = vld [vmem:[#allocation3 + $0x30] sm:$0xff]  ;;  %v1799_v52 = vld [vmem:[#allocation3 + $0x68] sm:$0xff] }
 0x4a2   :  { %2177 = vmatprep.subr.bf16.mxu0 %v2003_v36  ;;  %2403 = vmatprep.subr.bf16.mxu1 %v2005_v9  ;;  %v1801_v36 = vld [vmem:[#allocation3 + $0x78] sm:$0xff]  ;;  %v6615_v9 = vpack.c.bf16 %v6469_v28, %v6466_v17  ;;  %v1806_v28 = vld [vmem:[#allocation3 + $0xa0] sm:$0xff] }
 0x4a3   :  { %2134 = vmatprep.mubr.bf16.mxu0 %v6579_v12  ;;  %2360 = vmatprep.mubr.bf16.mxu1 %v6579_v12 }
 0x4a5   :  { %2178 = vmatpush1.bf16.msra.mxu0 %v2002_v14  ;;  %2404 = vmatpush1.bf16.msra.mxu1 %v2004_v19  ;;  %v1798_v14 = vld [vmem:[#allocation3 + $0x60] sm:$0xff]  ;;  %v1800_v19 = vld [vmem:[#allocation3 + $0x70] sm:$0xff] }
 0x4a6   :  { %2179 = vmatprep.subr.bf16.mxu0 %v2011_v22  ;;  %2405 = vmatprep.subr.bf16.mxu1 %v2013_v6  ;;  %v1807_v22 = vld [vmem:[#allocation3 + $0xa8] sm:$0xff]  ;;  %v1809_v6 = vld [vmem:[#allocation3 + $0xb8] sm:$0xff] }
 0x4a8   :  { %2135 = vmatmul.mubr.bf16.gmra.mrb[72].mxu0 %v6587_v27  ;;  %2361 = vmatmul.mubr.bf16.gmra.mrb[88].mxu1 %v6587_v27 }
 0x4a9   :  { %2180 = vmatpush1.bf16.msra.mxu0 %v2010_v21  ;;  %2406 = vmatpush1.bf16.msra.mxu1 %v2012_v8  ;;  %v8601_v21 = vld [vmem:[#allocation55_spill] sm:$0xff] }
 0x4aa   :  { %2181 = vmatprep.subr.bf16.mxu0 %v2019_v59  ;;  %2407 = vmatprep.subr.bf16.mxu1 %v2021_v10  ;;  %v6623_v17 = vpack.c.bf16 %v8601_v21, %v8600_v5  ;;  %v1808_v8 = vld [vmem:[#allocation3 + $0xb0] sm:$0xff]  ;;  %v1815_v59 = vld [vmem:[#allocation3 + $0xe8] sm:$0xff]  ;;  %v1817_v10 = vld [vmem:[#allocation3 + $0xf8] sm:$0xff] }
 0x4ab   :  { %2144 = vmatprep.mubr.bf16.mxu0 %v6591_v25  ;;  %2370 = vmatprep.mubr.bf16.mxu1 %v6591_v25  ;;  %v8607_v5 = vld [vmem:[#allocation61_spill] sm:$0xff]  ;;  %v1856_v21 = vld [vmem:[#allocation3 + $0x230] sm:$0xff] }
 0x4ad   :  { %2182 = vmatpush1.bf16.msra.mxu0 %v2018_v48  ;;  %2408 = vmatpush1.bf16.msra.mxu1 %v2020_v39  ;;  %v1816_v48 = vld [vmem:[#allocation3 + $0xf0] sm:$0xff]  ;;  %v1823_v39 = vld [vmem:[#allocation3 + $0x128] sm:$0xff] }
 0x4ae   :  { %2183 = vmatprep.subr.bf16.mxu0 %v2027_v33  ;;  %2409 = vmatprep.subr.bf16.mxu1 %v2029_v11  ;;  %v1825_v33 = vld [vmem:[#allocation3 + $0x138] sm:$0xff] }
 0x4af   :  { %v8602_v11 = vld [vmem:[#allocation56_spill] sm:$0xff] }
 0x4b0   :  { %2145 = vmatmul.mubr.bf16.gmra.mrb[76].mxu0 %v6599_v57  ;;  %2371 = vmatmul.mubr.bf16.gmra.mrb[92].mxu1 %v6599_v57  ;;  %v6635_v24 = vpack.c.bf16 %v8603_v37, %v8602_v11  ;;  %v8609_v11 = vld [vmem:[#allocation63_spill] sm:$0xff] }
 0x4b1   :  { %2184 = vmatpush1.bf16.msra.mxu0 %v2026_v40  ;;  %2410 = vmatpush1.bf16.msra.mxu1 %v2028_v26  ;;  %v1831_v40 = vld [vmem:[#allocation3 + $0x168] sm:$0xff]  ;;  %v1833_v26 = vld [vmem:[#allocation3 + $0x178] sm:$0xff]  ;;  %v1872_v37 = vld [vmem:[#allocation3 + $0x2b0] sm:$0xff] }
 0x4b2   :  { %2185 = vmatprep.subr.bf16.mxu0 %v2035_v44  ;;  %2411 = vmatprep.subr.bf16.mxu1 %v2037_v32  ;;  %v6639_v44 = vpack.c.bf16 %v6481_v35, %v6478_v30  ;;  %v1830_v32 = vld [vmem:[#allocation3 + $0x160] sm:$0xff] }
 0x4b3   :  { %2187 = vmatprep.mubr.bf16.mxu0 %v6603_v20  ;;  %2413 = vmatprep.mubr.bf16.mxu1 %v6603_v20  ;;  %v1838_v35 = vld [vmem:[#allocation3 + $0x1a0] sm:$0xff] }
 0x4b5   :  { %2186 = vmatpush1.bf16.msra.mxu0 %v2034_v61  ;;  %2412 = vmatpush1.bf16.msra.mxu1 %v2036_v2  ;;  %v1832_v61 = vld [vmem:[#allocation3 + $0x170] sm:$0xff]  ;;  %v1839_v2 = vld [vmem:[#allocation3 + $0x1a8] sm:$0xff] }
 0x4b6   :  { %2494 = vmatprep.subr.bf16.mxu0 %v1791_v58  ;;  %2720 = vmatprep.subr.bf16.mxu1 %v1793_v62  ;;  %v1841_v58 = vld [vmem:[#allocation3 + $0x1b8] sm:$0xff]  ;;  %v8604_v62 = vld [vmem:[#allocation58_spill] sm:$0xff] }
 0x4b7   :  { %v6647_v30 = vpack.c.bf16 %v8605_v18, %v8604_v62  ;;  %v8611_v62 = vld [vmem:[#allocation65_spill] sm:$0xff]  ;;  %v1888_v18 = vld [vmem:[#allocation3 + $0x330] sm:$0xff] }
 0x4b8   :  { %2188 = vmatmul.mubr.bf16.vlgmr.msra.gmra.mrb[48].mxu0 %v6611_v29  ;;  %2414 = vmatmul.mubr.bf16.vlgmr.msra.gmra.mrb[64].mxu1 %v6611_v29 }
 0x4b9   :  { %2495 = vmatpush1.bf16.msra.mxu0 %v1790_v49  ;;  %2721 = vmatpush1.bf16.msra.mxu1 %v1792_v16  ;;  %v1847_v49 = vld [vmem:[#allocation3 + $0x1e8] sm:$0xff]  ;;  %v1849_v16 = vld [vmem:[#allocation3 + $0x1f8] sm:$0xff] }
 0x4ba   :  { %2496 = vmatprep.subr.bf16.mxu0 %v1799_v52  ;;  %2722 = vmatprep.subr.bf16.mxu1 %v1801_v36  ;;  %v6651_v52 = vpack.c.bf16 %v6487_v43, %v6484_v15  ;;  %v1846_v36 = vld [vmem:[#allocation3 + $0x1e0] sm:$0xff] }
 0x4bb   :  { %2197 = vmatprep.mubr.bf16.mxu0 %v6615_v9  ;;  %2423 = vmatprep.mubr.bf16.mxu1 %v6615_v9  ;;  %v1854_v43 = vld [vmem:[#allocation3 + $0x220] sm:$0xff] }
 0x4bd   :  { %2497 = vmatpush1.bf16.msra.mxu0 %v1798_v14  ;;  %2723 = vmatpush1.bf16.msra.mxu1 %v1800_v19  ;;  %v1848_v14 = vld [vmem:[#allocation3 + $0x1f0] sm:$0xff]  ;;  %v1855_v19 = vld [vmem:[#allocation3 + $0x228] sm:$0xff] }
 0x4be   :  { %2498 = vmatprep.subr.bf16.mxu0 %v1807_v22  ;;  %2724 = vmatprep.subr.bf16.mxu1 %v1809_v6  ;;  %v1857_v22 = vld [vmem:[#allocation3 + $0x238] sm:$0xff] }
 0x4bf   :  { %v8606_v6 = vld [vmem:[#allocation60_spill] sm:$0xff] }
 0x4c0   :  { %2198 = vmatmul.mubr.bf16.gmra.mrb[52].mxu0 %v6623_v17  ;;  %2424 = vmatmul.mubr.bf16.gmra.mrb[68].mxu1 %v6623_v17  ;;  %v6659_v15 = vpack.c.bf16 %v8607_v5, %v8606_v6  ;;  %v8613_v6 = vld [vmem:[#allocation67_spill] sm:$0xff] }
 0x4c1   :  { %2499 = vmatpush1.bf16.msra.mxu0 %v1806_v28  ;;  %2725 = vmatpush1.bf16.msra.mxu1 %v1808_v8  ;;  %v1863_v28 = vld [vmem:[#allocation3 + $0x268] sm:$0xff]  ;;  %v1865_v8 = vld [vmem:[#allocation3 + $0x278] sm:$0xff]  ;;  %v1904_v5 = vld [vmem:[#allocation3 + $0x3b0] sm:$0xff] }
 0x4c2   :  { %2500 = vmatprep.subr.bf16.mxu0 %v1815_v59  ;;  %2726 = vmatprep.subr.bf16.mxu1 %v1817_v10  ;;  %v6663_v59 = vpack.c.bf16 %v6493_v56, %v6490_v7  ;;  %v1862_v10 = vld [vmem:[#allocation3 + $0x260] sm:$0xff] }
 0x4c3   :  { %2207 = vmatprep.mubr.bf16.mxu0 %v6627_v38  ;;  %2433 = vmatprep.mubr.bf16.mxu1 %v6627_v38  ;;  %v1870_v56 = vld [vmem:[#allocation3 + $0x2a0] sm:$0xff] }
 0x4c5   :  { %2501 = vmatpush1.bf16.msra.mxu0 %v1814_v42  ;;  %2727 = vmatpush1.bf16.msra.mxu1 %v1816_v48  ;;  %v1864_v42 = vld [vmem:[#allocation3 + $0x270] sm:$0xff]  ;;  %v1871_v48 = vld [vmem:[#allocation3 + $0x2a8] sm:$0xff] }
 0x4c6   :  { %2502 = vmatprep.subr.bf16.mxu0 %v1823_v39  ;;  %2728 = vmatprep.subr.bf16.mxu1 %v1825_v33  ;;  %v1873_v39 = vld [vmem:[#allocation3 + $0x2b8] sm:$0xff]  ;;  %v8608_v33 = vld [vmem:[#allocation62_spill] sm:$0xff] }
 0x4c7   :  { %v6671_v7 = vpack.c.bf16 %v8609_v11, %v8608_v33  ;;  %v1927_v33 = vld [vmem:[#allocation3 + $0x468] sm:$0xff]  ;;  %v1929_v11 = vld [vmem:[#allocation3 + $0x478] sm:$0xff] }
 0x4c8   :  { %2208 = vmatmul.mubr.bf16.gmra.mrb[56].mxu0 %v6635_v24  ;;  %2434 = vmatmul.mubr.bf16.gmra.mrb[72].mxu1 %v6635_v24 }
 0x4c9   :  { %2503 = vmatpush1.bf16.msra.mxu0 %v1822_v13  ;;  %2729 = vmatpush1.bf16.msra.mxu1 %v1824_v45  ;;  %v1879_v13 = vld [vmem:[#allocation3 + $0x2e8] sm:$0xff]  ;;  %v1881_v45 = vld [vmem:[#allocation3 + $0x2f8] sm:$0xff] }
 0x4ca   :  { %2504 = vmatprep.subr.bf16.mxu0 %v1831_v40  ;;  %2730 = vmatprep.subr.bf16.mxu1 %v1833_v26  ;;  %v6675_v40 = vpack.c.bf16 %v6499_v0, %v6496_v4  ;;  %v1878_v26 = vld [vmem:[#allocation3 + $0x2e0] sm:$0xff] }
 0x4cb   :  { %2217 = vmatprep.mubr.bf16.mxu0 %v6639_v44  ;;  %2443 = vmatprep.mubr.bf16.mxu1 %v6639_v44  ;;  %v1886_v0 = vld [vmem:[#allocation3 + $0x320] sm:$0xff] }
 0x4cd   :  { %2505 = vmatpush1.bf16.msra.mxu0 %v1830_v32  ;;  %2731 = vmatpush1.bf16.msra.mxu1 %v1832_v61  ;;  %v1880_v32 = vld [vmem:[#allocation3 + $0x2f0] sm:$0xff]  ;;  %v1887_v61 = vld [vmem:[#allocation3 + $0x328] sm:$0xff] }
 0x4ce   :  { %2506 = vmatprep.subr.bf16.mxu0 %v1839_v2  ;;  %2732 = vmatprep.subr.bf16.mxu1 %v1841_v58  ;;  %v1889_v2 = vld [vmem:[#allocation3 + $0x338] sm:$0xff] }
 0x4cf   :  { %v8610_v58 = vld [vmem:[#allocation64_spill] sm:$0xff] }
 0x4d0   :  { %2218 = vmatmul.mubr.bf16.gmra.mrb[60].mxu0 %v6647_v30  ;;  %2444 = vmatmul.mubr.bf16.gmra.mrb[76].mxu1 %v6647_v30  ;;  %v6683_v4 = vpack.c.bf16 %v8611_v62, %v8610_v58  ;;  %v1953_v58 = vld [vmem:[#allocation3 + $0x538] sm:$0xff]  ;;  %v1950_v62 = vld [vmem:[#allocation3 + $0x520] sm:$0xff] }
 0x4d1   :  { %2507 = vmatpush1.bf16.msra.mxu0 %v1838_v35  ;;  %2733 = vmatpush1.bf16.msra.mxu1 %v1840_v51  ;;  %v1895_v35 = vld [vmem:[#allocation3 + $0x368] sm:$0xff]  ;;  %v1897_v51 = vld [vmem:[#allocation3 + $0x378] sm:$0xff] }
 0x4d2   :  { %2508 = vmatprep.subr.bf16.mxu0 %v1847_v49  ;;  %2734 = vmatprep.subr.bf16.mxu1 %v1849_v16  ;;  %v6687_v49 = vpack.c.bf16 %v6505_v53, %v6502_v63  ;;  %v1894_v16 = vld [vmem:[#allocation3 + $0x360] sm:$0xff] }
 0x4d3   :  { %2227 = vmatprep.mubr.bf16.mxu0 %v6651_v52  ;;  %2453 = vmatprep.mubr.bf16.mxu1 %v6651_v52  ;;  %v1902_v53 = vld [vmem:[#allocation3 + $0x3a0] sm:$0xff] }
 0x4d5   :  { %2509 = vmatpush1.bf16.msra.mxu0 %v1846_v36  ;;  %2735 = vmatpush1.bf16.msra.mxu1 %v1848_v14  ;;  %v1896_v36 = vld [vmem:[#allocation3 + $0x370] sm:$0xff]  ;;  %v1903_v14 = vld [vmem:[#allocation3 + $0x3a8] sm:$0xff] }
 0x4d6   :  { %2510 = vmatprep.subr.bf16.mxu0 %v1855_v19  ;;  %2736 = vmatprep.subr.bf16.mxu1 %v1857_v22  ;;  %v1905_v19 = vld [vmem:[#allocation3 + $0x3b8] sm:$0xff]  ;;  %v8612_v22 = vld [vmem:[#allocation66_spill] sm:$0xff] }
 0x4d7   :  { %v6695_v63 = vpack.c.bf16 %v8613_v6, %v8612_v22  ;;  %v1974_v22 = vld [vmem:[#allocation3 + $0x5e0] sm:$0xff]  ;;  %v1983_v6 = vld [vmem:[#allocation3 + $0x628] sm:$0xff] }
 0x4d8   :  { %2228 = vmatmul.mubr.bf16.gmra.mrb[64].mxu0 %v6659_v15  ;;  %2454 = vmatmul.mubr.bf16.gmra.mrb[80].mxu1 %v6659_v15 }
 0x4d9   :  { %2511 = vmatpush1.bf16.msra.mxu0 %v1854_v43  ;;  %2737 = vmatpush1.bf16.msra.mxu1 %v1856_v21  ;;  %v1911_v43 = vld [vmem:[#allocation3 + $0x3e8] sm:$0xff]  ;;  %v1913_v21 = vld [vmem:[#allocation3 + $0x3f8] sm:$0xff] }
 0x4da   :  { %2512 = vmatprep.subr.bf16.mxu0 %v1863_v28  ;;  %2738 = vmatprep.subr.bf16.mxu1 %v1865_v8  ;;  %v1910_v28 = vld [vmem:[#allocation3 + $0x3e0] sm:$0xff]  ;;  %v1912_v8 = vld [vmem:[#allocation3 + $0x3f0] sm:$0xff] }
 0x4db   :  { %2237 = vmatprep.mubr.bf16.mxu0 %v6663_v59  ;;  %2463 = vmatprep.mubr.bf16.mxu1 %v6663_v59 }
 0x4dd   :  { %2513 = vmatpush1.bf16.msra.mxu0 %v1862_v10  ;;  %2739 = vmatpush1.bf16.msra.mxu1 %v1864_v42  ;;  %v1919_v10 = vld [vmem:[#allocation3 + $0x428] sm:$0xff]  ;;  %v1921_v42 = vld [vmem:[#allocation3 + $0x438] sm:$0xff] }
 0x4de   :  { %2514 = vmatprep.subr.bf16.mxu0 %v1871_v48  ;;  %2740 = vmatprep.subr.bf16.mxu1 %v1873_v39  ;;  %v1918_v48 = vld [vmem:[#allocation3 + $0x420] sm:$0xff]  ;;  %v1920_v39 = vld [vmem:[#allocation3 + $0x430] sm:$0xff] }
 0x4e0   :  { %2238 = vmatmul.mubr.bf16.gmra.mrb[68].mxu0 %v6671_v7  ;;  %2464 = vmatmul.mubr.bf16.gmra.mrb[84].mxu1 %v6671_v7 }
 0x4e1   :  { %2515 = vmatpush1.bf16.msra.mxu0 %v1870_v56  ;;  %2741 = vmatpush1.bf16.msra.mxu1 %v1872_v37  ;;  %v1926_v56 = vld [vmem:[#allocation3 + $0x460] sm:$0xff]  ;;  %v1935_v37 = vld [vmem:[#allocation3 + $0x4a8] sm:$0xff] }
 0x4e2   :  { %2516 = vmatprep.subr.bf16.mxu0 %v1879_v13  ;;  %2742 = vmatprep.subr.bf16.mxu1 %v1881_v45  ;;  %v1937_v13 = vld [vmem:[#allocation3 + $0x4b8] sm:$0xff]  ;;  %v1934_v45 = vld [vmem:[#allocation3 + $0x4a0] sm:$0xff] }
 0x4e3   :  { %2247 = vmatprep.mubr.bf16.mxu0 %v6675_v40  ;;  %2473 = vmatprep.mubr.bf16.mxu1 %v6675_v40 }
 0x4e5   :  { %2517 = vmatpush1.bf16.msra.mxu0 %v1878_v26  ;;  %2743 = vmatpush1.bf16.msra.mxu1 %v1880_v32  ;;  %v1936_v26 = vld [vmem:[#allocation3 + $0x4b0] sm:$0xff]  ;;  %v1943_v32 = vld [vmem:[#allocation3 + $0x4e8] sm:$0xff] }
 0x4e6   :  { %2518 = vmatprep.subr.bf16.mxu0 %v1887_v61  ;;  %2744 = vmatprep.subr.bf16.mxu1 %v1889_v2  ;;  %v1942_v61 = vld [vmem:[#allocation3 + $0x4e0] sm:$0xff]  ;;  %v1951_v2 = vld [vmem:[#allocation3 + $0x528] sm:$0xff] }
 0x4e8   :  { %2248 = vmatmul.mubr.bf16.gmra.mrb[72].mxu0 %v6683_v4  ;;  %2474 = vmatmul.mubr.bf16.gmra.mrb[88].mxu1 %v6683_v4 }
 0x4e9   :  { %2519 = vmatpush1.bf16.msra.mxu0 %v1886_v0  ;;  %2745 = vmatpush1.bf16.msra.mxu1 %v1888_v18  ;;  %v1952_v0 = vld [vmem:[#allocation3 + $0x530] sm:$0xff]  ;;  %v1959_v18 = vld [vmem:[#allocation3 + $0x568] sm:$0xff] }
 0x4ea   :  { %2520 = vmatprep.subr.bf16.mxu0 %v1895_v35  ;;  %2746 = vmatprep.subr.bf16.mxu1 %v1897_v51  ;;  %v1958_v35 = vld [vmem:[#allocation3 + $0x560] sm:$0xff]  ;;  %v1967_v51 = vld [vmem:[#allocation3 + $0x5a8] sm:$0xff] }
 0x4eb   :  { %2257 = vmatprep.mubr.bf16.mxu0 %v6687_v49  ;;  %2483 = vmatprep.mubr.bf16.mxu1 %v6687_v49 }
 0x4ed   :  { %2521 = vmatpush1.bf16.msra.mxu0 %v1894_v16  ;;  %2747 = vmatpush1.bf16.msra.mxu1 %v1896_v36  ;;  %v1969_v16 = vld [vmem:[#allocation3 + $0x5b8] sm:$0xff]  ;;  %v1966_v36 = vld [vmem:[#allocation3 + $0x5a0] sm:$0xff] }
 0x4ee   :  { %2522 = vmatprep.subr.bf16.mxu0 %v1903_v14  ;;  %2748 = vmatprep.subr.bf16.mxu1 %v1905_v19  ;;  %v1968_v14 = vld [vmem:[#allocation3 + $0x5b0] sm:$0xff]  ;;  %v1975_v19 = vld [vmem:[#allocation3 + $0x5e8] sm:$0xff] }
 0x4f0   :  { %2258 = vmatmul.mubr.bf16.gmra.mrb[76].mxu0 %v6695_v63  ;;  %2484 = vmatmul.mubr.bf16.gmra.mrb[92].mxu1 %v6695_v63 }
 0x4f1   :  { %2523 = vmatpush1.bf16.msra.mxu0 %v1902_v53  ;;  %2749 = vmatpush1.bf16.msra.mxu1 %v1904_v5  ;;  %v1985_v53 = vld [vmem:[#allocation3 + $0x638] sm:$0xff]  ;;  %v1982_v5 = vld [vmem:[#allocation3 + $0x620] sm:$0xff] }
 0x4f2   :  { %2524 = vmatprep.subr.bf16.mxu0 %v1911_v43  ;;  %2750 = vmatprep.subr.bf16.mxu1 %v1913_v21  ;;  %v1984_v43 = vld [vmem:[#allocation3 + $0x630] sm:$0xff]  ;;  %v1991_v21 = vld [vmem:[#allocation3 + $0x668] sm:$0xff] }
 0x4f3   :  { %2526 = vmatprep.mubr.bf16.mxu0 %v6509_v60  ;;  %2752 = vmatprep.mubr.bf16.mxu1 %v6509_v60  ;;  %v1928_v60 = vld [vmem:[#allocation3 + $0x470] sm:$0xff] }
 0x4f5   :  { %2525 = vmatpush1.bf16.msra.mxu0 %v1910_v28  ;;  %2751 = vmatpush1.bf16.msra.mxu1 %v1912_v8  ;;  %v1990_v28 = vld [vmem:[#allocation3 + $0x660] sm:$0xff]  ;;  %v1999_v8 = vld [vmem:[#allocation3 + $0x6a8] sm:$0xff] }
 0x4f6   :  { %2607 = vmatprep.subr.bf16.mxu0 %v1919_v10  ;;  %2833 = vmatprep.subr.bf16.mxu1 %v1921_v42  ;;  %v2001_v10 = vld [vmem:[#allocation3 + $0x6b8] sm:$0xff]  ;;  %v1998_v42 = vld [vmem:[#allocation3 + $0x6a0] sm:$0xff] }
 0x4f8   :  { %2527 = vmatmul.mubr.bf16.vlgmr.msra.gmra.mrb[80].mxu0 %v6515_v3  ;;  %2753 = vmatmul.mubr.bf16.vlgmr.msra.gmra.mrb[96].mxu1 %v6515_v3  ;;  %v1945_v3 = vld [vmem:[#allocation3 + $0x4f8] sm:$0xff] }
 0x4f9   :  { %2608 = vmatpush1.bf16.msra.mxu0 %v1918_v48  ;;  %2834 = vmatpush1.bf16.msra.mxu1 %v1920_v39  ;;  %v2000_v48 = vld [vmem:[#allocation3 + $0x6b0] sm:$0xff]  ;;  %v2007_v39 = vld [vmem:[#allocation3 + $0x6e8] sm:$0xff] }
 0x4fa   :  { %2609 = vmatprep.subr.bf16.mxu0 %v1927_v33  ;;  %2835 = vmatprep.subr.bf16.mxu1 %v1929_v11  ;;  %v2006_v33 = vld [vmem:[#allocation3 + $0x6e0] sm:$0xff]  ;;  %v2015_v11 = vld [vmem:[#allocation3 + $0x728] sm:$0xff] }
 0x4fb   :  { %2536 = vmatprep.mubr.bf16.mxu0 %v6519_v23  ;;  %2762 = vmatprep.mubr.bf16.mxu1 %v6519_v23  ;;  %v1944_v23 = vld [vmem:[#allocation3 + $0x4f0] sm:$0xff] }
 0x4fd   :  { %2610 = vmatpush1.bf16.msra.mxu0 %v1926_v56  ;;  %2836 = vmatpush1.bf16.msra.mxu1 %v1928_v60  ;;  %v2017_v56 = vld [vmem:[#allocation3 + $0x738] sm:$0xff]  ;;  %v2014_v60 = vld [vmem:[#allocation3 + $0x720] sm:$0xff] }
 0x4fe   :  { %2611 = vmatprep.subr.bf16.mxu0 %v1935_v37  ;;  %2837 = vmatprep.subr.bf16.mxu1 %v1937_v13  ;;  %v2016_v37 = vld [vmem:[#allocation3 + $0x730] sm:$0xff]  ;;  %v2023_v13 = vld [vmem:[#allocation3 + $0x768] sm:$0xff] }
 0x500   :  { %2537 = vmatmul.mubr.bf16.gmra.mrb[84].mxu0 %v6527_v50  ;;  %2763 = vmatmul.mubr.bf16.gmra.mrb[100].mxu1 %v6527_v50  ;;  %v1961_v50 = vld [vmem:[#allocation3 + $0x578] sm:$0xff] }
 0x501   :  { %2612 = vmatpush1.bf16.msra.mxu0 %v1934_v45  ;;  %2838 = vmatpush1.bf16.msra.mxu1 %v1936_v26  ;;  %v2022_v45 = vld [vmem:[#allocation3 + $0x760] sm:$0xff]  ;;  %v2031_v26 = vld [vmem:[#allocation3 + $0x7a8] sm:$0xff] }
 0x502   :  { %2613 = vmatprep.subr.bf16.mxu0 %v1943_v32  ;;  %2839 = vmatprep.subr.bf16.mxu1 %v1945_v3  ;;  %v2033_v32 = vld [vmem:[#allocation3 + $0x7b8] sm:$0xff]  ;;  %v2030_v3 = vld [vmem:[#allocation3 + $0x7a0] sm:$0xff] }
 0x503   :  { %2546 = vmatprep.mubr.bf16.mxu0 %v6531_v31  ;;  %2772 = vmatprep.mubr.bf16.mxu1 %v6531_v31  ;;  %v1960_v31 = vld [vmem:[#allocation3 + $0x570] sm:$0xff] }
 0x505   :  { %2614 = vmatpush1.bf16.msra.mxu0 %v1942_v61  ;;  %2840 = vmatpush1.bf16.msra.mxu1 %v1944_v23  ;;  %v2032_v61 = vld [vmem:[#allocation3 + $0x7b0] sm:$0xff]  ;;  %v2039_v23 = vld [vmem:[#allocation3 + $0x7e8] sm:$0xff] }
 0x506   :  { %2615 = vmatprep.subr.bf16.mxu0 %v1951_v2  ;;  %2841 = vmatprep.subr.bf16.mxu1 %v1953_v58  ;;  %v2038_v2 = vld [vmem:[#allocation3 + $0x7e0] sm:$0xff] }
 0x508   :  { %2547 = vmatmul.mubr.bf16.gmra.mrb[88].mxu0 %v6539_v54  ;;  %2773 = vmatmul.mubr.bf16.gmra.mrb[104].mxu1 %v6539_v54  ;;  %v1977_v54 = vld [vmem:[#allocation3 + $0x5f8] sm:$0xff] }
 0x509   :  { %2616 = vmatpush1.bf16.msra.mxu0 %v1950_v62  ;;  %2842 = vmatpush1.bf16.msra.mxu1 %v1952_v0 }
 0x50a   :  { %2617 = vmatprep.subr.bf16.mxu0 %v1959_v18  ;;  %2843 = vmatprep.subr.bf16.mxu1 %v1961_v50 }
 0x50b   :  { %2556 = vmatprep.mubr.bf16.mxu0 %v6543_v55  ;;  %2782 = vmatprep.mubr.bf16.mxu1 %v6543_v55  ;;  %v1976_v55 = vld [vmem:[#allocation3 + $0x5f0] sm:$0xff] }
 0x50d   :  { %2618 = vmatpush1.bf16.msra.mxu0 %v1958_v35  ;;  %2844 = vmatpush1.bf16.msra.mxu1 %v1960_v31 }
 0x50e   :  { %2619 = vmatprep.subr.bf16.mxu0 %v1967_v51  ;;  %2845 = vmatprep.subr.bf16.mxu1 %v1969_v16 }
 0x510   :  { %2557 = vmatmul.mubr.bf16.gmra.mrb[92].mxu0 %v6551_v1  ;;  %2783 = vmatmul.mubr.bf16.gmra.mrb[108].mxu1 %v6551_v1  ;;  %v1993_v1 = vld [vmem:[#allocation3 + $0x678] sm:$0xff] }
 0x511   :  { %2620 = vmatpush1.bf16.msra.mxu0 %v1966_v36  ;;  %2846 = vmatpush1.bf16.msra.mxu1 %v1968_v14 }
 0x512   :  { %2621 = vmatprep.subr.bf16.mxu0 %v1975_v19  ;;  %2847 = vmatprep.subr.bf16.mxu1 %v1977_v54 }
 0x513   :  { %2566 = vmatprep.mubr.bf16.mxu0 %v6555_v47  ;;  %2792 = vmatprep.mubr.bf16.mxu1 %v6555_v47  ;;  %v1992_v47 = vld [vmem:[#allocation3 + $0x670] sm:$0xff] }
 0x515   :  { %2622 = vmatpush1.bf16.msra.mxu0 %v1974_v22  ;;  %2848 = vmatpush1.bf16.msra.mxu1 %v1976_v55 }
 0x516   :  { %2623 = vmatprep.subr.bf16.mxu0 %v1983_v6  ;;  %2849 = vmatprep.subr.bf16.mxu1 %v1985_v53 }
 0x518   :  { %2567 = vmatmul.mubr.bf16.gmra.mrb[96].mxu0 %v6563_v34  ;;  %2793 = vmatmul.mubr.bf16.gmra.mrb[112].mxu1 %v6563_v34  ;;  %v2009_v34 = vld [vmem:[#allocation3 + $0x6f8] sm:$0xff] }
 0x519   :  { %2624 = vmatpush1.bf16.msra.mxu0 %v1982_v5  ;;  %2850 = vmatpush1.bf16.msra.mxu1 %v1984_v43 }
 0x51a   :  { %2625 = vmatprep.subr.bf16.mxu0 %v1991_v21  ;;  %2851 = vmatprep.subr.bf16.mxu1 %v1993_v1 }
 0x51b   :  { %2576 = vmatprep.mubr.bf16.mxu0 %v6567_v46  ;;  %2802 = vmatprep.mubr.bf16.mxu1 %v6567_v46  ;;  %v2008_v46 = vld [vmem:[#allocation3 + $0x6f0] sm:$0xff] }
 0x51d   :  { %2626 = vmatpush1.bf16.msra.mxu0 %v1990_v28  ;;  %2852 = vmatpush1.bf16.msra.mxu1 %v1992_v47 }
 0x51e   :  { %2627 = vmatprep.subr.bf16.mxu0 %v1999_v8  ;;  %2853 = vmatprep.subr.bf16.mxu1 %v2001_v10 }
 0x520   :  { %2577 = vmatmul.mubr.bf16.gmra.mrb[100].mxu0 %v6575_v41  ;;  %2803 = vmatmul.mubr.bf16.gmra.mrb[116].mxu1 %v6575_v41  ;;  %v2025_v41 = vld [vmem:[#allocation3 + $0x778] sm:$0xff] }
 0x521   :  { %2628 = vmatpush1.bf16.msra.mxu0 %v1998_v42  ;;  %2854 = vmatpush1.bf16.msra.mxu1 %v2000_v48 }
 0x522   :  { %2629 = vmatprep.subr.bf16.mxu0 %v2007_v39  ;;  %2855 = vmatprep.subr.bf16.mxu1 %v2009_v34 }
 0x523   :  { %2586 = vmatprep.mubr.bf16.mxu0 %v6579_v12  ;;  %2812 = vmatprep.mubr.bf16.mxu1 %v6579_v12  ;;  %v2024_v12 = vld [vmem:[#allocation3 + $0x770] sm:$0xff] }
 0x525   :  { %2630 = vmatpush1.bf16.msra.mxu0 %v2006_v33  ;;  %2856 = vmatpush1.bf16.msra.mxu1 %v2008_v46 }
 0x526   :  { %2631 = vmatprep.subr.bf16.mxu0 %v2015_v11  ;;  %2857 = vmatprep.subr.bf16.mxu1 %v2017_v56 }
 0x528   :  { %2587 = vmatmul.mubr.bf16.gmra.mrb[104].mxu0 %v6587_v27  ;;  %2813 = vmatmul.mubr.bf16.gmra.mrb[120].mxu1 %v6587_v27  ;;  %v2041_v27 = vld [vmem:[#allocation3 + $0x7f8] sm:$0xff] }
 0x529   :  { %2632 = vmatpush1.bf16.msra.mxu0 %v2014_v60  ;;  %2858 = vmatpush1.bf16.msra.mxu1 %v2016_v37 }
 0x52a   :  { %2633 = vmatprep.subr.bf16.mxu0 %v2023_v13  ;;  %2859 = vmatprep.subr.bf16.mxu1 %v2025_v41 }
 0x52b   :  { %2596 = vmatprep.mubr.bf16.mxu0 %v6591_v25  ;;  %2822 = vmatprep.mubr.bf16.mxu1 %v6591_v25  ;;  %v2040_v25 = vld [vmem:[#allocation3 + $0x7f0] sm:$0xff] }
 0x52d   :  { %2634 = vmatpush1.bf16.msra.mxu0 %v2022_v45  ;;  %2860 = vmatpush1.bf16.msra.mxu1 %v2024_v12 }
 0x52e   :  { %2635 = vmatprep.subr.bf16.mxu0 %v2031_v26  ;;  %2861 = vmatprep.subr.bf16.mxu1 %v2033_v32 }
 0x530   :  { %2597 = vmatmul.mubr.bf16.gmra.mrb[108].mxu0 %v6599_v57  ;;  %2823 = vmatmul.mubr.bf16.gmra.mrb[124].mxu1 %v6599_v57 }
 0x531   :  { %2636 = vmatpush1.bf16.msra.mxu0 %v2030_v3  ;;  %2862 = vmatpush1.bf16.msra.mxu1 %v2032_v61 }
 0x532   :  { %2637 = vmatprep.subr.bf16.mxu0 %v2039_v23  ;;  %2863 = vmatprep.subr.bf16.mxu1 %v2041_v27 }
 0x533   :  { %2639 = vmatprep.mubr.bf16.mxu0 %v6603_v20  ;;  %2865 = vmatprep.mubr.bf16.mxu1 %v6603_v20 }
 0x535   :  { %2638 = vmatpush1.bf16.msra.mxu0 %v2038_v2  ;;  %2864 = vmatpush1.bf16.msra.mxu1 %v2040_v25 }
 0x538   :  { %2640 = vmatmul.mubr.bf16.vlgmr.msra.gmra.mrb[80].mxu0 %v6611_v29  ;;  %2866 = vmatmul.mubr.bf16.vlgmr.msra.gmra.mrb[96].mxu1 %v6611_v29 }
 0x539   :  { %2649 = vmatprep.mubr.bf16.mxu0 %v6615_v9  ;;  %2875 = vmatprep.mubr.bf16.mxu1 %v6615_v9 }
 0x540   :  { %2650 = vmatmul.mubr.bf16.gmra.mrb[84].mxu0 %v6623_v17  ;;  %2876 = vmatmul.mubr.bf16.gmra.mrb[100].mxu1 %v6623_v17 }
 0x541   :  { %2659 = vmatprep.mubr.bf16.mxu0 %v6627_v38  ;;  %2885 = vmatprep.mubr.bf16.mxu1 %v6627_v38 }
 0x548   :  { %2660 = vmatmul.mubr.bf16.gmra.mrb[88].mxu0 %v6635_v24  ;;  %2886 = vmatmul.mubr.bf16.gmra.mrb[104].mxu1 %v6635_v24 }
 0x549   :  { %2669 = vmatprep.mubr.bf16.mxu0 %v6639_v44  ;;  %2895 = vmatprep.mubr.bf16.mxu1 %v6639_v44 }
 0x550   :  { %2670 = vmatmul.mubr.bf16.gmra.mrb[92].mxu0 %v6647_v30  ;;  %2896 = vmatmul.mubr.bf16.gmra.mrb[108].mxu1 %v6647_v30 }
 0x551   :  { %2679 = vmatprep.mubr.bf16.mxu0 %v6651_v52  ;;  %2905 = vmatprep.mubr.bf16.mxu1 %v6651_v52 }
 0x558   :  { %2680 = vmatmul.mubr.bf16.gmra.mrb[96].mxu0 %v6659_v15  ;;  %2906 = vmatmul.mubr.bf16.gmra.mrb[112].mxu1 %v6659_v15 }
 0x559   :  { %2689 = vmatprep.mubr.bf16.mxu0 %v6663_v59  ;;  %2915 = vmatprep.mubr.bf16.mxu1 %v6663_v59 }
 0x560   :  { %2690 = vmatmul.mubr.bf16.gmra.mrb[100].mxu0 %v6671_v7  ;;  %2916 = vmatmul.mubr.bf16.gmra.mrb[116].mxu1 %v6671_v7 }
 0x561   :  { %2699 = vmatprep.mubr.bf16.mxu0 %v6675_v40  ;;  %2925 = vmatprep.mubr.bf16.mxu1 %v6675_v40 }
 0x568   :  { %2700 = vmatmul.mubr.bf16.gmra.mrb[104].mxu0 %v6683_v4  ;;  %2926 = vmatmul.mubr.bf16.gmra.mrb[120].mxu1 %v6683_v4 }
 0x569   :  { %2709 = vmatprep.mubr.bf16.mxu0 %v6687_v49  ;;  %2935 = vmatprep.mubr.bf16.mxu1 %v6687_v49 }
 0x570   :  { %2710 = vmatmul.mubr.bf16.gmra.mrb[108].mxu0 %v6695_v63  ;;  %2936 = vmatmul.mubr.bf16.gmra.mrb[124].mxu1 %v6695_v63 }
 0x58b   :  { %v6763_v57 = vpop.f32.mrb[48].mxu0  ;;  %v6765_v20 = vpop.f32.mrb[64].mxu1 }
 0x58c   :  { %v6767_v29 = vpop.f32.mrb[49].mxu0  ;;  %v6769_v9 = vpop.f32.mrb[65].mxu1  ;;  %v3122_v17 = vmul.f32 %v6763_v57, %v6763_v57  ;;  %v3124_v38 = vmul.f32 %v6765_v20, %v6765_v20 }
 0x58d   :  { %8614 = vst [vmem:[#allocation21_spill] sm:$0xff] %v6767_v29  ;;  %8615 = vst [vmem:[#allocation23_spill] sm:$0xff] %v6769_v9  ;;  %v3123_v24 = vmul.f32 %v6767_v29, %v6767_v29  ;;  %v3125_v44 = vmul.f32 %v6769_v9, %v6769_v9  ;;  %v6779_v30 = vpop.f32.mrb[50].mxu0  ;;  %v6781_v52 = vpop.f32.mrb[66].mxu1 }
 0x58e   :  { %v2946_v15 = vadd.f32 %v6779_v30, %v6763_v57  ;;  %v3130_v59 = vmul.f32 %v6779_v30, %v6779_v30  ;;  %v2988_v7 = vadd.f32 %v6781_v52, %v6765_v20  ;;  %v3132_v40 = vmul.f32 %v6781_v52, %v6781_v52  ;;  %v6791_v4 = vpop.f32.mrb[51].mxu0  ;;  %v6793_v49 = vpop.f32.mrb[67].mxu1 }
 0x58f   :  { %8616 = vst [vmem:[#allocation25_spill] sm:$0xff] %v6791_v4  ;;  %8617 = vst [vmem:[#allocation27_spill] sm:$0xff] %v6793_v49  ;;  %v2967_v63 = vadd.f32 %v6791_v4, %v6767_v29  ;;  %v3131_v58 = vmul.f32 %v6791_v4, %v6791_v4  ;;  %v3009_v62 = vadd.f32 %v6793_v49, %v6769_v9 }
 0x590   :  { %v3133_v0 = vmul.f32 %v6793_v49, %v6793_v49  ;;  %v3250_v18 = vadd.f32 %v3130_v59, %v3122_v17  ;;  %v3292_v50 = vadd.f32 %v3132_v40, %v3124_v38 }
 0x591   :  { %v3271_v35 = vadd.f32 %v3131_v58, %v3123_v24 }
 0x592   :  { %v3313_v31 = vadd.f32 %v3133_v0, %v3125_v44 }
 0x593   :  { %v6803_v51 = vpop.f32.mrb[52].mxu0  ;;  %v6805_v16 = vpop.f32.mrb[68].mxu1 }
 0x594   :  { %v2947_v36 = vadd.f32 %v2946_v15, %v6803_v51  ;;  %v3138_v14 = vmul.f32 %v6803_v51, %v6803_v51  ;;  %v2989_v19 = vadd.f32 %v2988_v7, %v6805_v16  ;;  %v3140_v54 = vmul.f32 %v6805_v16, %v6805_v16  ;;  %v6813_v22 = vpop.f32.mrb[53].mxu0  ;;  %v6815_v55 = vpop.f32.mrb[69].mxu1 }
 0x595   :  { %8618 = vst [vmem:[#allocation29_spill] sm:$0xff] %v6813_v22  ;;  %8619 = vst [vmem:[#allocation31_spill] sm:$0xff] %v6815_v55  ;;  %v2968_v6 = vadd.f32 %v2967_v63, %v6813_v22  ;;  %v3139_v53 = vmul.f32 %v6813_v22, %v6813_v22  ;;  %v3010_v5 = vadd.f32 %v3009_v62, %v6815_v55  ;;  %v6823_v21 = vpop.f32.mrb[54].mxu0  ;;  %v6825_v1 = vpop.f32.mrb[70].mxu1 }
 0x596   :  { %v3141_v43 = vmul.f32 %v6815_v55, %v6815_v55  ;;  %v3251_v28 = vadd.f32 %v3250_v18, %v3138_v14  ;;  %v3293_v47 = vadd.f32 %v3292_v50, %v3140_v54  ;;  %v2948_v8 = vadd.f32 %v2947_v36, %v6823_v21  ;;  %v6830_v42 = vpop.f32.mrb[55].mxu0  ;;  %v6832_v48 = vpop.f32.mrb[71].mxu1 }
 0x597   :  { %v3146_v10 = vmul.f32 %v6823_v21, %v6823_v21  ;;  %8620 = vst [vmem:[#allocation33_spill] sm:$0xff] %v6830_v42  ;;  %8621 = vst [vmem:[#allocation35_spill] sm:$0xff] %v6832_v48  ;;  %v3272_v39 = vadd.f32 %v3271_v35, %v3139_v53  ;;  %v2990_v33 = vadd.f32 %v2989_v19, %v6825_v1 }
 0x598   :  { %v3314_v34 = vadd.f32 %v3313_v31, %v3141_v43  ;;  %v3148_v46 = vmul.f32 %v6825_v1, %v6825_v1  ;;  %v2969_v56 = vadd.f32 %v2968_v6, %v6830_v42  ;;  %v3147_v60 = vmul.f32 %v6830_v42, %v6830_v42 }
 0x599   :  { %v3252_v11 = vadd.f32 %v3251_v28, %v3146_v10  ;;  %v3011_v37 = vadd.f32 %v3010_v5, %v6832_v48  ;;  %v3149_v41 = vmul.f32 %v6832_v48, %v6832_v48 }
 0x59a   :  { %v3294_v13 = vadd.f32 %v3293_v47, %v3148_v46  ;;  %v3273_v45 = vadd.f32 %v3272_v39, %v3147_v60 }
 0x59b   :  { %v3315_v12 = vadd.f32 %v3314_v34, %v3149_v41  ;;  %v6843_v26 = vpop.f32.mrb[56].mxu0  ;;  %v6845_v32 = vpop.f32.mrb[72].mxu1 }
 0x59c   :  { %v2949_v3 = vadd.f32 %v2948_v8, %v6843_v26  ;;  %v3154_v61 = vmul.f32 %v6843_v26, %v6843_v26  ;;  %v2991_v23 = vadd.f32 %v2990_v33, %v6845_v32  ;;  %v3156_v27 = vmul.f32 %v6845_v32, %v6845_v32  ;;  %v6853_v2 = vpop.f32.mrb[57].mxu0  ;;  %v6855_v25 = vpop.f32.mrb[73].mxu1 }
 0x59d   :  { %8622 = vst [vmem:[#allocation37_spill] sm:$0xff] %v6853_v2  ;;  %8623 = vst [vmem:[#allocation39_spill] sm:$0xff] %v6855_v25  ;;  %v2970_v17 = vadd.f32 %v2969_v56, %v6853_v2  ;;  %v3155_v38 = vmul.f32 %v6853_v2, %v6853_v2  ;;  %v3012_v24 = vadd.f32 %v3011_v37, %v6855_v25  ;;  %v6863_v15 = vpop.f32.mrb[58].mxu0  ;;  %v6865_v59 = vpop.f32.mrb[74].mxu1 }
 0x59e   :  { %v3157_v44 = vmul.f32 %v6855_v25, %v6855_v25  ;;  %v3253_v7 = vadd.f32 %v3252_v11, %v3154_v61  ;;  %v3295_v40 = vadd.f32 %v3294_v13, %v3156_v27  ;;  %v2950_v63 = vadd.f32 %v2949_v3, %v6863_v15  ;;  %v6870_v62 = vpop.f32.mrb[59].mxu0  ;;  %v6872_v0 = vpop.f32.mrb[75].mxu1 }
 0x59f   :  { %v3162_v58 = vmul.f32 %v6863_v15, %v6863_v15  ;;  %8624 = vst [vmem:[#allocation41_spill] sm:$0xff] %v6870_v62  ;;  %8625 = vst [vmem:[#allocation43_spill] sm:$0xff] %v6872_v0  ;;  %v3274_v18 = vadd.f32 %v3273_v45, %v3155_v38  ;;  %v2992_v35 = vadd.f32 %v2991_v23, %v6865_v59 }
 0x5a0   :  { %v3316_v50 = vadd.f32 %v3315_v12, %v3157_v44  ;;  %v3164_v31 = vmul.f32 %v6865_v59, %v6865_v59  ;;  %v2971_v14 = vadd.f32 %v2970_v17, %v6870_v62  ;;  %v3163_v19 = vmul.f32 %v6870_v62, %v6870_v62 }
 0x5a1   :  { %v3254_v36 = vadd.f32 %v3253_v7, %v3162_v58  ;;  %v3013_v54 = vadd.f32 %v3012_v24, %v6872_v0  ;;  %v3165_v53 = vmul.f32 %v6872_v0, %v6872_v0 }
 0x5a2   :  { %v3296_v6 = vadd.f32 %v3295_v40, %v3164_v31  ;;  %v3275_v5 = vadd.f32 %v3274_v18, %v3163_v19 }
 0x5a3   :  { %v3317_v43 = vadd.f32 %v3316_v50, %v3165_v53  ;;  %v6883_v28 = vpop.f32.mrb[60].mxu0  ;;  %v6885_v47 = vpop.f32.mrb[76].mxu1 }
 0x5a4   :  { %v2951_v8 = vadd.f32 %v2950_v63, %v6883_v28  ;;  %v3170_v10 = vmul.f32 %v6883_v28, %v6883_v28  ;;  %v2993_v39 = vadd.f32 %v2992_v35, %v6885_v47  ;;  %v3172_v34 = vmul.f32 %v6885_v47, %v6885_v47  ;;  %v6893_v33 = vpop.f32.mrb[61].mxu0  ;;  %v6895_v46 = vpop.f32.mrb[77].mxu1 }
 0x5a5   :  { %8626 = vst [vmem:[#allocation45_spill] sm:$0xff] %v6893_v33  ;;  %8627 = vst [vmem:[#allocation48_spill] sm:$0xff] %v6895_v46  ;;  %v2972_v11 = vadd.f32 %v2971_v14, %v6893_v33  ;;  %v3171_v56 = vmul.f32 %v6893_v33, %v6893_v33  ;;  %v3014_v60 = vadd.f32 %v3013_v54, %v6895_v46  ;;  %v6903_v13 = vpop.f32.mrb[62].mxu0  ;;  %v6905_v41 = vpop.f32.mrb[78].mxu1 }
 0x5a6   :  { %v3173_v37 = vmul.f32 %v6895_v46, %v6895_v46  ;;  %v3255_v45 = vadd.f32 %v3254_v36, %v3170_v10  ;;  %v3297_v12 = vadd.f32 %v3296_v6, %v3172_v34  ;;  %v2952_v3 = vadd.f32 %v2951_v8, %v6903_v13  ;;  %v6910_v23 = vpop.f32.mrb[63].mxu0  ;;  %v6912_v27 = vpop.f32.mrb[79].mxu1 }
 0x5a7   :  { %v3178_v61 = vmul.f32 %v6903_v13, %v6903_v13  ;;  %8628 = vst [vmem:[#allocation18_spill] sm:$0xff] %v6910_v23  ;;  %8629 = vst [vmem:[#allocation20_spill] sm:$0xff] %v6912_v27  ;;  %v3276_v17 = vadd.f32 %v3275_v5, %v3171_v56  ;;  %v2994_v24 = vadd.f32 %v2993_v39, %v6905_v41 }
 0x5a8   :  { %v3318_v38 = vadd.f32 %v3317_v43, %v3173_v37  ;;  %v3180_v44 = vmul.f32 %v6905_v41, %v6905_v41  ;;  %v2973_v40 = vadd.f32 %v2972_v11, %v6910_v23  ;;  %v3179_v63 = vmul.f32 %v6910_v23, %v6910_v23 }
 0x5a9   :  { %v3256_v7 = vadd.f32 %v3255_v45, %v3178_v61  ;;  %v3015_v58 = vadd.f32 %v3014_v60, %v6912_v27  ;;  %v3181_v50 = vmul.f32 %v6912_v27, %v6912_v27 }
 0x5aa   :  { %v3298_v18 = vadd.f32 %v3297_v12, %v3180_v44  ;;  %v3277_v35 = vadd.f32 %v3276_v17, %v3179_v63 }
 0x5ab   :  { %v3319_v31 = vadd.f32 %v3318_v38, %v3181_v50  ;;  %v6923_v36 = vpop.f32.mrb[64].mxu0  ;;  %v6925_v14 = vpop.f32.mrb[80].mxu1 }
 0x5ac   :  { %v2953_v19 = vadd.f32 %v2952_v3, %v6923_v36  ;;  %v3186_v54 = vmul.f32 %v6923_v36, %v6923_v36  ;;  %v2995_v6 = vadd.f32 %v2994_v24, %v6925_v14  ;;  %v3188_v53 = vmul.f32 %v6925_v14, %v6925_v14  ;;  %v6933_v5 = vpop.f32.mrb[65].mxu0  ;;  %v6935_v43 = vpop.f32.mrb[81].mxu1 }
 0x5ad   :  { %8630 = vst [vmem:[#allocation22_spill] sm:$0xff] %v6933_v5  ;;  %8631 = vst [vmem:[#allocation24_spill] sm:$0xff] %v6935_v43  ;;  %v2974_v8 = vadd.f32 %v2973_v40, %v6933_v5  ;;  %v3187_v10 = vmul.f32 %v6933_v5, %v6933_v5  ;;  %v3016_v39 = vadd.f32 %v3015_v58, %v6935_v43  ;;  %v6943_v11 = vpop.f32.mrb[66].mxu0  ;;  %v6945_v56 = vpop.f32.mrb[82].mxu1 }
 0x5ae   :  { %v3189_v34 = vmul.f32 %v6935_v43, %v6935_v43  ;;  %v3257_v60 = vadd.f32 %v3256_v7, %v3186_v54  ;;  %v3299_v37 = vadd.f32 %v3298_v18, %v3188_v53  ;;  %v2954_v45 = vadd.f32 %v2953_v19, %v6943_v11  ;;  %v6950_v3 = vpop.f32.mrb[67].mxu0  ;;  %v6952_v61 = vpop.f32.mrb[83].mxu1 }
 0x5af   :  { %v3194_v12 = vmul.f32 %v6943_v11, %v6943_v11  ;;  %8632 = vst [vmem:[#allocation26_spill] sm:$0xff] %v6950_v3  ;;  %8633 = vst [vmem:[#allocation28_spill] sm:$0xff] %v6952_v61  ;;  %v3278_v17 = vadd.f32 %v3277_v35, %v3187_v10  ;;  %v2996_v24 = vadd.f32 %v2995_v6, %v6945_v56 }
 0x5b0   :  { %v3320_v38 = vadd.f32 %v3319_v31, %v3189_v34  ;;  %v3196_v44 = vmul.f32 %v6945_v56, %v6945_v56  ;;  %v2975_v7 = vadd.f32 %v2974_v8, %v6950_v3  ;;  %v3195_v63 = vmul.f32 %v6950_v3, %v6950_v3 }
 0x5b1   :  { %v3258_v40 = vadd.f32 %v3257_v60, %v3194_v12  ;;  %v3017_v58 = vadd.f32 %v3016_v39, %v6952_v61  ;;  %v3197_v50 = vmul.f32 %v6952_v61, %v6952_v61 }
 0x5b2   :  { %v3300_v18 = vadd.f32 %v3299_v37, %v3196_v44  ;;  %v3279_v19 = vadd.f32 %v3278_v17, %v3195_v63 }
 0x5b3   :  { %v3321_v35 = vadd.f32 %v3320_v38, %v3197_v50  ;;  %v6963_v31 = vpop.f32.mrb[68].mxu0  ;;  %v6965_v54 = vpop.f32.mrb[84].mxu1 }
 0x5b4   :  { %v2955_v6 = vadd.f32 %v2954_v45, %v6963_v31  ;;  %v3202_v53 = vmul.f32 %v6963_v31, %v6963_v31  ;;  %v2997_v8 = vadd.f32 %v2996_v24, %v6965_v54  ;;  %v3204_v10 = vmul.f32 %v6965_v54, %v6965_v54  ;;  %v6973_v39 = vpop.f32.mrb[69].mxu0  ;;  %v6975_v34 = vpop.f32.mrb[85].mxu1 }
 0x5b5   :  { %8634 = vst [vmem:[#allocation30_spill] sm:$0xff] %v6973_v39  ;;  %8635 = vst [vmem:[#allocation32_spill] sm:$0xff] %v6975_v34  ;;  %v2976_v60 = vadd.f32 %v2975_v7, %v6973_v39  ;;  %v3203_v37 = vmul.f32 %v6973_v39, %v6973_v39  ;;  %v3018_v12 = vadd.f32 %v3017_v58, %v6975_v34  ;;  %v6983_v17 = vpop.f32.mrb[70].mxu0  ;;  %v6985_v38 = vpop.f32.mrb[86].mxu1 }
 0x5b6   :  { %v3205_v45 = vmul.f32 %v6975_v34, %v6975_v34  ;;  %v3259_v24 = vadd.f32 %v3258_v40, %v3202_v53  ;;  %v3301_v44 = vadd.f32 %v3300_v18, %v3204_v10  ;;  %v2956_v63 = vadd.f32 %v2955_v6, %v6983_v17  ;;  %v6990_v7 = vpop.f32.mrb[71].mxu0  ;;  %v6992_v61 = vpop.f32.mrb[87].mxu1 }
 0x5b7   :  { %v3210_v50 = vmul.f32 %v6983_v17, %v6983_v17  ;;  %8636 = vst [vmem:[#allocation34_spill] sm:$0xff] %v6990_v7  ;;  %8637 = vst [vmem:[#allocation36_spill] sm:$0xff] %v6992_v61  ;;  %v3280_v43 = vadd.f32 %v3279_v19, %v3203_v37  ;;  %v2998_v27 = vadd.f32 %v2997_v8, %v6985_v38 }
 0x5b8   :  { %v3322_v58 = vadd.f32 %v3321_v35, %v3205_v45  ;;  %v3212_v34 = vmul.f32 %v6985_v38, %v6985_v38  ;;  %v2977_v40 = vadd.f32 %v2976_v60, %v6990_v7  ;;  %v3211_v18 = vmul.f32 %v6990_v7, %v6990_v7 }
 0x5b9   :  { %v3260_v46 = vadd.f32 %v3259_v24, %v3210_v50  ;;  %v3019_v6 = vadd.f32 %v3018_v12, %v6992_v61  ;;  %v3213_v10 = vmul.f32 %v6992_v61, %v6992_v61 }
 0x5ba   :  { %v3302_v53 = vadd.f32 %v3301_v44, %v3212_v34  ;;  %v3281_v0 = vadd.f32 %v3280_v43, %v3211_v18 }
 0x5bb   :  { %v3323_v19 = vadd.f32 %v3322_v58, %v3213_v10  ;;  %v7003_v35 = vpop.f32.mrb[72].mxu0  ;;  %v7005_v8 = vpop.f32.mrb[88].mxu1 }
 0x5bc   :  { %v2957_v37 = vadd.f32 %v2956_v63, %v7003_v35  ;;  %v3218_v60 = vmul.f32 %v7003_v35, %v7003_v35  ;;  %v2999_v45 = vadd.f32 %v2998_v27, %v7005_v8  ;;  %v3220_v12 = vmul.f32 %v7005_v8, %v7005_v8  ;;  %v7013_v34 = vpop.f32.mrb[73].mxu0  ;;  %v7015_v24 = vpop.f32.mrb[89].mxu1 }
 0x5bd   :  { %8638 = vst [vmem:[#allocation38_spill] sm:$0xff] %v7013_v34  ;;  %8639 = vst [vmem:[#allocation40_spill] sm:$0xff] %v7015_v24  ;;  %v2978_v43 = vadd.f32 %v2977_v40, %v7013_v34  ;;  %v3219_v44 = vmul.f32 %v7013_v34, %v7013_v34  ;;  %v3020_v50 = vadd.f32 %v3019_v6, %v7015_v24  ;;  %v7023_v58 = vpop.f32.mrb[74].mxu0  ;;  %v7025_v27 = vpop.f32.mrb[90].mxu1 }
 0x5be   :  { %v3221_v63 = vmul.f32 %v7015_v24, %v7015_v24  ;;  %v3261_v18 = vadd.f32 %v3260_v46, %v3218_v60  ;;  %v3303_v10 = vadd.f32 %v3302_v53, %v3220_v12  ;;  %v2958_v61 = vadd.f32 %v2957_v37, %v7023_v58  ;;  %v7030_v40 = vpop.f32.mrb[75].mxu0  ;;  %v7032_v48 = vpop.f32.mrb[91].mxu1 }
 0x5bf   :  { %v3226_v25 = vmul.f32 %v7023_v58, %v7023_v58  ;;  %8640 = vst [vmem:[#allocation42_spill] sm:$0xff] %v7030_v40  ;;  %8641 = vst [vmem:[#allocation44_spill] sm:$0xff] %v7032_v48  ;;  %v3282_v55 = vadd.f32 %v3281_v0, %v3219_v44  ;;  %v3000_v49 = vadd.f32 %v2999_v45, %v7025_v27 }
 0x5c0   :  { %v3324_v6 = vadd.f32 %v3323_v19, %v3221_v63  ;;  %v3228_v24 = vmul.f32 %v7025_v27, %v7025_v27  ;;  %v2979_v46 = vadd.f32 %v2978_v43, %v7030_v40  ;;  %v3227_v53 = vmul.f32 %v7030_v40, %v7030_v40 }
 0x5c1   :  { %v3262_v9 = vadd.f32 %v3261_v18, %v3226_v25  ;;  %v3021_v37 = vadd.f32 %v3020_v50, %v7032_v48  ;;  %v3229_v12 = vmul.f32 %v7032_v48, %v7032_v48 }
 0x5c2   :  { %v3304_v60 = vadd.f32 %v3303_v10, %v3228_v24  ;;  %v3283_v34 = vadd.f32 %v3282_v55, %v3227_v53 }
 0x5c3   :  { %v3325_v0 = vadd.f32 %v3324_v6, %v3229_v12  ;;  %v7043_v19 = vpop.f32.mrb[76].mxu0  ;;  %v7045_v45 = vpop.f32.mrb[92].mxu1 }
 0x5c4   :  { %v2959_v44 = vadd.f32 %v2958_v61, %v7043_v19  ;;  %v3234_v25 = vmul.f32 %v7043_v19, %v7043_v19  ;;  %v3001_v43 = vadd.f32 %v3000_v49, %v7045_v45  ;;  %v3236_v50 = vmul.f32 %v7045_v45, %v7045_v45  ;;  %v7053_v24 = vpop.f32.mrb[77].mxu0  ;;  %v7055_v63 = vpop.f32.mrb[93].mxu1 }
 0x5c5   :  { %8642 = vst [vmem:[#allocation46_spill] sm:$0xff] %v7053_v24  ;;  %8643 = vst [vmem:[#allocation49_spill] sm:$0xff] %v7055_v63  ;;  %v2980_v55 = vadd.f32 %v2979_v46, %v7053_v24  ;;  %v3235_v18 = vmul.f32 %v7053_v24, %v7053_v24  ;;  %v3022_v10 = vadd.f32 %v3021_v37, %v7055_v63  ;;  %v7063_v6 = vpop.f32.mrb[78].mxu0  ;;  %v7065_v49 = vpop.f32.mrb[94].mxu1 }
 0x5c6   :  { %v3237_v61 = vmul.f32 %v7055_v63, %v7055_v63  ;;  %8644 = vst [vmem:[#allocation50_spill] sm:$0xff] %v7065_v49  ;;  %v3263_v53 = vadd.f32 %v3262_v9, %v3234_v25  ;;  %v3305_v12 = vadd.f32 %v3304_v60, %v3236_v50  ;;  %v2960_v48 = vadd.f32 %v2959_v44, %v7063_v6  ;;  %v7070_v46 = vpop.f32.mrb[79].mxu0  ;;  %v7072_v7 = vpop.f32.mrb[95].mxu1 }
 0x5c7   :  { %v3242_v40 = vmul.f32 %v7063_v6, %v7063_v6  ;;  %8645 = vst [vmem:[#allocation17_spill] sm:$0xff] %v7070_v46  ;;  %8646 = vst [vmem:[#allocation19_spill] sm:$0xff] %v7072_v7  ;;  %v3284_v24 = vadd.f32 %v3283_v34, %v3235_v18  ;;  %v3002_v39 = vadd.f32 %v3001_v43, %v7065_v49 }
 0x5c8   :  { %v3326_v37 = vadd.f32 %v3325_v0, %v3237_v61  ;;  %v3244_v63 = vmul.f32 %v7065_v49, %v7065_v49  ;;  %v2961_v3 = vrot.slane %v2960_v48, 4  ;;  %v2981_v9 = vadd.f32 %v2980_v55, %v7070_v46 }
 0x5c9   :  { %v3264_v5 = vadd.f32 %v3263_v53, %v3242_v40  ;;  %v3243_v60 = vmul.f32 %v7070_v46, %v7070_v46  ;;  %v3003_v44 = vrot.slane %v3002_v39, 4  ;;  %v3023_v50 = vadd.f32 %v3022_v10, %v7072_v7 }
 0x5ca   :  { %v3306_v25 = vadd.f32 %v3305_v12, %v3244_v63  ;;  %v3245_v34 = vmul.f32 %v7072_v7, %v7072_v7  ;;  %v2962_v0 = vadd.f32 %v2961_v3, %v2960_v48  ;;  %v2982_v43 = vrot.slane %v2981_v9, 4 }
 0x5cb   :  { %v3265_v18 = vrot.slane %v3264_v5, 4  ;;  %v3285_v61 = vadd.f32 %v3284_v24, %v3243_v60  ;;  %v3004_v23 = vadd.f32 %v3003_v44, %v3002_v39  ;;  %v3024_v62 = vrot.slane %v3023_v50, 4 }
 0x5cc   :  { %v3307_v33 = vrot.slane %v3306_v25, 4  ;;  %v3327_v40 = vadd.f32 %v3326_v37, %v3245_v34  ;;  %v2963_v53 = vrot.slane %v2962_v0, 2  ;;  %v2983_v2 = vadd.f32 %v2982_v43, %v2981_v9 }
 0x5cd   :  { %v3266_v55 = vadd.f32 %v3265_v18, %v3264_v5  ;;  %v3286_v42 = vrot.slane %v3285_v61, 4  ;;  %v3005_v46 = vrot.slane %v3004_v23, 2  ;;  %v3025_v63 = vadd.f32 %v3024_v62, %v3023_v50 }
 0x5ce   :  { %v3308_v22 = vadd.f32 %v3307_v33, %v3306_v25  ;;  %v3328_v12 = vrot.slane %v3327_v40, 4  ;;  %v2964_v10 = vadd.f32 %v2963_v53, %v2962_v0  ;;  %v2984_v29 = vrot.slane %v2983_v2, 2 }
 0x5cf   :  { %v3267_v4 = vrot.slane %v3266_v55, 2  ;;  %v3287_v7 = vadd.f32 %v3286_v42, %v3285_v61  ;;  %v3006_v48 = vadd.f32 %v3005_v46, %v3004_v23  ;;  %v3026_v49 = vrot.slane %v3025_v63, 2 }
 0x5d0   :  { %v3309_v3 = vrot.slane %v3308_v22, 2  ;;  %v3329_v24 = vadd.f32 %v3328_v12, %v3327_v40  ;;  %v2965_v39 = vrot.slane %v2964_v10, 1  ;;  %v2985_v44 = vadd.f32 %v2984_v29, %v2983_v2 }
 0x5d1   :  { %v3268_v60 = vadd.f32 %v3267_v4, %v3266_v55  ;;  %v3288_v37 = vrot.slane %v3287_v7, 2  ;;  %v3007_v34 = vrot.slane %v3006_v48, 1  ;;  %v3027_v9 = vadd.f32 %v3026_v49, %v3025_v63 }
 0x5d2   :  { %v3310_v5 = vadd.f32 %v3309_v3, %v3308_v22  ;;  %v3330_v18 = vrot.slane %v3329_v24, 2  ;;  %v2966_v43 = vadd.f32 %v2965_v39, %v2964_v10  ;;  %v2986_v62 = vrot.slane %v2985_v44, 1 }
 0x5d3   :  { %v3269_v33 = vrot.slane %v3268_v60, 1  ;;  %v3289_v25 = vadd.f32 %v3288_v37, %v3287_v7  ;;  %v3008_v50 = vadd.f32 %v3007_v34, %v3006_v48  ;;  %v3028_v53 = vrot.slane %v3027_v9, 1 }
 0x5d4   :  { %v3311_v0 = vrot.slane %v3310_v5, 1  ;;  %v3331_v42 = vadd.f32 %v3330_v18, %v3329_v24  ;;  %v3114_v23 = vmul.f32 0.0078125, %v2966_v43  ;;  %v2987_v61 = vadd.f32 %v2986_v62, %v2985_v44 }
 0x5d5   :  { %v3270_v46 = vadd.f32 %v3269_v33, %v3268_v60  ;;  %v3290_v40 = vrot.slane %v3289_v25, 1  ;;  %v7083_v12 = vmul.f32 0.0078125, %v3008_v50  ;;  %v3029_v4 = vadd.f32 %v3028_v53, %v3027_v9 }
 0x5d6   :  { %v3312_v29 = vadd.f32 %v3311_v0, %v3310_v5  ;;  %v3332_v2 = vrot.slane %v3331_v42, 1  ;;  %v3426_v49 = vmul.f32 %v3114_v23, %v3114_v23  ;;  %v7085_v55 = vmul.f32 0.0078125, %v2987_v61 }
 0x5d7   :  { %v3418_v22 = vmul.f32 0.0078125, %v3270_v46  ;;  %v3428_v7 = vmul.f32 %v7083_v12, %v7083_v12  ;;  %v3291_v10 = vadd.f32 %v3290_v40, %v3289_v25  ;;  %v7091_v24 = vmul.f32 0.0078125, %v3029_v4 }
 0x5d8   :  { %v3420_v63 = vmul.f32 0.0078125, %v3312_v29  ;;  %v3427_v3 = vmul.f32 %v7085_v55, %v7085_v55  ;;  %v3333_v44 = vadd.f32 %v3332_v2, %v3331_v42  ;;  %v3458_v25 = vsub.f32 0.0, %v3114_v23  ;;  %v8696_v42 = vld [vmem:[#allocation38_spill] sm:$0xff] }
 0x5d9   :  { %v3434_v48 = vsub.f32 %v3418_v22, %v3426_v49  ;;  %v3419_v60 = vmul.f32 0.0078125, %v3291_v10  ;;  %v3429_v34 = vmul.f32 %v7091_v24, %v7091_v24  ;;  %v3460_v0 = vsub.f32 0.0, %v7083_v12 }
 0x5da   :  { %v3436_v39 = vsub.f32 %v3420_v63, %v3428_v7  ;;  %v3421_v9 = vmul.f32 0.0078125, %v3333_v44  ;;  %v3459_v53 = vsub.f32 0.0, %v7085_v55 }
 0x5db   :  { %v3442_v37 = vadd.f32 0.8, %v3434_v48  ;;  %v3435_v5 = vsub.f32 %v3419_v60, %v3427_v3 }
 0x5dc   :  { %v3437_v18 = vsub.f32 %v3421_v9, %v3429_v34  ;;  %v3444_v43 = vadd.f32 0.8, %v3436_v39 }
 0x5dd   :  { %5222 = vrsqrt.f32 %v3442_v37  ;;  %v3443_v33 = vadd.f32 0.8, %v3435_v5 }
 0x5de   :  { %v3445_v62 = vadd.f32 0.8, %v3437_v18  ;;  %5224 = vrsqrt.f32 %v3444_v43 }
 0x5df   :  { %5226 = vrsqrt.f32 %v3443_v33 }
 0x5e0   :  { %5228 = vrsqrt.f32 %v3445_v62 }
 0x5e7   :  { %v5223_v50 = vpop.eup %5222 }
 0x5e8   :  { %v3466_v46 = vmul.f32 %v5223_v50, %v3458_v25  ;;  %v3474_v61 = vmul.f32 %v5223_v50, %v6763_v57  ;;  %v3482_v40 = vmul.f32 %v5223_v50, %v6779_v30  ;;  %v3490_v29 = vmul.f32 %v5223_v50, %v6803_v51 }
 0x5e9   :  { %v3498_v4 = vmul.f32 %v5223_v50, %v6823_v21  ;;  %v3506_v23 = vmul.f32 %v5223_v50, %v6843_v26  ;;  %v3514_v2 = vmul.f32 %v5223_v50, %v6863_v15  ;;  %v3522_v12 = vmul.f32 %v5223_v50, %v6883_v28 }
 0x5ea   :  { %v3530_v22 = vmul.f32 %v5223_v50, %v6903_v13  ;;  %v3538_v49 = vmul.f32 %v5223_v50, %v6923_v36  ;;  %v3546_v63 = vmul.f32 %v5223_v50, %v6943_v11  ;;  %v3554_v57 = vmul.f32 %v5223_v50, %v6963_v31 }
 0x5eb   :  { %v3562_v30 = vmul.f32 %v5223_v50, %v6983_v17  ;;  %v3570_v51 = vmul.f32 %v5223_v50, %v7003_v35  ;;  %v3578_v21 = vmul.f32 %v5223_v50, %v7023_v58  ;;  %v3586_v26 = vmul.f32 %v5223_v50, %v7043_v19  ;;  %v7114_v17 = vpop.eup %5224 }
 0x5ec   :  { %v3594_v15 = vmul.f32 %v5223_v50, %v7063_v6  ;;  %v3602_v7 = vadd.f32 %v3474_v61, %v3466_v46  ;;  %v3610_v28 = vadd.f32 %v3482_v40, %v3466_v46  ;;  %v3618_v10 = vadd.f32 %v3490_v29, %v3466_v46  ;;  %v7116_v19 = vpop.eup %5226 }
 0x5ed   :  { %v3626_v13 = vadd.f32 %v3498_v4, %v3466_v46  ;;  %v3634_v48 = vadd.f32 %v3506_v23, %v3466_v46  ;;  %v3642_v36 = vadd.f32 %v3514_v2, %v3466_v46  ;;  %v3650_v3 = vadd.f32 %v3522_v12, %v3466_v46  ;;  %v7118_v34 = vpop.eup %5228 }
 0x5ee   :  { %v3658_v11 = vadd.f32 %v3530_v22, %v3466_v46  ;;  %v3666_v39 = vadd.f32 %v3538_v49, %v3466_v46  ;;  %v3674_v31 = vadd.f32 %v3546_v63, %v3466_v46  ;;  %v3682_v60 = vadd.f32 %v3554_v57, %v3466_v46 }
 0x5ef   :  { %v3690_v35 = vadd.f32 %v3562_v30, %v3466_v46  ;;  %v3698_v44 = vadd.f32 %v3570_v51, %v3466_v46  ;;  %v3706_v58 = vadd.f32 %v3578_v21, %v3466_v46  ;;  %v3714_v37 = vadd.f32 %v3586_v26, %v3466_v46 }
 0x5f0   :  { %v3722_v6 = vadd.f32 %v3594_v15, %v3466_v46  ;;  %vm3730_vm0 = vcmp.gt.f32.partialorder %v3602_v7, 0.0  ;;  %vm3738_vm1 = vcmp.gt.f32.partialorder %v3610_v28, 0.0  ;;  %vm3746_vm2 = vcmp.gt.f32.partialorder %v3618_v10, 0.0 }
 0x5f1   :  { %vm3754_vm3 = vcmp.gt.f32.partialorder %v3626_v13, 0.0  ;;  %vm3762_vm4 = vcmp.gt.f32.partialorder %v3634_v48, 0.0  ;;  %vm3770_vm5 = vcmp.gt.f32.partialorder %v3642_v36, 0.0  ;;  %vm3778_vm6 = vcmp.gt.f32.partialorder %v3650_v3, 0.0 }
 0x5f2   :  { %vm3786_vm7 = vcmp.gt.f32.partialorder %v3658_v11, 0.0  ;;  %vm3794_vm8 = vcmp.gt.f32.partialorder %v3666_v39, 0.0  ;;  %vm3802_vm9 = vcmp.gt.f32.partialorder %v3674_v31, 0.0  ;;  %vm3810_vm10 = vcmp.gt.f32.partialorder %v3682_v60, 0.0 }
 0x5f3   :  { %vm3818_vm11 = vcmp.gt.f32.partialorder %v3690_v35, 0.0  ;;  %vm3826_vm12 = vcmp.gt.f32.partialorder %v3698_v44, 0.0  ;;  %vm3834_vm13 = vcmp.gt.f32.partialorder %v3706_v58, 0.0  ;;  %vm3842_vm14 = vcmp.gt.f32.partialorder %v3714_v37, 0.0 }
 0x5f4   :  { %vm3850_vm15 = vcmp.gt.f32.partialorder %v3722_v6, 0.0  ;;  %v3858_v5 = vmul.f32 0.2, %v3602_v7  ;;  %v3866_v9 = vmul.f32 0.2, %v3610_v28  ;;  %v3468_v18 = vmul.f32 %v7114_v17, %v3460_v0 }
 0x5f5   :  { %v3874_v43 = vmul.f32 0.2, %v3618_v10  ;;  %v3882_v33 = vmul.f32 0.2, %v3626_v13  ;;  %v3890_v62 = vmul.f32 0.2, %v3634_v48  ;;  %v3476_v25 = vmul.f32 %v7114_v17, %v6765_v20 }
 0x5f6   :  { %v3898_v50 = vmul.f32 0.2, %v3642_v36  ;;  %v3906_v46 = vmul.f32 0.2, %v3650_v3  ;;  %v3914_v61 = vmul.f32 0.2, %v3658_v11  ;;  %v7124_v40 = vsel %vm3730_vm0, %v3602_v7, %v3858_v5 }
 0x5f7   :  { %8647 = vst [vmem:[#allocation51_spill] sm:$0xff] %v7124_v40  ;;  %v3922_v29 = vmul.f32 0.2, %v3666_v39  ;;  %v3930_v4 = vmul.f32 0.2, %v3674_v31  ;;  %v7127_v2 = vsel %vm3738_vm1, %v3610_v28, %v3866_v9  ;;  %v7130_v49 = vsel %vm3746_vm2, %v3618_v10, %v3874_v43 }
 0x5f8   :  { %v3938_v23 = vmul.f32 0.2, %v3682_v60  ;;  %8648 = vst [vmem:[#allocation52_spill] sm:$0xff] %v7127_v2  ;;  %v3946_v12 = vmul.f32 0.2, %v3690_v35  ;;  %8649 = vst [vmem:[#allocation47_spill] sm:$0xff] %v7130_v49  ;;  %v7133_v57 = vsel %vm3754_vm3, %v3626_v13, %v3882_v33  ;;  %v7136_v30 = vsel %vm3762_vm4, %v3634_v48, %v3890_v62 }
 0x5f9   :  { %v3954_v0 = vmul.f32 0.2, %v3698_v44  ;;  %v3962_v22 = vmul.f32 0.2, %v3706_v58  ;;  %v3970_v63 = vmul.f32 0.2, %v3714_v37  ;;  %v7139_v51 = vsel %vm3770_vm5, %v3642_v36, %v3898_v50 }
 0x5fa   :  { %v3978_v20 = vmul.f32 0.2, %v3722_v6  ;;  %8650 = vst [vmem:[#allocation53_spill] sm:$0xff] %v7133_v57  ;;  %8651 = vst [vmem:[#allocation54_spill] sm:$0xff] %v7136_v30  ;;  %v7142_v21 = vsel %vm3778_vm6, %v3650_v3, %v3906_v46  ;;  %v7145_v26 = vsel %vm3786_vm7, %v3658_v11, %v3914_v61  ;;  %v7148_v15 = vsel %vm3794_vm8, %v3666_v39, %v3922_v29 }
 0x5fb   :  { %8652 = vst [vmem:[#allocation55_spill] sm:$0xff] %v7139_v51  ;;  %8653 = vst [vmem:[#allocation56_spill] sm:$0xff] %v7142_v21  ;;  %v7151_v7 = vsel %vm3802_vm9, %v3674_v31, %v3930_v4  ;;  %v7154_v28 = vsel %vm3810_vm10, %v3682_v60, %v3938_v23  ;;  %v7157_v10 = vsel %vm3818_vm11, %v3690_v35, %v3946_v12 }
 0x5fc   :  { %8654 = vst [vmem:[#allocation57_spill] sm:$0xff] %v7145_v26  ;;  %8655 = vst [vmem:[#allocation58_spill] sm:$0xff] %v7148_v15  ;;  %v7160_v13 = vsel %vm3826_vm12, %v3698_v44, %v3954_v0  ;;  %v7163_v48 = vsel %vm3834_vm13, %v3706_v58, %v3962_v22  ;;  %v7166_v36 = vsel %vm3842_vm14, %v3714_v37, %v3970_v63  ;;  %v8663_v37 = vld [vmem:[#allocation50_spill] sm:$0xff] }
 0x5fd   :  { %8656 = vst [vmem:[#allocation59_spill] sm:$0xff] %v7151_v7  ;;  %8657 = vst [vmem:[#allocation60_spill] sm:$0xff] %v7154_v28  ;;  %v7169_v3 = vsel %vm3850_vm15, %v3722_v6, %v3978_v20  ;;  %v3484_v11 = vmul.f32 %v7114_v17, %v6781_v52  ;;  %v3492_v39 = vmul.f32 %v7114_v17, %v6805_v16 }
 0x5fe   :  { %8658 = vst [vmem:[#allocation61_spill] sm:$0xff] %v7157_v10  ;;  %8659 = vst [vmem:[#allocation62_spill] sm:$0xff] %v7160_v13  ;;  %v3500_v31 = vmul.f32 %v7114_v17, %v6825_v1  ;;  %v3508_v60 = vmul.f32 %v7114_v17, %v6845_v32  ;;  %v3516_v35 = vmul.f32 %v7114_v17, %v6865_v59 }
 0x5ff   :  { %8660 = vst [vmem:[#allocation63_spill] sm:$0xff] %v7163_v48  ;;  %8661 = vst [vmem:[#allocation64_spill] sm:$0xff] %v7166_v36  ;;  %v3524_v44 = vmul.f32 %v7114_v17, %v6885_v47  ;;  %v3532_v58 = vmul.f32 %v7114_v17, %v6905_v41  ;;  %v3540_v52 = vmul.f32 %v7114_v17, %v6925_v14 }
 0x600   :  { %8662 = vst [vmem:[#allocation65_spill] sm:$0xff] %v7169_v3  ;;  %v3548_v16 = vmul.f32 %v7114_v17, %v6945_v56  ;;  %v3556_v1 = vmul.f32 %v7114_v17, %v6965_v54  ;;  %v3564_v32 = vmul.f32 %v7114_v17, %v6985_v38  ;;  %v3572_v59 = vmul.f32 %v7114_v17, %v7005_v8  ;;  %v8699_v3 = vld [vmem:[#allocation17_spill] sm:$0xff] }
 0x601   :  { %v3580_v47 = vmul.f32 %v7114_v17, %v7025_v27  ;;  %v3588_v41 = vmul.f32 %v7114_v17, %v7045_v45  ;;  %v3596_v14 = vmul.f32 %v7114_v17, %v8663_v37  ;;  %v3604_v6 = vadd.f32 %v3476_v25, %v3468_v18 }
 0x602   :  { %v3612_v56 = vadd.f32 %v3484_v11, %v3468_v18  ;;  %v3620_v5 = vadd.f32 %v3492_v39, %v3468_v18  ;;  %v3628_v9 = vadd.f32 %v3500_v31, %v3468_v18  ;;  %v3636_v54 = vadd.f32 %v3508_v60, %v3468_v18 }
 0x603   :  { %v3644_v43 = vadd.f32 %v3516_v35, %v3468_v18  ;;  %v3652_v33 = vadd.f32 %v3524_v44, %v3468_v18  ;;  %v3660_v38 = vadd.f32 %v3532_v58, %v3468_v18  ;;  %v3668_v62 = vadd.f32 %v3540_v52, %v3468_v18 }
 0x604   :  { %v3676_v50 = vadd.f32 %v3548_v16, %v3468_v18  ;;  %v3684_v8 = vadd.f32 %v3556_v1, %v3468_v18  ;;  %v3692_v46 = vadd.f32 %v3564_v32, %v3468_v18  ;;  %v3700_v61 = vadd.f32 %v3572_v59, %v3468_v18 }
 0x605   :  { %v3708_v27 = vadd.f32 %v3580_v47, %v3468_v18  ;;  %v3716_v29 = vadd.f32 %v3588_v41, %v3468_v18  ;;  %v3724_v4 = vadd.f32 %v3596_v14, %v3468_v18  ;;  %vm3732_vm0 = vcmp.gt.f32.partialorder %v3604_v6, 0.0 }
 0x606   :  { %vm3740_vm1 = vcmp.gt.f32.partialorder %v3612_v56, 0.0  ;;  %vm3748_vm2 = vcmp.gt.f32.partialorder %v3620_v5, 0.0  ;;  %vm3756_vm3 = vcmp.gt.f32.partialorder %v3628_v9, 0.0  ;;  %vm3764_vm4 = vcmp.gt.f32.partialorder %v3636_v54, 0.0 }
 0x607   :  { %vm3772_vm5 = vcmp.gt.f32.partialorder %v3644_v43, 0.0  ;;  %vm3780_vm6 = vcmp.gt.f32.partialorder %v3652_v33, 0.0  ;;  %vm3788_vm7 = vcmp.gt.f32.partialorder %v3660_v38, 0.0  ;;  %vm3796_vm8 = vcmp.gt.f32.partialorder %v3668_v62, 0.0 }
 0x608   :  { %vm3804_vm9 = vcmp.gt.f32.partialorder %v3676_v50, 0.0  ;;  %vm3812_vm10 = vcmp.gt.f32.partialorder %v3684_v8, 0.0  ;;  %vm3820_vm11 = vcmp.gt.f32.partialorder %v3692_v46, 0.0  ;;  %vm3828_vm12 = vcmp.gt.f32.partialorder %v3700_v61, 0.0 }
 0x609   :  { %vm3836_vm13 = vcmp.gt.f32.partialorder %v3708_v27, 0.0  ;;  %vm3844_vm14 = vcmp.gt.f32.partialorder %v3716_v29, 0.0  ;;  %vm3852_vm15 = vcmp.gt.f32.partialorder %v3724_v4, 0.0  ;;  %v3860_v45 = vmul.f32 0.2, %v3604_v6 }
 0x60a   :  { %v3868_v17 = vmul.f32 0.2, %v3612_v56  ;;  %v3876_v25 = vmul.f32 0.2, %v3620_v5  ;;  %v3884_v18 = vmul.f32 0.2, %v3628_v9  ;;  %v7204_v12 = vmul.f32 %v7116_v19, %v3459_v53 }
 0x60b   :  { %v3892_v23 = vmul.f32 0.2, %v3636_v54  ;;  %v3900_v0 = vmul.f32 0.2, %v3644_v43  ;;  %v3908_v22 = vmul.f32 0.2, %v3652_v33  ;;  %v7207_v20 = vsel %vm3732_vm0, %v3604_v6, %v3860_v45 }
 0x60c   :  { %v3916_v63 = vmul.f32 0.2, %v3660_v38  ;;  %8664 = vst [vmem:[#allocation66_spill] sm:$0xff] %v7207_v20  ;;  %v3924_v11 = vmul.f32 0.2, %v3668_v62  ;;  %v7210_v60 = vsel %vm3740_vm1, %v3612_v56, %v3868_v17  ;;  %v7213_v55 = vsel %vm3748_vm2, %v3620_v5, %v3876_v25  ;;  %v7221_v32 = vpop.f32.mrb[80].mxu0 }
 0x60d   :  { %v3932_v39 = vmul.f32 0.2, %v3676_v50  ;;  %v3940_v31 = vmul.f32 0.2, %v3684_v8  ;;  %8665 = vst [vmem:[#allocation67_spill] sm:$0xff] %v7210_v60  ;;  %8666 = vst [vmem:[#allocation50_spill] sm:$0xff] %v7213_v55  ;;  %v7216_v16 = vsel %vm3756_vm3, %v3628_v9, %v3884_v18  ;;  %v7219_v1 = vsel %vm3764_vm4, %v3636_v54, %v3892_v23 }
 0x60e   :  { %v3948_v35 = vmul.f32 0.2, %v3692_v46  ;;  %v3956_v44 = vmul.f32 0.2, %v3700_v61  ;;  %v3964_v58 = vmul.f32 0.2, %v3708_v27  ;;  %v7226_v47 = vsel %vm3772_vm5, %v3644_v43, %v3900_v0 }
 0x60f   :  { %v3972_v53 = vmul.f32 0.2, %v3716_v29  ;;  %v3980_v52 = vmul.f32 0.2, %v3724_v4  ;;  %8667 = vst [vmem:[#allocation68_spill] sm:$0xff] %v7216_v16  ;;  %8668 = vst [vmem:[#allocation69_spill] sm:$0xff] %v7219_v1  ;;  %v7229_v41 = vsel %vm3780_vm6, %v3652_v33, %v3908_v22  ;;  %v7232_v37 = vsel %vm3788_vm7, %v3660_v38, %v3916_v63 }
 0x610   :  { %v7223_v59 = vpop.f32.mrb[96].mxu1  ;;  %8669 = vst [vmem:[#allocation70_spill] sm:$0xff] %v7226_v47  ;;  %8670 = vst [vmem:[#allocation71_spill] sm:$0xff] %v7229_v41  ;;  %v7235_v14 = vsel %vm3796_vm8, %v3668_v62, %v3924_v11  ;;  %v7237_v6 = vpop.f32.mrb[81].mxu0  ;;  %v7242_v5 = vsel %vm3804_vm9, %v3676_v50, %v3932_v39  ;;  %v7245_v9 = vsel %vm3812_vm10, %v3684_v8, %v3940_v31  ;;  %v8682_v8 = vld [vmem:[#allocation21_spill] sm:$0xff] }
 0x611   :  { %8671 = vst [vmem:[#allocation72_spill] sm:$0xff] %v7232_v37  ;;  %8672 = vst [vmem:[#allocation73_spill] sm:$0xff] %v7235_v14  ;;  %v7239_v56 = vpop.f32.mrb[97].mxu1  ;;  %v7248_v54 = vsel %vm3820_vm11, %v3692_v46, %v3948_v35  ;;  %v7251_v43 = vsel %vm3828_vm12, %v3700_v61, %v3956_v44  ;;  %v7253_v33 = vpop.f32.mrb[82].mxu0  ;;  %v7258_v62 = vsel %vm3836_vm13, %v3708_v27, %v3964_v58  ;;  %v8685_v25 = vld [vmem:[#allocation25_spill] sm:$0xff]  ;;  %v8691_v35 = vld [vmem:[#allocation18_spill] sm:$0xff] }
 0x612   :  { %8673 = vst [vmem:[#allocation74_spill] sm:$0xff] %v7237_v6  ;;  %8674 = vst [vmem:[#allocation75_spill] sm:$0xff] %v7239_v56  ;;  %v7255_v38 = vpop.f32.mrb[98].mxu1  ;;  %v7261_v45 = vsel %vm3844_vm14, %v3716_v29, %v3972_v53  ;;  %v7264_v50 = vsel %vm3852_vm15, %v3724_v4, %v3980_v52  ;;  %v3475_v46 = vmul.f32 %v7116_v19, %v8682_v8  ;;  %v7268_v17 = vpop.f32.mrb[83].mxu0  ;;  %v8686_v23 = vld [vmem:[#allocation29_spill] sm:$0xff]  ;;  %v8692_v58 = vld [vmem:[#allocation22_spill] sm:$0xff] }
 0x613   :  { %8675 = vst [vmem:[#allocation76_spill] sm:$0xff] %v7242_v5  ;;  %8676 = vst [vmem:[#allocation77_spill] sm:$0xff] %v7245_v9  ;;  %v7270_v61 = vpop.f32.mrb[99].mxu1  ;;  %v3483_v18 = vmul.f32 %v7116_v19, %v8685_v25  ;;  %v3491_v27 = vmul.f32 %v7116_v19, %v8686_v23  ;;  %v8687_v0 = vld [vmem:[#allocation33_spill] sm:$0xff]  ;;  %v3531_v44 = vmul.f32 %v7116_v19, %v8691_v35  ;;  %v8693_v52 = vld [vmem:[#allocation26_spill] sm:$0xff]  ;;  %v7303_v36 = vpop.f32.mrb[84].mxu0 }
 0x614   :  { %8677 = vst [vmem:[#allocation78_spill] sm:$0xff] %v7248_v54  ;;  %8678 = vst [vmem:[#allocation79_spill] sm:$0xff] %v7251_v43  ;;  %v3499_v29 = vmul.f32 %v7116_v19, %v8687_v0  ;;  %v8688_v22 = vld [vmem:[#allocation37_spill] sm:$0xff]  ;;  %v3539_v53 = vmul.f32 %v7116_v19, %v8692_v58  ;;  %v3547_v8 = vmul.f32 %v7116_v19, %v8693_v52  ;;  %v8694_v25 = vld [vmem:[#allocation30_spill] sm:$0xff]  ;;  %v7311_v43 = vpop.f32.mrb[85].mxu0 }
 0x615   :  { %8679 = vst [vmem:[#allocation80_spill] sm:$0xff] %v7258_v62  ;;  %8680 = vst [vmem:[#allocation81_spill] sm:$0xff] %v7261_v45  ;;  %v3507_v4 = vmul.f32 %v7116_v19, %v8688_v22  ;;  %v8689_v63 = vld [vmem:[#allocation41_spill] sm:$0xff]  ;;  %v3555_v23 = vmul.f32 %v7116_v19, %v8694_v25  ;;  %v8695_v0 = vld [vmem:[#allocation34_spill] sm:$0xff]  ;;  %v3595_v58 = vmul.f32 %v7116_v19, %v8699_v3  ;;  %v7305_v25 = vpop.f32.mrb[100].mxu1  ;;  %v7319_v13 = vpop.f32.mrb[86].mxu0 }
 0x616   :  { %8681 = vst [vmem:[#allocation82_spill] sm:$0xff] %v7264_v50  ;;  %8683 = vst [vmem:[#allocation21_spill] sm:$0xff] %v7268_v17  ;;  %v3515_v11 = vmul.f32 %v7116_v19, %v8689_v63  ;;  %v8690_v39 = vld [vmem:[#allocation45_spill] sm:$0xff]  ;;  %v3563_v22 = vmul.f32 %v7116_v19, %v8695_v0  ;;  %v3571_v63 = vmul.f32 %v7116_v19, %v8696_v42  ;;  %v8697_v50 = vld [vmem:[#allocation42_spill] sm:$0xff]  ;;  %v7327_v9 = vpop.f32.mrb[87].mxu0 }
 0x617   :  { %8684 = vst [vmem:[#allocation83_spill] sm:$0xff] %v7270_v61  ;;  %v3523_v31 = vmul.f32 %v7116_v19, %v8690_v39  ;;  %v3579_v39 = vmul.f32 %v7116_v19, %v8697_v50  ;;  %v8698_v45 = vld [vmem:[#allocation46_spill] sm:$0xff]  ;;  %v3603_v52 = vadd.f32 %v3475_v46, %v7204_v12  ;;  %v3611_v0 = vadd.f32 %v3483_v18, %v7204_v12 }
 0x618   :  { %v3587_v35 = vmul.f32 %v7116_v19, %v8698_v45  ;;  %v3619_v62 = vadd.f32 %v3491_v27, %v7204_v12  ;;  %v3627_v42 = vadd.f32 %v3499_v29, %v7204_v12  ;;  %v3635_v50 = vadd.f32 %v3507_v4, %v7204_v12  ;;  %8700 = vst [vmem:[#allocation25_spill] sm:$0xff] %v7311_v43  ;;  %v7313_v45 = vpop.f32.mrb[101].mxu1 }
 0x619   :  { %8701 = vst [vmem:[#allocation29_spill] sm:$0xff] %v7313_v45  ;;  %v3643_v19 = vadd.f32 %v3515_v11, %v7204_v12  ;;  %v3651_v3 = vadd.f32 %v3523_v31, %v7204_v12  ;;  %v3659_v46 = vadd.f32 %v3531_v44, %v7204_v12  ;;  %v3667_v48 = vadd.f32 %v3539_v53, %v7204_v12  ;;  %v7321_v18 = vpop.f32.mrb[102].mxu1 }
 0x61a   :  { %v3675_v27 = vadd.f32 %v3547_v8, %v7204_v12  ;;  %v3683_v29 = vadd.f32 %v3555_v23, %v7204_v12  ;;  %v3691_v4 = vadd.f32 %v3563_v22, %v7204_v12  ;;  %v3699_v54 = vadd.f32 %v3571_v63, %v7204_v12  ;;  %8702 = vst [vmem:[#allocation33_spill] sm:$0xff] %v7327_v9  ;;  %v7329_v11 = vpop.f32.mrb[103].mxu1 }
 0x61b   :  { %8703 = vst [vmem:[#allocation37_spill] sm:$0xff] %v7329_v11  ;;  %v3707_v31 = vadd.f32 %v3579_v39, %v7204_v12  ;;  %v3715_v44 = vadd.f32 %v3587_v35, %v7204_v12  ;;  %v3723_v53 = vadd.f32 %v3595_v58, %v7204_v12  ;;  %vm3731_vm0 = vcmp.gt.f32.partialorder %v3603_v52, 0.0  ;;  %v7334_v23 = vpop.f32.mrb[88].mxu0 }
 0x61c   :  { %vm3739_vm1 = vcmp.gt.f32.partialorder %v3611_v0, 0.0  ;;  %vm3747_vm2 = vcmp.gt.f32.partialorder %v3619_v62, 0.0  ;;  %vm3755_vm3 = vcmp.gt.f32.partialorder %v3627_v42, 0.0  ;;  %vm3763_vm4 = vcmp.gt.f32.partialorder %v3635_v50, 0.0 }
 0x61d   :  { %vm3771_vm5 = vcmp.gt.f32.partialorder %v3643_v19, 0.0  ;;  %vm3779_vm6 = vcmp.gt.f32.partialorder %v3651_v3, 0.0  ;;  %vm3787_vm7 = vcmp.gt.f32.partialorder %v3659_v46, 0.0  ;;  %vm3795_vm8 = vcmp.gt.f32.partialorder %v3667_v48, 0.0 }
 0x61e   :  { %vm3803_vm9 = vcmp.gt.f32.partialorder %v3675_v27, 0.0  ;;  %vm3811_vm10 = vcmp.gt.f32.partialorder %v3683_v29, 0.0  ;;  %vm3819_vm11 = vcmp.gt.f32.partialorder %v3691_v4, 0.0  ;;  %vm3827_vm12 = vcmp.gt.f32.partialorder %v3699_v54, 0.0 }
 0x61f   :  { %vm3835_vm13 = vcmp.gt.f32.partialorder %v3707_v31, 0.0  ;;  %vm3843_vm14 = vcmp.gt.f32.partialorder %v3715_v44, 0.0  ;;  %vm3851_vm15 = vcmp.gt.f32.partialorder %v3723_v53, 0.0  ;;  %v3859_v8 = vmul.f32 0.2, %v3603_v52 }
 0x620   :  { %v3867_v12 = vmul.f32 0.2, %v3611_v0  ;;  %v3875_v22 = vmul.f32 0.2, %v3619_v62  ;;  %v3883_v63 = vmul.f32 0.2, %v3627_v42  ;;  %v3126_v20 = vmul.f32 %v7221_v32, %v7221_v32 }
 0x621   :  { %v8704_v39 = vsub.f32 0.0, %v7091_v24  ;;  %v3891_v58 = vmul.f32 0.2, %v3635_v50  ;;  %v3899_v10 = vmul.f32 0.2, %v3643_v19  ;;  %v7342_v5 = vsel %vm3731_vm0, %v3603_v52, %v3859_v8 }
 0x622   :  { %v3907_v28 = vmul.f32 0.2, %v3651_v3  ;;  %8705 = vst [vmem:[#allocation41_spill] sm:$0xff] %v7342_v5  ;;  %v3915_v14 = vmul.f32 0.2, %v3659_v46  ;;  %v7345_v37 = vsel %vm3739_vm1, %v3611_v0, %v3867_v12  ;;  %v7348_v24 = vsel %vm3747_vm2, %v3619_v62, %v3875_v22  ;;  %v7365_v62 = vpop.f32.mrb[104].mxu1 }
 0x623   :  { %v7339_v35 = vmul.f32 %v7118_v34, %v8704_v39  ;;  %v3923_v7 = vmul.f32 0.2, %v3667_v48  ;;  %v3931_v15 = vmul.f32 0.2, %v3675_v27  ;;  %8706 = vst [vmem:[#allocation45_spill] sm:$0xff] %v7345_v37  ;;  %8707 = vst [vmem:[#allocation18_spill] sm:$0xff] %v7348_v24  ;;  %v7351_v51 = vsel %vm3755_vm3, %v3627_v42, %v3883_v63 }
 0x624   :  { %v3939_v41 = vmul.f32 0.2, %v3683_v29  ;;  %v3947_v26 = vmul.f32 0.2, %v3691_v4  ;;  %v3955_v21 = vmul.f32 0.2, %v3699_v54  ;;  %v7354_v52 = vsel %vm3763_vm4, %v3635_v50, %v3891_v58 }
 0x625   :  { %v3963_v39 = vmul.f32 0.2, %v3707_v31  ;;  %v3971_v47 = vmul.f32 0.2, %v3715_v44  ;;  %v3979_v1 = vmul.f32 0.2, %v3723_v53  ;;  %v7357_v8 = vsel %vm3771_vm5, %v3643_v19, %v3899_v10 }
 0x626   :  { %8708 = vst [vmem:[#allocation22_spill] sm:$0xff] %v7351_v51  ;;  %8709 = vst [vmem:[#allocation26_spill] sm:$0xff] %v7354_v52  ;;  %v7360_v0 = vsel %vm3779_vm6, %v3651_v3, %v3907_v28  ;;  %v7363_v12 = vsel %vm3787_vm7, %v3659_v46, %v3915_v14  ;;  %v7367_v22 = vpop.f32.mrb[89].mxu0  ;;  %v7370_v30 = vsel %vm3795_vm8, %v3667_v48, %v3923_v7  ;;  %v7381_v28 = vpop.f32.mrb[105].mxu1  ;;  %v8731_v63 = vld [vmem:[#allocation43_spill] sm:$0xff] }
 0x627   :  { %8710 = vst [vmem:[#allocation30_spill] sm:$0xff] %v7357_v8  ;;  %8711 = vst [vmem:[#allocation34_spill] sm:$0xff] %v7360_v0  ;;  %v7373_v42 = vsel %vm3803_vm9, %v3675_v27, %v3931_v15  ;;  %v7376_v50 = vsel %vm3811_vm10, %v3683_v29, %v3939_v41  ;;  %v7379_v10 = vsel %vm3819_vm11, %v3691_v4, %v3947_v26  ;;  %v7383_v14 = vpop.f32.mrb[90].mxu0  ;;  %v7397_v48 = vpop.f32.mrb[106].mxu1  ;;  %v8725_v41 = vld [vmem:[#allocation23_spill] sm:$0xff]  ;;  %v8743_v0 = vld [vmem:[#allocation44_spill] sm:$0xff] }
 0x628   :  { %8712 = vst [vmem:[#allocation38_spill] sm:$0xff] %v7363_v12  ;;  %8713 = vst [vmem:[#allocation42_spill] sm:$0xff] %v7367_v22  ;;  %v7386_v19 = vsel %vm3827_vm12, %v3699_v54, %v3955_v21  ;;  %v7389_v3 = vsel %vm3835_vm13, %v3707_v31, %v3963_v39  ;;  %v7392_v7 = vsel %vm3843_vm14, %v3715_v44, %v3971_v47  ;;  %v7399_v26 = vpop.f32.mrb[91].mxu0  ;;  %v8726_v27 = vld [vmem:[#allocation27_spill] sm:$0xff]  ;;  %v7409_v31 = vpop.f32.mrb[107].mxu1  ;;  %v8732_v39 = vld [vmem:[#allocation48_spill] sm:$0xff] }
 0x629   :  { %8714 = vst [vmem:[#allocation46_spill] sm:$0xff] %v7370_v30  ;;  %8715 = vst [vmem:[#allocation17_spill] sm:$0xff] %v7373_v42  ;;  %v7395_v15 = vsel %vm3851_vm15, %v3723_v53, %v3979_v1  ;;  %v3477_v46 = vmul.f32 %v7118_v34, %v8725_v41  ;;  %v3485_v21 = vmul.f32 %v7118_v34, %v8726_v27  ;;  %v8727_v54 = vld [vmem:[#allocation31_spill] sm:$0xff]  ;;  %v7411_v1 = vpop.f32.mrb[92].mxu0  ;;  %v8733_v27 = vld [vmem:[#allocation20_spill] sm:$0xff] }
 0x62a   :  { %8716 = vst [vmem:[#allocation84_spill] sm:$0xff] %v7376_v50  ;;  %8717 = vst [vmem:[#allocation85_spill] sm:$0xff] %v7379_v10  ;;  %v3493_v29 = vmul.f32 %v7118_v34, %v8727_v54  ;;  %v8728_v4 = vld [vmem:[#allocation35_spill] sm:$0xff]  ;;  %v3517_v58 = vmul.f32 %v7118_v34, %v8731_v63  ;;  %v3525_v41 = vmul.f32 %v7118_v34, %v8732_v39  ;;  %v7421_v54 = vpop.f32.mrb[108].mxu1  ;;  %v8739_v63 = vld [vmem:[#allocation36_spill] sm:$0xff] }
 0x62b   :  { %8718 = vst [vmem:[#allocation86_spill] sm:$0xff] %v7381_v28  ;;  %8719 = vst [vmem:[#allocation87_spill] sm:$0xff] %v7386_v19  ;;  %v3501_v47 = vmul.f32 %v7118_v34, %v8728_v4  ;;  %v8730_v44 = vld [vmem:[#allocation39_spill] sm:$0xff]  ;;  %v8736_v4 = vld [vmem:[#allocation24_spill] sm:$0xff]  ;;  %v3565_v42 = vmul.f32 %v7118_v34, %v8739_v63  ;;  %v7433_v39 = vpop.f32.mrb[109].mxu1  ;;  %v3581_v8 = vmul.f32 %v7118_v34, %v8743_v0 }
 0x62c   :  { %8720 = vst [vmem:[#allocation88_spill] sm:$0xff] %v7389_v3  ;;  %8721 = vst [vmem:[#allocation89_spill] sm:$0xff] %v7392_v7  ;;  %v3509_v53 = vmul.f32 %v7118_v34, %v8730_v44  ;;  %v7423_v7 = vpop.f32.mrb[93].mxu0  ;;  %v3541_v3 = vmul.f32 %v7118_v34, %v8736_v4  ;;  %v8737_v19 = vld [vmem:[#allocation28_spill] sm:$0xff]  ;;  %v8744_v4 = vld [vmem:[#allocation49_spill] sm:$0xff]  ;;  %v3605_v63 = vadd.f32 %v3477_v46, %v7339_v35 }
 0x62d   :  { %8722 = vst [vmem:[#allocation90_spill] sm:$0xff] %v7395_v15  ;;  %8723 = vst [vmem:[#allocation91_spill] sm:$0xff] %v7397_v48  ;;  %v3533_v15 = vmul.f32 %v7118_v34, %v8733_v27  ;;  %v3549_v10 = vmul.f32 %v7118_v34, %v8737_v19  ;;  %v8738_v44 = vld [vmem:[#allocation32_spill] sm:$0xff]  ;;  %v7435_v30 = vpop.f32.mrb[94].mxu0  ;;  %v3589_v52 = vmul.f32 %v7118_v34, %v8744_v4  ;;  %v8745_v19 = vld [vmem:[#allocation19_spill] sm:$0xff] }
 0x62e   :  { %8724 = vst [vmem:[#allocation92_spill] sm:$0xff] %v7399_v26  ;;  %8729 = vst [vmem:[#allocation23_spill] sm:$0xff] %v7409_v31  ;;  %v3557_v50 = vmul.f32 %v7118_v34, %v8738_v44  ;;  %v8742_v27 = vld [vmem:[#allocation40_spill] sm:$0xff]  ;;  %v3597_v16 = vmul.f32 %v7118_v34, %v8745_v19  ;;  %v7445_v44 = vpop.f32.mrb[110].mxu1  ;;  %v7447_v55 = vpop.f32.mrb[95].mxu0  ;;  %v3613_v57 = vadd.f32 %v3485_v21, %v7339_v35  ;;  %vm3733_vm0 = vcmp.gt.f32.partialorder %v3605_v63, 0.0 }
 0x62f   :  { %8734 = vst [vmem:[#allocation27_spill] sm:$0xff] %v7421_v54  ;;  %8735 = vst [vmem:[#allocation31_spill] sm:$0xff] %v7423_v7  ;;  %v3573_v12 = vmul.f32 %v7118_v34, %v8742_v27  ;;  %v3621_v49 = vadd.f32 %v3493_v29, %v7339_v35  ;;  %v3629_v27 = vadd.f32 %v3501_v47, %v7339_v35  ;;  %v7453_v51 = vpop.f32.mrb[111].mxu1 }
 0x630   :  { %8740 = vst [vmem:[#allocation35_spill] sm:$0xff] %v7433_v39  ;;  %8741 = vst [vmem:[#allocation39_spill] sm:$0xff] %v7435_v30  ;;  %v3637_v0 = vadd.f32 %v3509_v53, %v7339_v35  ;;  %v3645_v4 = vadd.f32 %v3517_v58, %v7339_v35  ;;  %v3653_v34 = vadd.f32 %v3525_v41, %v7339_v35  ;;  %vm3741_vm1 = vcmp.gt.f32.partialorder %v3613_v57, 0.0 }
 0x631   :  { %8746 = vst [vmem:[#allocation43_spill] sm:$0xff] %v7445_v44  ;;  %8747 = vst [vmem:[#allocation48_spill] sm:$0xff] %v7447_v55  ;;  %v3661_v19 = vadd.f32 %v3533_v15, %v7339_v35  ;;  %v3669_v24 = vadd.f32 %v3541_v3, %v7339_v35  ;;  %v3677_v46 = vadd.f32 %v3549_v10, %v7339_v35  ;;  %v7479_v3 = vpop.f32.mrb[96].mxu0  ;;  %v7481_v10 = vpop.f32.mrb[112].mxu1  ;;  %vm3749_vm2 = vcmp.gt.f32.partialorder %v3621_v49, 0.0 }
 0x632   :  { %8748 = vst [vmem:[#allocation20_spill] sm:$0xff] %v7453_v51  ;;  %v7462_v21 = vadd.f32 %v3557_v50, %v7339_v35  ;;  %v7465_v29 = vadd.f32 %v3565_v42, %v7339_v35  ;;  %v7468_v47 = vadd.f32 %v3573_v12, %v7339_v35  ;;  %v7471_v53 = vadd.f32 %v3581_v8, %v7339_v35  ;;  %v7483_v42 = vpop.f32.mrb[97].mxu0  ;;  %v7485_v12 = vpop.f32.mrb[113].mxu1 }
 0x633   :  { %v7474_v58 = vadd.f32 %v3589_v52, %v7339_v35  ;;  %v7477_v15 = vadd.f32 %v3597_v16, %v7339_v35  ;;  %8749 = vst [vmem:[#allocation24_spill] sm:$0xff] %v7479_v3  ;;  %8750 = vst [vmem:[#allocation28_spill] sm:$0xff] %v7481_v10  ;;  %vm3757_vm3 = vcmp.gt.f32.partialorder %v3629_v27, 0.0  ;;  %vm3765_vm4 = vcmp.gt.f32.partialorder %v3637_v0, 0.0  ;;  %v7487_v52 = vpop.f32.mrb[98].mxu0  ;;  %v7489_v16 = vpop.f32.mrb[114].mxu1 }
 0x634   :  { %8751 = vst [vmem:[#allocation32_spill] sm:$0xff] %v7483_v42  ;;  %8752 = vst [vmem:[#allocation36_spill] sm:$0xff] %v7485_v12  ;;  %vm3773_vm5 = vcmp.gt.f32.partialorder %v3645_v4, 0.0  ;;  %vm3781_vm6 = vcmp.gt.f32.partialorder %v3653_v34, 0.0  ;;  %vm3789_vm7 = vcmp.gt.f32.partialorder %v3661_v19, 0.0  ;;  %vm3797_vm8 = vcmp.gt.f32.partialorder %v3669_v24, 0.0 }
 0x635   :  { %8753 = vst [vmem:[#allocation40_spill] sm:$0xff] %v7487_v52  ;;  %8754 = vst [vmem:[#allocation44_spill] sm:$0xff] %v7489_v16  ;;  %vm3805_vm9 = vcmp.gt.f32.partialorder %v3677_v46, 0.0  ;;  %vm3813_vm10 = vcmp.gt.f32.partialorder %v7462_v21, 0.0  ;;  %vm3821_vm11 = vcmp.gt.f32.partialorder %v7465_v29, 0.0  ;;  %v7493_v35 = vpop.f32.mrb[99].mxu0  ;;  %v3128_v5 = vmul.f32 %v7223_v59, %v7223_v59 }
 0x636   :  { %8755 = vst [vmem:[#allocation49_spill] sm:$0xff] %v7493_v35  ;;  %v7495_v8 = vpop.f32.mrb[115].mxu1  ;;  %vm3829_vm12 = vcmp.gt.f32.partialorder %v7468_v47, 0.0  ;;  %vm3837_vm13 = vcmp.gt.f32.partialorder %v7471_v53, 0.0  ;;  %vm3845_vm14 = vcmp.gt.f32.partialorder %v7474_v58, 0.0  ;;  %vm3853_vm15 = vcmp.gt.f32.partialorder %v7477_v15, 0.0 }
 0x637   :  { %8756 = vst [vmem:[#allocation19_spill] sm:$0xff] %v7495_v8  ;;  %v3861_v50 = vmul.f32 0.2, %v3605_v63  ;;  %v3869_v41 = vmul.f32 0.2, %v3613_v57 }
 0x638   :  { %v3877_v60 = vmul.f32 0.2, %v3621_v49  ;;  %v3885_v2 = vmul.f32 0.2, %v3629_v27  ;;  %v3893_v40 = vmul.f32 0.2, %v3637_v0 }
 0x639   :  { %v3901_v37 = vmul.f32 0.2, %v3645_v4  ;;  %v3909_v8 = vmul.f32 0.2, %v3653_v34  ;;  %v3917_v35 = vmul.f32 0.2, %v3661_v19  ;;  %v7506_v52 = vsel %vm3733_vm0, %v3605_v63, %v3861_v50 }
 0x63a   :  { %v3925_v16 = vmul.f32 0.2, %v3669_v24  ;;  %8757 = vst [vmem:[#allocation93_spill] sm:$0xff] %v7506_v52  ;;  %v3933_v12 = vmul.f32 0.2, %v3677_v46  ;;  %v7511_v3 = vsel %vm3741_vm1, %v3613_v57, %v3869_v41  ;;  %v7517_v30 = vsel %vm3749_vm2, %v3621_v49, %v3877_v60  ;;  %v7529_v41 = vpop.f32.mrb[100].mxu0 }
 0x63b   :  { %v3941_v42 = vmul.f32 0.2, %v7462_v21  ;;  %v3949_v10 = vmul.f32 0.2, %v7465_v29  ;;  %8758 = vst [vmem:[#allocation94_spill] sm:$0xff] %v7511_v3  ;;  %8759 = vst [vmem:[#allocation95_spill] sm:$0xff] %v7517_v30  ;;  %v7521_v50 = vsel %vm3757_vm3, %v3629_v27, %v3885_v2  ;;  %v7524_v52 = vsel %vm3765_vm4, %v3637_v0, %v3893_v40 }
 0x63c   :  { %v3957_v51 = vmul.f32 0.2, %v7468_v47  ;;  %v3965_v55 = vmul.f32 0.2, %v7471_v53  ;;  %v3973_v44 = vmul.f32 0.2, %v7474_v58  ;;  %v7527_v57 = vsel %vm3773_vm5, %v3645_v4, %v3901_v37 }
 0x63d   :  { %v3981_v63 = vmul.f32 0.2, %v7477_v15  ;;  %8760 = vst [vmem:[#allocation96_spill] sm:$0xff] %v7521_v50  ;;  %8761 = vst [vmem:[#allocation97_spill] sm:$0xff] %v7524_v52  ;;  %v7531_v3 = vpop.f32.mrb[116].mxu1  ;;  %v7534_v39 = vsel %vm3781_vm6, %v3653_v34, %v3909_v8  ;;  %v7537_v49 = vsel %vm3789_vm7, %v3661_v19, %v3917_v35  ;;  %v7540_v60 = vsel %vm3797_vm8, %v3669_v24, %v3925_v16  ;;  %v7545_v40 = vpop.f32.mrb[101].mxu0 }
 0x63e   :  { %8762 = vst [vmem:[#allocation98_spill] sm:$0xff] %v7527_v57  ;;  %8763 = vst [vmem:[#allocation99_spill] sm:$0xff] %v7534_v39  ;;  %v7543_v2 = vsel %vm3805_vm9, %v3677_v46, %v3933_v12  ;;  %v7547_v37 = vpop.f32.mrb[117].mxu1  ;;  %v7552_v27 = vsel %vm3813_vm10, %v7462_v21, %v3941_v42  ;;  %v7557_v0 = vsel %vm3821_vm11, %v7465_v29, %v3949_v10  ;;  %v7569_v34 = vpop.f32.mrb[102].mxu0 }
 0x63f   :  { %8764 = vst [vmem:[#allocation100_spill] sm:$0xff] %v7537_v49  ;;  %8765 = vst [vmem:[#allocation101_spill] sm:$0xff] %v7540_v60  ;;  %v7562_v24 = vsel %vm3829_vm12, %v7468_v47, %v3957_v51  ;;  %v7567_v4 = vsel %vm3837_vm13, %v7471_v53, %v3965_v55  ;;  %v7571_v19 = vpop.f32.mrb[118].mxu1  ;;  %v7576_v46 = vsel %vm3845_vm14, %v7474_v58, %v3973_v44  ;;  %v7587_v29 = vpop.f32.mrb[103].mxu0 }
 0x640   :  { %8766 = vst [vmem:[#allocation102_spill] sm:$0xff] %v7543_v2  ;;  %8767 = vst [vmem:[#allocation103_spill] sm:$0xff] %v7547_v37  ;;  %v7581_v21 = vsel %vm3853_vm15, %v7477_v15, %v3981_v63  ;;  %v3127_v51 = vmul.f32 %v7237_v6, %v7237_v6  ;;  %v3129_v55 = vmul.f32 %v7239_v56, %v7239_v56  ;;  %v7589_v47 = vpop.f32.mrb[119].mxu1 }
 0x641   :  { %8768 = vst [vmem:[#allocation104_spill] sm:$0xff] %v7552_v27  ;;  %8769 = vst [vmem:[#allocation105_spill] sm:$0xff] %v7557_v0  ;;  %v3030_v53 = vadd.f32 %v7253_v33, %v7221_v32  ;;  %v3134_v44 = vmul.f32 %v7253_v33, %v7253_v33  ;;  %v3072_v58 = vadd.f32 %v7255_v38, %v7223_v59 }
 0x642   :  { %8770 = vst [vmem:[#allocation106_spill] sm:$0xff] %v7562_v24  ;;  %8771 = vst [vmem:[#allocation107_spill] sm:$0xff] %v7567_v4  ;;  %v3136_v15 = vmul.f32 %v7255_v38, %v7255_v38  ;;  %v3051_v10 = vadd.f32 %v7268_v17, %v7237_v6  ;;  %v3135_v42 = vmul.f32 %v7268_v17, %v7268_v17  ;;  %v7612_v4 = vpop.f32.mrb[120].mxu1  ;;  %v8785_v17 = vld [vmem:[#allocation43_spill] sm:$0xff] }
 0x643   :  { %8772 = vst [vmem:[#allocation108_spill] sm:$0xff] %v7576_v46  ;;  %8773 = vst [vmem:[#allocation109_spill] sm:$0xff] %v7581_v21  ;;  %v3093_v12 = vadd.f32 %v7270_v61, %v7239_v56  ;;  %v3137_v16 = vmul.f32 %v7270_v61, %v7270_v61  ;;  %v3334_v35 = vadd.f32 %v3134_v44, %v3126_v20  ;;  %v7610_v46 = vpop.f32.mrb[104].mxu0  ;;  %v7619_v20 = vpop.f32.mrb[121].mxu1 }
 0x644   :  { %8774 = vst [vmem:[#allocation110_spill] sm:$0xff] %v7589_v47  ;;  %v3376_v8 = vadd.f32 %v3136_v15, %v3128_v5  ;;  %v3031_v63 = vadd.f32 %v3030_v53, %v7303_v36  ;;  %v3142_v21 = vmul.f32 %v7303_v36, %v7303_v36  ;;  %v3355_v24 = vadd.f32 %v3135_v42, %v3127_v51  ;;  %v7617_v60 = vpop.f32.mrb[105].mxu0  ;;  %v7627_v51 = vpop.f32.mrb[122].mxu1 }
 0x645   :  { %v3397_v0 = vadd.f32 %v3137_v16, %v3129_v55  ;;  %v3073_v27 = vadd.f32 %v3072_v58, %v7305_v25  ;;  %v3144_v2 = vmul.f32 %v7305_v25, %v7305_v25  ;;  %8775 = vst [vmem:[#allocation111_spill] sm:$0xff] %v7617_v60  ;;  %8776 = vst [vmem:[#allocation112_spill] sm:$0xff] %v7619_v20  ;;  %v7625_v49 = vpop.f32.mrb[106].mxu0 }
 0x646   :  { %v3335_v5 = vadd.f32 %v3334_v35, %v3142_v21  ;;  %v3052_v53 = vadd.f32 %v3051_v10, %v7311_v43  ;;  %v3143_v44 = vmul.f32 %v7311_v43, %v7311_v43  ;;  %v3094_v15 = vadd.f32 %v3093_v12, %v7313_v45  ;;  %v7634_v16 = vpop.f32.mrb[107].mxu0  ;;  %v7636_v10 = vpop.f32.mrb[123].mxu1  ;;  %v8784_v43 = vld [vmem:[#allocation39_spill] sm:$0xff] }
 0x647   :  { %v3377_v55 = vadd.f32 %v3376_v8, %v3144_v2  ;;  %v3145_v58 = vmul.f32 %v7313_v45, %v7313_v45  ;;  %v3032_v42 = vadd.f32 %v3031_v63, %v7319_v13  ;;  %v3150_v21 = vmul.f32 %v7319_v13, %v7319_v13  ;;  %8777 = vst [vmem:[#allocation113_spill] sm:$0xff] %v7634_v16 }
 0x648   :  { %8778 = vst [vmem:[#allocation114_spill] sm:$0xff] %v7636_v10  ;;  %v3356_v35 = vadd.f32 %v3355_v24, %v3143_v44  ;;  %v3074_v12 = vadd.f32 %v3073_v27, %v7321_v18  ;;  %v3152_v39 = vmul.f32 %v7321_v18, %v7321_v18  ;;  %v3053_v2 = vadd.f32 %v3052_v53, %v7327_v9 }
 0x649   :  { %v3398_v8 = vadd.f32 %v3397_v0, %v3145_v58  ;;  %v3336_v57 = vadd.f32 %v3335_v5, %v3150_v21  ;;  %v3151_v63 = vmul.f32 %v7327_v9, %v7327_v9  ;;  %v3095_v52 = vadd.f32 %v3094_v15, %v7329_v11 }
 0x64a   :  { %v3378_v50 = vadd.f32 %v3377_v55, %v3152_v39  ;;  %v3153_v30 = vmul.f32 %v7329_v11, %v7329_v11  ;;  %v3033_v24 = vadd.f32 %v3032_v42, %v7334_v23  ;;  %v3158_v27 = vmul.f32 %v7334_v23, %v7334_v23  ;;  %v7657_v55 = vpop.f32.mrb[108].mxu0  ;;  %v7659_v42 = vpop.f32.mrb[124].mxu1 }
 0x64b   :  { %v3357_v44 = vadd.f32 %v3356_v35, %v3151_v63  ;;  %v3075_v45 = vadd.f32 %v3074_v12, %v7365_v62  ;;  %v3160_v0 = vmul.f32 %v7365_v62, %v7365_v62  ;;  %v3054_v5 = vadd.f32 %v3053_v2, %v7367_v22 }
 0x64c   :  { %v3399_v53 = vadd.f32 %v3398_v8, %v3153_v30  ;;  %v3337_v58 = vadd.f32 %v3336_v57, %v3158_v27  ;;  %v3159_v39 = vmul.f32 %v7367_v22, %v7367_v22  ;;  %v3096_v15 = vadd.f32 %v3095_v52, %v7381_v28  ;;  %v7666_v30 = vpop.f32.mrb[109].mxu0  ;;  %v7668_v57 = vpop.f32.mrb[125].mxu1 }
 0x64d   :  { %v3379_v21 = vadd.f32 %v3378_v50, %v3160_v0  ;;  %v3161_v35 = vmul.f32 %v7381_v28, %v7381_v28  ;;  %v3034_v12 = vadd.f32 %v3033_v24, %v7383_v14  ;;  %v3166_v2 = vmul.f32 %v7383_v14, %v7383_v14  ;;  %8779 = vst [vmem:[#allocation115_spill] sm:$0xff] %v7666_v30  ;;  %v7674_v27 = vpop.f32.mrb[110].mxu0  ;;  %v7676_v0 = vpop.f32.mrb[126].mxu1 }
 0x64e   :  { %8780 = vst [vmem:[#allocation116_spill] sm:$0xff] %v7668_v57  ;;  %v3358_v8 = vadd.f32 %v3357_v44, %v3159_v39  ;;  %v3076_v52 = vadd.f32 %v3075_v45, %v7397_v48  ;;  %v3168_v63 = vmul.f32 %v7397_v48, %v7397_v48  ;;  %v3055_v50 = vadd.f32 %v3054_v5, %v7399_v26  ;;  %v7681_v56 = vpop.f32.mrb[111].mxu0  ;;  %v7683_v44 = vpop.f32.mrb[127].mxu1 }
 0x64f   :  { %v3400_v24 = vadd.f32 %v3399_v53, %v3161_v35  ;;  %v3338_v28 = vadd.f32 %v3337_v58, %v3166_v2  ;;  %v3167_v11 = vmul.f32 %v7399_v26, %v7399_v26  ;;  %v3097_v61 = vadd.f32 %v3096_v15, %v7409_v31  ;;  %8781 = vst [vmem:[#allocation117_spill] sm:$0xff] %v7681_v56 }
 0x650   :  { %8782 = vst [vmem:[#allocation118_spill] sm:$0xff] %v7683_v44  ;;  %v3380_v45 = vadd.f32 %v3379_v21, %v3168_v63  ;;  %v3169_v39 = vmul.f32 %v7409_v31, %v7409_v31  ;;  %v3035_v5 = vadd.f32 %v3034_v12, %v7411_v1  ;;  %v3174_v22 = vmul.f32 %v7411_v1, %v7411_v1  ;;  %v8783_v63 = vld [vmem:[#allocation35_spill] sm:$0xff] }
 0x651   :  { %v3359_v53 = vadd.f32 %v3358_v8, %v3167_v11  ;;  %v3077_v58 = vadd.f32 %v3076_v52, %v7421_v54  ;;  %v3176_v35 = vmul.f32 %v7421_v54, %v7421_v54  ;;  %v3056_v15 = vadd.f32 %v3055_v50, %v7423_v7 }
 0x652   :  { %v3401_v2 = vadd.f32 %v3400_v24, %v3169_v39  ;;  %v3339_v26 = vadd.f32 %v3338_v28, %v3174_v22  ;;  %v3175_v21 = vmul.f32 %v7423_v7, %v7423_v7  ;;  %v3098_v31 = vadd.f32 %v3097_v61, %v8783_v63  ;;  %v8786_v28 = vld [vmem:[#allocation48_spill] sm:$0xff] }
 0x653   :  { %v3381_v9 = vadd.f32 %v3380_v45, %v3176_v35  ;;  %v3177_v12 = vmul.f32 %v8783_v63, %v8783_v63  ;;  %v3036_v11 = vadd.f32 %v3035_v5, %v8784_v43  ;;  %v3182_v8 = vmul.f32 %v8784_v43, %v8784_v43  ;;  %v8787_v45 = vld [vmem:[#allocation20_spill] sm:$0xff] }
 0x654   :  { %v3360_v52 = vadd.f32 %v3359_v53, %v3175_v21  ;;  %v3078_v6 = vadd.f32 %v3077_v58, %v8785_v17  ;;  %v3184_v22 = vmul.f32 %v8785_v17, %v8785_v17  ;;  %v3057_v50 = vadd.f32 %v3056_v15, %v8786_v28  ;;  %v8788_v7 = vld [vmem:[#allocation24_spill] sm:$0xff] }
 0x655   :  { %v3402_v24 = vadd.f32 %v3401_v2, %v3177_v12  ;;  %v3340_v39 = vadd.f32 %v3339_v26, %v3182_v8  ;;  %v3183_v61 = vmul.f32 %v8786_v28, %v8786_v28  ;;  %v3099_v35 = vadd.f32 %v3098_v31, %v8787_v45  ;;  %v8789_v17 = vld [vmem:[#allocation28_spill] sm:$0xff] }
 0x656   :  { %v3382_v63 = vadd.f32 %v3381_v9, %v3184_v22  ;;  %v3185_v5 = vmul.f32 %v8787_v45, %v8787_v45  ;;  %v3037_v53 = vadd.f32 %v3036_v11, %v8788_v7  ;;  %v3190_v58 = vmul.f32 %v8788_v7, %v8788_v7  ;;  %v8790_v15 = vld [vmem:[#allocation32_spill] sm:$0xff] }
 0x657   :  { %v3361_v21 = vadd.f32 %v3360_v52, %v3183_v61  ;;  %v3079_v54 = vadd.f32 %v3078_v6, %v8789_v17  ;;  %v3192_v26 = vmul.f32 %v8789_v17, %v8789_v17  ;;  %v3058_v2 = vadd.f32 %v3057_v50, %v8790_v15  ;;  %v8791_v31 = vld [vmem:[#allocation36_spill] sm:$0xff] }
 0x658   :  { %v3403_v12 = vadd.f32 %v3402_v24, %v3185_v5  ;;  %v3341_v8 = vadd.f32 %v3340_v39, %v3190_v58  ;;  %v3191_v9 = vmul.f32 %v8790_v15, %v8790_v15  ;;  %v3100_v22 = vadd.f32 %v3099_v35, %v8791_v31  ;;  %v8792_v28 = vld [vmem:[#allocation40_spill] sm:$0xff]  ;;  %v8794_v24 = vld [vmem:[#allocation49_spill] sm:$0xff]  ;;  %v8795_v35 = vld [vmem:[#allocation19_spill] sm:$0xff] }
 0x659   :  { %v3383_v45 = vadd.f32 %v3382_v63, %v3192_v26  ;;  %v3193_v11 = vmul.f32 %v8791_v31, %v8791_v31  ;;  %v3038_v52 = vadd.f32 %v3037_v53, %v8792_v28  ;;  %v3198_v6 = vmul.f32 %v8792_v28, %v8792_v28  ;;  %v8793_v17 = vld [vmem:[#allocation44_spill] sm:$0xff] }
 0x65a   :  { %v3362_v61 = vadd.f32 %v3361_v21, %v3191_v9  ;;  %v3080_v48 = vadd.f32 %v3079_v54, %v8793_v17  ;;  %v3200_v50 = vmul.f32 %v8793_v17, %v8793_v17  ;;  %v3059_v39 = vadd.f32 %v3058_v2, %v8794_v24 }
 0x65b   :  { %v3404_v5 = vadd.f32 %v3403_v12, %v3193_v11  ;;  %v3342_v58 = vadd.f32 %v3341_v8, %v3198_v6  ;;  %v3199_v63 = vmul.f32 %v8794_v24, %v8794_v24  ;;  %v3101_v26 = vadd.f32 %v3100_v22, %v8795_v35 }
 0x65c   :  { %v3384_v31 = vadd.f32 %v3383_v45, %v3200_v50  ;;  %v3201_v53 = vmul.f32 %v8795_v35, %v8795_v35  ;;  %v3039_v21 = vadd.f32 %v3038_v52, %v7529_v41  ;;  %v3206_v54 = vmul.f32 %v7529_v41, %v7529_v41 }
 0x65d   :  { %v3363_v9 = vadd.f32 %v3362_v61, %v3199_v63  ;;  %v3081_v15 = vadd.f32 %v3080_v48, %v7531_v3  ;;  %v3208_v2 = vmul.f32 %v7531_v3, %v7531_v3  ;;  %v3060_v12 = vadd.f32 %v3059_v39, %v7545_v40 }
 0x65e   :  { %v3405_v8 = vadd.f32 %v3404_v5, %v3201_v53  ;;  %v3343_v11 = vadd.f32 %v3342_v58, %v3206_v54  ;;  %v3207_v45 = vmul.f32 %v7545_v40, %v7545_v40  ;;  %v3102_v22 = vadd.f32 %v3101_v26, %v7547_v37 }
 0x65f   :  { %v3385_v6 = vadd.f32 %v3384_v31, %v3208_v2  ;;  %v3209_v52 = vmul.f32 %v7547_v37, %v7547_v37  ;;  %v3040_v61 = vadd.f32 %v3039_v21, %v7569_v34  ;;  %v3214_v48 = vmul.f32 %v7569_v34, %v7569_v34 }
 0x660   :  { %v3364_v50 = vadd.f32 %v3363_v9, %v3207_v45  ;;  %v3082_v63 = vadd.f32 %v3081_v15, %v7571_v19  ;;  %v3216_v39 = vmul.f32 %v7571_v19, %v7571_v19  ;;  %v3061_v5 = vadd.f32 %v3060_v12, %v7587_v29 }
 0x661   :  { %v3406_v58 = vadd.f32 %v3405_v8, %v3209_v52  ;;  %v3344_v53 = vadd.f32 %v3343_v11, %v3214_v48  ;;  %v3215_v31 = vmul.f32 %v7587_v29, %v7587_v29  ;;  %v3103_v26 = vadd.f32 %v3102_v22, %v7589_v47 }
 0x662   :  { %v3386_v54 = vadd.f32 %v3385_v6, %v3216_v39  ;;  %v3217_v21 = vmul.f32 %v7589_v47, %v7589_v47  ;;  %v3041_v9 = vadd.f32 %v3040_v61, %v7610_v46  ;;  %v3222_v15 = vmul.f32 %v7610_v46, %v7610_v46 }
 0x663   :  { %v3365_v2 = vadd.f32 %v3364_v50, %v3215_v31  ;;  %v3083_v45 = vadd.f32 %v3082_v63, %v7612_v4  ;;  %v3224_v12 = vmul.f32 %v7612_v4, %v7612_v4  ;;  %v3062_v8 = vadd.f32 %v3061_v5, %v7617_v60 }
 0x664   :  { %v3407_v11 = vadd.f32 %v3406_v58, %v3217_v21  ;;  %v3345_v52 = vadd.f32 %v3344_v53, %v3222_v15  ;;  %v3223_v22 = vmul.f32 %v7617_v60, %v7617_v60  ;;  %v3104_v6 = vadd.f32 %v3103_v26, %v7619_v20 }
 0x665   :  { %v3387_v48 = vadd.f32 %v3386_v54, %v3224_v12  ;;  %v3225_v61 = vmul.f32 %v7619_v20, %v7619_v20  ;;  %v3042_v50 = vadd.f32 %v3041_v9, %v7625_v49  ;;  %v3230_v63 = vmul.f32 %v7625_v49, %v7625_v49 }
 0x666   :  { %v3366_v39 = vadd.f32 %v3365_v2, %v3223_v22  ;;  %v3084_v31 = vadd.f32 %v3083_v45, %v7627_v51  ;;  %v3232_v5 = vmul.f32 %v7627_v51, %v7627_v51  ;;  %v3063_v58 = vadd.f32 %v3062_v8, %v7634_v16 }
 0x667   :  { %v3408_v53 = vadd.f32 %v3407_v11, %v3225_v61  ;;  %v3346_v21 = vadd.f32 %v3345_v52, %v3230_v63  ;;  %v3231_v26 = vmul.f32 %v7634_v16, %v7634_v16  ;;  %v3105_v54 = vadd.f32 %v3104_v6, %v7636_v10 }
 0x668   :  { %v3388_v15 = vadd.f32 %v3387_v48, %v3232_v5  ;;  %v3233_v9 = vmul.f32 %v7636_v10, %v7636_v10  ;;  %v3043_v2 = vadd.f32 %v3042_v50, %v7657_v55  ;;  %v3238_v45 = vmul.f32 %v7657_v55, %v7657_v55 }
 0x669   :  { %v3367_v12 = vadd.f32 %v3366_v39, %v3231_v26  ;;  %v3085_v22 = vadd.f32 %v3084_v31, %v7659_v42  ;;  %v3240_v8 = vmul.f32 %v7659_v42, %v7659_v42  ;;  %v3064_v11 = vadd.f32 %v3063_v58, %v7666_v30 }
 0x66a   :  { %v3409_v52 = vadd.f32 %v3408_v53, %v3233_v9  ;;  %v3347_v61 = vadd.f32 %v3346_v21, %v3238_v45  ;;  %v3239_v6 = vmul.f32 %v7666_v30, %v7666_v30  ;;  %v3106_v48 = vadd.f32 %v3105_v54, %v7668_v57 }
 0x66b   :  { %v3389_v63 = vadd.f32 %v3388_v15, %v3240_v8  ;;  %v3241_v50 = vmul.f32 %v7668_v57, %v7668_v57  ;;  %v3044_v39 = vadd.f32 %v3043_v2, %v7674_v27  ;;  %v3246_v31 = vmul.f32 %v7674_v27, %v7674_v27 }
 0x66c   :  { %v3368_v5 = vadd.f32 %v3367_v12, %v3239_v6  ;;  %v3086_v26 = vadd.f32 %v3085_v22, %v7676_v0  ;;  %v3248_v58 = vmul.f32 %v7676_v0, %v7676_v0  ;;  %v3065_v53 = vadd.f32 %v3064_v11, %v7681_v56 }
 0x66d   :  { %v3410_v21 = vadd.f32 %v3409_v52, %v3241_v50  ;;  %v3045_v9 = vrot.slane %v3044_v39, 4  ;;  %v3348_v54 = vadd.f32 %v3347_v61, %v3246_v31  ;;  %v3247_v15 = vmul.f32 %v7681_v56, %v7681_v56 }
 0x66e   :  { %v3087_v45 = vrot.slane %v3086_v26, 4  ;;  %v3390_v8 = vadd.f32 %v3389_v63, %v3248_v58  ;;  %v3066_v2 = vrot.slane %v3065_v53, 4  ;;  %v3107_v57 = vadd.f32 %v3106_v48, %v7683_v44 }
 0x66f   :  { %v3046_v10 = vadd.f32 %v3045_v9, %v3044_v39  ;;  %v3349_v12 = vrot.slane %v3348_v54, 4  ;;  %v3369_v6 = vadd.f32 %v3368_v5, %v3247_v15  ;;  %v3249_v22 = vmul.f32 %v7683_v44, %v7683_v44 }
 0x670   :  { %v3088_v20 = vadd.f32 %v3087_v45, %v3086_v26  ;;  %v3391_v47 = vrot.slane %v3390_v8, 4  ;;  %v3067_v11 = vadd.f32 %v3066_v2, %v3065_v53  ;;  %v3108_v52 = vrot.slane %v3107_v57, 4 }
 0x671   :  { %v3047_v50 = vrot.slane %v3046_v10, 2  ;;  %v3350_v61 = vadd.f32 %v3349_v12, %v3348_v54  ;;  %v3370_v31 = vrot.slane %v3369_v6, 4  ;;  %v3411_v37 = vadd.f32 %v3410_v21, %v3249_v22 }
 0x672   :  { %v3089_v35 = vrot.slane %v3088_v20, 2  ;;  %v3392_v56 = vadd.f32 %v3391_v47, %v3390_v8  ;;  %v3068_v63 = vrot.slane %v3067_v11, 2  ;;  %v3109_v58 = vadd.f32 %v3108_v52, %v3107_v57 }
 0x673   :  { %v3048_v30 = vadd.f32 %v3047_v50, %v3046_v10  ;;  %v3351_v48 = vrot.slane %v3350_v61, 2  ;;  %v3371_v39 = vadd.f32 %v3370_v31, %v3369_v6  ;;  %v3412_v9 = vrot.slane %v3411_v37, 4 }
 0x674   :  { %v3090_v5 = vadd.f32 %v3089_v35, %v3088_v20  ;;  %v3393_v15 = vrot.slane %v3392_v56, 2  ;;  %v3069_v16 = vadd.f32 %v3068_v63, %v3067_v11  ;;  %v3110_v44 = vrot.slane %v3109_v58, 2 }
 0x675   :  { %v3049_v26 = vrot.slane %v3048_v30, 1  ;;  %v3352_v45 = vadd.f32 %v3351_v48, %v3350_v61  ;;  %v3372_v53 = vrot.slane %v3371_v39, 2  ;;  %v3413_v2 = vadd.f32 %v3412_v9, %v3411_v37 }
 0x676   :  { %v3091_v60 = vrot.slane %v3090_v5, 1  ;;  %v3394_v54 = vadd.f32 %v3393_v15, %v3392_v56  ;;  %v3070_v12 = vrot.slane %v3069_v16, 1  ;;  %v3111_v21 = vadd.f32 %v3110_v44, %v3109_v58 }
 0x677   :  { %v3050_v22 = vadd.f32 %v3049_v26, %v3048_v30  ;;  %v3353_v47 = vrot.slane %v3352_v45, 1  ;;  %v3373_v8 = vadd.f32 %v3372_v53, %v3371_v39  ;;  %v3414_v57 = vrot.slane %v3413_v2, 2 }
 0x678   :  { %v3092_v10 = vadd.f32 %v3091_v60, %v3090_v5  ;;  %v3395_v52 = vrot.slane %v3394_v54, 1  ;;  %v3071_v6 = vadd.f32 %v3070_v12, %v3069_v16  ;;  %v3112_v50 = vrot.slane %v3111_v21, 1 }
 0x679   :  { %v3118_v20 = vmul.f32 0.0078125, %v3050_v22  ;;  %v3354_v35 = vadd.f32 %v3353_v47, %v3352_v45  ;;  %v3374_v11 = vrot.slane %v3373_v8, 1  ;;  %v3415_v31 = vadd.f32 %v3414_v57, %v3413_v2 }
 0x67a   :  { %v7807_v63 = vmul.f32 0.0078125, %v3092_v10  ;;  %v3396_v61 = vadd.f32 %v3395_v52, %v3394_v54  ;;  %v7809_v37 = vmul.f32 0.0078125, %v3071_v6  ;;  %v3113_v56 = vadd.f32 %v3112_v50, %v3111_v21 }
 0x67b   :  { %v3422_v48 = vmul.f32 0.0078125, %v3354_v35  ;;  %v3430_v44 = vmul.f32 %v3118_v20, %v3118_v20  ;;  %v3375_v30 = vadd.f32 %v3374_v11, %v3373_v8  ;;  %v3416_v26 = vrot.slane %v3415_v31, 1 }
 0x67c   :  { %v3424_v58 = vmul.f32 0.0078125, %v3396_v61  ;;  %v3432_v60 = vmul.f32 %v7807_v63, %v7807_v63  ;;  %v3431_v16 = vmul.f32 %v7809_v37, %v7809_v37  ;;  %v7815_v5 = vmul.f32 0.0078125, %v3113_v56 }
 0x67d   :  { %v3438_v39 = vsub.f32 %v3422_v48, %v3430_v44  ;;  %v3423_v9 = vmul.f32 0.0078125, %v3375_v30  ;;  %v3417_v2 = vadd.f32 %v3416_v26, %v3415_v31  ;;  %v3462_v57 = vsub.f32 0.0, %v3118_v20 }
 0x67e   :  { %v3440_v15 = vsub.f32 %v3424_v58, %v3432_v60  ;;  %v3433_v54 = vmul.f32 %v7815_v5, %v7815_v5  ;;  %v3464_v52 = vsub.f32 0.0, %v7807_v63  ;;  %v3463_v6 = vsub.f32 0.0, %v7809_v37 }
 0x67f   :  { %v3446_v45 = vadd.f32 0.8, %v3438_v39  ;;  %v3439_v53 = vsub.f32 %v3423_v9, %v3431_v16  ;;  %v3425_v12 = vmul.f32 0.0078125, %v3417_v2 }
 0x680   :  { %v3448_v22 = vadd.f32 0.8, %v3440_v15 }
 0x681   :  { %5230 = vrsqrt.f32 %v3446_v45  ;;  %v3441_v21 = vsub.f32 %v3425_v12, %v3433_v54  ;;  %v3447_v47 = vadd.f32 0.8, %v3439_v53 }
 0x682   :  { %5232 = vrsqrt.f32 %v3448_v22 }
 0x683   :  { %v3449_v8 = vadd.f32 0.8, %v3441_v21  ;;  %5234 = vrsqrt.f32 %v3447_v47 }
 0x685   :  { %5236 = vrsqrt.f32 %v3449_v8 }
 0x68b   :  { %v5231_v10 = vpop.eup %5230 }
 0x68c   :  { %v3470_v35 = vmul.f32 %v5231_v10, %v3462_v57  ;;  %v3478_v11 = vmul.f32 %v5231_v10, %v7221_v32  ;;  %v3486_v31 = vmul.f32 %v5231_v10, %v7253_v33  ;;  %v3494_v61 = vmul.f32 %v5231_v10, %v7303_v36 }
 0x68d   :  { %v3502_v56 = vmul.f32 %v5231_v10, %v7319_v13  ;;  %v3510_v20 = vmul.f32 %v5231_v10, %v7334_v23  ;;  %v3518_v48 = vmul.f32 %v5231_v10, %v7383_v14  ;;  %v3526_v63 = vmul.f32 %v5231_v10, %v7411_v1 }
 0x68e   :  { %v3534_v44 = vmul.f32 %v5231_v10, %v8784_v43  ;;  %v3542_v30 = vmul.f32 %v5231_v10, %v8788_v7  ;;  %v3550_v58 = vmul.f32 %v5231_v10, %v8792_v28  ;;  %v3558_v32 = vmul.f32 %v5231_v10, %v7529_v41 }
 0x68f   :  { %v3566_v33 = vmul.f32 %v5231_v10, %v7569_v34  ;;  %v3574_v36 = vmul.f32 %v5231_v10, %v7610_v46  ;;  %v3582_v13 = vmul.f32 %v5231_v10, %v7625_v49  ;;  %v3590_v23 = vmul.f32 %v5231_v10, %v7657_v55  ;;  %v7838_v34 = vpop.eup %5232 }
 0x690   :  { %v3598_v14 = vmul.f32 %v5231_v10, %v7674_v27  ;;  %v3606_v60 = vadd.f32 %v3478_v11, %v3470_v35  ;;  %v3614_v1 = vadd.f32 %v3486_v31, %v3470_v35  ;;  %v3622_v16 = vadd.f32 %v3494_v61, %v3470_v35  ;;  %v7840_v55 = vpop.eup %5234 }
 0x691   :  { %v3630_v43 = vadd.f32 %v3502_v56, %v3470_v35  ;;  %v3638_v39 = vadd.f32 %v3510_v20, %v3470_v35  ;;  %v3646_v7 = vadd.f32 %v3518_v48, %v3470_v35  ;;  %v3654_v9 = vadd.f32 %v3526_v63, %v3470_v35  ;;  %v7842_v2 = vpop.eup %5236 }
 0x692   :  { %v3662_v28 = vadd.f32 %v3534_v44, %v3470_v35  ;;  %v3670_v15 = vadd.f32 %v3542_v30, %v3470_v35  ;;  %v3678_v41 = vadd.f32 %v3550_v58, %v3470_v35  ;;  %v3686_v26 = vadd.f32 %v3558_v32, %v3470_v35 }
 0x693   :  { %v3694_v46 = vadd.f32 %v3566_v33, %v3470_v35  ;;  %v3702_v45 = vadd.f32 %v3574_v36, %v3470_v35  ;;  %v3710_v49 = vadd.f32 %v3582_v13, %v3470_v35  ;;  %v3718_v53 = vadd.f32 %v3590_v23, %v3470_v35 }
 0x694   :  { %v3726_v27 = vadd.f32 %v3598_v14, %v3470_v35  ;;  %vm3734_vm0 = vcmp.gt.f32.partialorder %v3606_v60, 0.0  ;;  %vm3742_vm1 = vcmp.gt.f32.partialorder %v3614_v1, 0.0  ;;  %vm3750_vm2 = vcmp.gt.f32.partialorder %v3622_v16, 0.0 }
 0x695   :  { %vm3758_vm3 = vcmp.gt.f32.partialorder %v3630_v43, 0.0  ;;  %vm3766_vm4 = vcmp.gt.f32.partialorder %v3638_v39, 0.0  ;;  %vm3774_vm5 = vcmp.gt.f32.partialorder %v3646_v7, 0.0  ;;  %vm3782_vm6 = vcmp.gt.f32.partialorder %v3654_v9, 0.0 }
 0x696   :  { %vm3790_vm7 = vcmp.gt.f32.partialorder %v3662_v28, 0.0  ;;  %vm3798_vm8 = vcmp.gt.f32.partialorder %v3670_v15, 0.0  ;;  %vm3806_vm9 = vcmp.gt.f32.partialorder %v3678_v41, 0.0  ;;  %vm3814_vm10 = vcmp.gt.f32.partialorder %v3686_v26, 0.0 }
 0x697   :  { %vm3822_vm11 = vcmp.gt.f32.partialorder %v3694_v46, 0.0  ;;  %vm3830_vm12 = vcmp.gt.f32.partialorder %v3702_v45, 0.0  ;;  %vm3838_vm13 = vcmp.gt.f32.partialorder %v3710_v49, 0.0  ;;  %vm3846_vm14 = vcmp.gt.f32.partialorder %v3718_v53, 0.0 }
 0x698   :  { %vm3854_vm15 = vcmp.gt.f32.partialorder %v3726_v27, 0.0  ;;  %v3862_v54 = vmul.f32 0.2, %v3606_v60  ;;  %v3870_v12 = vmul.f32 0.2, %v3614_v1  ;;  %v3472_v21 = vmul.f32 %v7838_v34, %v3464_v52 }
 0x699   :  { %v3878_v22 = vmul.f32 0.2, %v3622_v16  ;;  %v3886_v47 = vmul.f32 0.2, %v3630_v43  ;;  %v3894_v8 = vmul.f32 0.2, %v3638_v39  ;;  %v3480_v57 = vmul.f32 %v7838_v34, %v7223_v59 }
 0x69a   :  { %v3902_v10 = vmul.f32 0.2, %v3646_v7  ;;  %v3910_v35 = vmul.f32 0.2, %v3654_v9  ;;  %v3918_v11 = vmul.f32 0.2, %v3662_v28  ;;  %v7848_v31 = vsel %vm3734_vm0, %v3606_v60, %v3862_v54 }
 0x69b   :  { %v3926_v61 = vmul.f32 0.2, %v3670_v15  ;;  %v3934_v56 = vmul.f32 0.2, %v3678_v41  ;;  %v3942_v20 = vmul.f32 0.2, %v3686_v26  ;;  %v7851_v48 = vsel %vm3742_vm1, %v3614_v1, %v3870_v12 }
 0x69c   :  { %v3950_v63 = vmul.f32 0.2, %v3694_v46  ;;  %v3958_v52 = vmul.f32 0.2, %v3702_v45  ;;  %v3966_v44 = vmul.f32 0.2, %v3710_v49  ;;  %v7854_v30 = vsel %vm3750_vm2, %v3622_v16, %v3878_v22 }
 0x69d   :  { %v3974_v58 = vmul.f32 0.2, %v3718_v53  ;;  %v3982_v59 = vmul.f32 0.2, %v3726_v27  ;;  %v7857_v32 = vsel %vm3758_vm3, %v3630_v43, %v3886_v47  ;;  %v7860_v33 = vsel %vm3766_vm4, %v3638_v39, %v3894_v8  ;;  %v8806_v12 = vld [vmem:[#allocation28_spill] sm:$0xff] }
 0x69e   :  { %v7863_v36 = vsel %vm3774_vm5, %v3646_v7, %v3902_v10  ;;  %v7866_v13 = vsel %vm3782_vm6, %v3654_v9, %v3910_v35  ;;  %v7869_v23 = vsel %vm3790_vm7, %v3662_v28, %v3918_v11  ;;  %v7872_v14 = vsel %vm3798_vm8, %v3670_v15, %v3926_v61 }
 0x69f   :  { %v7875_v60 = vsel %vm3806_vm9, %v3678_v41, %v3934_v56  ;;  %v7878_v1 = vsel %vm3814_vm10, %v3686_v26, %v3942_v20  ;;  %v7881_v16 = vsel %vm3822_vm11, %v3694_v46, %v3950_v63  ;;  %v7884_v43 = vsel %vm3830_vm12, %v3702_v45, %v3958_v52  ;;  %v8803_v46 = vld [vmem:[#allocation91_spill] sm:$0xff] }
 0x6a0   :  { %8796 = vst [vmem:[#allocation39_spill] sm:$0xff] %v7875_v60  ;;  %8797 = vst [vmem:[#allocation24_spill] sm:$0xff] %v7878_v1  ;;  %v7887_v39 = vsel %vm3838_vm13, %v3710_v49, %v3966_v44  ;;  %v7890_v7 = vsel %vm3846_vm14, %v3718_v53, %v3974_v58  ;;  %v7893_v9 = vsel %vm3854_vm15, %v3726_v27, %v3982_v59  ;;  %v8804_v49 = vld [vmem:[#allocation27_spill] sm:$0xff] }
 0x6a1   :  { %8798 = vst [vmem:[#allocation40_spill] sm:$0xff] %v7881_v16  ;;  %8799 = vst [vmem:[#allocation44_spill] sm:$0xff] %v7884_v43  ;;  %v3488_v28 = vmul.f32 %v7838_v34, %v7255_v38  ;;  %v3496_v15 = vmul.f32 %v7838_v34, %v7305_v25  ;;  %v3504_v41 = vmul.f32 %v7838_v34, %v7321_v18  ;;  %v8805_v27 = vld [vmem:[#allocation43_spill] sm:$0xff] }
 0x6a2   :  { %8800 = vst [vmem:[#allocation49_spill] sm:$0xff] %v7887_v39  ;;  %8801 = vst [vmem:[#allocation119_spill] sm:$0xff] %v7890_v7  ;;  %v3512_v26 = vmul.f32 %v7838_v34, %v7365_v62  ;;  %v3520_v45 = vmul.f32 %v7838_v34, %v8803_v46  ;;  %v3528_v53 = vmul.f32 %v7838_v34, %v8804_v49  ;;  %v8850_v39 = vld [vmem:[#allocation118_spill] sm:$0xff] }
 0x6a3   :  { %8802 = vst [vmem:[#allocation120_spill] sm:$0xff] %v7893_v9  ;;  %v3536_v54 = vmul.f32 %v7838_v34, %v8805_v27  ;;  %v3544_v38 = vmul.f32 %v7838_v34, %v8806_v12  ;;  %v3552_v25 = vmul.f32 %v7838_v34, %v8793_v17  ;;  %v3560_v18 = vmul.f32 %v7838_v34, %v7531_v3 }
 0x6a4   :  { %v3568_v62 = vmul.f32 %v7838_v34, %v7571_v19  ;;  %v3576_v22 = vmul.f32 %v7838_v34, %v7612_v4  ;;  %v3584_v47 = vmul.f32 %v7838_v34, %v7627_v51  ;;  %v3592_v8 = vmul.f32 %v7838_v34, %v7659_v42 }
 0x6a5   :  { %v3600_v10 = vmul.f32 %v7838_v34, %v7676_v0  ;;  %v3608_v35 = vadd.f32 %v3480_v57, %v3472_v21  ;;  %v3616_v17 = vadd.f32 %v3488_v28, %v3472_v21  ;;  %v3624_v11 = vadd.f32 %v3496_v15, %v3472_v21 }
 0x6a6   :  { %v3632_v61 = vadd.f32 %v3504_v41, %v3472_v21  ;;  %v3640_v3 = vadd.f32 %v3512_v26, %v3472_v21  ;;  %v3648_v56 = vadd.f32 %v3520_v45, %v3472_v21  ;;  %v3656_v20 = vadd.f32 %v3528_v53, %v3472_v21 }
 0x6a7   :  { %v3664_v19 = vadd.f32 %v3536_v54, %v3472_v21  ;;  %v3672_v63 = vadd.f32 %v3544_v38, %v3472_v21  ;;  %v3680_v52 = vadd.f32 %v3552_v25, %v3472_v21  ;;  %v3688_v4 = vadd.f32 %v3560_v18, %v3472_v21 }
 0x6a8   :  { %v3696_v44 = vadd.f32 %v3568_v62, %v3472_v21  ;;  %v3704_v58 = vadd.f32 %v3576_v22, %v3472_v21  ;;  %v3712_v51 = vadd.f32 %v3584_v47, %v3472_v21  ;;  %v3720_v59 = vadd.f32 %v3592_v8, %v3472_v21 }
 0x6a9   :  { %v3728_v46 = vadd.f32 %v3600_v10, %v3472_v21  ;;  %vm3736_vm0 = vcmp.gt.f32.partialorder %v3608_v35, 0.0  ;;  %vm3744_vm1 = vcmp.gt.f32.partialorder %v3616_v17, 0.0  ;;  %vm3752_vm2 = vcmp.gt.f32.partialorder %v3624_v11, 0.0 }
 0x6aa   :  { %vm3760_vm3 = vcmp.gt.f32.partialorder %v3632_v61, 0.0  ;;  %vm3768_vm4 = vcmp.gt.f32.partialorder %v3640_v3, 0.0  ;;  %vm3776_vm5 = vcmp.gt.f32.partialorder %v3648_v56, 0.0  ;;  %vm3784_vm6 = vcmp.gt.f32.partialorder %v3656_v20, 0.0 }
 0x6ab   :  { %vm3792_vm7 = vcmp.gt.f32.partialorder %v3664_v19, 0.0  ;;  %vm3800_vm8 = vcmp.gt.f32.partialorder %v3672_v63, 0.0  ;;  %vm3808_vm9 = vcmp.gt.f32.partialorder %v3680_v52, 0.0  ;;  %vm3816_vm10 = vcmp.gt.f32.partialorder %v3688_v4, 0.0 }
 0x6ac   :  { %vm3824_vm11 = vcmp.gt.f32.partialorder %v3696_v44, 0.0  ;;  %vm3832_vm12 = vcmp.gt.f32.partialorder %v3704_v58, 0.0  ;;  %vm3840_vm13 = vcmp.gt.f32.partialorder %v3712_v51, 0.0  ;;  %vm3848_vm14 = vcmp.gt.f32.partialorder %v3720_v59, 0.0 }
 0x6ad   :  { %vm3856_vm15 = vcmp.gt.f32.partialorder %v3728_v46, 0.0  ;;  %v3864_v42 = vmul.f32 0.2, %v3608_v35  ;;  %v3872_v0 = vmul.f32 0.2, %v3616_v17  ;;  %v3471_v28 = vmul.f32 %v7840_v55, %v3463_v6 }
 0x6ae   :  { %v3880_v34 = vmul.f32 0.2, %v3624_v11  ;;  %v3888_v21 = vmul.f32 0.2, %v3632_v61  ;;  %v3896_v57 = vmul.f32 0.2, %v3640_v3 }
 0x6af   :  { %v3904_v15 = vmul.f32 0.2, %v3648_v56  ;;  %v3912_v41 = vmul.f32 0.2, %v3656_v20  ;;  %v3920_v26 = vmul.f32 0.2, %v3664_v19  ;;  %v7929_v45 = vsel %vm3736_vm0, %v3608_v35, %v3864_v42 }
 0x6b0   :  { %v3928_v49 = vmul.f32 0.2, %v3672_v63  ;;  %v3936_v53 = vmul.f32 0.2, %v3680_v52  ;;  %v3944_v27 = vmul.f32 0.2, %v3688_v4  ;;  %v7932_v54 = vsel %vm3744_vm1, %v3616_v17, %v3872_v0 }
 0x6b1   :  { %v3952_v12 = vmul.f32 0.2, %v3696_v44  ;;  %v3960_v38 = vmul.f32 0.2, %v3704_v58  ;;  %v3968_v25 = vmul.f32 0.2, %v3712_v51  ;;  %v7935_v18 = vsel %vm3752_vm2, %v3624_v11, %v3880_v34 }
 0x6b2   :  { %v3976_v37 = vmul.f32 0.2, %v3720_v59  ;;  %v3984_v6 = vmul.f32 0.2, %v3728_v46  ;;  %v7938_v62 = vsel %vm3760_vm3, %v3632_v61, %v3888_v21  ;;  %v7941_v22 = vsel %vm3768_vm4, %v3640_v3, %v3896_v57 }
 0x6b3   :  { %v7944_v47 = vsel %vm3776_vm5, %v3648_v56, %v3904_v15  ;;  %v7947_v8 = vsel %vm3784_vm6, %v3656_v20, %v3912_v41  ;;  %v7950_v10 = vsel %vm3792_vm7, %v3664_v19, %v3920_v26  ;;  %v7953_v35 = vsel %vm3800_vm8, %v3672_v63, %v3928_v49  ;;  %v8815_v63 = vld [vmem:[#allocation74_spill] sm:$0xff]  ;;  %v8822_v41 = vld [vmem:[#allocation48_spill] sm:$0xff] }
 0x6b4   :  { %8807 = vst [vmem:[#allocation91_spill] sm:$0xff] %v7953_v35  ;;  %v7956_v17 = vsel %vm3808_vm9, %v3680_v52, %v3936_v53  ;;  %v7959_v11 = vsel %vm3816_vm10, %v3688_v4, %v3944_v27  ;;  %v7962_v61 = vsel %vm3824_vm11, %v3696_v44, %v3952_v12  ;;  %v7965_v3 = vsel %vm3832_vm12, %v3704_v58, %v3960_v38  ;;  %v8816_v4 = vld [vmem:[#allocation21_spill] sm:$0xff]  ;;  %v8823_v49 = vld [vmem:[#allocation32_spill] sm:$0xff] }
 0x6b5   :  { %8808 = vst [vmem:[#allocation27_spill] sm:$0xff] %v7956_v17  ;;  %8809 = vst [vmem:[#allocation43_spill] sm:$0xff] %v7959_v11  ;;  %v7968_v56 = vsel %vm3840_vm13, %v3712_v51, %v3968_v25  ;;  %v7971_v20 = vsel %vm3848_vm14, %v3720_v59, %v3976_v37  ;;  %v7974_v19 = vsel %vm3856_vm15, %v3728_v46, %v3984_v6  ;;  %v8817_v44 = vld [vmem:[#allocation25_spill] sm:$0xff]  ;;  %v8819_v51 = vld [vmem:[#allocation42_spill] sm:$0xff] }
 0x6b6   :  { %8810 = vst [vmem:[#allocation28_spill] sm:$0xff] %v7962_v61  ;;  %8811 = vst [vmem:[#allocation121_spill] sm:$0xff] %v7965_v3  ;;  %v3479_v52 = vmul.f32 %v7840_v55, %v8815_v63  ;;  %v3487_v42 = vmul.f32 %v7840_v55, %v8816_v4  ;;  %v3495_v0 = vmul.f32 %v7840_v55, %v8817_v44  ;;  %v8818_v58 = vld [vmem:[#allocation33_spill] sm:$0xff]  ;;  %v8820_v59 = vld [vmem:[#allocation92_spill] sm:$0xff] }
 0x6b7   :  { %8812 = vst [vmem:[#allocation122_spill] sm:$0xff] %v7968_v56  ;;  %8813 = vst [vmem:[#allocation123_spill] sm:$0xff] %v7971_v20  ;;  %v3503_v34 = vmul.f32 %v7840_v55, %v8818_v58  ;;  %v3511_v21 = vmul.f32 %v7840_v55, %v8819_v51  ;;  %v3519_v57 = vmul.f32 %v7840_v55, %v8820_v59  ;;  %v8821_v46 = vld [vmem:[#allocation31_spill] sm:$0xff]  ;;  %v8825_v6 = vld [vmem:[#allocation113_spill] sm:$0xff] }
 0x6b8   :  { %8814 = vst [vmem:[#allocation124_spill] sm:$0xff] %v7974_v19  ;;  %v3527_v15 = vmul.f32 %v7840_v55, %v8821_v46  ;;  %v3535_v26 = vmul.f32 %v7840_v55, %v8822_v41  ;;  %v3543_v53 = vmul.f32 %v7840_v55, %v8823_v49  ;;  %v3551_v27 = vmul.f32 %v7840_v55, %v8794_v24  ;;  %v8824_v25 = vld [vmem:[#allocation111_spill] sm:$0xff]  ;;  %v8827_v58 = vld [vmem:[#allocation117_spill] sm:$0xff] }
 0x6b9   :  { %v3559_v12 = vmul.f32 %v7840_v55, %v7545_v40  ;;  %v3567_v38 = vmul.f32 %v7840_v55, %v7587_v29  ;;  %v3575_v37 = vmul.f32 %v7840_v55, %v8824_v25  ;;  %v3583_v63 = vmul.f32 %v7840_v55, %v8825_v6  ;;  %v8826_v4 = vld [vmem:[#allocation115_spill] sm:$0xff] }
 0x6ba   :  { %v3591_v44 = vmul.f32 %v7840_v55, %v8826_v4  ;;  %v3599_v51 = vmul.f32 %v7840_v55, %v8827_v58  ;;  %v3607_v59 = vadd.f32 %v3479_v52, %v3471_v28  ;;  %v3615_v24 = vadd.f32 %v3487_v42, %v3471_v28 }
 0x6bb   :  { %v3623_v46 = vadd.f32 %v3495_v0, %v3471_v28  ;;  %v3631_v41 = vadd.f32 %v3503_v34, %v3471_v28  ;;  %v3639_v40 = vadd.f32 %v3511_v21, %v3471_v28  ;;  %v3647_v49 = vadd.f32 %v3519_v57, %v3471_v28 }
 0x6bc   :  { %v3655_v50 = vadd.f32 %v3527_v15, %v3471_v28  ;;  %v3663_v29 = vadd.f32 %v3535_v26, %v3471_v28  ;;  %v3671_v19 = vadd.f32 %v3543_v53, %v3471_v28  ;;  %v3679_v20 = vadd.f32 %v3551_v27, %v3471_v28 }
 0x6bd   :  { %v3687_v25 = vadd.f32 %v3559_v12, %v3471_v28  ;;  %v3695_v9 = vadd.f32 %v3567_v38, %v3471_v28  ;;  %v3703_v7 = vadd.f32 %v3575_v37, %v3471_v28  ;;  %v3711_v6 = vadd.f32 %v3583_v63, %v3471_v28 }
 0x6be   :  { %v3719_v56 = vadd.f32 %v3591_v44, %v3471_v28  ;;  %v3727_v3 = vadd.f32 %v3599_v51, %v3471_v28  ;;  %vm3735_vm0 = vcmp.gt.f32.partialorder %v3607_v59, 0.0  ;;  %vm3743_vm1 = vcmp.gt.f32.partialorder %v3615_v24, 0.0 }
 0x6bf   :  { %vm3751_vm2 = vcmp.gt.f32.partialorder %v3623_v46, 0.0  ;;  %vm3759_vm3 = vcmp.gt.f32.partialorder %v3631_v41, 0.0  ;;  %vm3767_vm4 = vcmp.gt.f32.partialorder %v3639_v40, 0.0  ;;  %vm3775_vm5 = vcmp.gt.f32.partialorder %v3647_v49, 0.0 }
 0x6c0   :  { %vm3783_vm6 = vcmp.gt.f32.partialorder %v3655_v50, 0.0  ;;  %vm3791_vm7 = vcmp.gt.f32.partialorder %v3663_v29, 0.0  ;;  %vm3799_vm8 = vcmp.gt.f32.partialorder %v3671_v19, 0.0  ;;  %vm3807_vm9 = vcmp.gt.f32.partialorder %v3679_v20, 0.0 }
 0x6c1   :  { %vm3815_vm10 = vcmp.gt.f32.partialorder %v3687_v25, 0.0  ;;  %vm3823_vm11 = vcmp.gt.f32.partialorder %v3695_v9, 0.0  ;;  %vm3831_vm12 = vcmp.gt.f32.partialorder %v3703_v7, 0.0  ;;  %vm3839_vm13 = vcmp.gt.f32.partialorder %v3711_v6, 0.0 }
 0x6c2   :  { %vm3847_vm14 = vcmp.gt.f32.partialorder %v3719_v56, 0.0  ;;  %vm3855_vm15 = vcmp.gt.f32.partialorder %v3727_v3, 0.0  ;;  %v3863_v55 = vmul.f32 0.2, %v3607_v59  ;;  %v3871_v52 = vmul.f32 0.2, %v3615_v24 }
 0x6c3   :  { %v3879_v42 = vmul.f32 0.2, %v3623_v46  ;;  %v3887_v28 = vmul.f32 0.2, %v3631_v41  ;;  %v8828_v0 = vsub.f32 0.0, %v7815_v5 }
 0x6c4   :  { %v3895_v21 = vmul.f32 0.2, %v3639_v40  ;;  %v3903_v57 = vmul.f32 0.2, %v3647_v49  ;;  %v3911_v15 = vmul.f32 0.2, %v3655_v50  ;;  %v8012_v26 = vsel %vm3735_vm0, %v3607_v59, %v3863_v55 }
 0x6c5   :  { %v3473_v34 = vmul.f32 %v7842_v2, %v8828_v0  ;;  %v3919_v53 = vmul.f32 0.2, %v3663_v29  ;;  %v3927_v27 = vmul.f32 0.2, %v3671_v19  ;;  %v3935_v12 = vmul.f32 0.2, %v3679_v20 }
 0x6c6   :  { %v8015_v38 = vsel %vm3743_vm1, %v3615_v24, %v3871_v52  ;;  %v3943_v37 = vmul.f32 0.2, %v3687_v25  ;;  %v3951_v63 = vmul.f32 0.2, %v3695_v9  ;;  %v3959_v4 = vmul.f32 0.2, %v3703_v7 }
 0x6c7   :  { %v8018_v44 = vsel %vm3751_vm2, %v3623_v46, %v3879_v42  ;;  %v3967_v5 = vmul.f32 0.2, %v3711_v6  ;;  %v3975_v58 = vmul.f32 0.2, %v3719_v56  ;;  %v3983_v51 = vmul.f32 0.2, %v3727_v3 }
 0x6c8   :  { %v8021_v0 = vsel %vm3759_vm3, %v3631_v41, %v3887_v28  ;;  %v8024_v59 = vsel %vm3767_vm4, %v3639_v40, %v3895_v21  ;;  %v8027_v55 = vsel %vm3775_vm5, %v3647_v49, %v3903_v57  ;;  %v8030_v24 = vsel %vm3783_vm6, %v3655_v50, %v3911_v15 }
 0x6c9   :  { %v8033_v52 = vsel %vm3791_vm7, %v3663_v29, %v3919_v53  ;;  %v8036_v46 = vsel %vm3799_vm8, %v3671_v19, %v3927_v27  ;;  %v8039_v42 = vsel %vm3807_vm9, %v3679_v20, %v3935_v12  ;;  %v8042_v41 = vsel %vm3815_vm10, %v3687_v25, %v3943_v37  ;;  %v8835_v20 = vld [vmem:[#allocation75_spill] sm:$0xff]  ;;  %v8842_v37 = vld [vmem:[#allocation20_spill] sm:$0xff] }
 0x6ca   :  { %8829 = vst [vmem:[#allocation74_spill] sm:$0xff] %v8042_v41  ;;  %v8045_v40 = vsel %vm3823_vm11, %v3695_v9, %v3951_v63  ;;  %v8048_v49 = vsel %vm3831_vm12, %v3703_v7, %v3959_v4  ;;  %v8051_v50 = vsel %vm3839_vm13, %v3711_v6, %v3967_v5  ;;  %v8054_v29 = vsel %vm3847_vm14, %v3719_v56, %v3975_v58  ;;  %v8836_v25 = vld [vmem:[#allocation83_spill] sm:$0xff]  ;;  %v8837_v9 = vld [vmem:[#allocation29_spill] sm:$0xff]  ;;  %v8839_v6 = vld [vmem:[#allocation86_spill] sm:$0xff] }
 0x6cb   :  { %8830 = vst [vmem:[#allocation21_spill] sm:$0xff] %v8045_v40  ;;  %8831 = vst [vmem:[#allocation25_spill] sm:$0xff] %v8048_v49  ;;  %v8057_v19 = vsel %vm3855_vm15, %v3727_v3, %v3983_v51  ;;  %v3481_v28 = vmul.f32 %v7842_v2, %v8835_v20  ;;  %v3489_v21 = vmul.f32 %v7842_v2, %v8836_v25  ;;  %v8838_v7 = vld [vmem:[#allocation37_spill] sm:$0xff]  ;;  %v8840_v56 = vld [vmem:[#allocation23_spill] sm:$0xff] }
 0x6cc   :  { %8832 = vst [vmem:[#allocation33_spill] sm:$0xff] %v8051_v50  ;;  %8833 = vst [vmem:[#allocation42_spill] sm:$0xff] %v8054_v29  ;;  %v3497_v57 = vmul.f32 %v7842_v2, %v8837_v9  ;;  %v3505_v15 = vmul.f32 %v7842_v2, %v8838_v7  ;;  %v3513_v53 = vmul.f32 %v7842_v2, %v8839_v6  ;;  %v8841_v3 = vld [vmem:[#allocation35_spill] sm:$0xff]  ;;  %v8843_v4 = vld [vmem:[#allocation36_spill] sm:$0xff] }
 0x6cd   :  { %8834 = vst [vmem:[#allocation92_spill] sm:$0xff] %v8057_v19  ;;  %v3521_v27 = vmul.f32 %v7842_v2, %v8840_v56  ;;  %v3529_v12 = vmul.f32 %v7842_v2, %v8841_v3  ;;  %v3537_v63 = vmul.f32 %v7842_v2, %v8842_v37  ;;  %v3545_v5 = vmul.f32 %v7842_v2, %v8843_v4  ;;  %v8844_v58 = vld [vmem:[#allocation19_spill] sm:$0xff]  ;;  %v8846_v9 = vld [vmem:[#allocation110_spill] sm:$0xff]  ;;  %v8847_v6 = vld [vmem:[#allocation112_spill] sm:$0xff] }
 0x6ce   :  { %v3553_v51 = vmul.f32 %v7842_v2, %v8844_v58  ;;  %v8845_v20 = vld [vmem:[#allocation103_spill] sm:$0xff]  ;;  %v3569_v7 = vmul.f32 %v7842_v2, %v8846_v9  ;;  %v3577_v56 = vmul.f32 %v7842_v2, %v8847_v6  ;;  %v8848_v19 = vld [vmem:[#allocation114_spill] sm:$0xff]  ;;  %v8849_v29 = vld [vmem:[#allocation116_spill] sm:$0xff]  ;;  %v3601_v4 = vmul.f32 %v7842_v2, %v8850_v39 }
 0x6cf   :  { %v3561_v25 = vmul.f32 %v7842_v2, %v8845_v20  ;;  %v3585_v3 = vmul.f32 %v7842_v2, %v8848_v19  ;;  %v3593_v37 = vmul.f32 %v7842_v2, %v8849_v29  ;;  %v3609_v43 = vadd.f32 %v3481_v28, %v3473_v34 }
 0x6d0   :  { %v3617_v58 = vadd.f32 %v3489_v21, %v3473_v34  ;;  %v3625_v50 = vadd.f32 %v3497_v57, %v3473_v34  ;;  %v3633_v49 = vadd.f32 %v3505_v15, %v3473_v34  ;;  %v3641_v20 = vadd.f32 %v3513_v53, %v3473_v34 }
 0x6d1   :  { %v3649_v61 = vadd.f32 %v3521_v27, %v3473_v34  ;;  %v3657_v11 = vadd.f32 %v3529_v12, %v3473_v34  ;;  %v3665_v9 = vadd.f32 %v3537_v63, %v3473_v34  ;;  %v3673_v16 = vadd.f32 %v3545_v5, %v3473_v34 }
 0x6d2   :  { %v3681_v1 = vadd.f32 %v3553_v51, %v3473_v34  ;;  %v3689_v6 = vadd.f32 %v3561_v25, %v3473_v34  ;;  %v3697_v40 = vadd.f32 %v3569_v7, %v3473_v34  ;;  %v3705_v41 = vadd.f32 %v3577_v56, %v3473_v34 }
 0x6d3   :  { %v3713_v19 = vadd.f32 %v3585_v3, %v3473_v34  ;;  %v3721_v17 = vadd.f32 %v3593_v37, %v3473_v34  ;;  %v3729_v35 = vadd.f32 %v3601_v4, %v3473_v34  ;;  %vm3737_vm0 = vcmp.gt.f32.partialorder %v3609_v43, 0.0 }
 0x6d4   :  { %vm3745_vm1 = vcmp.gt.f32.partialorder %v3617_v58, 0.0  ;;  %vm3753_vm2 = vcmp.gt.f32.partialorder %v3625_v50, 0.0  ;;  %vm3761_vm3 = vcmp.gt.f32.partialorder %v3633_v49, 0.0  ;;  %vm3769_vm4 = vcmp.gt.f32.partialorder %v3641_v20, 0.0 }
 0x6d5   :  { %vm3777_vm5 = vcmp.gt.f32.partialorder %v3649_v61, 0.0  ;;  %vm3785_vm6 = vcmp.gt.f32.partialorder %v3657_v11, 0.0  ;;  %vm3793_vm7 = vcmp.gt.f32.partialorder %v3665_v9, 0.0  ;;  %vm3801_vm8 = vcmp.gt.f32.partialorder %v3673_v16, 0.0 }
 0x6d6   :  { %vm3809_vm9 = vcmp.gt.f32.partialorder %v3681_v1, 0.0  ;;  %vm3817_vm10 = vcmp.gt.f32.partialorder %v3689_v6, 0.0  ;;  %vm3825_vm11 = vcmp.gt.f32.partialorder %v3697_v40, 0.0  ;;  %vm3833_vm12 = vcmp.gt.f32.partialorder %v3705_v41, 0.0 }
 0x6d7   :  { %vm3841_vm13 = vcmp.gt.f32.partialorder %v3713_v19, 0.0  ;;  %vm3849_vm14 = vcmp.gt.f32.partialorder %v3721_v17, 0.0  ;;  %vm3857_vm15 = vcmp.gt.f32.partialorder %v3729_v35, 0.0  ;;  %v3865_v2 = vmul.f32 0.2, %v3609_v43 }
 0x6d8   :  { %v3873_v39 = vmul.f32 0.2, %v3617_v58  ;;  %v3881_v29 = vmul.f32 0.2, %v3625_v50  ;;  %v3889_v34 = vmul.f32 0.2, %v3633_v49 }
 0x6d9   :  { %v3897_v28 = vmul.f32 0.2, %v3641_v20  ;;  %v3905_v21 = vmul.f32 0.2, %v3649_v61  ;;  %v3913_v57 = vmul.f32 0.2, %v3657_v11  ;;  %v8092_v27 = vsel %vm3737_vm0, %v3609_v43, %v3865_v2 }
 0x6da   :  { %v3921_v15 = vmul.f32 0.2, %v3665_v9  ;;  %v3929_v53 = vmul.f32 0.2, %v3673_v16  ;;  %v3937_v12 = vmul.f32 0.2, %v3681_v1  ;;  %v8095_v51 = vsel %vm3745_vm1, %v3617_v58, %v3873_v39 }
 0x6db   :  { %v3945_v63 = vmul.f32 0.2, %v3689_v6  ;;  %v3953_v5 = vmul.f32 0.2, %v3697_v40  ;;  %v3961_v25 = vmul.f32 0.2, %v3705_v41  ;;  %v8098_v3 = vsel %vm3753_vm2, %v3625_v50, %v3881_v29 }
 0x6dc   :  { %v3969_v7 = vmul.f32 0.2, %v3713_v19  ;;  %v3977_v56 = vmul.f32 0.2, %v3721_v17  ;;  %v3985_v37 = vmul.f32 0.2, %v3729_v35  ;;  %v8101_v4 = vsel %vm3761_vm3, %v3633_v49, %v3889_v34 }
 0x6dd   :  { %v8104_v60 = vsel %vm3769_vm4, %v3641_v20, %v3897_v28  ;;  %v8107_v43 = vsel %vm3777_vm5, %v3649_v61, %v3905_v21  ;;  %v8110_v2 = vsel %vm3785_vm6, %v3657_v11, %v3913_v57  ;;  %v8113_v58 = vsel %vm3793_vm7, %v3665_v9, %v3921_v15 }
 0x6de   :  { %v8116_v39 = vsel %vm3801_vm8, %v3673_v16, %v3929_v53  ;;  %v8119_v50 = vsel %vm3809_vm9, %v3681_v1, %v3937_v12  ;;  %v8122_v49 = vsel %vm3817_vm10, %v3689_v6, %v3945_v63  ;;  %v8125_v20 = vsel %vm3825_vm11, %v3697_v40, %v3953_v5 }
 0x6df   :  { %v8128_v61 = vsel %vm3833_vm12, %v3705_v41, %v3961_v25  ;;  %v8131_v11 = vsel %vm3841_vm13, %v3713_v19, %v3969_v7  ;;  %v8134_v9 = vsel %vm3849_vm14, %v3721_v17, %v3977_v56  ;;  %v8137_v16 = vsel %vm3857_vm15, %v3729_v35, %v3985_v37 }
 0x6e0   :  { %5296 = dma.done.wait [#allocation5 + $0x2], 8192 }
 0x6e1   :  { %5297 = vsyncadd [#allocation5 + $0x2], 4294959104  ;;  %v8851_v1 = vld [vmem:[#allocation41_spill] sm:$0xff]  ;;  %v8854_v40 = vld [vmem:[#allocation94_spill] sm:$0xff] }
 0x6e2   :  { %v8852_v6 = vld [vmem:[#allocation45_spill] sm:$0xff]  ;;  %v4191_v57 = vld [vmem:[#allocation4 + $0x48] sm:$0xff]  ;;  %v4192_v12 = vld [vmem:[#allocation4 + $0x50] sm:$0xff] }
 0x6e3   :  { %v4119_v29 = vpack.c.bf16 %v8852_v6, %v8851_v1  ;;  %v8853_v34 = vld [vmem:[#allocation93_spill] sm:$0xff]  ;;  %v4207_v15 = vld [vmem:[#allocation4 + $0xc8] sm:$0xff]  ;;  %v4208_v63 = vld [vmem:[#allocation4 + $0xd0] sm:$0xff] }
 0x6e4   :  { %v4121_v28 = vpack.c.bf16 %v8854_v40, %v8853_v34  ;;  %v4190_v41 = vld [vmem:[#allocation4 + $0x40] sm:$0xff]  ;;  %v4183_v35 = vld [vmem:[#allocation4 + $0x8] sm:$0xff]  ;;  %v4184_v5 = vld [vmem:[#allocation4 + $0x10] sm:$0xff] }
 0x6e5   :  { %4285 = vmatprep.mubr.bf16.mxu0 %v4119_v29  ;;  %v4206_v21 = vld [vmem:[#allocation4 + $0xc0] sm:$0xff]  ;;  %4746 = vmatprep.subr.bf16.mxu0 %v4190_v41  ;;  %v4199_v53 = vld [vmem:[#allocation4 + $0x88] sm:$0xff]  ;;  %v4200_v25 = vld [vmem:[#allocation4 + $0x90] sm:$0xff] }
 0x6e6   :  { %4382 = vmatprep.mubr.bf16.mxu1 %v4121_v28  ;;  %v4182_v19 = vld [vmem:[#allocation4] sm:$0xff]  ;;  %4810 = vmatprep.subr.bf16.mxu1 %v4206_v21  ;;  %v4193_v7 = vld [vmem:[#allocation4 + $0x58] sm:$0xff]  ;;  %v4195_v28 = vld [vmem:[#allocation4 + $0x68] sm:$0xff] }
 0x6e7   :  { %v4198_v17 = vld [vmem:[#allocation4 + $0x80] sm:$0xff]  ;;  %4747 = vmatpush3.bf16.msra.mxu0 %v4182_v19  ;;  %v4209_v56 = vld [vmem:[#allocation4 + $0xd8] sm:$0xff]  ;;  %v4211_v41 = vld [vmem:[#allocation4 + $0xe8] sm:$0xff] }
 0x6e8   :  { %4811 = vmatpush3.bf16.msra.mxu1 %v4198_v17  ;;  %4748 = vmatprep.subr.bf16.mxu0 %v4191_v57  ;;  %v4185_v37 = vld [vmem:[#allocation4 + $0x18] sm:$0xff]  ;;  %v4194_v6 = vld [vmem:[#allocation4 + $0x60] sm:$0xff]  ;;  %v4187_v21 = vld [vmem:[#allocation4 + $0x28] sm:$0xff] }
 0x6e9   :  { %4812 = vmatprep.subr.bf16.mxu1 %v4207_v15  ;;  %v4201_v1 = vld [vmem:[#allocation4 + $0x98] sm:$0xff]  ;;  %v4210_v29 = vld [vmem:[#allocation4 + $0xe0] sm:$0xff]  ;;  %v4203_v19 = vld [vmem:[#allocation4 + $0xa8] sm:$0xff] }
 0x6ea   :  { %v4186_v34 = vld [vmem:[#allocation4 + $0x20] sm:$0xff]  ;;  %v4196_v17 = vld [vmem:[#allocation4 + $0x70] sm:$0xff] }
 0x6eb   :  { %4749 = vmatpush3.bf16.msra.mxu0 %v4183_v35  ;;  %v4202_v40 = vld [vmem:[#allocation4 + $0xa0] sm:$0xff]  ;;  %v4212_v57 = vld [vmem:[#allocation4 + $0xf0] sm:$0xff] }
 0x6ec   :  { %4813 = vmatpush3.bf16.msra.mxu1 %v4199_v53  ;;  %4750 = vmatprep.subr.bf16.mxu0 %v4192_v12  ;;  %v4188_v15 = vld [vmem:[#allocation4 + $0x30] sm:$0xff]  ;;  %v4197_v53 = vld [vmem:[#allocation4 + $0x78] sm:$0xff] }
 0x6ed   :  { %4814 = vmatprep.subr.bf16.mxu1 %v4208_v63  ;;  %v4204_v35 = vld [vmem:[#allocation4 + $0xb0] sm:$0xff]  ;;  %v4213_v12 = vld [vmem:[#allocation4 + $0xf8] sm:$0xff] }
 0x6ee   :  { %v4189_v63 = vld [vmem:[#allocation4 + $0x38] sm:$0xff] }
 0x6ef   :  { %4751 = vmatpush3.bf16.msra.mxu0 %v4184_v5  ;;  %v4205_v5 = vld [vmem:[#allocation4 + $0xb8] sm:$0xff] }
 0x6f0   :  { %4815 = vmatpush3.bf16.msra.mxu1 %v4200_v25  ;;  %4752 = vmatprep.subr.bf16.mxu0 %v4193_v7  ;;  %v4222_v25 = vld [vmem:[#allocation4 + $0x140] sm:$0xff] }
 0x6f1   :  { %4816 = vmatprep.subr.bf16.mxu1 %v4209_v56  ;;  %v4238_v7 = vld [vmem:[#allocation4 + $0x1c0] sm:$0xff]  ;;  %v8855_v56 = vld [vmem:[#allocation51_spill] sm:$0xff] }
 0x6f3   :  { %4753 = vmatpush3.bf16.msra.mxu0 %v4185_v37  ;;  %v8856_v37 = vld [vmem:[#allocation52_spill] sm:$0xff] }
 0x6f4   :  { %4817 = vmatpush3.bf16.msra.mxu1 %v4201_v1  ;;  %4754 = vmatprep.subr.bf16.mxu0 %v4194_v6  ;;  %v4118_v1 = vpack.c.bf16 %v8856_v37, %v8855_v56  ;;  %v8857_v6 = vld [vmem:[#allocation66_spill] sm:$0xff]  ;;  %v8864_v56 = vld [vmem:[#allocation53_spill] sm:$0xff] }
 0x6f5   :  { %4818 = vmatprep.subr.bf16.mxu1 %v4210_v29  ;;  %v8858_v29 = vld [vmem:[#allocation67_spill] sm:$0xff] }
 0x6f7   :  { %4755 = vmatpush3.bf16.msra.mxu0 %v4186_v34  ;;  %v4120_v34 = vpack.c.bf16 %v8858_v29, %v8857_v6  ;;  %v8865_v6 = vld [vmem:[#allocation50_spill] sm:$0xff]  ;;  %v8866_v29 = vld [vmem:[#allocation68_spill] sm:$0xff] }
 0x6f8   :  { %4819 = vmatpush3.bf16.msra.mxu1 %v4202_v40  ;;  %4756 = vmatprep.subr.bf16.mxu0 %v4195_v28  ;;  %v4214_v40 = vld [vmem:[#allocation4 + $0x100] sm:$0xff] }
 0x6f9   :  { %4820 = vmatprep.subr.bf16.mxu1 %v4211_v41  ;;  %v4230_v28 = vld [vmem:[#allocation4 + $0x180] sm:$0xff]  ;;  %v8859_v41 = vld [vmem:[#allocation18_spill] sm:$0xff] }
 0x6fb   :  { %4757 = vmatpush3.bf16.msra.mxu0 %v4187_v21  ;;  %v8860_v21 = vld [vmem:[#allocation22_spill] sm:$0xff] }
 0x6fc   :  { %4821 = vmatpush3.bf16.msra.mxu1 %v4203_v19  ;;  %4758 = vmatprep.subr.bf16.mxu0 %v4196_v17  ;;  %v4127_v19 = vpack.c.bf16 %v8860_v21, %v8859_v41  ;;  %v8861_v17 = vld [vmem:[#allocation95_spill] sm:$0xff]  ;;  %v4128_v41 = vpack.c.bf16 %v8866_v29, %v8865_v6  ;;  %v8870_v21 = vld [vmem:[#allocation98_spill] sm:$0xff]  ;;  %v8873_v6 = vld [vmem:[#allocation69_spill] sm:$0xff] }
 0x6fd   :  { %4822 = vmatprep.subr.bf16.mxu1 %v4212_v57  ;;  %v8862_v57 = vld [vmem:[#allocation96_spill] sm:$0xff]  ;;  %v4226_v29 = vld [vmem:[#allocation4 + $0x160] sm:$0xff] }
 0x6ff   :  { %4759 = vmatpush3.bf16.msra.mxu0 %v4188_v15  ;;  %v4129_v15 = vpack.c.bf16 %v8862_v57, %v8861_v17  ;;  %v4216_v17 = vld [vmem:[#allocation4 + $0x110] sm:$0xff] }
 0x700   :  { %4823 = vmatpush3.bf16.msra.mxu1 %v4204_v35  ;;  %4760 = vmatprep.subr.bf16.mxu0 %v4197_v53  ;;  %v4223_v35 = vld [vmem:[#allocation4 + $0x148] sm:$0xff]  ;;  %v4232_v57 = vld [vmem:[#allocation4 + $0x190] sm:$0xff] }
 0x701   :  { %4824 = vmatprep.subr.bf16.mxu1 %v4213_v12  ;;  %v4239_v53 = vld [vmem:[#allocation4 + $0x1c8] sm:$0xff] }
 0x702   :  { %v4215_v12 = vld [vmem:[#allocation4 + $0x108] sm:$0xff] }
 0x703   :  { %4761 = vmatpush3.bf16.msra.mxu0 %v4189_v63  ;;  %v4231_v63 = vld [vmem:[#allocation4 + $0x188] sm:$0xff] }
 0x704   :  { %4825 = vmatpush3.bf16.msra.mxu1 %v4205_v5  ;;  %4874 = vmatprep.subr.bf16.mxu0 %v4222_v25  ;;  %v4224_v5 = vld [vmem:[#allocation4 + $0x150] sm:$0xff] }
 0x705   :  { %4938 = vmatprep.subr.bf16.mxu1 %v4238_v7  ;;  %v4240_v25 = vld [vmem:[#allocation4 + $0x1d0] sm:$0xff] }
 0x706   :  { %4286 = vmatmul.mubr.bf16.vlgmr.msra.gmra.mrb[112].mxu0 %v4118_v1  ;;  %v8863_v7 = vld [vmem:[#allocation47_spill] sm:$0xff]  ;;  %v8867_v1 = vld [vmem:[#allocation26_spill] sm:$0xff] }
 0x707   :  { %4383 = vmatmul.mubr.bf16.vlgmr.msra.gmra.mrb[128].mxu1 %v4120_v34  ;;  %4875 = vmatpush3.bf16.msra.mxu0 %v4214_v40  ;;  %v4126_v37 = vpack.c.bf16 %v8864_v56, %v8863_v7  ;;  %v8868_v34 = vld [vmem:[#allocation30_spill] sm:$0xff]  ;;  %v8872_v7 = vld [vmem:[#allocation55_spill] sm:$0xff] }
 0x708   :  { %4939 = vmatpush3.bf16.msra.mxu1 %v4230_v28  ;;  %4293 = vmatprep.mubr.bf16.mxu0 %v4127_v19  ;;  %v4135_v40 = vpack.c.bf16 %v8868_v34, %v8867_v1  ;;  %v8869_v28 = vld [vmem:[#allocation97_spill] sm:$0xff] }
 0x709   :  { %4390 = vmatprep.mubr.bf16.mxu1 %v4129_v15  ;;  %4876 = vmatprep.subr.bf16.mxu0 %v4223_v35  ;;  %v4137_v19 = vpack.c.bf16 %v8870_v21, %v8869_v28  ;;  %v4225_v15 = vld [vmem:[#allocation4 + $0x158] sm:$0xff]  ;;  %v4242_v1 = vld [vmem:[#allocation4 + $0x1e0] sm:$0xff]  ;;  %v8877_v28 = vld [vmem:[#allocation99_spill] sm:$0xff] }
 0x70a   :  { %4940 = vmatprep.subr.bf16.mxu1 %v4239_v53  ;;  %v4241_v35 = vld [vmem:[#allocation4 + $0x1d8] sm:$0xff] }
 0x70b   :  { %4877 = vmatpush3.bf16.msra.mxu0 %v4215_v12  ;;  %v4217_v53 = vld [vmem:[#allocation4 + $0x118] sm:$0xff] }
 0x70c   :  { %4941 = vmatpush3.bf16.msra.mxu1 %v4231_v63  ;;  %4878 = vmatprep.subr.bf16.mxu0 %v4224_v5  ;;  %v4233_v12 = vld [vmem:[#allocation4 + $0x198] sm:$0xff]  ;;  %v8871_v63 = vld [vmem:[#allocation54_spill] sm:$0xff] }
 0x70d   :  { %4942 = vmatprep.subr.bf16.mxu1 %v4240_v25  ;;  %v4134_v56 = vpack.c.bf16 %v8872_v7, %v8871_v63  ;;  %v8874_v5 = vld [vmem:[#allocation70_spill] sm:$0xff]  ;;  %v8879_v7 = vld [vmem:[#allocation56_spill] sm:$0xff] }
 0x70e   :  { %4294 = vmatmul.mubr.bf16.gmra.mrb[116].mxu0 %v4126_v37  ;;  %v4136_v25 = vpack.c.bf16 %v8874_v5, %v8873_v6  ;;  %v8875_v37 = vld [vmem:[#allocation34_spill] sm:$0xff]  ;;  %v8880_v6 = vld [vmem:[#allocation57_spill] sm:$0xff]  ;;  %v8882_v5 = vld [vmem:[#allocation72_spill] sm:$0xff] }
 0x70f   :  { %4391 = vmatmul.mubr.bf16.gmra.mrb[132].mxu1 %v4128_v41  ;;  %4301 = vmatprep.mubr.bf16.mxu0 %v4135_v40  ;;  %v8876_v41 = vld [vmem:[#allocation38_spill] sm:$0xff]  ;;  %v8878_v40 = vld [vmem:[#allocation100_spill] sm:$0xff] }
 0x710   :  { %4398 = vmatprep.mubr.bf16.mxu1 %v4137_v19  ;;  %4879 = vmatpush3.bf16.msra.mxu0 %v4216_v17  ;;  %v4143_v34 = vpack.c.bf16 %v8876_v41, %v8875_v37  ;;  %v4145_v21 = vpack.c.bf16 %v8878_v40, %v8877_v28  ;;  %v4218_v19 = vld [vmem:[#allocation4 + $0x120] sm:$0xff]  ;;  %v4235_v63 = vld [vmem:[#allocation4 + $0x1a8] sm:$0xff]  ;;  %v4244_v37 = vld [vmem:[#allocation4 + $0x1f0] sm:$0xff] }
 0x711   :  { %4943 = vmatpush3.bf16.msra.mxu1 %v4232_v57  ;;  %4880 = vmatprep.subr.bf16.mxu0 %v4225_v15  ;;  %v4234_v17 = vld [vmem:[#allocation4 + $0x1a0] sm:$0xff]  ;;  %v4227_v57 = vld [vmem:[#allocation4 + $0x168] sm:$0xff] }
 0x712   :  { %4944 = vmatprep.subr.bf16.mxu1 %v4241_v35  ;;  %v4243_v15 = vld [vmem:[#allocation4 + $0x1e8] sm:$0xff]  ;;  %v8885_v28 = vld [vmem:[#allocation101_spill] sm:$0xff] }
 0x713   :  { %v4219_v35 = vld [vmem:[#allocation4 + $0x128] sm:$0xff] }
 0x714   :  { %4881 = vmatpush3.bf16.msra.mxu0 %v4217_v53  ;;  %v4142_v53 = vpack.c.bf16 %v8880_v6, %v8879_v7  ;;  %v4237_v7 = vld [vmem:[#allocation4 + $0x1b8] sm:$0xff]  ;;  %v8887_v6 = vld [vmem:[#allocation58_spill] sm:$0xff] }
 0x715   :  { %4945 = vmatpush3.bf16.msra.mxu1 %v4233_v12  ;;  %4882 = vmatprep.subr.bf16.mxu0 %v4226_v29  ;;  %v8881_v12 = vld [vmem:[#allocation71_spill] sm:$0xff] }
 0x716   :  { %4946 = vmatprep.subr.bf16.mxu1 %v4242_v1  ;;  %4302 = vmatmul.mubr.bf16.gmra.mrb[120].mxu0 %v4134_v56  ;;  %v4144_v29 = vpack.c.bf16 %v8882_v5, %v8881_v12  ;;  %v4228_v1 = vld [vmem:[#allocation4 + $0x170] sm:$0xff]  ;;  %v8883_v56 = vld [vmem:[#allocation46_spill] sm:$0xff]  ;;  %v8890_v5 = vld [vmem:[#allocation76_spill] sm:$0xff] }
 0x717   :  { %4399 = vmatmul.mubr.bf16.gmra.mrb[136].mxu1 %v4136_v25  ;;  %4309 = vmatprep.mubr.bf16.mxu0 %v4143_v34  ;;  %v8884_v25 = vld [vmem:[#allocation17_spill] sm:$0xff]  ;;  %v8886_v34 = vld [vmem:[#allocation102_spill] sm:$0xff]  ;;  %v8888_v12 = vld [vmem:[#allocation59_spill] sm:$0xff] }
 0x718   :  { %4406 = vmatprep.mubr.bf16.mxu1 %v4145_v21  ;;  %4883 = vmatpush3.bf16.msra.mxu0 %v4218_v19  ;;  %v4151_v41 = vpack.c.bf16 %v8884_v25, %v8883_v56  ;;  %v4153_v40 = vpack.c.bf16 %v8886_v34, %v8885_v28  ;;  %v4220_v21 = vld [vmem:[#allocation4 + $0x130] sm:$0xff]  ;;  %v8892_v56 = vld [vmem:[#allocation85_spill] sm:$0xff] }
 0x719   :  { %4947 = vmatpush3.bf16.msra.mxu1 %v4234_v17  ;;  %4884 = vmatprep.subr.bf16.mxu0 %v4227_v57  ;;  %v4236_v19 = vld [vmem:[#allocation4 + $0x1b0] sm:$0xff]  ;;  %v4229_v17 = vld [vmem:[#allocation4 + $0x178] sm:$0xff]  ;;  %v8894_v25 = vld [vmem:[#allocation105_spill] sm:$0xff] }
 0x71a   :  { %4948 = vmatprep.subr.bf16.mxu1 %v4243_v15  ;;  %v4245_v57 = vld [vmem:[#allocation4 + $0x1f8] sm:$0xff]  ;;  %v8896_v34 = vld [vmem:[#allocation61_spill] sm:$0xff] }
 0x71b   :  { %v4221_v15 = vld [vmem:[#allocation4 + $0x138] sm:$0xff] }
 0x71c   :  { %4885 = vmatpush3.bf16.msra.mxu0 %v4219_v35  ;;  %v4150_v35 = vpack.c.bf16 %v8888_v12, %v8887_v6  ;;  %v8900_v6 = vld [vmem:[#allocation88_spill] sm:$0xff] }
 0x71d   :  { %4949 = vmatpush3.bf16.msra.mxu1 %v4235_v63  ;;  %4886 = vmatprep.subr.bf16.mxu0 %v4228_v1  ;;  %v8889_v63 = vld [vmem:[#allocation73_spill] sm:$0xff] }
 0x71e   :  { %4950 = vmatprep.subr.bf16.mxu1 %v4244_v37  ;;  %4310 = vmatmul.mubr.bf16.gmra.mrb[124].mxu0 %v4142_v53  ;;  %v4152_v1 = vpack.c.bf16 %v8890_v5, %v8889_v63  ;;  %v8891_v37 = vld [vmem:[#allocation84_spill] sm:$0xff]  ;;  %v8901_v63 = vld [vmem:[#allocation106_spill] sm:$0xff]  ;;  %v8902_v5 = vld [vmem:[#allocation107_spill] sm:$0xff] }
 0x71f   :  { %4407 = vmatmul.mubr.bf16.gmra.mrb[140].mxu1 %v4144_v29  ;;  %4317 = vmatprep.mubr.bf16.mxu0 %v4151_v41  ;;  %v4159_v53 = vpack.c.bf16 %v8892_v56, %v8891_v37  ;;  %v8893_v29 = vld [vmem:[#allocation104_spill] sm:$0xff]  ;;  %v4169_v37 = vpack.c.bf16 %v8902_v5, %v8901_v63  ;;  %v4123_v63 = vpack.c.bf16 %v8015_v38, %v8012_v26 }
 0x720   :  { %4414 = vmatprep.mubr.bf16.mxu1 %v4153_v40  ;;  %4887 = vmatpush3.bf16.msra.mxu0 %v4220_v21  ;;  %v4161_v28 = vpack.c.bf16 %v8894_v25, %v8893_v29  ;;  %v8895_v41 = vld [vmem:[#allocation60_spill] sm:$0xff]  ;;  %v8897_v21 = vld [vmem:[#allocation77_spill] sm:$0xff]  ;;  %v8908_v25 = vld [vmem:[#allocation90_spill] sm:$0xff]  ;;  %v4125_v5 = vpack.c.bf16 %v8095_v51, %v8092_v27  ;;  %v4130_v26 = vpack.c.bf16 %v7857_v32, %v7854_v30 }
 0x721   :  { %4951 = vmatpush3.bf16.msra.mxu1 %v4236_v19  ;;  %4888 = vmatprep.subr.bf16.mxu0 %v4229_v17  ;;  %v4158_v40 = vpack.c.bf16 %v8896_v34, %v8895_v41  ;;  %v8898_v19 = vld [vmem:[#allocation78_spill] sm:$0xff]  ;;  %v8906_v56 = vld [vmem:[#allocation80_spill] sm:$0xff]  ;;  %v8907_v29 = vld [vmem:[#allocation89_spill] sm:$0xff]  ;;  %v4132_v38 = vpack.c.bf16 %v7938_v62, %v7935_v18  ;;  %v4147_v30 = vpack.c.bf16 %v8033_v52, %v8030_v24 }
 0x722   :  { %4952 = vmatprep.subr.bf16.mxu1 %v4245_v57  ;;  %v4160_v17 = vpack.c.bf16 %v8898_v19, %v8897_v21  ;;  %v8899_v57 = vld [vmem:[#allocation87_spill] sm:$0xff]  ;;  %v8909_v41 = vld [vmem:[#allocation108_spill] sm:$0xff]  ;;  %v8910_v34 = vld [vmem:[#allocation109_spill] sm:$0xff]  ;;  %v4149_v32 = vpack.c.bf16 %v8113_v58, %v8110_v2  ;;  %v4148_v18 = vpack.c.bf16 %v7950_v10, %v7947_v8  ;;  %v4165_v8 = vpack.c.bf16 %v8125_v20, %v8122_v49 }
 0x723   :  { %v4167_v12 = vpack.c.bf16 %v8900_v6, %v8899_v57  ;;  %v4177_v21 = vpack.c.bf16 %v8910_v34, %v8909_v41  ;;  %v8912_v19 = vld [vmem:[#allocation65_spill] sm:$0xff]  ;;  %v8914_v6 = vld [vmem:[#allocation82_spill] sm:$0xff]  ;;  %v8915_v62 = vld [vmem:[#allocation39_spill] sm:$0xff] }
 0x724   :  { %4889 = vmatpush3.bf16.msra.mxu0 %v4221_v15  ;;  %v8903_v15 = vld [vmem:[#allocation62_spill] sm:$0xff]  ;;  %v8913_v57 = vld [vmem:[#allocation81_spill] sm:$0xff]  ;;  %v8920_v10 = vld [vmem:[#allocation24_spill] sm:$0xff] }
 0x725   :  { %4953 = vmatpush3.bf16.msra.mxu1 %v4237_v7  ;;  %v8904_v7 = vld [vmem:[#allocation63_spill] sm:$0xff]  ;;  %v8925_v27 = vld [vmem:[#allocation33_spill] sm:$0xff]  ;;  %v8930_v49 = vld [vmem:[#allocation42_spill] sm:$0xff] }
 0x726   :  { %4318 = vmatmul.mubr.bf16.gmra.mrb[128].mxu0 %v4150_v35  ;;  %v4166_v35 = vpack.c.bf16 %v8904_v7, %v8903_v15  ;;  %v4124_v15 = vpack.c.bf16 %v7932_v54, %v7929_v45  ;;  %v4131_v7 = vpack.c.bf16 %v8021_v0, %v8018_v44  ;;  %v4138_v45 = vpack.c.bf16 %v7863_v36, %v7860_v33  ;;  %v8917_v44 = vld [vmem:[#allocation27_spill] sm:$0xff]  ;;  %v8928_v58 = vld [vmem:[#allocation121_spill] sm:$0xff]  ;;  %v8931_v20 = vld [vmem:[#allocation92_spill] sm:$0xff] }
 0x727   :  { %4415 = vmatmul.mubr.bf16.gmra.mrb[144].mxu1 %v4152_v1  ;;  %4325 = vmatprep.mubr.bf16.mxu0 %v4159_v53  ;;  %v8905_v1 = vld [vmem:[#allocation79_spill] sm:$0xff]  ;;  %v4140_v54 = vpack.c.bf16 %v7944_v47, %v7941_v22  ;;  %v4155_v33 = vpack.c.bf16 %v8039_v42, %v8036_v46  ;;  %v4157_v36 = vpack.c.bf16 %v8119_v50, %v8116_v39  ;;  %v8923_v46 = vld [vmem:[#allocation28_spill] sm:$0xff]  ;;  %v8929_v39 = vld [vmem:[#allocation122_spill] sm:$0xff] }
 0x728   :  { %4422 = vmatprep.mubr.bf16.mxu1 %v4161_v28  ;;  %v4168_v53 = vpack.c.bf16 %v8906_v56, %v8905_v1  ;;  %v4175_v28 = vpack.c.bf16 %v8908_v25, %v8907_v29  ;;  %v4154_v22 = vpack.c.bf16 %v8915_v62, %v7872_v14  ;;  %v8916_v47 = vld [vmem:[#allocation91_spill] sm:$0xff]  ;;  %v8924_v14 = vld [vmem:[#allocation25_spill] sm:$0xff]  ;;  %v4172_v50 = vpack.c.bf16 %v8929_v39, %v8928_v58  ;;  %v8935_v25 = vld [vmem:[#allocation124_spill] sm:$0xff] }
 0x729   :  { %v4156_v0 = vpack.c.bf16 %v8917_v44, %v8916_v47  ;;  %v8922_v52 = vld [vmem:[#allocation43_spill] sm:$0xff]  ;;  %v4171_v51 = vpack.c.bf16 %v8925_v27, %v8924_v14  ;;  %v4179_v1 = vpack.c.bf16 %v8931_v20, %v8930_v49  ;;  %v4181_v56 = vpack.c.bf16 %v8137_v16, %v8134_v9 }
 0x72a   :  { %v4164_v42 = vpack.c.bf16 %v8923_v46, %v8922_v52  ;;  %v8934_v29 = vld [vmem:[#allocation123_spill] sm:$0xff] }
 0x72e   :  { %4326 = vmatmul.mubr.bf16.gmra.mrb[132].mxu0 %v4158_v40  ;;  %v8911_v40 = vld [vmem:[#allocation64_spill] sm:$0xff] }
 0x72f   :  { %4423 = vmatmul.mubr.bf16.gmra.mrb[148].mxu1 %v4160_v17  ;;  %4333 = vmatprep.mubr.bf16.mxu0 %v4167_v12  ;;  %v4174_v17 = vpack.c.bf16 %v8912_v19, %v8911_v40  ;;  %v4176_v12 = vpack.c.bf16 %v8914_v6, %v8913_v57 }
 0x730   :  { %4430 = vmatprep.mubr.bf16.mxu1 %v4169_v37  ;;  %v4122_v37 = vpack.c.bf16 %v7851_v48, %v7848_v31  ;;  %v4139_v31 = vpack.c.bf16 %v8027_v55, %v8024_v59  ;;  %v4141_v48 = vpack.c.bf16 %v8107_v43, %v8104_v60  ;;  %v4146_v60 = vpack.c.bf16 %v7869_v23, %v7866_v13  ;;  %v8918_v13 = vld [vmem:[#allocation74_spill] sm:$0xff]  ;;  %v8919_v23 = vld [vmem:[#allocation21_spill] sm:$0xff]  ;;  %v8921_v55 = vld [vmem:[#allocation40_spill] sm:$0xff] }
 0x731   :  { %v4163_v59 = vpack.c.bf16 %v8919_v23, %v8918_v13  ;;  %v4162_v24 = vpack.c.bf16 %v8921_v55, %v8920_v10  ;;  %v8927_v43 = vld [vmem:[#allocation49_spill] sm:$0xff] }
 0x736   :  { %4334 = vmatmul.mubr.bf16.gmra.mrb[136].mxu0 %v4166_v35  ;;  %v4133_v35 = vpack.c.bf16 %v8101_v4, %v8098_v3  ;;  %v4173_v3 = vpack.c.bf16 %v8131_v11, %v8128_v61  ;;  %v8926_v4 = vld [vmem:[#allocation44_spill] sm:$0xff]  ;;  %v8932_v61 = vld [vmem:[#allocation119_spill] sm:$0xff] }
 0x737   :  { %4431 = vmatmul.mubr.bf16.gmra.mrb[152].mxu1 %v4168_v53  ;;  %4341 = vmatprep.mubr.bf16.mxu0 %v4175_v28  ;;  %v4170_v2 = vpack.c.bf16 %v8927_v43, %v8926_v4  ;;  %v8933_v11 = vld [vmem:[#allocation120_spill] sm:$0xff]  ;;  %v4180_v28 = vpack.c.bf16 %v8935_v25, %v8934_v29 }
 0x738   :  { %4438 = vmatprep.mubr.bf16.mxu1 %v4177_v21  ;;  %v4178_v53 = vpack.c.bf16 %v8933_v11, %v8932_v61  ;;  %v8270_v21 = vld [vmem:[%s8391_s7] ss:$0 sm:$0xff] }
 0x73e   :  { %4342 = vmatmul.mubr.bf16.gmra.mrb[140].mxu0 %v4174_v17 }
 0x73f   :  { %4439 = vmatmul.mubr.bf16.gmra.mrb[156].mxu1 %v4176_v12  ;;  %4479 = vmatprep.mubr.bf16.mxu0 %v4123_v63 }
 0x740   :  { %4576 = vmatprep.mubr.bf16.mxu1 %v4125_v5 }
 0x746   :  { %4480 = vmatmul.mubr.bf16.vlgmr.msra.gmra.mrb[144].mxu0 %v4122_v37 }
 0x747   :  { %4577 = vmatmul.mubr.bf16.vlgmr.msra.gmra.mrb[160].mxu1 %v4124_v15  ;;  %4487 = vmatprep.mubr.bf16.mxu0 %v4131_v7 }
 0x748   :  { %4584 = vmatprep.mubr.bf16.mxu1 %v4133_v35 }
 0x74e   :  { %4488 = vmatmul.mubr.bf16.gmra.mrb[148].mxu0 %v4130_v26 }
 0x74f   :  { %4585 = vmatmul.mubr.bf16.gmra.mrb[164].mxu1 %v4132_v38  ;;  %4495 = vmatprep.mubr.bf16.mxu0 %v4139_v31 }
 0x750   :  { %4592 = vmatprep.mubr.bf16.mxu1 %v4141_v48 }
 0x756   :  { %4496 = vmatmul.mubr.bf16.gmra.mrb[152].mxu0 %v4138_v45 }
 0x757   :  { %4593 = vmatmul.mubr.bf16.gmra.mrb[168].mxu1 %v4140_v54  ;;  %4503 = vmatprep.mubr.bf16.mxu0 %v4147_v30 }
 0x758   :  { %4600 = vmatprep.mubr.bf16.mxu1 %v4149_v32 }
 0x75e   :  { %4504 = vmatmul.mubr.bf16.gmra.mrb[156].mxu0 %v4146_v60 }
 0x75f   :  { %4601 = vmatmul.mubr.bf16.gmra.mrb[172].mxu1 %v4148_v18  ;;  %4511 = vmatprep.mubr.bf16.mxu0 %v4155_v33 }
 0x760   :  { %4608 = vmatprep.mubr.bf16.mxu1 %v4157_v36 }
 0x766   :  { %4512 = vmatmul.mubr.bf16.gmra.mrb[160].mxu0 %v4154_v22 }
 0x767   :  { %4609 = vmatmul.mubr.bf16.gmra.mrb[176].mxu1 %v4156_v0  ;;  %4519 = vmatprep.mubr.bf16.mxu0 %v4163_v59 }
 0x768   :  { %4616 = vmatprep.mubr.bf16.mxu1 %v4165_v8 }
 0x76e   :  { %4520 = vmatmul.mubr.bf16.gmra.mrb[164].mxu0 %v4162_v24 }
 0x76f   :  { %4617 = vmatmul.mubr.bf16.gmra.mrb[180].mxu1 %v4164_v42  ;;  %4527 = vmatprep.mubr.bf16.mxu0 %v4171_v51 }
 0x770   :  { %4624 = vmatprep.mubr.bf16.mxu1 %v4173_v3 }
 0x776   :  { %4528 = vmatmul.mubr.bf16.gmra.mrb[168].mxu0 %v4170_v2 }
 0x777   :  { %4625 = vmatmul.mubr.bf16.gmra.mrb[184].mxu1 %v4172_v50  ;;  %4535 = vmatprep.mubr.bf16.mxu0 %v4179_v1 }
 0x778   :  { %4632 = vmatprep.mubr.bf16.mxu1 %v4181_v56 }
 0x77e   :  { %4536 = vmatmul.mubr.bf16.gmra.mrb[172].mxu0 %v4178_v53 }
 0x77f   :  { %4633 = vmatmul.mubr.bf16.gmra.mrb[188].mxu1 %v4180_v28 }
 0x7d9   :  { %v4762_v41 = vpop.f32.mrb[112].mxu0 }
 0x7da   :  { %v4826_v34 = vpop.f32.mrb[128].mxu1  ;;  %v4763_v9 = vpop.f32.mrb[113].mxu0 }
 0x7db   :  { %v4827_v16 = vpop.f32.mrb[129].mxu1  ;;  %v4764_v40 = vadd.f32 %v4763_v9, %v4762_v41  ;;  %v4765_v17 = vpop.f32.mrb[114].mxu0 }
 0x7dc   :  { %v4828_v19 = vadd.f32 %v4827_v16, %v4826_v34  ;;  %v4829_v57 = vpop.f32.mrb[130].mxu1  ;;  %v4766_v6 = vpop.f32.mrb[115].mxu0 }
 0x7dd   :  { %v4830_v12 = vpop.f32.mrb[131].mxu1  ;;  %v4288_v63 = vadd.f32 %v4764_v40, %v8270_v21  ;;  %v4767_v5 = vadd.f32 %v4766_v6, %v4765_v17 }
 0x7de   :  { %v4831_v37 = vadd.f32 %v4830_v12, %v4829_v57 }
 0x7df   :  { %v8273_v15 = vadd.f32 %v4828_v19, %v4288_v63  ;;  %v4291_v7 = vadd.f32 %v4767_v5, %v8270_v21 }
 0x7e1   :  { %v8276_v35 = vadd.f32 %v4831_v37, %v4291_v7  ;;  %v4768_v26 = vpop.f32.mrb[116].mxu0 }
 0x7e2   :  { %v4832_v38 = vpop.f32.mrb[132].mxu1  ;;  %v4769_v31 = vpop.f32.mrb[117].mxu0 }
 0x7e3   :  { %v4833_v48 = vpop.f32.mrb[133].mxu1  ;;  %v4770_v45 = vadd.f32 %v4769_v31, %v4768_v26  ;;  %v4771_v30 = vpop.f32.mrb[118].mxu0 }
 0x7e4   :  { %v4834_v54 = vadd.f32 %v4833_v48, %v4832_v38  ;;  %v4835_v32 = vpop.f32.mrb[134].mxu1  ;;  %v4772_v60 = vpop.f32.mrb[119].mxu0 }
 0x7e5   :  { %v4836_v18 = vpop.f32.mrb[135].mxu1  ;;  %v4296_v33 = vadd.f32 %v4770_v45, %v8270_v21  ;;  %v4773_v36 = vadd.f32 %v4772_v60, %v4771_v30 }
 0x7e6   :  { %v4837_v62 = vadd.f32 %v4836_v18, %v4835_v32 }
 0x7e7   :  { %v8279_v22 = vadd.f32 %v4834_v54, %v4296_v33  ;;  %v4299_v47 = vadd.f32 %v4773_v36, %v8270_v21 }
 0x7e9   :  { %v8282_v44 = vadd.f32 %v4837_v62, %v4299_v47  ;;  %v4774_v0 = vpop.f32.mrb[120].mxu0 }
 0x7ea   :  { %v4838_v13 = vpop.f32.mrb[136].mxu1  ;;  %v4775_v23 = vpop.f32.mrb[121].mxu0 }
 0x7eb   :  { %v4839_v59 = vpop.f32.mrb[137].mxu1  ;;  %v4776_v8 = vadd.f32 %v4775_v23, %v4774_v0  ;;  %v4777_v55 = vpop.f32.mrb[122].mxu0 }
 0x7ec   :  { %v4840_v10 = vadd.f32 %v4839_v59, %v4838_v13  ;;  %v4841_v24 = vpop.f32.mrb[138].mxu1  ;;  %v4778_v52 = vpop.f32.mrb[123].mxu0 }
 0x7ed   :  { %v4842_v46 = vpop.f32.mrb[139].mxu1  ;;  %v4304_v42 = vadd.f32 %v4776_v8, %v8270_v21  ;;  %v4779_v14 = vadd.f32 %v4778_v52, %v4777_v55 }
 0x7ee   :  { %v4843_v27 = vadd.f32 %v4842_v46, %v4841_v24 }
 0x7ef   :  { %v8285_v51 = vadd.f32 %v4840_v10, %v4304_v42  ;;  %v4307_v3 = vadd.f32 %v4779_v14, %v8270_v21 }
 0x7f1   :  { %v8288_v4 = vadd.f32 %v4843_v27, %v4307_v3  ;;  %v4780_v43 = vpop.f32.mrb[124].mxu0 }
 0x7f2   :  { %v4844_v2 = vpop.f32.mrb[140].mxu1  ;;  %v4781_v58 = vpop.f32.mrb[125].mxu0 }
 0x7f3   :  { %v4845_v39 = vpop.f32.mrb[141].mxu1  ;;  %v4782_v50 = vadd.f32 %v4781_v58, %v4780_v43  ;;  %v4783_v20 = vpop.f32.mrb[126].mxu0 }
 0x7f4   :  { %v4846_v49 = vadd.f32 %v4845_v39, %v4844_v2  ;;  %v4847_v1 = vpop.f32.mrb[142].mxu1  ;;  %v4784_v56 = vpop.f32.mrb[127].mxu0 }
 0x7f5   :  { %v4848_v61 = vpop.f32.mrb[143].mxu1  ;;  %v4312_v11 = vadd.f32 %v4782_v50, %v8270_v21  ;;  %v4785_v53 = vadd.f32 %v4784_v56, %v4783_v20 }
 0x7f6   :  { %v4849_v29 = vadd.f32 %v4848_v61, %v4847_v1 }
 0x7f7   :  { %v8291_v25 = vadd.f32 %v4846_v49, %v4312_v11  ;;  %v4315_v28 = vadd.f32 %v4785_v53, %v8270_v21 }
 0x7f9   :  { %v8294_v41 = vadd.f32 %v4849_v29, %v4315_v28  ;;  %v4786_v34 = vpop.f32.mrb[128].mxu0 }
 0x7fa   :  { %v4850_v9 = vpop.f32.mrb[144].mxu1  ;;  %v4787_v16 = vpop.f32.mrb[129].mxu0 }
 0x7fb   :  { %v4851_v40 = vpop.f32.mrb[145].mxu1  ;;  %v4788_v19 = vadd.f32 %v4787_v16, %v4786_v34  ;;  %v4789_v57 = vpop.f32.mrb[130].mxu0 }
 0x7fc   :  { %v4852_v17 = vadd.f32 %v4851_v40, %v4850_v9  ;;  %v4853_v6 = vpop.f32.mrb[146].mxu1  ;;  %v4790_v12 = vpop.f32.mrb[131].mxu0 }
 0x7fd   :  { %v4854_v63 = vpop.f32.mrb[147].mxu1  ;;  %v4320_v5 = vadd.f32 %v4788_v19, %v8270_v21  ;;  %v4791_v37 = vadd.f32 %v4790_v12, %v4789_v57 }
 0x7fe   :  { %v4855_v7 = vadd.f32 %v4854_v63, %v4853_v6 }
 0x7ff   :  { %v8297_v26 = vadd.f32 %v4852_v17, %v4320_v5  ;;  %v4323_v38 = vadd.f32 %v4791_v37, %v8270_v21 }
 0x801   :  { %v8300_v31 = vadd.f32 %v4855_v7, %v4323_v38  ;;  %v4792_v48 = vpop.f32.mrb[132].mxu0 }
 0x802   :  { %v4856_v45 = vpop.f32.mrb[148].mxu1  ;;  %v4793_v54 = vpop.f32.mrb[133].mxu0 }
 0x803   :  { %v4857_v30 = vpop.f32.mrb[149].mxu1  ;;  %v4794_v32 = vadd.f32 %v4793_v54, %v4792_v48  ;;  %v4795_v18 = vpop.f32.mrb[134].mxu0 }
 0x804   :  { %v4858_v60 = vadd.f32 %v4857_v30, %v4856_v45  ;;  %v4859_v33 = vpop.f32.mrb[150].mxu1  ;;  %v4796_v36 = vpop.f32.mrb[135].mxu0 }
 0x805   :  { %v4860_v62 = vpop.f32.mrb[151].mxu1  ;;  %v4328_v47 = vadd.f32 %v4794_v32, %v8270_v21  ;;  %v4797_v0 = vadd.f32 %v4796_v36, %v4795_v18 }
 0x806   :  { %v4861_v13 = vadd.f32 %v4860_v62, %v4859_v33 }
 0x807   :  { %v8303_v23 = vadd.f32 %v4858_v60, %v4328_v47  ;;  %v4331_v59 = vadd.f32 %v4797_v0, %v8270_v21 }
 0x809   :  { %v8306_v8 = vadd.f32 %v4861_v13, %v4331_v59  ;;  %v4798_v10 = vpop.f32.mrb[136].mxu0 }
 0x80a   :  { %v4862_v55 = vpop.f32.mrb[152].mxu1  ;;  %v4799_v24 = vpop.f32.mrb[137].mxu0 }
 0x80b   :  { %v4863_v52 = vpop.f32.mrb[153].mxu1  ;;  %v4800_v46 = vadd.f32 %v4799_v24, %v4798_v10  ;;  %v4801_v14 = vpop.f32.mrb[138].mxu0 }
 0x80c   :  { %v4864_v42 = vadd.f32 %v4863_v52, %v4862_v55  ;;  %v4865_v27 = vpop.f32.mrb[154].mxu1  ;;  %v4802_v3 = vpop.f32.mrb[139].mxu0 }
 0x80d   :  { %v4866_v43 = vpop.f32.mrb[155].mxu1  ;;  %v4336_v2 = vadd.f32 %v4800_v46, %v8270_v21  ;;  %v4803_v58 = vadd.f32 %v4802_v3, %v4801_v14 }
 0x80e   :  { %v4867_v39 = vadd.f32 %v4866_v43, %v4865_v27 }
 0x80f   :  { %v8309_v50 = vadd.f32 %v4864_v42, %v4336_v2  ;;  %v4339_v49 = vadd.f32 %v4803_v58, %v8270_v21 }
 0x811   :  { %v8312_v20 = vadd.f32 %v4867_v39, %v4339_v49  ;;  %v4804_v1 = vpop.f32.mrb[140].mxu0 }
 0x812   :  { %v4868_v56 = vpop.f32.mrb[156].mxu1  ;;  %v4805_v61 = vpop.f32.mrb[141].mxu0 }
 0x813   :  { %v4869_v11 = vpop.f32.mrb[157].mxu1  ;;  %v4806_v53 = vadd.f32 %v4805_v61, %v4804_v1  ;;  %v4807_v28 = vpop.f32.mrb[142].mxu0 }
 0x814   :  { %v4870_v29 = vadd.f32 %v4869_v11, %v4868_v56  ;;  %v4871_v34 = vpop.f32.mrb[158].mxu1  ;;  %v4808_v9 = vpop.f32.mrb[143].mxu0 }
 0x815   :  { %v4872_v16 = vpop.f32.mrb[159].mxu1  ;;  %v4344_v40 = vadd.f32 %v4806_v53, %v8270_v21  ;;  %v4809_v19 = vadd.f32 %v4808_v9, %v4807_v28 }
 0x816   :  { %v4873_v17 = vadd.f32 %v4872_v16, %v4871_v34 }
 0x817   :  { %v8315_v57 = vadd.f32 %v4870_v29, %v4344_v40  ;;  %v4347_v6 = vadd.f32 %v4809_v19, %v8270_v21 }
 0x819   :  { %v8318_v12 = vadd.f32 %v4873_v17, %v4347_v6  ;;  %v4890_v63 = vpop.f32.mrb[144].mxu0 }
 0x81a   :  { %v4954_v5 = vpop.f32.mrb[160].mxu1  ;;  %v4891_v37 = vpop.f32.mrb[145].mxu0 }
 0x81b   :  { %v4955_v7 = vpop.f32.mrb[161].mxu1  ;;  %v4892_v38 = vadd.f32 %v4891_v37, %v4890_v63  ;;  %v4893_v45 = vpop.f32.mrb[146].mxu0 }
 0x81c   :  { %v4956_v48 = vadd.f32 %v4955_v7, %v4954_v5  ;;  %v4957_v54 = vpop.f32.mrb[162].mxu1  ;;  %v4894_v30 = vpop.f32.mrb[147].mxu0 }
 0x81d   :  { %v4958_v32 = vpop.f32.mrb[163].mxu1  ;;  %v4482_v60 = vadd.f32 %v4892_v38, %v8273_v15  ;;  %v4895_v18 = vadd.f32 %v4894_v30, %v4893_v45 }
 0x81e   :  { %v4959_v33 = vadd.f32 %v4958_v32, %v4957_v54 }
 0x81f   :  { %v4579_v36 = vadd.f32 %v4956_v48, %v4482_v60  ;;  %v4485_v62 = vadd.f32 %v4895_v18, %v8276_v35 }
 0x821   :  { %5238 = vtanh.f32 %v4579_v36  ;;  %v4582_v21 = vadd.f32 %v4959_v33, %v4485_v62  ;;  %v4896_v47 = vpop.f32.mrb[148].mxu0 }
 0x822   :  { %v4960_v0 = vpop.f32.mrb[164].mxu1  ;;  %v4897_v13 = vpop.f32.mrb[149].mxu0 }
 0x823   :  { %v4961_v59 = vpop.f32.mrb[165].mxu1  ;;  %5240 = vtanh.f32 %v4582_v21  ;;  %v4898_v10 = vadd.f32 %v4897_v13, %v4896_v47  ;;  %v4899_v24 = vpop.f32.mrb[150].mxu0 }
 0x824   :  { %v4962_v55 = vadd.f32 %v4961_v59, %v4960_v0  ;;  %v4963_v52 = vpop.f32.mrb[166].mxu1  ;;  %v4900_v46 = vpop.f32.mrb[151].mxu0 }
 0x825   :  { %v4964_v42 = vpop.f32.mrb[167].mxu1  ;;  %v4490_v15 = vadd.f32 %v4898_v10, %v8279_v22  ;;  %v4901_v14 = vadd.f32 %v4900_v46, %v4899_v24 }
 0x826   :  { %v4965_v27 = vadd.f32 %v4964_v42, %v4963_v52 }
 0x827   :  { %v4587_v3 = vadd.f32 %v4962_v55, %v4490_v15  ;;  %v4493_v35 = vadd.f32 %v4901_v14, %v8282_v44 }
 0x829   :  { %5242 = vtanh.f32 %v4587_v3  ;;  %v4590_v43 = vadd.f32 %v4965_v27, %v4493_v35  ;;  %v4902_v2 = vpop.f32.mrb[152].mxu0 }
 0x82a   :  { %v4966_v58 = vpop.f32.mrb[168].mxu1  ;;  %v4903_v39 = vpop.f32.mrb[153].mxu0 }
 0x82b   :  { %v4967_v49 = vpop.f32.mrb[169].mxu1  ;;  %v5239_v1 = vpop.eup %5238  ;;  %5244 = vtanh.f32 %v4590_v43  ;;  %v4904_v56 = vadd.f32 %v4903_v39, %v4902_v2 }
 0x82c   :  { %v4968_v61 = vadd.f32 %v4967_v49, %v4966_v58  ;;  %v4905_v11 = vpop.f32.mrb[154].mxu0  ;;  %v4969_v53 = vpop.f32.mrb[170].mxu1  ;;  %4657 = vst [vmem:[%s8392_s8] sm:$0xff] %v5239_v1 }
 0x82d   :  { %v4906_v22 = vpop.f32.mrb[155].mxu0  ;;  %v4970_v29 = vpop.f32.mrb[171].mxu1  ;;  %v4498_v44 = vadd.f32 %v4904_v56, %v8285_v51 }
 0x82e   :  { %v5241_v28 = vpop.eup %5240  ;;  %v4907_v34 = vadd.f32 %v4906_v22, %v4905_v11  ;;  %v4971_v9 = vadd.f32 %v4970_v29, %v4969_v53 }
 0x82f   :  { %4658 = vst [vmem:[%s8392_s8 + $0x8] sm:$0xff] %v5241_v28  ;;  %v4595_v16 = vadd.f32 %v4968_v61, %v4498_v44 }
 0x830   :  { %v4501_v40 = vadd.f32 %v4907_v34, %v8288_v4 }
 0x831   :  { %5246 = vtanh.f32 %v4595_v16  ;;  %v4908_v17 = vpop.f32.mrb[156].mxu0 }
 0x832   :  { %v4598_v19 = vadd.f32 %v4971_v9, %v4501_v40  ;;  %v4972_v6 = vpop.f32.mrb[172].mxu1  ;;  %v4909_v63 = vpop.f32.mrb[157].mxu0 }
 0x833   :  { %v4973_v5 = vpop.f32.mrb[173].mxu1  ;;  %v5243_v37 = vpop.eup %5242  ;;  %v4910_v7 = vadd.f32 %v4909_v63, %v4908_v17 }
 0x834   :  { %5248 = vtanh.f32 %v4598_v19  ;;  %v4974_v38 = vadd.f32 %v4973_v5, %v4972_v6  ;;  %v4911_v51 = vpop.f32.mrb[158].mxu0  ;;  %v4975_v48 = vpop.f32.mrb[174].mxu1  ;;  %4659 = vst [vmem:[%s8392_s8 + $0x10] sm:$0xff] %v5243_v37 }
 0x835   :  { %v4912_v45 = vpop.f32.mrb[159].mxu0  ;;  %v4976_v54 = vpop.f32.mrb[175].mxu1  ;;  %v4506_v4 = vadd.f32 %v4910_v7, %v8291_v25 }
 0x836   :  { %v5245_v30 = vpop.eup %5244  ;;  %v4913_v32 = vadd.f32 %v4912_v45, %v4911_v51  ;;  %v4977_v60 = vadd.f32 %v4976_v54, %v4975_v48 }
 0x837   :  { %4660 = vst [vmem:[%s8392_s8 + $0x18] sm:$0xff] %v5245_v30  ;;  %v4603_v18 = vadd.f32 %v4974_v38, %v4506_v4 }
 0x838   :  { %v4509_v33 = vadd.f32 %v4913_v32, %v8294_v41 }
 0x839   :  { %5250 = vtanh.f32 %v4603_v18  ;;  %v4914_v62 = vpop.f32.mrb[160].mxu0 }
 0x83a   :  { %v4606_v36 = vadd.f32 %v4977_v60, %v4509_v33  ;;  %v4978_v21 = vpop.f32.mrb[176].mxu1  ;;  %v4915_v47 = vpop.f32.mrb[161].mxu0 }
 0x83b   :  { %v4979_v0 = vpop.f32.mrb[177].mxu1  ;;  %v5247_v13 = vpop.eup %5246  ;;  %v4916_v59 = vadd.f32 %v4915_v47, %v4914_v62 }
 0x83c   :  { %5252 = vtanh.f32 %v4606_v36  ;;  %v4980_v10 = vadd.f32 %v4979_v0, %v4978_v21  ;;  %v4917_v25 = vpop.f32.mrb[162].mxu0  ;;  %v4981_v55 = vpop.f32.mrb[178].mxu1  ;;  %4661 = vst [vmem:[%s8392_s8 + $0x20] sm:$0xff] %v5247_v13 }
 0x83d   :  { %v4918_v24 = vpop.f32.mrb[163].mxu0  ;;  %v4982_v52 = vpop.f32.mrb[179].mxu1  ;;  %v4514_v41 = vadd.f32 %v4916_v59, %v8297_v26 }
 0x83e   :  { %v5249_v46 = vpop.eup %5248  ;;  %v4919_v42 = vadd.f32 %v4918_v24, %v4917_v25  ;;  %v4983_v15 = vadd.f32 %v4982_v52, %v4981_v55 }
 0x83f   :  { %4662 = vst [vmem:[%s8392_s8 + $0x28] sm:$0xff] %v5249_v46  ;;  %v4611_v14 = vadd.f32 %v4980_v10, %v4514_v41 }
 0x840   :  { %v4517_v27 = vadd.f32 %v4919_v42, %v8300_v31 }
 0x841   :  { %5254 = vtanh.f32 %v4611_v14  ;;  %v4920_v35 = vpop.f32.mrb[164].mxu0 }
 0x842   :  { %v4614_v3 = vadd.f32 %v4983_v15, %v4517_v27  ;;  %v4984_v43 = vpop.f32.mrb[180].mxu1  ;;  %v4921_v2 = vpop.f32.mrb[165].mxu0 }
 0x843   :  { %v4985_v58 = vpop.f32.mrb[181].mxu1  ;;  %v5251_v39 = vpop.eup %5250  ;;  %v4922_v49 = vadd.f32 %v4921_v2, %v4920_v35 }
 0x844   :  { %5256 = vtanh.f32 %v4614_v3  ;;  %v4986_v1 = vadd.f32 %v4985_v58, %v4984_v43  ;;  %v4923_v26 = vpop.f32.mrb[166].mxu0  ;;  %v4987_v56 = vpop.f32.mrb[182].mxu1  ;;  %4663 = vst [vmem:[%s8392_s8 + $0x30] sm:$0xff] %v5251_v39 }
 0x845   :  { %v4924_v61 = vpop.f32.mrb[167].mxu0  ;;  %v4988_v11 = vpop.f32.mrb[183].mxu1  ;;  %v4522_v31 = vadd.f32 %v4922_v49, %v8303_v23 }
 0x846   :  { %v5253_v53 = vpop.eup %5252  ;;  %v4925_v22 = vadd.f32 %v4924_v61, %v4923_v26  ;;  %v4989_v29 = vadd.f32 %v4988_v11, %v4987_v56 }
 0x847   :  { %4664 = vst [vmem:[%s8392_s8 + $0x38] sm:$0xff] %v5253_v53  ;;  %v4619_v28 = vadd.f32 %v4986_v1, %v4522_v31 }
 0x848   :  { %v4525_v44 = vadd.f32 %v4925_v22, %v8306_v8 }
 0x849   :  { %5258 = vtanh.f32 %v4619_v28  ;;  %v4926_v9 = vpop.f32.mrb[168].mxu0 }
 0x84a   :  { %v4622_v34 = vadd.f32 %v4989_v29, %v4525_v44  ;;  %v4990_v16 = vpop.f32.mrb[184].mxu1  ;;  %v4927_v40 = vpop.f32.mrb[169].mxu0 }
 0x84b   :  { %v4991_v19 = vpop.f32.mrb[185].mxu1  ;;  %v5255_v17 = vpop.eup %5254  ;;  %v4928_v6 = vadd.f32 %v4927_v40, %v4926_v9 }
 0x84c   :  { %5260 = vtanh.f32 %v4622_v34  ;;  %v4992_v63 = vadd.f32 %v4991_v19, %v4990_v16  ;;  %v4929_v23 = vpop.f32.mrb[170].mxu0  ;;  %v4993_v5 = vpop.f32.mrb[186].mxu1  ;;  %4665 = vst [vmem:[%s8392_s8 + $0x40] sm:$0xff] %v5255_v17 }
 0x84d   :  { %v4930_v37 = vpop.f32.mrb[171].mxu0  ;;  %v4994_v7 = vpop.f32.mrb[187].mxu1  ;;  %v4530_v8 = vadd.f32 %v4928_v6, %v8309_v50 }
 0x84e   :  { %v5257_v38 = vpop.eup %5256  ;;  %v4931_v51 = vadd.f32 %v4930_v37, %v4929_v23  ;;  %v4995_v48 = vadd.f32 %v4994_v7, %v4993_v5 }
 0x84f   :  { %4666 = vst [vmem:[%s8392_s8 + $0x48] sm:$0xff] %v5257_v38  ;;  %v4627_v45 = vadd.f32 %v4992_v63, %v4530_v8 }
 0x850   :  { %v4533_v54 = vadd.f32 %v4931_v51, %v8312_v20 }
 0x851   :  { %5262 = vtanh.f32 %v4627_v45  ;;  %v4932_v4 = vpop.f32.mrb[172].mxu0 }
 0x852   :  { %v4630_v30 = vadd.f32 %v4995_v48, %v4533_v54  ;;  %v4996_v32 = vpop.f32.mrb[188].mxu1  ;;  %v4933_v60 = vpop.f32.mrb[173].mxu0 }
 0x853   :  { %v4997_v18 = vpop.f32.mrb[189].mxu1  ;;  %v5259_v33 = vpop.eup %5258  ;;  %v4934_v36 = vadd.f32 %v4933_v60, %v4932_v4 }
 0x854   :  { %5264 = vtanh.f32 %v4630_v30  ;;  %v4998_v62 = vadd.f32 %v4997_v18, %v4996_v32  ;;  %v4935_v50 = vpop.f32.mrb[174].mxu0  ;;  %v4999_v21 = vpop.f32.mrb[190].mxu1  ;;  %4667 = vst [vmem:[%s8392_s8 + $0x50] sm:$0xff] %v5259_v33 }
 0x855   :  { %v4936_v47 = vpop.f32.mrb[175].mxu0  ;;  %v5000_v0 = vpop.f32.mrb[191].mxu1  ;;  %v4538_v20 = vadd.f32 %v4934_v36, %v8315_v57 }
 0x856   :  { %v5261_v13 = vpop.eup %5260  ;;  %v4937_v59 = vadd.f32 %v4936_v47, %v4935_v50  ;;  %v5001_v10 = vadd.f32 %v5000_v0, %v4999_v21 }
 0x857   :  { %4668 = vst [vmem:[%s8392_s8 + $0x58] sm:$0xff] %v5261_v13  ;;  %v4635_v25 = vadd.f32 %v4998_v62, %v4538_v20 }
 0x858   :  { %v4541_v55 = vadd.f32 %v4937_v59, %v8318_v12 }
 0x859   :  { %5266 = vtanh.f32 %v4635_v25 }
 0x85a   :  { %v4638_v24 = vadd.f32 %v5001_v10, %v4541_v55 }
 0x85b   :  { %v5263_v52 = vpop.eup %5262 }
 0x85c   :  { %5268 = vtanh.f32 %v4638_v24  ;;  %4669 = vst [vmem:[%s8392_s8 + $0x60] sm:$0xff] %v5263_v52 }
 0x85e   :  { %v5265_v46 = vpop.eup %5264 }
 0x85f   :  { %4670 = vst [vmem:[%s8392_s8 + $0x68] sm:$0xff] %v5265_v46 }
 0x863   :  { %v5267_v57 = vpop.eup %5266 }
 0x864   :  { %4671 = vst [vmem:[%s8392_s8 + $0x70] sm:$0xff] %v5267_v57 }
 0x866   :  { %v5269_v41 = vpop.eup %5268 }
 0x867   :  { %4672 = vst [vmem:[%s8392_s8 + $0x78] sm:$0xff] %v5269_v41 }
 0x868   :  { %4677 = vsyncmov [#allocation5] }
 0x86b   :  { %s4678_s22 = vpop.sfrf %4677 }
 0x86c   :  { %p4727_p8 = scmp.ne.s32.totalorder %s4678_s22, 0 }
 0x86e   :  { %4682 = shalt.err (%p4727_p8)  }
 0x86f   :  { %4684 = vsyncmov [#allocation5 + $0x1] }
 0x872   :  { %s4685_s23 = vpop.sfrf %4684 }
 0x873   :  { %p4728_p9 = scmp.ne.s32.totalorder %s4685_s23, 0 }
 0x875   :  { %4689 = shalt.err (%p4728_p9)  }
 0x876   :  { %4691 = vsyncmov [#allocation5 + $0x2] }
 0x879   :  { %s4692_s24 = vpop.sfrf %4691 }
 0x87a   :  { %p4729_p10 = scmp.ne.s32.totalorder %s4692_s24, 0 }
 0x87c   :  { %4696 = shalt.err (%p4729_p10)  }

</bundles_post_ra>
